<compile_context>
chip_gen: v6e
topology: v6e:2x2x1
jax: 0.10.0
libtpu: 0.0.40
codegen_flags: <defaults>
</compile_context>

<pallas_src>
import math

import jax
import jax.numpy as jnp
from jax.experimental import pallas as pl
from jax.experimental.pallas import tpu as pltpu

F32 = jnp.float32
BF16 = jnp.bfloat16


# ----------------------------------------------------------------------------
# Pallas kernels
# ----------------------------------------------------------------------------

def _conv_kernel(patch_ref, w_ref, b_ref, o_ref):
    # patch: (1, K, P) bf16   w: (Cout, K) bf16   b: (Cout, 1) f32
    # out  : (1, Cout, P) f32  -- P = To*H*W on the lane axis (lane-dense),
    #        which is exactly the spatial-token layout 'b c (t h w)'.
    acc = jnp.dot(w_ref[...], patch_ref[0], preferred_element_type=jnp.float32)
    o_ref[0] = acc + b_ref[...]


def _layer_norm(v, gamma, beta, eps=1e-5):
    mu = jnp.mean(v, axis=-1, keepdims=True)
    var = jnp.mean((v - mu) ** 2, axis=-1, keepdims=True)
    return (v - mu) * jax.lax.rsqrt(var + eps) * gamma + beta


def _gelu_exact(v):
    # Exact (erf-based) GELU.  erf via Abramowitz-Stegun 7.1.26 polynomial
    # (|abs err| < 1.5e-7): only exp / mul / where, all native Mosaic ops.
    z = v * (1.0 / math.sqrt(2.0))
    a = jnp.abs(z)
    t = 1.0 / (1.0 + 0.3275911 * a)
    poly = t * (0.254829592 + t * (-0.284496736 + t * (1.421413741
               + t * (-1.453152027 + t * 1.061405429))))
    erf_abs = 1.0 - poly * jnp.exp(-a * a)
    erf_z = jnp.where(z >= 0, erf_abs, -erf_abs)
    return 0.5 * v * (1.0 + erf_z)


def _transformer_block(x, p):
    """Pre-norm attention + pre-norm MLP.  x: (N, D) f32, weights bf16."""
    N, D = x.shape
    H, _, d = p["wq"].shape                      # (heads, D, head_dim)
    scale = float(d) ** -0.5

    # --- attention (batched over the head axis) ---
    xn = _layer_norm(x, p["g1"], p["b1"])
    xb = jnp.broadcast_to(xn.astype(BF16)[None], (H, N, D))
    q = jnp.einsum("hnD,hDd->hnd", xb, p["wq"], preferred_element_type=F32)
    k = jnp.einsum("hnD,hDd->hnd", xb, p["wk"], preferred_element_type=F32)
    v = jnp.einsum("hnD,hDd->hnd", xb, p["wv"], preferred_element_type=F32)

    s = jnp.einsum("hnd,hmd->hnm", q.astype(BF16), k.astype(BF16),
                   preferred_element_type=F32) * scale
    s = s - jnp.max(s, axis=-1, keepdims=True)
    e = jnp.exp(s)
    att = e * pl.reciprocal(jnp.sum(e, axis=-1, keepdims=True), approx=True)

    ctx = jnp.einsum("hnm,hmd->hnd", att.astype(BF16), v.astype(BF16),
                     preferred_element_type=F32)
    proj = jnp.einsum("hnd,hdD->hnD", ctx.astype(BF16), p["wo"],
                      preferred_element_type=F32)
    x = jnp.sum(proj, axis=0) + p["bo"] + x      # residual

    # --- MLP ---
    xn2 = _layer_norm(x, p["g2"], p["b2"])
    h1 = jnp.dot(xn2.astype(BF16), p["w1"],
                 preferred_element_type=F32) + p["bm1"]
    h1 = _gelu_exact(h1)
    h2 = jnp.dot(h1.astype(BF16), p["w2"],
                 preferred_element_type=F32) + p["bm2"]
    return h2 + x


def _classifier_head(sp, tp, p):
    """Projections + token-mean + LayerNorm + 4-layer LeakyReLU MLP."""
    n_sp, n_tp = sp.shape[0], tp.shape[0]
    # linearity: mean over tokens of cat(sp@Ws+bs, tp@Wt+bt)
    sum_sp = jnp.sum(sp, axis=0, keepdims=True)              # (1, Ds)
    sum_tp = jnp.sum(tp, axis=0, keepdims=True)              # (1, Dt)
    m = (jnp.dot(sum_sp.astype(BF16), p["ws"], preferred_element_type=F32)
         + float(n_sp) * p["bs"]
         + jnp.dot(sum_tp.astype(BF16), p["wt"], preferred_element_type=F32)
         + float(n_tp) * p["bt"]) * (1.0 / float(n_sp + n_tp))

    h = _layer_norm(m, p["ln_g"], p["ln_b"])

    def lrelu(v):                                            # slope 0.01
        return jnp.where(v >= 0, v, 0.01 * v)

    h = lrelu(jnp.dot(h.astype(BF16), p["w1"], preferred_element_type=F32) + p["b1"])
    h = lrelu(jnp.dot(h.astype(BF16), p["w2"], preferred_element_type=F32) + p["b2"])
    h = lrelu(jnp.dot(h.astype(BF16), p["w3"], preferred_element_type=F32) + p["b3"])
    h = jnp.dot(h.astype(BF16), p["w4"], preferred_element_type=F32) + p["b4"]
    return h                                                  # (1, num_class)


_TR_KEYS = ("g1", "b1", "wq", "wk", "wv", "wo", "bo",
            "g2", "b2", "w1", "bm1", "w2", "bm2")
_HEAD_KEYS = ("ws", "bs", "wt", "bt", "ln_g", "ln_b",
              "w1", "b1", "w2", "b2", "w3", "b3", "w4", "b4")


def _fused_kernel(*refs):
    n_tr, n_hd = len(_TR_KEYS), len(_HEAD_KEYS)
    sp_ref, tp_ref = refs[0], refs[1]
    base = 2
    spw = {k: refs[base + i][...] for i, k in enumerate(_TR_KEYS)}
    base += n_tr
    tpw = {k: refs[base + i][...] for i, k in enumerate(_TR_KEYS)}
    base += n_tr
    hdw = {k: refs[base + i][...] for i, k in enumerate(_HEAD_KEYS)}
    base += n_hd
    out_ref = refs[base]

    sp = _transformer_block(sp_ref[0], spw)       # (Ns, Ds)
    tp = _transformer_block(tp_ref[0], tpw)       # (Nt, Dt)
    out_ref[0] = _classifier_head(sp, tp, hdw)    # (1, num_class)


# ----------------------------------------------------------------------------
# Wrappers
# ----------------------------------------------------------------------------

def _full_spec(shape):
    nd = len(shape)
    return pl.BlockSpec(shape, lambda b, _nd=nd: (0,) * _nd)


def conv3d_spatial_tokens(x, weight, bias, kernel_size, stride, padding):
    """x: (B,C,T,H,W) f32; weight: (Cout,C,kt,kh,kw) bf16; bias: (Cout,) f32.

    Returns conv output directly in spatial-token layout (B, Cout, To*Ho*Wo).
    """
    B, C, T, H, W = x.shape
    Cout = weight.shape[0]
    kt, kh, kw = kernel_size
    st, sh, sw = stride
    pt, ph, pw = padding
    To = (T + 2 * pt - kt) // st + 1
    Ho = (H + 2 * ph - kh) // sh + 1
    Wo = (W + 2 * pw - kw) // sw + 1

    xp = jnp.pad(x, ((0, 0), (0, 0), (pt, pt), (ph, ph), (pw, pw)))
    cols = []
    for i in range(kt):
        for j in range(kh):
            for l in range(kw):
                cols.append(xp[:, :, i:i + st * To:st,
                               j:j + sh * Ho:sh,
                               l:l + sw * Wo:sw])            # (B,C,To,Ho,Wo)
    K = C * kt * kh * kw
    P = To * Ho * Wo
    # (B, C, taps, To, Ho, Wo) -> (B, K, P): pixel index stays lane-dense,
    # tap index order (c, kt, kh, kw) matches weight.reshape(Cout, K).
    patch = jnp.stack(cols, axis=2).reshape(B, K, P).astype(BF16)

    wflat = weight.reshape(Cout, K)                          # bf16
    b2 = bias.reshape(Cout, 1).astype(F32)

    out = pl.pallas_call(
        _conv_kernel,
        out_shape=jax.ShapeDtypeStruct((B, Cout, P), F32),
        grid=(B,),
        in_specs=[pl.BlockSpec((1, K, P), lambda b: (b, 0, 0)),
                  _full_spec(wflat.shape),
                  _full_spec(b2.shape)],
        out_specs=pl.BlockSpec((1, Cout, P), lambda b: (b, 0, 0)),
        compiler_params=pltpu.CompilerParams(
            dimension_semantics=("parallel",)),
    )(patch, wflat, b2)
    return out, (To, Ho, Wo)


def run_fused(sp_tok, tp_tok, sp_params, tp_params, head_params, num_class):
    B, Ns, Ds = sp_tok.shape
    _, Nt, Dt = tp_tok.shape
    weights = ([sp_params[k] for k in _TR_KEYS]
               + [tp_params[k] for k in _TR_KEYS]
               + [head_params[k] for k in _HEAD_KEYS])
    in_specs = [pl.BlockSpec((1, Ns, Ds), lambda b: (b, 0, 0)),
                pl.BlockSpec((1, Nt, Dt), lambda b: (b, 0, 0))]
    in_specs += [_full_spec(w.shape) for w in weights]
    out_spec = pl.BlockSpec((1, 1, num_class), lambda b: (b, 0, 0))

    out = pl.pallas_call(
        _fused_kernel,
        out_shape=jax.ShapeDtypeStruct((B, 1, num_class), F32),
        grid=(B,),
        in_specs=in_specs,
        out_specs=out_spec,
        compiler_params=pltpu.CompilerParams(
            dimension_semantics=("parallel",)),
    )(sp_tok, tp_tok, *weights)
    return out[:, 0, :]


def model_forward(x, params, cfg):
    # 1) DimensionReduction (Conv3d) -> lane-dense spatial-token layout.
    y_sp, (To, Ho, Wo) = conv3d_spatial_tokens(
        x, params["conv_w"], params["conv_b"],
        cfg["kernel_size"], cfg["stride"], cfg["padding"])    # (B, Cout, To*H*W)
    B, Cout, P = y_sp.shape

    # 2) TokenProcess: temporal tokens 'b c t h w -> b t (h w c)' (16 KB glue).
    temporal = (y_sp.reshape(B, Cout, To, Ho, Wo)
                .transpose(0, 2, 3, 4, 1)
                .reshape(B, To, Ho * Wo * Cout))
    spatial = y_sp                                            # 'b c (t h w)'

    # 3+4) Fused: both transformer blocks + projections + mean + classifier.
    return run_fused(spatial, temporal, params["spatial"], params["temporal"],
                     params["head"], cfg["num_class"])


# ----------------------------------------------------------------------------
# Parameter construction (deterministic, synthetic)
# ----------------------------------------------------------------------------

def _init_transformer_params(key, dim, head_cnt, head_dim, mlp_dim):
    inner = head_cnt * head_dim
    ks = jax.random.split(key, 5)
    s = 0.05
    wqkv = jax.random.normal(ks[0], (dim, 3 * inner), F32) * s
    wo = jax.random.normal(ks[1], (inner, dim), F32) * s
    bo = jax.random.normal(ks[2], (1, dim), F32) * s
    w1 = jax.random.normal(ks[3], (dim, mlp_dim), F32) * s
    w2 = jax.random.normal(ks[4], (mlp_dim, dim), F32) * s

    def per_head(w):  # (dim, inner) with columns ordered (h, d) -> (H, dim, d)
        return w.reshape(dim, head_cnt, head_dim).transpose(1, 0, 2)

    return {
        "g1": jnp.ones((1, dim), F32), "b1": jnp.zeros((1, dim), F32),
        "wq": per_head(wqkv[:, 0 * inner:1 * inner]).astype(BF16),
        "wk": per_head(wqkv[:, 1 * inner:2 * inner]).astype(BF16),
        "wv": per_head(wqkv[:, 2 * inner:3 * inner]).astype(BF16),
        "wo": wo.reshape(head_cnt, head_dim, dim).astype(BF16),
        "bo": bo,
        "g2": jnp.ones((1, dim), F32), "b2": jnp.zeros((1, dim), F32),
        "w1": w1.astype(BF16), "bm1": jnp.zeros((1, mlp_dim), F32),
        "w2": w2.astype(BF16), "bm2": jnp.zeros((1, dim), F32),
    }


def _init_head_params(key, spatial_dim, temporal_dim, st_dim, num_class):
    ks = jax.random.split(key, 6)
    s = 0.05
    return {
        "ws": (jax.random.normal(ks[0], (spatial_dim, st_dim), F32) * s).astype(BF16),
        "bs": jnp.zeros((1, st_dim), F32),
        "wt": (jax.random.normal(ks[1], (temporal_dim, st_dim), F32) * s).astype(BF16),
        "bt": jnp.zeros((1, st_dim), F32),
        "ln_g": jnp.ones((1, st_dim), F32),
        "ln_b": jnp.zeros((1, st_dim), F32),
        "w1": (jax.random.normal(ks[2], (st_dim, 256), F32) * s).astype(BF16),
        "b1": jnp.zeros((1, 256), F32),
        "w2": (jax.random.normal(ks[3], (256, 128), F32) * s).astype(BF16),
        "b2": jnp.zeros((1, 128), F32),
        "w3": (jax.random.normal(ks[4], (128, 64), F32) * s).astype(BF16),
        "b3": jnp.zeros((1, 64), F32),
        "w4": (jax.random.normal(ks[5], (64, num_class), F32) * s).astype(BF16),
        "b4": jnp.zeros((1, num_class), F32),
    }


# ----------------------------------------------------------------------------
# Main
# ----------------------------------------------------------------------------

if __name__ == "__main__":
    # Small shapes consistent with the module's constructor.
    batch = 2
    channel = 4
    time, height, width = 8, 8, 8
    out_time, out_channel = 4, 8
    kernel_size = (3, 3, 3)
    stride = (2, 1, 1)
    padding = (1, 1, 1)
    head_spatial_dim, head_spatial_cnt, scale_spatial_dim = 32, 4, 2
    head_temporal_dim, head_temporal_cnt, scale_temporal_dim = 32, 4, 1
    st_dim, num_class = 128, 10

    spatial_input_dim = out_time * height * width            # 256
    temporal_input_dim = out_channel * height * width        # 512

    cfg = dict(kernel_size=kernel_size, stride=stride, padding=padding,
               num_class=num_class)

    key = jax.random.PRNGKey(0)
    k_x, k_conv, k_sp, k_tp, k_head = jax.random.split(key, 5)

    params = {
        "conv_w": (jax.random.normal(
            k_conv, (out_channel, channel) + kernel_size, F32) * 0.05).astype(BF16),
        "conv_b": jnp.zeros((out_channel,), F32),
        "spatial": _init_transformer_params(
            k_sp, spatial_input_dim, head_spatial_cnt, head_spatial_dim,
            spatial_input_dim * scale_spatial_dim),
        "temporal": _init_transformer_params(
            k_tp, temporal_input_dim, head_temporal_cnt, head_temporal_dim,
            temporal_input_dim * scale_temporal_dim),
        "head": _init_head_params(
            k_head, spatial_input_dim, temporal_input_dim, st_dim, num_class),
    }

    x = jax.random.normal(k_x, (batch, channel, time, height, width), F32)

    fwd = jax.jit(lambda xx, pp: model_forward(xx, pp, cfg))
    out = jax.block_until_ready(fwd(x, params))

    assert out.shape == (batch, num_class)
    assert bool(jnp.all(jnp.isfinite(out)))
    print("KERNEL_OK")
</pallas_src>

<mosaic_0001>
module attributes {stable_mosaic.version = 11 : i64} {
  func.func @_conv_kernel(%arg0: i32, %arg1: memref<1x108x256xbf16, #tpu.memory_space<vmem>>, %arg2: memref<8x108xbf16, #tpu.memory_space<vmem>>, %arg3: memref<8x1xf32, #tpu.memory_space<vmem>>, %arg4: memref<1x8x256xf32, #tpu.memory_space<vmem>>) attributes {dimension_semantics = [#tpu.dimension_semantics<parallel>], iteration_bounds = array<i64: 2>, scalar_prefetch = 0 : i64, scratch_operands = 0 : i64, tpu.core_type = #tpu.core_type<tc>, window_params = [{transform_indices = @transform_0, window_bounds = array<i64: 1, 108, 256>}, {pipeline_mode = #tpu.pipeline_mode<synchronous>, transform_indices = @transform_1, window_bounds = array<i64: 8, 108>}, {pipeline_mode = #tpu.pipeline_mode<synchronous>, transform_indices = @transform_2, window_bounds = array<i64: 8, 1>}, {transform_indices = @transform_3, window_bounds = array<i64: 1, 8, 256>}]} {
    %c0 = arith.constant 0 : index
    %c0_0 = arith.constant 0 : index
    %0 = vector.load %arg2[%c0, %c0_0] : memref<8x108xbf16, #tpu.memory_space<vmem>>, vector<8x108xbf16>
    %c0_1 = arith.constant 0 : index
    %c0_2 = arith.constant 0 : index
    %c0_3 = arith.constant 0 : index
    %1 = vector.load %arg1[%c0_1, %c0_2, %c0_3] : memref<1x108x256xbf16, #tpu.memory_space<vmem>>, vector<1x108x256xbf16>
    %2 = vector.shape_cast %1 : vector<1x108x256xbf16> to vector<108x256xbf16>
    %cst = arith.constant dense<0.000000e+00> : vector<8x256xf32>
    %3 = tpu.matmul %0, %2, %cst {dimension_numbers = #tpu.dot_dimension_numbers<[1], [0], [0], [1], [0, 0, 1, 1], [], []>} : vector<8x108xbf16>, vector<108x256xbf16>, vector<8x256xf32> -> vector<8x256xf32>
    %c0_4 = arith.constant 0 : index
    %c0_5 = arith.constant 0 : index
    %4 = vector.load %arg3[%c0_4, %c0_5] : memref<8x1xf32, #tpu.memory_space<vmem>>, vector<8x1xf32>
    %5 = vector.broadcast %4 : vector<8x1xf32> to vector<8x256xf32>
    %6 = arith.addf %3, %5 : vector<8x256xf32>
    %c0_6 = arith.constant 0 : index
    %c0_7 = arith.constant 0 : index
    %c0_8 = arith.constant 0 : index
    %7 = vector.load %arg4[%c0_6, %c0_7, %c0_8] : memref<1x8x256xf32, #tpu.memory_space<vmem>>, vector<1x8x256xf32>
    %8 = vector.shape_cast %7 : vector<1x8x256xf32> to vector<8x256xf32>
    %9 = vector.shape_cast %6 : vector<8x256xf32> to vector<1x8x256xf32>
    tpu.vector_store %arg4[%c0_6, %c0_7, %c0_8], %9 {strides = array<i32>} : memref<1x8x256xf32, #tpu.memory_space<vmem>>, vector<1x8x256xf32>,
    return
  }
  func.func @transform_0(%arg0: i32) -> (i32, i32, i32) {
    %c0_i32 = arith.constant 0 : i32
    %c0_i32_0 = arith.constant 0 : i32
    %c0_i32_1 = arith.constant 0 : i32
    return %arg0, %c0_i32, %c0_i32_0 : i32, i32, i32
  }
  func.func @transform_1(%arg0: i32) -> (i32, i32) {
    %c0_i32 = arith.constant 0 : i32
    %c0_i32_0 = arith.constant 0 : i32
    %c0_i32_1 = arith.constant 0 : i32
    return %c0_i32, %c0_i32_0 : i32, i32
  }
  func.func @transform_2(%arg0: i32) -> (i32, i32) {
    %c0_i32 = arith.constant 0 : i32
    %c0_i32_0 = arith.constant 0 : i32
    %c0_i32_1 = arith.constant 0 : i32
    return %c0_i32, %c0_i32_0 : i32, i32
  }
  func.func @transform_3(%arg0: i32) -> (i32, i32, i32) {
    %c0_i32 = arith.constant 0 : i32
    %c0_i32_0 = arith.constant 0 : i32
    %c0_i32_1 = arith.constant 0 : i32
    return %arg0, %c0_i32, %c0_i32_0 : i32, i32, i32
  }
}

module attributes {stable_mosaic.version = 11 : i64} {
  func.func @_fused_kernel(%arg0: i32, %arg1: memref<1x8x256xf32, #tpu.memory_space<vmem>>, %arg2: memref<1x4x512xf32, #tpu.memory_space<vmem>>, %arg3: memref<1x256xf32, #tpu.memory_space<vmem>>, %arg4: memref<1x256xf32, #tpu.memory_space<vmem>>, %arg5: memref<4x256x32xbf16, #tpu.memory_space<vmem>>, %arg6: memref<4x256x32xbf16, #tpu.memory_space<vmem>>, %arg7: memref<4x256x32xbf16, #tpu.memory_space<vmem>>, %arg8: memref<4x32x256xbf16, #tpu.memory_space<vmem>>, %arg9: memref<1x256xf32, #tpu.memory_space<vmem>>, %arg10: memref<1x256xf32, #tpu.memory_space<vmem>>, %arg11: memref<1x256xf32, #tpu.memory_space<vmem>>, %arg12: memref<256x512xbf16, #tpu.memory_space<vmem>>, %arg13: memref<1x512xf32, #tpu.memory_space<vmem>>, %arg14: memref<512x256xbf16, #tpu.memory_space<vmem>>, %arg15: memref<1x256xf32, #tpu.memory_space<vmem>>, %arg16: memref<1x512xf32, #tpu.memory_space<vmem>>, %arg17: memref<1x512xf32, #tpu.memory_space<vmem>>, %arg18: memref<4x512x32xbf16, #tpu.memory_space<vmem>>, %arg19: memref<4x512x32xbf16, #tpu.memory_space<vmem>>, %arg20: memref<4x512x32xbf16, #tpu.memory_space<vmem>>, %arg21: memref<4x32x512xbf16, #tpu.memory_space<vmem>>, %arg22: memref<1x512xf32, #tpu.memory_space<vmem>>, %arg23: memref<1x512xf32, #tpu.memory_space<vmem>>, %arg24: memref<1x512xf32, #tpu.memory_space<vmem>>, %arg25: memref<512x512xbf16, #tpu.memory_space<vmem>>, %arg26: memref<1x512xf32, #tpu.memory_space<vmem>>, %arg27: memref<512x512xbf16, #tpu.memory_space<vmem>>, %arg28: memref<1x512xf32, #tpu.memory_space<vmem>>, %arg29: memref<256x128xbf16, #tpu.memory_space<vmem>>, %arg30: memref<1x128xf32, #tpu.memory_space<vmem>>, %arg31: memref<512x128xbf16, #tpu.memory_space<vmem>>, %arg32: memref<1x128xf32, #tpu.memory_space<vmem>>, %arg33: memref<1x128xf32, #tpu.memory_space<vmem>>, %arg34: memref<1x128xf32, #tpu.memory_space<vmem>>, %arg35: memref<128x256xbf16, #tpu.memory_space<vmem>>, %arg36: memref<1x256xf32, #tpu.memory_space<vmem>>, %arg37: memref<256x128xbf16, #tpu.memory_space<vmem>>, %arg38: memref<1x128xf32, #tpu.memory_space<vmem>>, %arg39: memref<128x64xbf16, #tpu.memory_space<vmem>>, %arg40: memref<1x64xf32, #tpu.memory_space<vmem>>, %arg41: memref<64x10xbf16, #tpu.memory_space<vmem>>, %arg42: memref<1x10xf32, #tpu.memory_space<vmem>>, %arg43: memref<1x1x10xf32, #tpu.memory_space<vmem>>) attributes {dimension_semantics = [#tpu.dimension_semantics<parallel>], iteration_bounds = array<i64: 2>, scalar_prefetch = 0 : i64, scratch_operands = 0 : i64, tpu.core_type = #tpu.core_type<tc>, window_params = [{transform_indices = @transform_0, window_bounds = array<i64: 1, 8, 256>}, {transform_indices = @transform_1, window_bounds = array<i64: 1, 4, 512>}, {pipeline_mode = #tpu.pipeline_mode<synchronous>, transform_indices = @transform_2, window_bounds = array<i64: 1, 256>}, {pipeline_mode = #tpu.pipeline_mode<synchronous>, transform_indices = @transform_3, window_bounds = array<i64: 1, 256>}, {pipeline_mode = #tpu.pipeline_mode<synchronous>, transform_indices = @transform_4, window_bounds = array<i64: 4, 256, 32>}, {pipeline_mode = #tpu.pipeline_mode<synchronous>, transform_indices = @transform_5, window_bounds = array<i64: 4, 256, 32>}, {pipeline_mode = #tpu.pipeline_mode<synchronous>, transform_indices = @transform_6, window_bounds = array<i64: 4, 256, 32>}, {pipeline_mode = #tpu.pipeline_mode<synchronous>, transform_indices = @transform_7, window_bounds = array<i64: 4, 32, 256>}, {pipeline_mode = #tpu.pipeline_mode<synchronous>, transform_indices = @transform_8, window_bounds = array<i64: 1, 256>}, {pipeline_mode = #tpu.pipeline_mode<synchronous>, transform_indices = @transform_9, window_bounds = array<i64: 1, 256>}, {pipeline_mode = #tpu.pipeline_mode<synchronous>, transform_indices = @transform_10, window_bounds = array<i64: 1, 256>}, {pipeline_mode = #tpu.pipeline_mode<synchronous>, transform_indices = @transform_11, window_bounds = array<i64: 256, 512>}, {pipeline_mode = #tpu.pipeline_mode<synchronous>, transform_indices = @transform_12, window_bounds = array<i64: 1, 512>}, {pipeline_mode = #tpu.pipeline_mode<synchronous>, transform_indices = @transform_13, window_bounds = array<i64: 512, 256>}, {pipeline_mode = #tpu.pipeline_mode<synchronous>, transform_indices = @transform_14, window_bounds = array<i64: 1, 256>}, {pipeline_mode = #tpu.pipeline_mode<synchronous>, transform_indices = @transform_15, window_bounds = array<i64: 1, 512>}, {pipeline_mode = #tpu.pipeline_mode<synchronous>, transform_indices = @transform_16, window_bounds = array<i64: 1, 512>}, {pipeline_mode = #tpu.pipeline_mode<synchronous>, transform_indices = @transform_17, window_bounds = array<i64: 4, 512, 32>}, {pipeline_mode = #tpu.pipeline_mode<synchronous>, transform_indices = @transform_18, window_bounds = array<i64: 4, 512, 32>}, {pipeline_mode = #tpu.pipeline_mode<synchronous>, transform_indices = @transform_19, window_bounds = array<i64: 4, 512, 32>}, {pipeline_mode = #tpu.pipeline_mode<synchronous>, transform_indices = @transform_20, window_bounds = array<i64: 4, 32, 512>}, {pipeline_mode = #tpu.pipeline_mode<synchronous>, transform_indices = @transform_21, window_bounds = array<i64: 1, 512>}, {pipeline_mode = #tpu.pipeline_mode<synchronous>, transform_indices = @transform_22, window_bounds = array<i64: 1, 512>}, {pipeline_mode = #tpu.pipeline_mode<synchronous>, transform_indices = @transform_23, window_bounds = array<i64: 1, 512>}, {pipeline_mode = #tpu.pipeline_mode<synchronous>, transform_indices = @transform_24, window_bounds = array<i64: 512, 512>}, {pipeline_mode = #tpu.pipeline_mode<synchronous>, transform_indices = @transform_25, window_bounds = array<i64: 1, 512>}, {pipeline_mode = #tpu.pipeline_mode<synchronous>, transform_indices = @transform_26, window_bounds = array<i64: 512, 512>}, {pipeline_mode = #tpu.pipeline_mode<synchronous>, transform_indices = @transform_27, window_bounds = array<i64: 1, 512>}, {pipeline_mode = #tpu.pipeline_mode<synchronous>, transform_indices = @transform_28, window_bounds = array<i64: 256, 128>}, {pipeline_mode = #tpu.pipeline_mode<synchronous>, transform_indices = @transform_29, window_bounds = array<i64: 1, 128>}, {pipeline_mode = #tpu.pipeline_mode<synchronous>, transform_indices = @transform_30, window_bounds = array<i64: 512, 128>}, {pipeline_mode = #tpu.pipeline_mode<synchronous>, transform_indices = @transform_31, window_bounds = array<i64: 1, 128>}, {pipeline_mode = #tpu.pipeline_mode<synchronous>, transform_indices = @transform_32, window_bounds = array<i64: 1, 128>}, {pipeline_mode = #tpu.pipeline_mode<synchronous>, transform_indices = @transform_33, window_bounds = array<i64: 1, 128>}, {pipeline_mode = #tpu.pipeline_mode<synchronous>, transform_indices = @transform_34, window_bounds = array<i64: 128, 256>}, {pipeline_mode = #tpu.pipeline_mode<synchronous>, transform_indices = @transform_35, window_bounds = array<i64: 1, 256>}, {pipeline_mode = #tpu.pipeline_mode<synchronous>, transform_indices = @transform_36, window_bounds = array<i64: 256, 128>}, {pipeline_mode = #tpu.pipeline_mode<synchronous>, transform_indices = @transform_37, window_bounds = array<i64: 1, 128>}, {pipeline_mode = #tpu.pipeline_mode<synchronous>, transform_indices = @transform_38, window_bounds = array<i64: 128, 64>}, {pipeline_mode = #tpu.pipeline_mode<synchronous>, transform_indices = @transform_39, window_bounds = array<i64: 1, 64>}, {pipeline_mode = #tpu.pipeline_mode<synchronous>, transform_indices = @transform_40, window_bounds = array<i64: 64, 10>}, {pipeline_mode = #tpu.pipeline_mode<synchronous>, transform_indices = @transform_41, window_bounds = array<i64: 1, 10>}, {transform_indices = @transform_42, window_bounds = array<i64: 1, 1, 10>}]} {
    %c0 = arith.constant 0 : index
    %c0_0 = arith.constant 0 : index
    %0 = vector.load %arg3[%c0, %c0_0] : memref<1x256xf32, #tpu.memory_space<vmem>>, vector<1x256xf32>
    %c0_1 = arith.constant 0 : index
    %c0_2 = arith.constant 0 : index
    %1 = vector.load %arg4[%c0_1, %c0_2] : memref<1x256xf32, #tpu.memory_space<vmem>>, vector<1x256xf32>
    %c0_3 = arith.constant 0 : index
    %c0_4 = arith.constant 0 : index
    %c0_5 = arith.constant 0 : index
    %2 = vector.load %arg5[%c0_3, %c0_4, %c0_5] : memref<4x256x32xbf16, #tpu.memory_space<vmem>>, vector<4x256x32xbf16>
    %c0_6 = arith.constant 0 : index
    %c0_7 = arith.constant 0 : index
    %c0_8 = arith.constant 0 : index
    %3 = vector.load %arg6[%c0_6, %c0_7, %c0_8] : memref<4x256x32xbf16, #tpu.memory_space<vmem>>, vector<4x256x32xbf16>
    %c0_9 = arith.constant 0 : index
    %c0_10 = arith.constant 0 : index
    %c0_11 = arith.constant 0 : index
    %4 = vector.load %arg7[%c0_9, %c0_10, %c0_11] : memref<4x256x32xbf16, #tpu.memory_space<vmem>>, vector<4x256x32xbf16>
    %c0_12 = arith.constant 0 : index
    %c0_13 = arith.constant 0 : index
    %c0_14 = arith.constant 0 : index
    %5 = vector.load %arg8[%c0_12, %c0_13, %c0_14] : memref<4x32x256xbf16, #tpu.memory_space<vmem>>, vector<4x32x256xbf16>
    %c0_15 = arith.constant 0 : index
    %c0_16 = arith.constant 0 : index
    %6 = vector.load %arg9[%c0_15, %c0_16] : memref<1x256xf32, #tpu.memory_space<vmem>>, vector<1x256xf32>
    %c0_17 = arith.constant 0 : index
    %c0_18 = arith.constant 0 : index
    %7 = vector.load %arg10[%c0_17, %c0_18] : memref<1x256xf32, #tpu.memory_space<vmem>>, vector<1x256xf32>
    %c0_19 = arith.constant 0 : index
    %c0_20 = arith.constant 0 : index
    %8 = vector.load %arg11[%c0_19, %c0_20] : memref<1x256xf32, #tpu.memory_space<vmem>>, vector<1x256xf32>
    %c0_21 = arith.constant 0 : index
    %c0_22 = arith.constant 0 : index
    %9 = vector.load %arg12[%c0_21, %c0_22] : memref<256x512xbf16, #tpu.memory_space<vmem>>, vector<256x512xbf16>
    %c0_23 = arith.constant 0 : index
    %c0_24 = arith.constant 0 : index
    %10 = vector.load %arg13[%c0_23, %c0_24] : memref<1x512xf32, #tpu.memory_space<vmem>>, vector<1x512xf32>
    %c0_25 = arith.constant 0 : index
    %c0_26 = arith.constant 0 : index
    %11 = vector.load %arg14[%c0_25, %c0_26] : memref<512x256xbf16, #tpu.memory_space<vmem>>, vector<512x256xbf16>
    %c0_27 = arith.constant 0 : index
    %c0_28 = arith.constant 0 : index
    %12 = vector.load %arg15[%c0_27, %c0_28] : memref<1x256xf32, #tpu.memory_space<vmem>>, vector<1x256xf32>
    %c0_29 = arith.constant 0 : index
    %c0_30 = arith.constant 0 : index
    %13 = vector.load %arg16[%c0_29, %c0_30] : memref<1x512xf32, #tpu.memory_space<vmem>>, vector<1x512xf32>
    %c0_31 = arith.constant 0 : index
    %c0_32 = arith.constant 0 : index
    %14 = vector.load %arg17[%c0_31, %c0_32] : memref<1x512xf32, #tpu.memory_space<vmem>>, vector<1x512xf32>
    %c0_33 = arith.constant 0 : index
    %c0_34 = arith.constant 0 : index
    %c0_35 = arith.constant 0 : index
    %15 = vector.load %arg18[%c0_33, %c0_34, %c0_35] : memref<4x512x32xbf16, #tpu.memory_space<vmem>>, vector<4x512x32xbf16>
    %c0_36 = arith.constant 0 : index
    %c0_37 = arith.constant 0 : index
    %c0_38 = arith.constant 0 : index
    %16 = vector.load %arg19[%c0_36, %c0_37, %c0_38] : memref<4x512x32xbf16, #tpu.memory_space<vmem>>, vector<4x512x32xbf16>
    %c0_39 = arith.constant 0 : index
    %c0_40 = arith.constant 0 : index
    %c0_41 = arith.constant 0 : index
    %17 = vector.load %arg20[%c0_39, %c0_40, %c0_41] : memref<4x512x32xbf16, #tpu.memory_space<vmem>>, vector<4x512x32xbf16>
    %c0_42 = arith.constant 0 : index
    %c0_43 = arith.constant 0 : index
    %c0_44 = arith.constant 0 : index
    %18 = vector.load %arg21[%c0_42, %c0_43, %c0_44] : memref<4x32x512xbf16, #tpu.memory_space<vmem>>, vector<4x32x512xbf16>
    %c0_45 = arith.constant 0 : index
    %c0_46 = arith.constant 0 : index
    %19 = vector.load %arg22[%c0_45, %c0_46] : memref<1x512xf32, #tpu.memory_space<vmem>>, vector<1x512xf32>
    %c0_47 = arith.constant 0 : index
    %c0_48 = arith.constant 0 : index
    %20 = vector.load %arg23[%c0_47, %c0_48] : memref<1x512xf32, #tpu.memory_space<vmem>>, vector<1x512xf32>
    %c0_49 = arith.constant 0 : index
    %c0_50 = arith.constant 0 : index
    %21 = vector.load %arg24[%c0_49, %c0_50] : memref<1x512xf32, #tpu.memory_space<vmem>>, vector<1x512xf32>
    %c0_51 = arith.constant 0 : index
    %c0_52 = arith.constant 0 : index
    %22 = vector.load %arg25[%c0_51, %c0_52] : memref<512x512xbf16, #tpu.memory_space<vmem>>, vector<512x512xbf16>
    %c0_53 = arith.constant 0 : index
    %c0_54 = arith.constant 0 : index
    %23 = vector.load %arg26[%c0_53, %c0_54] : memref<1x512xf32, #tpu.memory_space<vmem>>, vector<1x512xf32>
    %c0_55 = arith.constant 0 : index
    %c0_56 = arith.constant 0 : index
    %24 = vector.load %arg27[%c0_55, %c0_56] : memref<512x512xbf16, #tpu.memory_space<vmem>>, vector<512x512xbf16>
    %c0_57 = arith.constant 0 : index
    %c0_58 = arith.constant 0 : index
    %25 = vector.load %arg28[%c0_57, %c0_58] : memref<1x512xf32, #tpu.memory_space<vmem>>, vector<1x512xf32>
    %c0_59 = arith.constant 0 : index
    %c0_60 = arith.constant 0 : index
    %26 = vector.load %arg29[%c0_59, %c0_60] : memref<256x128xbf16, #tpu.memory_space<vmem>>, vector<256x128xbf16>
    %c0_61 = arith.constant 0 : index
    %c0_62 = arith.constant 0 : index
    %27 = vector.load %arg30[%c0_61, %c0_62] : memref<1x128xf32, #tpu.memory_space<vmem>>, vector<1x128xf32>
    %c0_63 = arith.constant 0 : index
    %c0_64 = arith.constant 0 : index
    %28 = vector.load %arg31[%c0_63, %c0_64] : memref<512x128xbf16, #tpu.memory_space<vmem>>, vector<512x128xbf16>
    %c0_65 = arith.constant 0 : index
    %c0_66 = arith.constant 0 : index
    %29 = vector.load %arg32[%c0_65, %c0_66] : memref<1x128xf32, #tpu.memory_space<vmem>>, vector<1x128xf32>
    %c0_67 = arith.constant 0 : index
    %c0_68 = arith.constant 0 : index
    %30 = vector.load %arg33[%c0_67, %c0_68] : memref<1x128xf32, #tpu.memory_space<vmem>>, vector<1x128xf32>
    %c0_69 = arith.constant 0 : index
    %c0_70 = arith.constant 0 : index
    %31 = vector.load %arg34[%c0_69, %c0_70] : memref<1x128xf32, #tpu.memory_space<vmem>>, vector<1x128xf32>
    %c0_71 = arith.constant 0 : index
    %c0_72 = arith.constant 0 : index
    %32 = vector.load %arg35[%c0_71, %c0_72] : memref<128x256xbf16, #tpu.memory_space<vmem>>, vector<128x256xbf16>
    %c0_73 = arith.constant 0 : index
    %c0_74 = arith.constant 0 : index
    %33 = vector.load %arg36[%c0_73, %c0_74] : memref<1x256xf32, #tpu.memory_space<vmem>>, vector<1x256xf32>
    %c0_75 = arith.constant 0 : index
    %c0_76 = arith.constant 0 : index
    %34 = vector.load %arg37[%c0_75, %c0_76] : memref<256x128xbf16, #tpu.memory_space<vmem>>, vector<256x128xbf16>
    %c0_77 = arith.constant 0 : index
    %c0_78 = arith.constant 0 : index
    %35 = vector.load %arg38[%c0_77, %c0_78] : memref<1x128xf32, #tpu.memory_space<vmem>>, vector<1x128xf32>
    %c0_79 = arith.constant 0 : index
    %c0_80 = arith.constant 0 : index
    %36 = vector.load %arg39[%c0_79, %c0_80] : memref<128x64xbf16, #tpu.memory_space<vmem>>, vector<128x64xbf16>
    %c0_81 = arith.constant 0 : index
    %c0_82 = arith.constant 0 : index
    %37 = vector.load %arg40[%c0_81, %c0_82] : memref<1x64xf32, #tpu.memory_space<vmem>>, vector<1x64xf32>
    %c0_83 = arith.constant 0 : index
    %c0_84 = arith.constant 0 : index
    %38 = vector.load %arg41[%c0_83, %c0_84] : memref<64x10xbf16, #tpu.memory_space<vmem>>, vector<64x10xbf16>
    %c0_85 = arith.constant 0 : index
    %c0_86 = arith.constant 0 : index
    %39 = vector.load %arg42[%c0_85, %c0_86] : memref<1x10xf32, #tpu.memory_space<vmem>>, vector<1x10xf32>
    %c0_87 = arith.constant 0 : index
    %c0_88 = arith.constant 0 : index
    %c0_89 = arith.constant 0 : index
    %40 = vector.load %arg1[%c0_87, %c0_88, %c0_89] : memref<1x8x256xf32, #tpu.memory_space<vmem>>, vector<1x8x256xf32>
    %41 = vector.shape_cast %40 : vector<1x8x256xf32> to vector<8x256xf32>
    %cst = arith.constant dense<0.000000e+00> : vector<8xf32>
    %42 = vector.multi_reduction <add>, %41, %cst [1] : vector<8x256xf32> to vector<8xf32>
    %43 = vector.shape_cast %42 : vector<8xf32> to vector<8x1xf32>
    %cst_90 = arith.constant 2.560000e+02 : f32
    %44 = vector.broadcast %cst_90 : f32 to vector<8x1xf32>
    %45 = arith.divf %43, %44 : vector<8x1xf32>
    %46 = vector.broadcast %45 : vector<8x1xf32> to vector<8x256xf32>
    %47 = arith.subf %41, %46 : vector<8x256xf32>
    %48 = arith.mulf %47, %47 : vector<8x256xf32>
    %cst_91 = arith.constant dense<0.000000e+00> : vector<8xf32>
    %49 = vector.multi_reduction <add>, %48, %cst_91 [1] : vector<8x256xf32> to vector<8xf32>
    %50 = vector.shape_cast %49 : vector<8xf32> to vector<8x1xf32>
    %cst_92 = arith.constant 2.560000e+02 : f32
    %51 = vector.broadcast %cst_92 : f32 to vector<8x1xf32>
    %52 = arith.divf %50, %51 : vector<8x1xf32>
    %53 = vector.broadcast %45 : vector<8x1xf32> to vector<8x256xf32>
    %54 = arith.subf %41, %53 : vector<8x256xf32>
    %cst_93 = arith.constant 9.99999974E-6 : f32
    %55 = vector.broadcast %cst_93 : f32 to vector<8x1xf32>
    %56 = arith.addf %52, %55 : vector<8x1xf32>
    %57 = math.rsqrt %56 : vector<8x1xf32>
    %58 = vector.broadcast %57 : vector<8x1xf32> to vector<8x256xf32>
    %59 = arith.mulf %54, %58 : vector<8x256xf32>
    %60 = vector.broadcast %0 : vector<1x256xf32> to vector<8x256xf32>
    %61 = arith.mulf %59, %60 : vector<8x256xf32>
    %62 = vector.broadcast %1 : vector<1x256xf32> to vector<8x256xf32>
    %63 = arith.addf %61, %62 : vector<8x256xf32>
    %64 = arith.truncf %63 : vector<8x256xf32> to vector<8x256xbf16>
    %65 = vector.shape_cast %64 : vector<8x256xbf16> to vector<1x8x256xbf16>
    %66 = vector.shape_cast %65 : vector<1x8x256xbf16> to vector<1x8x256xbf16>
    %67 = vector.broadcast %66 : vector<1x8x256xbf16> to vector<4x8x256xbf16>
    "tpu.trace_start"() <{level = 10 : i32, message = "hnD,hDd->hnd"}> : () -> ()
    %cst_94 = arith.constant dense<0.000000e+00> : vector<4x8x32xf32>
    %68 = tpu.matmul %67, %2, %cst_94 {dimension_numbers = #tpu.dot_dimension_numbers<[2], [1], [1], [2], [0, 0, 0, 1, 1, 2], [0], [0]>} : vector<4x8x256xbf16>, vector<4x256x32xbf16>, vector<4x8x32xf32> -> vector<4x8x32xf32>
    %cst_95 = arith.constant dense<0.000000e+00> : vector<4x8x32xf32>
    %69 = tpu.matmul %67, %3, %cst_95 {dimension_numbers = #tpu.dot_dimension_numbers<[2], [1], [1], [2], [0, 0, 0, 1, 1, 2], [0], [0]>} : vector<4x8x256xbf16>, vector<4x256x32xbf16>, vector<4x8x32xf32> -> vector<4x8x32xf32>
    %cst_96 = arith.constant dense<0.000000e+00> : vector<4x8x32xf32>
    %70 = tpu.matmul %67, %4, %cst_96 {dimension_numbers = #tpu.dot_dimension_numbers<[2], [1], [1], [2], [0, 0, 0, 1, 1, 2], [0], [0]>} : vector<4x8x256xbf16>, vector<4x256x32xbf16>, vector<4x8x32xf32> -> vector<4x8x32xf32>
    "tpu.trace_stop"() : () -> ()
    %71 = arith.truncf %68 : vector<4x8x32xf32> to vector<4x8x32xbf16>
    %72 = arith.truncf %69 : vector<4x8x32xf32> to vector<4x8x32xbf16>
    "tpu.trace_start"() <{level = 10 : i32, message = "hnd,hmd->hnm"}> : () -> ()
    %cst_97 = arith.constant dense<0.000000e+00> : vector<4x8x8xf32>
    %73 = tpu.matmul %71, %72, %cst_97 {dimension_numbers = #tpu.dot_dimension_numbers<[2], [2], [1], [1], [0, 0, 0, 1, 1, 1], [0], [0]>} : vector<4x8x32xbf16>, vector<4x8x32xbf16>, vector<4x8x8xf32> -> vector<4x8x8xf32>
    "tpu.trace_stop"() : () -> ()
    %cst_98 = arith.constant 0.176776692 : f32
    %74 = vector.broadcast %cst_98 : f32 to vector<4x8x8xf32>
    %75 = arith.mulf %73, %74 : vector<4x8x8xf32>
    %cst_99 = arith.constant dense<0xFF800000> : vector<4x8xf32>
    %76 = vector.multi_reduction <maximumf>, %75, %cst_99 [2] : vector<4x8x8xf32> to vector<4x8xf32>
    %77 = vector.shape_cast %76 : vector<4x8xf32> to vector<4x8x1xf32>
    %78 = vector.broadcast %77 : vector<4x8x1xf32> to vector<4x8x8xf32>
    %79 = arith.subf %75, %78 : vector<4x8x8xf32>
    %80 = math.exp %79 : vector<4x8x8xf32>
    %cst_100 = arith.constant dense<0.000000e+00> : vector<4x8xf32>
    %81 = vector.multi_reduction <add>, %80, %cst_100 [2] : vector<4x8x8xf32> to vector<4x8xf32>
    %82 = vector.shape_cast %81 : vector<4x8xf32> to vector<4x8x1xf32>
    %83 = tpu.reciprocal %82 {approx = true} : vector<4x8x1xf32> -> vector<4x8x1xf32>
    %84 = vector.broadcast %83 : vector<4x8x1xf32> to vector<4x8x8xf32>
    %85 = arith.mulf %80, %84 : vector<4x8x8xf32>
    %86 = arith.truncf %85 : vector<4x8x8xf32> to vector<4x8x8xbf16>
    %87 = arith.truncf %70 : vector<4x8x32xf32> to vector<4x8x32xbf16>
    "tpu.trace_start"() <{level = 10 : i32, message = "hnm,hmd->hnd"}> : () -> ()
    %cst_101 = arith.constant dense<0.000000e+00> : vector<4x8x32xf32>
    %88 = tpu.matmul %86, %87, %cst_101 {dimension_numbers = #tpu.dot_dimension_numbers<[2], [1], [1], [2], [0, 0, 0, 1, 1, 2], [0], [0]>} : vector<4x8x8xbf16>, vector<4x8x32xbf16>, vector<4x8x32xf32> -> vector<4x8x32xf32>
    "tpu.trace_stop"() : () -> ()
    %89 = arith.truncf %88 : vector<4x8x32xf32> to vector<4x8x32xbf16>
    "tpu.trace_start"() <{level = 10 : i32, message = "hnd,hdD->hnD"}> : () -> ()
    %cst_102 = arith.constant dense<0.000000e+00> : vector<4x8x256xf32>
    %90 = tpu.matmul %89, %5, %cst_102 {dimension_numbers = #tpu.dot_dimension_numbers<[2], [1], [1], [2], [0, 0, 0, 1, 1, 2], [0], [0]>} : vector<4x8x32xbf16>, vector<4x32x256xbf16>, vector<4x8x256xf32> -> vector<4x8x256xf32>
    "tpu.trace_stop"() : () -> ()
    %cst_103 = arith.constant dense<0.000000e+00> : vector<8x256xf32>
    %91 = vector.multi_reduction <add>, %90, %cst_103 [0] : vector<4x8x256xf32> to vector<8x256xf32>
    %92 = vector.broadcast %6 : vector<1x256xf32> to vector<8x256xf32>
    %93 = arith.addf %91, %92 : vector<8x256xf32>
    %94 = arith.addf %93, %41 : vector<8x256xf32>
    %cst_104 = arith.constant dense<0.000000e+00> : vector<8xf32>
    %95 = vector.multi_reduction <add>, %94, %cst_104 [1] : vector<8x256xf32> to vector<8xf32>
    %96 = vector.shape_cast %95 : vector<8xf32> to vector<8x1xf32>
    %cst_105 = arith.constant 2.560000e+02 : f32
    %97 = vector.broadcast %cst_105 : f32 to vector<8x1xf32>
    %98 = arith.divf %96, %97 : vector<8x1xf32>
    %99 = vector.broadcast %98 : vector<8x1xf32> to vector<8x256xf32>
    %100 = arith.subf %94, %99 : vector<8x256xf32>
    %101 = arith.mulf %100, %100 : vector<8x256xf32>
    %cst_106 = arith.constant dense<0.000000e+00> : vector<8xf32>
    %102 = vector.multi_reduction <add>, %101, %cst_106 [1] : vector<8x256xf32> to vector<8xf32>
    %103 = vector.shape_cast %102 : vector<8xf32> to vector<8x1xf32>
    %cst_107 = arith.constant 2.560000e+02 : f32
    %104 = vector.broadcast %cst_107 : f32 to vector<8x1xf32>
    %105 = arith.divf %103, %104 : vector<8x1xf32>
    %106 = vector.broadcast %98 : vector<8x1xf32> to vector<8x256xf32>
    %107 = arith.subf %94, %106 : vector<8x256xf32>
    %cst_108 = arith.constant 9.99999974E-6 : f32
    %108 = vector.broadcast %cst_108 : f32 to vector<8x1xf32>
    %109 = arith.addf %105, %108 : vector<8x1xf32>
    %110 = math.rsqrt %109 : vector<8x1xf32>
    %111 = vector.broadcast %110 : vector<8x1xf32> to vector<8x256xf32>
    %112 = arith.mulf %107, %111 : vector<8x256xf32>
    %113 = vector.broadcast %7 : vector<1x256xf32> to vector<8x256xf32>
    %114 = arith.mulf %112, %113 : vector<8x256xf32>
    %115 = vector.broadcast %8 : vector<1x256xf32> to vector<8x256xf32>
    %116 = arith.addf %114, %115 : vector<8x256xf32>
    %117 = arith.truncf %116 : vector<8x256xf32> to vector<8x256xbf16>
    %cst_109 = arith.constant dense<0.000000e+00> : vector<8x512xf32>
    %118 = tpu.matmul %117, %9, %cst_109 {dimension_numbers = #tpu.dot_dimension_numbers<[1], [0], [0], [1], [0, 0, 1, 1], [], []>} : vector<8x256xbf16>, vector<256x512xbf16>, vector<8x512xf32> -> vector<8x512xf32>
    %119 = vector.broadcast %10 : vector<1x512xf32> to vector<8x512xf32>
    %120 = arith.addf %118, %119 : vector<8x512xf32>
    %cst_110 = arith.constant 0.707106769 : f32
    %121 = vector.broadcast %cst_110 : f32 to vector<8x512xf32>
    %122 = arith.mulf %120, %121 : vector<8x512xf32>
    %123 = math.absf %122 : vector<8x512xf32>
    %cst_111 = arith.constant 0.327591091 : f32
    %124 = vector.broadcast %cst_111 : f32 to vector<8x512xf32>
    %125 = arith.mulf %124, %123 : vector<8x512xf32>
    %cst_112 = arith.constant 1.000000e+00 : f32
    %126 = vector.broadcast %cst_112 : f32 to vector<8x512xf32>
    %127 = arith.addf %126, %125 : vector<8x512xf32>
    %cst_113 = arith.constant 1.000000e+00 : f32
    %128 = vector.broadcast %cst_113 : f32 to vector<8x512xf32>
    %129 = arith.divf %128, %127 : vector<8x512xf32>
    %cst_114 = arith.constant 1.06140542 : f32
    %130 = vector.broadcast %cst_114 : f32 to vector<8x512xf32>
    %131 = arith.mulf %129, %130 : vector<8x512xf32>
    %cst_115 = arith.constant -1.45315206 : f32
    %132 = vector.broadcast %cst_115 : f32 to vector<8x512xf32>
    %133 = arith.addf %132, %131 : vector<8x512xf32>
    %134 = arith.mulf %129, %133 : vector<8x512xf32>
    %cst_116 = arith.constant 1.42141378 : f32
    %135 = vector.broadcast %cst_116 : f32 to vector<8x512xf32>
    %136 = arith.addf %135, %134 : vector<8x512xf32>
    %137 = arith.mulf %129, %136 : vector<8x512xf32>
    %cst_117 = arith.constant -0.284496725 : f32
    %138 = vector.broadcast %cst_117 : f32 to vector<8x512xf32>
    %139 = arith.addf %138, %137 : vector<8x512xf32>
    %140 = arith.mulf %129, %139 : vector<8x512xf32>
    %cst_118 = arith.constant 0.254829586 : f32
    %141 = vector.broadcast %cst_118 : f32 to vector<8x512xf32>
    %142 = arith.addf %141, %140 : vector<8x512xf32>
    %143 = arith.mulf %129, %142 : vector<8x512xf32>
    %cst_119 = arith.constant 0.000000e+00 : f32
    %144 = vector.broadcast %cst_119 : f32 to vector<8x512xf32>
    %145 = arith.subf %144, %123 : vector<8x512xf32>
    %146 = arith.mulf %145, %123 : vector<8x512xf32>
    %147 = math.exp %146 : vector<8x512xf32>
    %148 = arith.mulf %143, %147 : vector<8x512xf32>
    %cst_120 = arith.constant 1.000000e+00 : f32
    %149 = vector.broadcast %cst_120 : f32 to vector<8x512xf32>
    %150 = arith.subf %149, %148 : vector<8x512xf32>
    %cst_121 = arith.constant 0.000000e+00 : f32
    %151 = vector.broadcast %cst_121 : f32 to vector<8x512xf32>
    %152 = arith.cmpf oge, %122, %151 : vector<8x512xf32>
    %cst_122 = arith.constant 0.000000e+00 : f32
    %153 = vector.broadcast %cst_122 : f32 to vector<8x512xf32>
    %154 = arith.subf %153, %150 : vector<8x512xf32>
    %155 = arith.select %152, %150, %154 : vector<8x512xi1>, vector<8x512xf32>
    %cst_123 = arith.constant 5.000000e-01 : f32
    %156 = vector.broadcast %cst_123 : f32 to vector<8x512xf32>
    %157 = arith.mulf %156, %120 : vector<8x512xf32>
    %cst_124 = arith.constant 1.000000e+00 : f32
    %158 = vector.broadcast %cst_124 : f32 to vector<8x512xf32>
    %159 = arith.addf %158, %155 : vector<8x512xf32>
    %160 = arith.mulf %157, %159 : vector<8x512xf32>
    %161 = arith.truncf %160 : vector<8x512xf32> to vector<8x512xbf16>
    %cst_125 = arith.constant dense<0.000000e+00> : vector<8x256xf32>
    %162 = tpu.matmul %161, %11, %cst_125 {dimension_numbers = #tpu.dot_dimension_numbers<[1], [0], [0], [1], [0, 0, 1, 1], [], []>} : vector<8x512xbf16>, vector<512x256xbf16>, vector<8x256xf32> -> vector<8x256xf32>
    %163 = vector.broadcast %12 : vector<1x256xf32> to vector<8x256xf32>
    %164 = arith.addf %162, %163 : vector<8x256xf32>
    %165 = arith.addf %164, %94 : vector<8x256xf32>
    %c0_126 = arith.constant 0 : index
    %c0_127 = arith.constant 0 : index
    %c0_128 = arith.constant 0 : index
    %166 = vector.load %arg2[%c0_126, %c0_127, %c0_128] : memref<1x4x512xf32, #tpu.memory_space<vmem>>, vector<1x4x512xf32>
    %167 = vector.shape_cast %166 : vector<1x4x512xf32> to vector<4x512xf32>
    %cst_129 = arith.constant dense<0.000000e+00> : vector<4xf32>
    %168 = vector.multi_reduction <add>, %167, %cst_129 [1] : vector<4x512xf32> to vector<4xf32>
    %169 = vector.shape_cast %168 : vector<4xf32> to vector<4x1xf32>
    %cst_130 = arith.constant 5.120000e+02 : f32
    %170 = vector.broadcast %cst_130 : f32 to vector<4x1xf32>
    %171 = arith.divf %169, %170 : vector<4x1xf32>
    %172 = vector.broadcast %171 : vector<4x1xf32> to vector<4x512xf32>
    %173 = arith.subf %167, %172 : vector<4x512xf32>
    %174 = arith.mulf %173, %173 : vector<4x512xf32>
    %cst_131 = arith.constant dense<0.000000e+00> : vector<4xf32>
    %175 = vector.multi_reduction <add>, %174, %cst_131 [1] : vector<4x512xf32> to vector<4xf32>
    %176 = vector.shape_cast %175 : vector<4xf32> to vector<4x1xf32>
    %cst_132 = arith.constant 5.120000e+02 : f32
    %177 = vector.broadcast %cst_132 : f32 to vector<4x1xf32>
    %178 = arith.divf %176, %177 : vector<4x1xf32>
    %179 = vector.broadcast %171 : vector<4x1xf32> to vector<4x512xf32>
    %180 = arith.subf %167, %179 : vector<4x512xf32>
    %cst_133 = arith.constant 9.99999974E-6 : f32
    %181 = vector.broadcast %cst_133 : f32 to vector<4x1xf32>
    %182 = arith.addf %178, %181 : vector<4x1xf32>
    %183 = math.rsqrt %182 : vector<4x1xf32>
    %184 = vector.broadcast %183 : vector<4x1xf32> to vector<4x512xf32>
    %185 = arith.mulf %180, %184 : vector<4x512xf32>
    %186 = vector.broadcast %13 : vector<1x512xf32> to vector<4x512xf32>
    %187 = arith.mulf %185, %186 : vector<4x512xf32>
    %188 = vector.broadcast %14 : vector<1x512xf32> to vector<4x512xf32>
    %189 = arith.addf %187, %188 : vector<4x512xf32>
    %190 = arith.truncf %189 : vector<4x512xf32> to vector<4x512xbf16>
    %191 = vector.shape_cast %190 : vector<4x512xbf16> to vector<1x4x512xbf16>
    %192 = vector.shape_cast %191 : vector<1x4x512xbf16> to vector<1x4x512xbf16>
    %193 = vector.broadcast %192 : vector<1x4x512xbf16> to vector<4x4x512xbf16>
    "tpu.trace_start"() <{level = 10 : i32, message = "hnD,hDd->hnd"}> : () -> ()
    %cst_134 = arith.constant dense<0.000000e+00> : vector<4x4x32xf32>
    %194 = tpu.matmul %193, %15, %cst_134 {dimension_numbers = #tpu.dot_dimension_numbers<[2], [1], [1], [2], [0, 0, 0, 1, 1, 2], [0], [0]>} : vector<4x4x512xbf16>, vector<4x512x32xbf16>, vector<4x4x32xf32> -> vector<4x4x32xf32>
    %cst_135 = arith.constant dense<0.000000e+00> : vector<4x4x32xf32>
    %195 = tpu.matmul %193, %16, %cst_135 {dimension_numbers = #tpu.dot_dimension_numbers<[2], [1], [1], [2], [0, 0, 0, 1, 1, 2], [0], [0]>} : vector<4x4x512xbf16>, vector<4x512x32xbf16>, vector<4x4x32xf32> -> vector<4x4x32xf32>
    %cst_136 = arith.constant dense<0.000000e+00> : vector<4x4x32xf32>
    %196 = tpu.matmul %193, %17, %cst_136 {dimension_numbers = #tpu.dot_dimension_numbers<[2], [1], [1], [2], [0, 0, 0, 1, 1, 2], [0], [0]>} : vector<4x4x512xbf16>, vector<4x512x32xbf16>, vector<4x4x32xf32> -> vector<4x4x32xf32>
    "tpu.trace_stop"() : () -> ()
    %197 = arith.truncf %194 : vector<4x4x32xf32> to vector<4x4x32xbf16>
    %198 = arith.truncf %195 : vector<4x4x32xf32> to vector<4x4x32xbf16>
    "tpu.trace_start"() <{level = 10 : i32, message = "hnd,hmd->hnm"}> : () -> ()
    %cst_137 = arith.constant dense<0.000000e+00> : vector<4x4x4xf32>
    %199 = tpu.matmul %197, %198, %cst_137 {dimension_numbers = #tpu.dot_dimension_numbers<[2], [2], [1], [1], [0, 0, 0, 1, 1, 1], [0], [0]>} : vector<4x4x32xbf16>, vector<4x4x32xbf16>, vector<4x4x4xf32> -> vector<4x4x4xf32>
    "tpu.trace_stop"() : () -> ()
    %cst_138 = arith.constant 0.176776692 : f32
    %200 = vector.broadcast %cst_138 : f32 to vector<4x4x4xf32>
    %201 = arith.mulf %199, %200 : vector<4x4x4xf32>
    %cst_139 = arith.constant dense<0xFF800000> : vector<4x4xf32>
    %202 = vector.multi_reduction <maximumf>, %201, %cst_139 [2] : vector<4x4x4xf32> to vector<4x4xf32>
    %203 = vector.shape_cast %202 : vector<4x4xf32> to vector<4x4x1xf32>
    %204 = vector.broadcast %203 : vector<4x4x1xf32> to vector<4x4x4xf32>
    %205 = arith.subf %201, %204 : vector<4x4x4xf32>
    %206 = math.exp %205 : vector<4x4x4xf32>
    %cst_140 = arith.constant dense<0.000000e+00> : vector<4x4xf32>
    %207 = vector.multi_reduction <add>, %206, %cst_140 [2] : vector<4x4x4xf32> to vector<4x4xf32>
    %208 = vector.shape_cast %207 : vector<4x4xf32> to vector<4x4x1xf32>
    %209 = tpu.reciprocal %208 {approx = true} : vector<4x4x1xf32> -> vector<4x4x1xf32>
    %210 = vector.broadcast %209 : vector<4x4x1xf32> to vector<4x4x4xf32>
    %211 = arith.mulf %206, %210 : vector<4x4x4xf32>
    %212 = arith.truncf %211 : vector<4x4x4xf32> to vector<4x4x4xbf16>
    %213 = arith.truncf %196 : vector<4x4x32xf32> to vector<4x4x32xbf16>
    "tpu.trace_start"() <{level = 10 : i32, message = "hnm,hmd->hnd"}> : () -> ()
    %cst_141 = arith.constant dense<0.000000e+00> : vector<4x4x32xf32>
    %214 = tpu.matmul %212, %213, %cst_141 {dimension_numbers = #tpu.dot_dimension_numbers<[2], [1], [1], [2], [0, 0, 0, 1, 1, 2], [0], [0]>} : vector<4x4x4xbf16>, vector<4x4x32xbf16>, vector<4x4x32xf32> -> vector<4x4x32xf32>
    "tpu.trace_stop"() : () -> ()
    %215 = arith.truncf %214 : vector<4x4x32xf32> to vector<4x4x32xbf16>
    "tpu.trace_start"() <{level = 10 : i32, message = "hnd,hdD->hnD"}> : () -> ()
    %cst_142 = arith.constant dense<0.000000e+00> : vector<4x4x512xf32>
    %216 = tpu.matmul %215, %18, %cst_142 {dimension_numbers = #tpu.dot_dimension_numbers<[2], [1], [1], [2], [0, 0, 0, 1, 1, 2], [0], [0]>} : vector<4x4x32xbf16>, vector<4x32x512xbf16>, vector<4x4x512xf32> -> vector<4x4x512xf32>
    "tpu.trace_stop"() : () -> ()
    %cst_143 = arith.constant dense<0.000000e+00> : vector<4x512xf32>
    %217 = vector.multi_reduction <add>, %216, %cst_143 [0] : vector<4x4x512xf32> to vector<4x512xf32>
    %218 = vector.broadcast %19 : vector<1x512xf32> to vector<4x512xf32>
    %219 = arith.addf %217, %218 : vector<4x512xf32>
    %220 = arith.addf %219, %167 : vector<4x512xf32>
    %cst_144 = arith.constant dense<0.000000e+00> : vector<4xf32>
    %221 = vector.multi_reduction <add>, %220, %cst_144 [1] : vector<4x512xf32> to vector<4xf32>
    %222 = vector.shape_cast %221 : vector<4xf32> to vector<4x1xf32>
    %cst_145 = arith.constant 5.120000e+02 : f32
    %223 = vector.broadcast %cst_145 : f32 to vector<4x1xf32>
    %224 = arith.divf %222, %223 : vector<4x1xf32>
    %225 = vector.broadcast %224 : vector<4x1xf32> to vector<4x512xf32>
    %226 = arith.subf %220, %225 : vector<4x512xf32>
    %227 = arith.mulf %226, %226 : vector<4x512xf32>
    %cst_146 = arith.constant dense<0.000000e+00> : vector<4xf32>
    %228 = vector.multi_reduction <add>, %227, %cst_146 [1] : vector<4x512xf32> to vector<4xf32>
    %229 = vector.shape_cast %228 : vector<4xf32> to vector<4x1xf32>
    %cst_147 = arith.constant 5.120000e+02 : f32
    %230 = vector.broadcast %cst_147 : f32 to vector<4x1xf32>
    %231 = arith.divf %229, %230 : vector<4x1xf32>
    %232 = vector.broadcast %224 : vector<4x1xf32> to vector<4x512xf32>
    %233 = arith.subf %220, %232 : vector<4x512xf32>
    %cst_148 = arith.constant 9.99999974E-6 : f32
    %234 = vector.broadcast %cst_148 : f32 to vector<4x1xf32>
    %235 = arith.addf %231, %234 : vector<4x1xf32>
    %236 = math.rsqrt %235 : vector<4x1xf32>
    %237 = vector.broadcast %236 : vector<4x1xf32> to vector<4x512xf32>
    %238 = arith.mulf %233, %237 : vector<4x512xf32>
    %239 = vector.broadcast %20 : vector<1x512xf32> to vector<4x512xf32>
    %240 = arith.mulf %238, %239 : vector<4x512xf32>
    %241 = vector.broadcast %21 : vector<1x512xf32> to vector<4x512xf32>
    %242 = arith.addf %240, %241 : vector<4x512xf32>
    %243 = arith.truncf %242 : vector<4x512xf32> to vector<4x512xbf16>
    %cst_149 = arith.constant dense<0.000000e+00> : vector<4x512xf32>
    %244 = tpu.matmul %243, %22, %cst_149 {dimension_numbers = #tpu.dot_dimension_numbers<[1], [0], [0], [1], [0, 0, 1, 1], [], []>} : vector<4x512xbf16>, vector<512x512xbf16>, vector<4x512xf32> -> vector<4x512xf32>
    %245 = vector.broadcast %23 : vector<1x512xf32> to vector<4x512xf32>
    %246 = arith.addf %244, %245 : vector<4x512xf32>
    %cst_150 = arith.constant 0.707106769 : f32
    %247 = vector.broadcast %cst_150 : f32 to vector<4x512xf32>
    %248 = arith.mulf %246, %247 : vector<4x512xf32>
    %249 = math.absf %248 : vector<4x512xf32>
    %cst_151 = arith.constant 0.327591091 : f32
    %250 = vector.broadcast %cst_151 : f32 to vector<4x512xf32>
    %251 = arith.mulf %250, %249 : vector<4x512xf32>
    %cst_152 = arith.constant 1.000000e+00 : f32
    %252 = vector.broadcast %cst_152 : f32 to vector<4x512xf32>
    %253 = arith.addf %252, %251 : vector<4x512xf32>
    %cst_153 = arith.constant 1.000000e+00 : f32
    %254 = vector.broadcast %cst_153 : f32 to vector<4x512xf32>
    %255 = arith.divf %254, %253 : vector<4x512xf32>
    %cst_154 = arith.constant 1.06140542 : f32
    %256 = vector.broadcast %cst_154 : f32 to vector<4x512xf32>
    %257 = arith.mulf %255, %256 : vector<4x512xf32>
    %cst_155 = arith.constant -1.45315206 : f32
    %258 = vector.broadcast %cst_155 : f32 to vector<4x512xf32>
    %259 = arith.addf %258, %257 : vector<4x512xf32>
    %260 = arith.mulf %255, %259 : vector<4x512xf32>
    %cst_156 = arith.constant 1.42141378 : f32
    %261 = vector.broadcast %cst_156 : f32 to vector<4x512xf32>
    %262 = arith.addf %261, %260 : vector<4x512xf32>
    %263 = arith.mulf %255, %262 : vector<4x512xf32>
    %cst_157 = arith.constant -0.284496725 : f32
    %264 = vector.broadcast %cst_157 : f32 to vector<4x512xf32>
    %265 = arith.addf %264, %263 : vector<4x512xf32>
    %266 = arith.mulf %255, %265 : vector<4x512xf32>
    %cst_158 = arith.constant 0.254829586 : f32
    %267 = vector.broadcast %cst_158 : f32 to vector<4x512xf32>
    %268 = arith.addf %267, %266 : vector<4x512xf32>
    %269 = arith.mulf %255, %268 : vector<4x512xf32>
    %cst_159 = arith.constant 0.000000e+00 : f32
    %270 = vector.broadcast %cst_159 : f32 to vector<4x512xf32>
    %271 = arith.subf %270, %249 : vector<4x512xf32>
    %272 = arith.mulf %271, %249 : vector<4x512xf32>
    %273 = math.exp %272 : vector<4x512xf32>
    %274 = arith.mulf %269, %273 : vector<4x512xf32>
    %cst_160 = arith.constant 1.000000e+00 : f32
    %275 = vector.broadcast %cst_160 : f32 to vector<4x512xf32>
    %276 = arith.subf %275, %274 : vector<4x512xf32>
    %cst_161 = arith.constant 0.000000e+00 : f32
    %277 = vector.broadcast %cst_161 : f32 to vector<4x512xf32>
    %278 = arith.cmpf oge, %248, %277 : vector<4x512xf32>
    %cst_162 = arith.constant 0.000000e+00 : f32
    %279 = vector.broadcast %cst_162 : f32 to vector<4x512xf32>
    %280 = arith.subf %279, %276 : vector<4x512xf32>
    %281 = arith.select %278, %276, %280 : vector<4x512xi1>, vector<4x512xf32>
    %cst_163 = arith.constant 5.000000e-01 : f32
    %282 = vector.broadcast %cst_163 : f32 to vector<4x512xf32>
    %283 = arith.mulf %282, %246 : vector<4x512xf32>
    %cst_164 = arith.constant 1.000000e+00 : f32
    %284 = vector.broadcast %cst_164 : f32 to vector<4x512xf32>
    %285 = arith.addf %284, %281 : vector<4x512xf32>
    %286 = arith.mulf %283, %285 : vector<4x512xf32>
    %287 = arith.truncf %286 : vector<4x512xf32> to vector<4x512xbf16>
    %cst_165 = arith.constant dense<0.000000e+00> : vector<4x512xf32>
    %288 = tpu.matmul %287, %24, %cst_165 {dimension_numbers = #tpu.dot_dimension_numbers<[1], [0], [0], [1], [0, 0, 1, 1], [], []>} : vector<4x512xbf16>, vector<512x512xbf16>, vector<4x512xf32> -> vector<4x512xf32>
    %289 = vector.broadcast %25 : vector<1x512xf32> to vector<4x512xf32>
    %290 = arith.addf %288, %289 : vector<4x512xf32>
    %291 = arith.addf %290, %220 : vector<4x512xf32>
    %cst_166 = arith.constant dense<0.000000e+00> : vector<256xf32>
    %292 = vector.multi_reduction <add>, %165, %cst_166 [0] : vector<8x256xf32> to vector<256xf32>
    %293 = vector.shape_cast %292 : vector<256xf32> to vector<1x256xf32>
    %cst_167 = arith.constant dense<0.000000e+00> : vector<512xf32>
    %294 = vector.multi_reduction <add>, %291, %cst_167 [0] : vector<4x512xf32> to vector<512xf32>
    %295 = vector.shape_cast %294 : vector<512xf32> to vector<1x512xf32>
    %296 = arith.truncf %293 : vector<1x256xf32> to vector<1x256xbf16>
    %cst_168 = arith.constant dense<0.000000e+00> : vector<1x128xf32>
    %297 = tpu.matmul %296, %26, %cst_168 {dimension_numbers = #tpu.dot_dimension_numbers<[1], [0], [0], [1], [0, 0, 1, 1], [], []>} : vector<1x256xbf16>, vector<256x128xbf16>, vector<1x128xf32> -> vector<1x128xf32>
    %cst_169 = arith.constant 8.000000e+00 : f32
    %298 = vector.broadcast %cst_169 : f32 to vector<1x128xf32>
    %299 = arith.mulf %298, %27 : vector<1x128xf32>
    %300 = arith.addf %297, %299 : vector<1x128xf32>
    %301 = arith.truncf %295 : vector<1x512xf32> to vector<1x512xbf16>
    %cst_170 = arith.constant dense<0.000000e+00> : vector<1x128xf32>
    %302 = tpu.matmul %301, %28, %cst_170 {dimension_numbers = #tpu.dot_dimension_numbers<[1], [0], [0], [1], [0, 0, 1, 1], [], []>} : vector<1x512xbf16>, vector<512x128xbf16>, vector<1x128xf32> -> vector<1x128xf32>
    %303 = arith.addf %300, %302 : vector<1x128xf32>
    %cst_171 = arith.constant 4.000000e+00 : f32
    %304 = vector.broadcast %cst_171 : f32 to vector<1x128xf32>
    %305 = arith.mulf %304, %29 : vector<1x128xf32>
    %306 = arith.addf %303, %305 : vector<1x128xf32>
    %cst_172 = arith.constant 0.0833333358 : f32
    %307 = vector.broadcast %cst_172 : f32 to vector<1x128xf32>
    %308 = arith.mulf %306, %307 : vector<1x128xf32>
    %cst_173 = arith.constant dense<0.000000e+00> : vector<1xf32>
    %309 = vector.multi_reduction <add>, %308, %cst_173 [1] : vector<1x128xf32> to vector<1xf32>
    %310 = vector.shape_cast %309 : vector<1xf32> to vector<1x1xf32>
    %cst_174 = arith.constant 1.280000e+02 : f32
    %311 = vector.broadcast %cst_174 : f32 to vector<1x1xf32>
    %312 = arith.divf %310, %311 : vector<1x1xf32>
    %313 = vector.broadcast %312 : vector<1x1xf32> to vector<1x128xf32>
    %314 = arith.subf %308, %313 : vector<1x128xf32>
    %315 = arith.mulf %314, %314 : vector<1x128xf32>
    %cst_175 = arith.constant dense<0.000000e+00> : vector<1xf32>
    %316 = vector.multi_reduction <add>, %315, %cst_175 [1] : vector<1x128xf32> to vector<1xf32>
    %317 = vector.shape_cast %316 : vector<1xf32> to vector<1x1xf32>
    %cst_176 = arith.constant 1.280000e+02 : f32
    %318 = vector.broadcast %cst_176 : f32 to vector<1x1xf32>
    %319 = arith.divf %317, %318 : vector<1x1xf32>
    %320 = vector.broadcast %312 : vector<1x1xf32> to vector<1x128xf32>
    %321 = arith.subf %308, %320 : vector<1x128xf32>
    %cst_177 = arith.constant 9.99999974E-6 : f32
    %322 = vector.broadcast %cst_177 : f32 to vector<1x1xf32>
    %323 = arith.addf %319, %322 : vector<1x1xf32>
    %324 = math.rsqrt %323 : vector<1x1xf32>
    %325 = vector.broadcast %324 : vector<1x1xf32> to vector<1x128xf32>
    %326 = arith.mulf %321, %325 : vector<1x128xf32>
    %327 = arith.mulf %326, %30 : vector<1x128xf32>
    %328 = arith.addf %327, %31 : vector<1x128xf32>
    %329 = arith.truncf %328 : vector<1x128xf32> to vector<1x128xbf16>
    %cst_178 = arith.constant dense<0.000000e+00> : vector<1x256xf32>
    %330 = tpu.matmul %329, %32, %cst_178 {dimension_numbers = #tpu.dot_dimension_numbers<[1], [0], [0], [1], [0, 0, 1, 1], [], []>} : vector<1x128xbf16>, vector<128x256xbf16>, vector<1x256xf32> -> vector<1x256xf32>
    %331 = arith.addf %330, %33 : vector<1x256xf32>
    %cst_179 = arith.constant 0.000000e+00 : f32
    %332 = vector.broadcast %cst_179 : f32 to vector<1x256xf32>
    %333 = arith.cmpf oge, %331, %332 : vector<1x256xf32>
    %cst_180 = arith.constant 0.00999999977 : f32
    %334 = vector.broadcast %cst_180 : f32 to vector<1x256xf32>
    %335 = arith.mulf %334, %331 : vector<1x256xf32>
    %336 = arith.select %333, %331, %335 : vector<1x256xi1>, vector<1x256xf32>
    %337 = arith.truncf %336 : vector<1x256xf32> to vector<1x256xbf16>
    %cst_181 = arith.constant dense<0.000000e+00> : vector<1x128xf32>
    %338 = tpu.matmul %337, %34, %cst_181 {dimension_numbers = #tpu.dot_dimension_numbers<[1], [0], [0], [1], [0, 0, 1, 1], [], []>} : vector<1x256xbf16>, vector<256x128xbf16>, vector<1x128xf32> -> vector<1x128xf32>
    %339 = arith.addf %338, %35 : vector<1x128xf32>
    %cst_182 = arith.constant 0.000000e+00 : f32
    %340 = vector.broadcast %cst_182 : f32 to vector<1x128xf32>
    %341 = arith.cmpf oge, %339, %340 : vector<1x128xf32>
    %cst_183 = arith.constant 0.00999999977 : f32
    %342 = vector.broadcast %cst_183 : f32 to vector<1x128xf32>
    %343 = arith.mulf %342, %339 : vector<1x128xf32>
    %344 = arith.select %341, %339, %343 : vector<1x128xi1>, vector<1x128xf32>
    %345 = arith.truncf %344 : vector<1x128xf32> to vector<1x128xbf16>
    %cst_184 = arith.constant dense<0.000000e+00> : vector<1x64xf32>
    %346 = tpu.matmul %345, %36, %cst_184 {dimension_numbers = #tpu.dot_dimension_numbers<[1], [0], [0], [1], [0, 0, 1, 1], [], []>} : vector<1x128xbf16>, vector<128x64xbf16>, vector<1x64xf32> -> vector<1x64xf32>
    %347 = arith.addf %346, %37 : vector<1x64xf32>
    %cst_185 = arith.constant 0.000000e+00 : f32
    %348 = vector.broadcast %cst_185 : f32 to vector<1x64xf32>
    %349 = arith.cmpf oge, %347, %348 : vector<1x64xf32>
    %cst_186 = arith.constant 0.00999999977 : f32
    %350 = vector.broadcast %cst_186 : f32 to vector<1x64xf32>
    %351 = arith.mulf %350, %347 : vector<1x64xf32>
    %352 = arith.select %349, %347, %351 : vector<1x64xi1>, vector<1x64xf32>
    %353 = arith.truncf %352 : vector<1x64xf32> to vector<1x64xbf16>
    %cst_187 = arith.constant dense<0.000000e+00> : vector<1x10xf32>
    %354 = tpu.matmul %353, %38, %cst_187 {dimension_numbers = #tpu.dot_dimension_numbers<[1], [0], [0], [1], [0, 0, 1, 1], [], []>} : vector<1x64xbf16>, vector<64x10xbf16>, vector<1x10xf32> -> vector<1x10xf32>
    %355 = arith.addf %354, %39 : vector<1x10xf32>
    %c0_188 = arith.constant 0 : index
    %c0_189 = arith.constant 0 : index
    %c0_190 = arith.constant 0 : index
    %356 = vector.load %arg43[%c0_188, %c0_189, %c0_190] : memref<1x1x10xf32, #tpu.memory_space<vmem>>, vector<1x1x10xf32>
    %357 = vector.shape_cast %356 : vector<1x1x10xf32> to vector<1x10xf32>
    %358 = vector.shape_cast %355 : vector<1x10xf32> to vector<1x1x10xf32>
    tpu.vector_store %arg43[%c0_188, %c0_189, %c0_190], %358 {strides = array<i32>} : memref<1x1x10xf32, #tpu.memory_space<vmem>>, vector<1x1x10xf32>,
    return
  }
  func.func @transform_0(%arg0: i32) -> (i32, i32, i32) {
    %c0_i32 = arith.constant 0 : i32
    %c0_i32_0 = arith.constant 0 : i32
    %c0_i32_1 = arith.constant 0 : i32
    return %arg0, %c0_i32, %c0_i32_0 : i32, i32, i32
  }
  func.func @transform_1(%arg0: i32) -> (i32, i32, i32) {
    %c0_i32 = arith.constant 0 : i32
    %c0_i32_0 = arith.constant 0 : i32
    %c0_i32_1 = arith.constant 0 : i32
    return %arg0, %c0_i32, %c0_i32_0 : i32, i32, i32
  }
  func.func @transform_2(%arg0: i32) -> (i32, i32) {
    %c0_i32 = arith.constant 0 : i32
    %c0_i32_0 = arith.constant 0 : i32
    %c0_i32_1 = arith.constant 0 : i32
    return %c0_i32, %c0_i32_0 : i32, i32
  }
  func.func @transform_3(%arg0: i32) -> (i32, i32) {
    %c0_i32 = arith.constant 0 : i32
    %c0_i32_0 = arith.constant 0 : i32
    %c0_i32_1 = arith.constant 0 : i32
    return %c0_i32, %c0_i32_0 : i32, i32
  }
  func.func @transform_4(%arg0: i32) -> (i32, i32, i32) {
    %c0_i32 = arith.constant 0 : i32
    %c0_i32_0 = arith.constant 0 : i32
    %c0_i32_1 = arith.constant 0 : i32
    %c0_i32_2 = arith.constant 0 : i32
    return %c0_i32, %c0_i32_0, %c0_i32_1 : i32, i32, i32
  }
  func.func @transform_5(%arg0: i32) -> (i32, i32, i32) {
    %c0_i32 = arith.constant 0 : i32
    %c0_i32_0 = arith.constant 0 : i32
    %c0_i32_1 = arith.constant 0 : i32
    %c0_i32_2 = arith.constant 0 : i32
    return %c0_i32, %c0_i32_0, %c0_i32_1 : i32, i32, i32
  }
  func.func @transform_6(%arg0: i32) -> (i32, i32, i32) {
    %c0_i32 = arith.constant 0 : i32
    %c0_i32_0 = arith.constant 0 : i32
    %c0_i32_1 = arith.constant 0 : i32
    %c0_i32_2 = arith.constant 0 : i32
    return %c0_i32, %c0_i32_0, %c0_i32_1 : i32, i32, i32
  }
  func.func @transform_7(%arg0: i32) -> (i32, i32, i32) {
    %c0_i32 = arith.constant 0 : i32
    %c0_i32_0 = arith.constant 0 : i32
    %c0_i32_1 = arith.constant 0 : i32
    %c0_i32_2 = arith.constant 0 : i32
    return %c0_i32, %c0_i32_0, %c0_i32_1 : i32, i32, i32
  }
  func.func @transform_8(%arg0: i32) -> (i32, i32) {
    %c0_i32 = arith.constant 0 : i32
    %c0_i32_0 = arith.constant 0 : i32
    %c0_i32_1 = arith.constant 0 : i32
    return %c0_i32, %c0_i32_0 : i32, i32
  }
  func.func @transform_9(%arg0: i32) -> (i32, i32) {
    %c0_i32 = arith.constant 0 : i32
    %c0_i32_0 = arith.constant 0 : i32
    %c0_i32_1 = arith.constant 0 : i32
    return %c0_i32, %c0_i32_0 : i32, i32
  }
  func.func @transform_10(%arg0: i32) -> (i32, i32) {
    %c0_i32 = arith.constant 0 : i32
    %c0_i32_0 = arith.constant 0 : i32
    %c0_i32_1 = arith.constant 0 : i32
    return %c0_i32, %c0_i32_0 : i32, i32
  }
  func.func @transform_11(%arg0: i32) -> (i32, i32) {
    %c0_i32 = arith.constant 0 : i32
    %c0_i32_0 = arith.constant 0 : i32
    %c0_i32_1 = arith.constant 0 : i32
    return %c0_i32, %c0_i32_0 : i32, i32
  }
  func.func @transform_12(%arg0: i32) -> (i32, i32) {
    %c0_i32 = arith.constant 0 : i32
    %c0_i32_0 = arith.constant 0 : i32
    %c0_i32_1 = arith.constant 0 : i32
    return %c0_i32, %c0_i32_0 : i32, i32
  }
  func.func @transform_13(%arg0: i32) -> (i32, i32) {
    %c0_i32 = arith.constant 0 : i32
    %c0_i32_0 = arith.constant 0 : i32
    %c0_i32_1 = arith.constant 0 : i32
    return %c0_i32, %c0_i32_0 : i32, i32
  }
  func.func @transform_14(%arg0: i32) -> (i32, i32) {
    %c0_i32 = arith.constant 0 : i32
    %c0_i32_0 = arith.constant 0 : i32
    %c0_i32_1 = arith.constant 0 : i32
    return %c0_i32, %c0_i32_0 : i32, i32
  }
  func.func @transform_15(%arg0: i32) -> (i32, i32) {
    %c0_i32 = arith.constant 0 : i32
    %c0_i32_0 = arith.constant 0 : i32
    %c0_i32_1 = arith.constant 0 : i32
    return %c0_i32, %c0_i32_0 : i32, i32
  }
  func.func @transform_16(%arg0: i32) -> (i32, i32) {
    %c0_i32 = arith.constant 0 : i32
    %c0_i32_0 = arith.constant 0 : i32
    %c0_i32_1 = arith.constant 0 : i32
    return %c0_i32, %c0_i32_0 : i32, i32
  }
  func.func @transform_17(%arg0: i32) -> (i32, i32, i32) {
    %c0_i32 = arith.constant 0 : i32
    %c0_i32_0 = arith.constant 0 : i32
    %c0_i32_1 = arith.constant 0 : i32
    %c0_i32_2 = arith.constant 0 : i32
    return %c0_i32, %c0_i32_0, %c0_i32_1 : i32, i32, i32
  }
  func.func @transform_18(%arg0: i32) -> (i32, i32, i32) {
    %c0_i32 = arith.constant 0 : i32
    %c0_i32_0 = arith.constant 0 : i32
    %c0_i32_1 = arith.constant 0 : i32
    %c0_i32_2 = arith.constant 0 : i32
    return %c0_i32, %c0_i32_0, %c0_i32_1 : i32, i32, i32
  }
  func.func @transform_19(%arg0: i32) -> (i32, i32, i32) {
    %c0_i32 = arith.constant 0 : i32
    %c0_i32_0 = arith.constant 0 : i32
    %c0_i32_1 = arith.constant 0 : i32
    %c0_i32_2 = arith.constant 0 : i32
    return %c0_i32, %c0_i32_0, %c0_i32_1 : i32, i32, i32
  }
  func.func @transform_20(%arg0: i32) -> (i32, i32, i32) {
    %c0_i32 = arith.constant 0 : i32
    %c0_i32_0 = arith.constant 0 : i32
    %c0_i32_1 = arith.constant 0 : i32
    %c0_i32_2 = arith.constant 0 : i32
    return %c0_i32, %c0_i32_0, %c0_i32_1 : i32, i32, i32
  }
  func.func @transform_21(%arg0: i32) -> (i32, i32) {
    %c0_i32 = arith.constant 0 : i32
    %c0_i32_0 = arith.constant 0 : i32
    %c0_i32_1 = arith.constant 0 : i32
    return %c0_i32, %c0_i32_0 : i32, i32
  }
  func.func @transform_22(%arg0: i32) -> (i32, i32) {
    %c0_i32 = arith.constant 0 : i32
    %c0_i32_0 = arith.constant 0 : i32
    %c0_i32_1 = arith.constant 0 : i32
    return %c0_i32, %c0_i32_0 : i32, i32
  }
  func.func @transform_23(%arg0: i32) -> (i32, i32) {
    %c0_i32 = arith.constant 0 : i32
    %c0_i32_0 = arith.constant 0 : i32
    %c0_i32_1 = arith.constant 0 : i32
    return %c0_i32, %c0_i32_0 : i32, i32
  }
  func.func @transform_24(%arg0: i32) -> (i32, i32) {
    %c0_i32 = arith.constant 0 : i32
    %c0_i32_0 = arith.constant 0 : i32
    %c0_i32_1 = arith.constant 0 : i32
    return %c0_i32, %c0_i32_0 : i32, i32
  }
  func.func @transform_25(%arg0: i32) -> (i32, i32) {
    %c0_i32 = arith.constant 0 : i32
    %c0_i32_0 = arith.constant 0 : i32
    %c0_i32_1 = arith.constant 0 : i32
    return %c0_i32, %c0_i32_0 : i32, i32
  }
  func.func @transform_26(%arg0: i32) -> (i32, i32) {
    %c0_i32 = arith.constant 0 : i32
    %c0_i32_0 = arith.constant 0 : i32
    %c0_i32_1 = arith.constant 0 : i32
    return %c0_i32, %c0_i32_0 : i32, i32
  }
  func.func @transform_27(%arg0: i32) -> (i32, i32) {
    %c0_i32 = arith.constant 0 : i32
    %c0_i32_0 = arith.constant 0 : i32
    %c0_i32_1 = arith.constant 0 : i32
    return %c0_i32, %c0_i32_0 : i32, i32
  }
  func.func @transform_28(%arg0: i32) -> (i32, i32) {
    %c0_i32 = arith.constant 0 : i32
    %c0_i32_0 = arith.constant 0 : i32
    %c0_i32_1 = arith.constant 0 : i32
    return %c0_i32, %c0_i32_0 : i32, i32
  }
  func.func @transform_29(%arg0: i32) -> (i32, i32) {
    %c0_i32 = arith.constant 0 : i32
    %c0_i32_0 = arith.constant 0 : i32
    %c0_i32_1 = arith.constant 0 : i32
    return %c0_i32, %c0_i32_0 : i32, i32
  }
  func.func @transform_30(%arg0: i32) -> (i32, i32) {
    %c0_i32 = arith.constant 0 : i32
    %c0_i32_0 = arith.constant 0 : i32
    %c0_i32_1 = arith.constant 0 : i32
    return %c0_i32, %c0_i32_0 : i32, i32
  }
  func.func @transform_31(%arg0: i32) -> (i32, i32) {
    %c0_i32 = arith.constant 0 : i32
    %c0_i32_0 = arith.constant 0 : i32
    %c0_i32_1 = arith.constant 0 : i32
    return %c0_i32, %c0_i32_0 : i32, i32
  }
  func.func @transform_32(%arg0: i32) -> (i32, i32) {
    %c0_i32 = arith.constant 0 : i32
    %c0_i32_0 = arith.constant 0 : i32
    %c0_i32_1 = arith.constant 0 : i32
    return %c0_i32, %c0_i32_0 : i32, i32
  }
  func.func @transform_33(%arg0: i32) -> (i32, i32) {
    %c0_i32 = arith.constant 0 : i32
    %c0_i32_0 = arith.constant 0 : i32
    %c0_i32_1 = arith.constant 0 : i32
    return %c0_i32, %c0_i32_0 : i32, i32
  }
  func.func @transform_34(%arg0: i32) -> (i32, i32) {
    %c0_i32 = arith.constant 0 : i32
    %c0_i32_0 = arith.constant 0 : i32
    %c0_i32_1 = arith.constant 0 : i32
    return %c0_i32, %c0_i32_0 : i32, i32
  }
  func.func @transform_35(%arg0: i32) -> (i32, i32) {
    %c0_i32 = arith.constant 0 : i32
    %c0_i32_0 = arith.constant 0 : i32
    %c0_i32_1 = arith.constant 0 : i32
    return %c0_i32, %c0_i32_0 : i32, i32
  }
  func.func @transform_36(%arg0: i32) -> (i32, i32) {
    %c0_i32 = arith.constant 0 : i32
    %c0_i32_0 = arith.constant 0 : i32
    %c0_i32_1 = arith.constant 0 : i32
    return %c0_i32, %c0_i32_0 : i32, i32
  }
  func.func @transform_37(%arg0: i32) -> (i32, i32) {
    %c0_i32 = arith.constant 0 : i32
    %c0_i32_0 = arith.constant 0 : i32
    %c0_i32_1 = arith.constant 0 : i32
    return %c0_i32, %c0_i32_0 : i32, i32
  }
  func.func @transform_38(%arg0: i32) -> (i32, i32) {
    %c0_i32 = arith.constant 0 : i32
    %c0_i32_0 = arith.constant 0 : i32
    %c0_i32_1 = arith.constant 0 : i32
    return %c0_i32, %c0_i32_0 : i32, i32
  }
  func.func @transform_39(%arg0: i32) -> (i32, i32) {
    %c0_i32 = arith.constant 0 : i32
    %c0_i32_0 = arith.constant 0 : i32
    %c0_i32_1 = arith.constant 0 : i32
    return %c0_i32, %c0_i32_0 : i32, i32
  }
  func.func @transform_40(%arg0: i32) -> (i32, i32) {
    %c0_i32 = arith.constant 0 : i32
    %c0_i32_0 = arith.constant 0 : i32
    %c0_i32_1 = arith.constant 0 : i32
    return %c0_i32, %c0_i32_0 : i32, i32
  }
  func.func @transform_41(%arg0: i32) -> (i32, i32) {
    %c0_i32 = arith.constant 0 : i32
    %c0_i32_0 = arith.constant 0 : i32
    %c0_i32_1 = arith.constant 0 : i32
    return %c0_i32, %c0_i32_0 : i32, i32
  }
  func.func @transform_42(%arg0: i32) -> (i32, i32, i32) {
    %c0_i32 = arith.constant 0 : i32
    %c0_i32_0 = arith.constant 0 : i32
    %c0_i32_1 = arith.constant 0 : i32
    return %arg0, %c0_i32, %c0_i32_0 : i32, i32, i32
  }
}

</mosaic_0001>

<bundles_post_ra>
// kernel: _lambda_.2
= control target key start
LH: loop header
LB: loop body
LE: loop exit
PB: predicated region body
PF: predicated region fallthrough
CT: control target
= control target key end

     0   :  { %s458_s12 = smov 0   ;;  %s485_s0 = inlined_call_operand.vmem [shape: bf16[2,108,256], index: 0, kind: input, shape index: {}]   ;;  %s486_s1 = inlined_call_operand.vmem [shape: bf16[8,108], index: 1, kind: input, shape index: {}]   ;;  %s487_s2 = inlined_call_operand.vmem [shape: f32[8,1], index: 2, kind: input, shape index: {}]   ;;  %s488_s3 = inlined_call_operand.vmem [shape: f32[2,8,256], index: 3, kind: output, shape index: {}]  }
   0x1 LB: > { %s370_s13 = sadd.s32 4294967295, %s435_s12   ;;  %p374_p0 = scmp.ge.s32.totalorder %s435_s12, 1  ;;  %s435_s12 = sphi %s458_s12, %s13_s12  }
   0x2   : > { %p137_p1 = scmp.lt.s32.totalorder %s435_s12, 3 }
   0x4   : > { %p138_p2 = pnand %p374_p0, %p137_p1 }
   0x5   : > { %p161_p3 = scmp.lt.s32.totalorder (!%p138_p2), %s370_s13, 1 }
   0x6   : > { %141 = sbr.rel (%p138_p2) target bundleno = 243 (0xf3), region = 32 }
   0xb   : > { %v437_v0 = vmov 0   ;;  %v187_v1 = vld [vmem:[%s487_s2] sm:$0xff]  ;;  %s490_s13 = smov (!%p161_p3, %s370_s13), 1  ;;  %vm265_vm0 = vcmask 1045504   ;;  %vm261_vm1 = vcmask 883712  }
   0xc   : > { %304 = vmatprep.mubr.bf16.mxu0 %v437_v0  ;;  %407 = vset.pattern.permute.xlu0 %v437_v0  ;;  %s397_s16 = smul.u32 112, %s490_s13  ;;  %v172_v17 = vld [vmem:[%s486_s1] sm:$0xf]  ;;  %s396_s22 = sshll.u32 %s490_s13, 4 }
   0xd   : > { %190 = vperm.xlu0 %407, %v187_v1   ;;  %s170_s25 = scalar_lea.vmem %s488_s3, %s396_s22 }
   0xe   : > { %s165_s19 = scalar_lea.vmem %s485_s0, %s397_s16 }
   0xf   : > { %v408_v2 = vld [vmem:[%s165_s19 + $0x64] ss:$8 sps:$4 sm:$0x3f]   ;;  %v410_v3 = vld [vmem:[%s165_s19 + $0x60] ss:$8 sps:$4 sm:$0x3f]  }
  0x10   : > { %392 = vmatprep.subr.msk.bf16.mxu0 %vm265_vm0, %v408_v2  ;;  %v411_v4 = vld [vmem:[%s165_s19 + $0x54] ss:$8 sps:$4 sm:$0xff]   ;;  %v267_v5 = vsel %vm265_vm0, %v410_v3, 0  ;;  %v413_v6 = vld [vmem:[%s165_s19 + $0x50] ss:$8 sps:$4 sm:$0xff]  }
  0x11   : > { %275 = vmatpush1.bf16.msra.mxu0 %v267_v5  ;;  %v414_v7 = vld [vmem:[%s165_s19 + $0x44] ss:$8 sps:$4 sm:$0xff]   ;;  %v416_v8 = vld [vmem:[%s165_s19 + $0x40] ss:$8 sps:$4 sm:$0xff]   ;;  %v417_v9 = vld [vmem:[%s165_s19 + $0x34] ss:$8 sps:$4 sm:$0xff]  }
  0x12   : > { %276 = vmatprep.subr.bf16.mxu0 %v411_v4  ;;  %v419_v10 = vld [vmem:[%s165_s19 + $0x30] ss:$8 sps:$4 sm:$0xff]   ;;  %v420_v11 = vld [vmem:[%s165_s19 + $0x24] ss:$8 sps:$4 sm:$0xff]   ;;  %v422_v12 = vld [vmem:[%s165_s19 + $0x20] ss:$8 sps:$4 sm:$0xff]  }
  0x13   : > { %v423_v13 = vld [vmem:[%s165_s19 + $0x14] ss:$8 sps:$4 sm:$0xff]   ;;  %v425_v14 = vld [vmem:[%s165_s19 + $0x10] ss:$8 sps:$4 sm:$0xff]   ;;  %v426_v15 = vld [vmem:[%s165_s19 + $0x4] ss:$8 sps:$4 sm:$0xff]  }
  0x14   : > { %v428_v16 = vld [vmem:[%s165_s19] ss:$8 sps:$4 sm:$0xff]  }
  0x15   : > { %277 = vmatpush1.bf16.msra.mxu0 %v413_v6 }
  0x16   : > { %278 = vmatprep.subr.bf16.mxu0 %v414_v7 }
  0x19   : > { %279 = vmatpush1.bf16.msra.mxu0 %v416_v8 }
  0x1a   : > { %280 = vmatprep.subr.bf16.mxu0 %v417_v9 }
  0x1d   : > { %281 = vmatpush1.bf16.msra.mxu0 %v419_v10 }
  0x1e   : > { %282 = vmatprep.subr.bf16.mxu0 %v420_v11 }
  0x21   : > { %283 = vmatpush1.bf16.msra.mxu0 %v422_v12 }
  0x22   : > { %284 = vmatprep.subr.bf16.mxu0 %v423_v13 }
  0x25   : > { %285 = vmatpush1.bf16.msra.mxu0 %v425_v14 }
  0x26   : > { %286 = vmatprep.subr.bf16.mxu0 %v426_v15 }
  0x29   : > { %287 = vmatpush1.bf16.msra.mxu0 %v428_v16 }
  0x2c   : > { %393 = vmatmul.mubr.msk.bf16.vlgmr.msra.gmra.mxu0 %vm261_vm1, %v172_v17 }
  0x88   : > { %v191_v18 = vpop.permute.xlu0 %190 }
  0xec   : > { %v306_v19 = vpop.f32.mrf.mxu0 }
  0xed   : > { %v307_v20 = vadd.f32 %v306_v19, %v191_v18 }
  0xee   : > { %v308_v21 = vpop.f32.mrf.mxu0 }
  0xef   : > { %313 = vst [vmem:[%s170_s25] sm:$0xff] %v307_v20  ;;  %v309_v22 = vadd.f32 %v308_v21, %v191_v18 }
  0xf0   : > { %v310_v23 = vpop.f32.mrf.mxu0 }
  0xf1   : > { %314 = vst [vmem:[%s170_s25 + $0x8] sm:$0xff] %v309_v22 }
  0xf2   : > { %v311_v24 = vpop.f32.mrf.mxu0 }
  0xf3 PF: > { %s13_s12 = sadd.s32 1, %s435_s12  }
  0xf4   : > { %p10_p4 = scmp.ge.s32.totalorder %s13_s12, 4  }
  0xf6   :  { %12 = sbr.rel (!%p10_p4) target bundleno = 1 (0x1), region = 62 }

// kernel: _lambda_.3
= control target key start
LH: loop header
LB: loop body
LE: loop exit
PB: predicated region body
PF: predicated region fallthrough
CT: control target
= control target key end

     0   :  { %s17467_s6 = smov 1   ;;  %s17468_s10 = smov 2   ;;  %s19511_s0 = inlined_call_operand.smem [shape: u32[43], index: -1, kind: input, shape index: {}] }
   0x1   :  { %s17522_s5 = sld [smem:[%s19511_s0]]   ;;  %s17469_s14 = smov 3  }
   0x2   :  { %s17527_s9 = sld [smem:[%s19511_s0 + %s17467_s6]]   ;;  %s17470_s18 = smov 4  }
   0x3   :  { %s17532_s13 = sld [smem:[%s19511_s0 + %s17468_s10]]   ;;  %s17471_s22 = smov 5  }
   0x4   :  { %s17537_s17 = sld [smem:[%s19511_s0 + %s17469_s14]]   ;;  %s17472_s26 = smov 6  }
   0x5   :  { %s17542_s21 = sld [smem:[%s19511_s0 + %s17470_s18]]   ;;  %s17473_s30 = smov 7  }
   0x6   :  { %s17547_s25 = sld [smem:[%s19511_s0 + %s17471_s22]]   ;;  %s17474_s4 = smov 8  }
   0x7   :  { %19533 = sst [smem:[#allocation5_spill]] %s17522_s5  ;;  %s17475_s10 = smov 9  }
   0x8   :  { %19534 = sst [smem:[#allocation6_spill]] %s17527_s9  ;;  %s17476_s15 = smov 10  }
   0x9   :  { %19535 = sst [smem:[#allocation7_spill]] %s17532_s13  ;;  %s17477_s20 = smov 11  }
   0xa   :  { %s17552_s29 = sld [smem:[%s19511_s0 + %s17472_s26]]   ;;  %s17478_s26 = smov 12  }
   0xb   :  { %s17557_s3 = sld [smem:[%s19511_s0 + %s17473_s30]]   ;;  %s17479_s1 = smov 13  }
   0xc   :  { %s17562_s8 = sld [smem:[%s19511_s0 + %s17474_s4]]   ;;  %s17480_s7 = smov 14  }
   0xd   :  { %s17567_s14 = sld [smem:[%s19511_s0 + %s17475_s10]]   ;;  %s17482_s22 = smov 16  }
   0xe   :  { %s17572_s19 = sld [smem:[%s19511_s0 + %s17476_s15]]   ;;  %s17481_s15 = smov 15  }
   0xf   :  { %s17577_s24 = sld [smem:[%s19511_s0 + %s17477_s20]]   ;;  %s17483_s28 = smov 17  }
  0x10   :  { %s17582_s30 = sld [smem:[%s19511_s0 + %s17478_s26]]  }
  0x11   :  { %19536 = sst [smem:[#allocation8_spill]] %s17557_s3 }
  0x12   :  { %19537 = sst [smem:[#allocation9_spill]] %s17562_s8 }
  0x13   :  { %s17587_s6 = sld [smem:[%s19511_s0 + %s17479_s1]]  }
  0x14   :  { %s17592_s12 = sld [smem:[%s19511_s0 + %s17480_s7]]   ;;  %s17484_s7 = smov 18  }
  0x15   :  { %s17597_s20 = sld [smem:[%s19511_s0 + %s17481_s15]]   ;;  %s17485_s15 = smov 19  }
  0x16   :  { %19538 = sst [smem:[#allocation10_spill]] %s17582_s30 }
  0x17   :  { %s17602_s27 = sld [smem:[%s19511_s0 + %s17482_s22]]   ;;  %s17486_s22 = smov 20  }
  0x18   :  { %s17607_s4 = sld [smem:[%s19511_s0 + %s17483_s28]]   ;;  %s17487_s28 = smov 21  }
  0x19   :  { %19539 = sst [smem:[#allocation11_spill]] %s17587_s6 }
  0x1a   :  { %19540 = sst [smem:[#allocation12_spill]] %s17592_s12 }
  0x1b   :  { %19541 = sst [smem:[#allocation13_spill]] %s17597_s20 }
  0x1c   :  { %s17612_s12 = sld [smem:[%s19511_s0 + %s17484_s7]]   ;;  %s17488_s7 = smov 22  }
  0x1d   :  { %19542 = sst [smem:[#allocation14_spill]] %s17602_s27 }
  0x1e   :  { %19543 = sst [smem:[#allocation15_spill]] %s17607_s4 }
  0x1f   :  { %s17617_s20 = sld [smem:[%s19511_s0 + %s17485_s15]]   ;;  %s17489_s15 = smov 23  }
  0x20   :  { %s17622_s27 = sld [smem:[%s19511_s0 + %s17486_s22]]   ;;  %s17490_s22 = smov 24  }
  0x21   :  { %s17627_s30 = sld [smem:[%s19511_s0 + %s17487_s28]]   ;;  %s17491_s28 = smov 25  }
  0x22   :  { %19544 = sst [smem:[#allocation16_spill]] %s17612_s12 }
  0x23   :  { %s17632_s12 = sld [smem:[%s19511_s0 + %s17488_s7]]   ;;  %s17492_s7 = smov 26  }
  0x25   :  { %19545 = sst [smem:[#allocation17_spill]] %s17617_s20 }
  0x26   :  { %19546 = sst [smem:[#allocation18_spill]] %s17622_s27 }
  0x27   :  { %19547 = sst [smem:[#allocation19_spill]] %s17627_s30 }
  0x28   :  { %s17637_s20 = sld [smem:[%s19511_s0 + %s17489_s15]]   ;;  %s17493_s15 = smov 27  }
  0x29   :  { %19548 = sst [smem:[#allocation20_spill]] %s17632_s12 }
  0x2a   :  { %s17642_s27 = sld [smem:[%s19511_s0 + %s17490_s22]]   ;;  %s17494_s22 = smov 28  }
  0x2b   :  { %s17647_s30 = sld [smem:[%s19511_s0 + %s17491_s28]]   ;;  %s17495_s28 = smov 29  }
  0x2c   :  { %s17652_s12 = sld [smem:[%s19511_s0 + %s17492_s7]]   ;;  %s17496_s7 = smov 30  }
  0x2e   :  { %19549 = sst [smem:[#allocation21_spill]] %s17637_s20 }
  0x2f   :  { %s17657_s20 = sld [smem:[%s19511_s0 + %s17493_s15]]   ;;  %s17497_s15 = smov 31  }
  0x30   :  { %19550 = sst [smem:[#allocation22_spill]] %s17642_s27 }
  0x31   :  { %19551 = sst [smem:[#allocation23_spill]] %s17647_s30 }
  0x32   :  { %19552 = sst [smem:[#allocation24_spill]] %s17652_s12 }
  0x33   :  { %s17662_s27 = sld [smem:[%s19511_s0 + %s17494_s22]]   ;;  %s17498_s22 = smov 32  }
  0x34   :  { %s17667_s30 = sld [smem:[%s19511_s0 + %s17495_s28]]   ;;  %s17499_s28 = smov 33  }
  0x35   :  { %19553 = sst [smem:[#allocation25_spill]] %s17657_s20 }
  0x36   :  { %s17672_s12 = sld [smem:[%s19511_s0 + %s17496_s7]]   ;;  %s17500_s7 = smov 34  }
  0x37   :  { %s17677_s20 = sld [smem:[%s19511_s0 + %s17497_s15]]   ;;  %s17501_s15 = smov 35  }
  0x39   :  { %19554 = sst [smem:[#allocation26_spill]] %s17662_s27 }
  0x3a   :  { %19555 = sst [smem:[#allocation27_spill]] %s17667_s30 }
  0x3b   :  { %s17682_s27 = sld [smem:[%s19511_s0 + %s17498_s22]]   ;;  %s17502_s22 = smov 36  }
  0x3c   :  { %19556 = sst [smem:[#allocation28_spill]] %s17672_s12 }
  0x3d   :  { %19557 = sst [smem:[#allocation29_spill]] %s17677_s20 }
  0x3e   :  { %s17687_s30 = sld [smem:[%s19511_s0 + %s17499_s28]]   ;;  %s17503_s28 = smov 37  }
  0x3f   :  { %s17692_s12 = sld [smem:[%s19511_s0 + %s17500_s7]]   ;;  %s17504_s7 = smov 38  }
  0x40   :  { %s17697_s20 = sld [smem:[%s19511_s0 + %s17501_s15]]   ;;  %s17505_s15 = smov 39  }
  0x41   :  { %19558 = sst [smem:[#allocation30_spill]] %s17682_s27 }
  0x42   :  { %s17702_s27 = sld [smem:[%s19511_s0 + %s17502_s22]]   ;;  %s17506_s22 = smov 40  }
  0x44   :  { %19559 = sst [smem:[#allocation31_spill]] %s17687_s30 }
  0x45   :  { %19560 = sst [smem:[#allocation32_spill]] %s17692_s12 }
  0x46   :  { %19561 = sst [smem:[#allocation33_spill]] %s17697_s20 }
  0x47   :  { %s17707_s30 = sld [smem:[%s19511_s0 + %s17503_s28]]   ;;  %s17507_s28 = smov 41  }
  0x48   :  { %19562 = sst [smem:[#allocation34_spill]] %s17702_s27 }
  0x49   :  { %s17712_s12 = sld [smem:[%s19511_s0 + %s17504_s7]]   ;;  %s17508_s7 = smov 42  }
  0x4a   :  { %s17717_s20 = sld [smem:[%s19511_s0 + %s17505_s15]]  }
  0x4b   :  { %s17722_s27 = sld [smem:[%s19511_s0 + %s17506_s22]]  }
  0x4d   :  { %19563 = sst [smem:[#allocation35_spill]] %s17707_s30 }
  0x4e   :  { %s17727_s30 = sld [smem:[%s19511_s0 + %s17507_s28]]  }
  0x4f   :  { %19564 = sst [smem:[#allocation36_spill]] %s17712_s12 }
  0x50   :  { %s17732_s12 = sld [smem:[%s19511_s0 + %s17508_s7]]  }
  0x51   :  { %90 = vsyncpa [#allocation3], 0 }
  0x52   :  { %92 = vsyncpa [#allocation3 + $0x1], 0  ;;  %s17734_s15 = smov 0   ;;  %s17736_s16 = smov 0  }
  0x53   :  { %s17738_s18 = smov 0   ;;  %s17740_s22 = smov 0  }
  0x54 LB: > { %s19565_s6 = sld [smem:[#allocation11_spill]]  ;;  %s17755_s0 = sadd.s32 4294967295, %s17465_s22   ;;  %s17461_s18 = sphi %s17738_s18, %s19601_s18   ;;  %s17457_s16 = sphi %s17736_s16, %s19600_s16   ;;  %s17453_s15 = sphi %s17734_s15, %s19599_s15   ;;  %s17465_s22 = sphi %s17740_s22, %s19602_s22  }
  0x55   : > { %s19566_s4 = sld [smem:[#allocation15_spill]]  ;;  %s13720_s23 = sadd.s32 4294967294, %s17465_s22  }
  0x56   : > { %s19567_s3 = sld [smem:[#allocation8_spill]]  ;;  %s17759_s26 = sadd.s32 1, %s17465_s22  }
  0x57   : > { %s997_s28 = sadd.s32 1, %s17461_s18  ;;  %s994_s1 = ssub.s32 %s17465_s22, %s17759_s26 }
  0x58   : > { %p1007_p0 = scmp.ne.s32.totalorder %s17461_s18, %s17457_s16  ;;  %p995_p1 = scmp.eq.s32.totalorder %s994_s1, 0 }
  0x59   : > { %p1008_p2 = scmp.eq.s32.totalorder %s17755_s0, 1  ;;  %p1013_p3 = scmp.ne.s32.totalorder %s17457_s16, %s17453_s15 }
  0x5a   : > { %p1014_p4 = scmp.eq.s32.totalorder %s13720_s23, 1  ;;  %p13723_p7 = scmp.ge.s32.totalorder %s17465_s22, 1 }
  0x5b   : > { %s17770_s2 = scalar_select %p995_p1, %s17461_s18, %s997_s28  }
  0x5c   : > { %p17772_p5 = por %p1008_p2, %p1007_p0  ;;  %p17776_p6 = por %p1014_p4, %p1013_p3 }
  0x5d   : > { %p1168_p8 = scmp.lt.s32.totalorder %s17465_s22, 3 }
  0x5f   : > { %p1169_p9 = pnand %p13723_p7, %p1168_p8 }
  0x60   : > { %s19570_s5 = sld [smem:[#allocation5_spill]] (!%p1169_p9)  ;;  %p1274_p10 = scmp.lt.s32.totalorder (!%p1169_p9), %s17755_s0, 1 }
  0x61   : > { %1172 = sbr.rel (%p1169_p9) target bundleno = 5817 (0x16b9), region = 188  ;;  %s19571_s13 = sld [smem:[#allocation7_spill]] (!%p1169_p9) }
  0x62   : > { %s19572_s9 = sld [smem:[#allocation6_spill]] (!%p1169_p9) }
  0x63   : > { %s19573_s8 = sld [smem:[#allocation9_spill]] (!%p1169_p9) }
  0x66   : > { %s17784_s11 = scalar_select %p1274_p10, %s17755_s0, 1  ;;  %v16001_v3 = vld [vmem:[%s17542_s21 + $0x78] sm:$0xff]   ;;  %v16005_v7 = vld [vmem:[%s17542_s21 + $0x70] sm:$0xff]   ;;  %v16009_v18 = vld [vmem:[%s17542_s21 + $0x68] sm:$0xff]   ;;  %v3079_v47 = vlaneseq  ;;  %vm17510_vm0 = vmmov 0   ;;  %vm4746_vm1 = vcmask 261120  }
  0x67   : > { %v16002_v4 = vld [vmem:[%s17542_s21 + $0xf8] sm:$0xff]   ;;  %v16006_v8 = vld [vmem:[%s17542_s21 + $0xf0] sm:$0xff]   ;;  %14862 = vmatprep.subr.bf16.mxu0 %v16001_v3  ;;  %v16010_v19 = vld [vmem:[%s17542_s21 + $0xe8] sm:$0xff]   ;;  %vm4991_vm2 = vcmask 1043456   ;;  %vm4935_vm3 = vcmask 64512   ;;  %vm10082_vm8 = vcmask 1041408  }
  0x68   : > { %s14860_s23 = sshll.u32 %s17784_s11, 4  ;;  %v16003_v5 = vld [vmem:[%s17542_s21 + $0x38] sm:$0xff]   ;;  %14884 = vmatprep.subr.bf16.mxu1 %v16002_v4  ;;  %v16007_v9 = vld [vmem:[%s17542_s21 + $0x30] sm:$0xff]   ;;  %v16011_v20 = vld [vmem:[%s17542_s21 + $0x28] sm:$0xff]   ;;  %v17836_v48 = vshrl.u32 %v3079_v47, 7  ;;  %s19574_s11 = sld [smem:[#allocation10_spill]] }
  0x69   : > { %s17790_s28 = scalar_lea.vmem %s19570_s5, %s14860_s23  ;;  %v16004_v6 = vld [vmem:[%s17542_s21 + $0xb8] sm:$0xff]   ;;  %14863 = vmatpush3.bf16.msra.mxu0 %v16003_v5  ;;  %v16008_v10 = vld [vmem:[%s17542_s21 + $0xb0] sm:$0xff]   ;;  %v16012_v21 = vld [vmem:[%s17542_s21 + $0xa8] sm:$0xff]   ;;  %s18121_s1 = scalar_lea.vmem %s19572_s9, %s14860_s23  ;;  %vm10025_vm9 = vcmask 27648   ;;  %vm10078_vm10 = vcmask 31744   ;;  %vm13138_vm15 = vcmask 1040384  }
  0x6a   : > { %v3059_v0 = vld [vmem:[%s17790_s28] sm:$0xff]  ;;  %v3060_v1 = vld [vmem:[%s17790_s28 + $0x8] sm:$0xff]  ;;  %14885 = vmatpush3.bf16.msra.mxu1 %v16004_v6  ;;  %14864 = vmatprep.subr.bf16.mxu0 %v16005_v7  ;;  %v16017_v26 = vld [vmem:[%s17542_s21 + $0x58] sm:$0xff]   ;;  %v17839_v49 = vsub.s32 0, %v17836_v48  ;;  %v17842_v50 = vsub.s32 1, %v17836_v48  ;;  %s19575_s23 = sld [smem:[#allocation13_spill]] }
  0x6b   : > { %v3061_v2 = vadd.f32 %v3060_v1, %v3059_v0  ;;  %14886 = vmatprep.subr.bf16.mxu1 %v16006_v8  ;;  %v16013_v22 = vld [vmem:[%s17542_s21 + $0x60] sm:$0xff]   ;;  %v16018_v27 = vld [vmem:[%s17542_s21 + $0xd8] sm:$0xff]   ;;  %v16021_v30 = vld [vmem:[%s17542_s21 + $0x50] sm:$0xff]   ;;  %s19596_s5 = sld [smem:[#allocation36_spill]] }
  0x6c   : > { %v16014_v23 = vld [vmem:[%s17542_s21 + $0xe0] sm:$0xff]   ;;  %v16019_v28 = vld [vmem:[%s17542_s21 + $0x18] sm:$0xff]   ;;  %v16022_v31 = vld [vmem:[%s17542_s21 + $0xd0] sm:$0xff]  }
  0x6d   : > { %3062 = vadd.xlane.f32.xlu0 %v3061_v2  ;;  %14865 = vmatpush3.bf16.msra.mxu0 %v16007_v9  ;;  %v16015_v24 = vld [vmem:[%s17542_s21 + $0x20] sm:$0xff]   ;;  %v16020_v29 = vld [vmem:[%s17542_s21 + $0x98] sm:$0xff]   ;;  %v16023_v32 = vld [vmem:[%s17542_s21 + $0x10] sm:$0xff]  }
  0x6e   : > { %14887 = vmatpush3.bf16.msra.mxu1 %v16008_v10  ;;  %14866 = vmatprep.subr.bf16.mxu0 %v16009_v18  ;;  %v16016_v25 = vld [vmem:[%s17542_s21 + $0xa0] sm:$0xff]   ;;  %v16024_v33 = vld [vmem:[%s17542_s21 + $0x90] sm:$0xff]   ;;  %v16025_v34 = vld [vmem:[%s17542_s21 + $0x48] sm:$0xff]  }
  0x6f   : > { %14888 = vmatprep.subr.bf16.mxu1 %v16010_v19  ;;  %v16026_v35 = vld [vmem:[%s17542_s21 + $0xc8] sm:$0xff]   ;;  %v16029_v38 = vld [vmem:[%s17542_s21 + $0x40] sm:$0xff]   ;;  %v16033_v42 = vld [vmem:[%s17542_s21 + $0x178] sm:$0xff]  }
  0x70   : > { %v16027_v36 = vld [vmem:[%s17542_s21 + $0x8] sm:$0xff]   ;;  %v16030_v39 = vld [vmem:[%s17542_s21 + $0xc0] sm:$0xff]   ;;  %v16034_v43 = vld [vmem:[%s17542_s21 + $0x1f8] sm:$0xff]  }
  0x71   : > { %14867 = vmatpush3.bf16.msra.mxu0 %v16011_v20  ;;  %v16028_v37 = vld [vmem:[%s17542_s21 + $0x88] sm:$0xff]   ;;  %v16031_v40 = vld [vmem:[%s17542_s21] sm:$0xff]   ;;  %v16037_v4 = vld [vmem:[%s17542_s21 + $0x170] sm:$0xff]  }
  0x72   : > { %14889 = vmatpush3.bf16.msra.mxu1 %v16012_v21  ;;  %14868 = vmatprep.subr.bf16.mxu0 %v16013_v22  ;;  %v16032_v41 = vld [vmem:[%s17542_s21 + $0x80] sm:$0xff]   ;;  %v16038_v5 = vld [vmem:[%s17542_s21 + $0x1f0] sm:$0xff]   ;;  %v16041_v8 = vld [vmem:[%s17542_s21 + $0x168] sm:$0xff]  }
  0x73   : > { %14890 = vmatprep.subr.bf16.mxu1 %v16014_v23  ;;  %v1285_v51 = vld [vmem:[%s19571_s13] sm:$0x3]  ;;  %v16039_v6 = vld [vmem:[%s17542_s21 + $0x130] sm:$0xff]   ;;  %v16042_v9 = vld [vmem:[%s17542_s21 + $0x1e8] sm:$0xff]  }
  0x74   : > { %v1286_v52 = vld [vmem:[%s17537_s17] sm:$0x3]  ;;  %v3082_v53 = vrot.slane %v1285_v51, %v17839_v49  ;;  %v3086_v54 = vrot.slane %v1285_v51, %v17842_v50  ;;  %v16040_v7 = vld [vmem:[%s17542_s21 + $0x1b0] sm:$0xff]   ;;  %v16043_v10 = vld [vmem:[%s17542_s21 + $0x128] sm:$0xff]  }
  0x75   : > { %14869 = vmatpush3.bf16.msra.mxu0 %v16015_v24  ;;  %v3095_v56 = vrot.slane %v1286_v52, %v17839_v49  ;;  %v3099_v57 = vrot.slane %v1286_v52, %v17842_v50  ;;  %v16051_v18 = vld [vmem:[%s17542_s21 + $0x118] sm:$0xff]   ;;  %v16053_v20 = vld [vmem:[%s17542_s21 + $0x150] sm:$0xff]   ;;  %v16057_v24 = vld [vmem:[%s17542_s21 + $0x148] sm:$0xff]  }
  0x76   : > { %14891 = vmatpush3.bf16.msra.mxu1 %v16016_v25  ;;  %14870 = vmatprep.subr.bf16.mxu0 %v16017_v26  ;;  %v16052_v19 = vld [vmem:[%s17542_s21 + $0x198] sm:$0xff]   ;;  %v16054_v21 = vld [vmem:[%s17542_s21 + $0x1d0] sm:$0xff]   ;;  %v16058_v25 = vld [vmem:[%s17542_s21 + $0x1c8] sm:$0xff]  }
  0x77   : > { %14892 = vmatprep.subr.bf16.mxu1 %v16018_v27  ;;  %v16055_v22 = vld [vmem:[%s17542_s21 + $0x110] sm:$0xff]   ;;  %v16059_v26 = vld [vmem:[%s17542_s21 + $0x108] sm:$0xff]   ;;  %v16080_v47 = vld [vmem:[%s17547_s25 + $0xa0] sm:$0xff]  }
  0x78   : > { %v16056_v23 = vld [vmem:[%s17542_s21 + $0x190] sm:$0xff]   ;;  %v16060_v27 = vld [vmem:[%s17542_s21 + $0x188] sm:$0xff]   ;;  %v16081_v51 = vld [vmem:[%s17547_s25 + $0x58] sm:$0xff]  }
  0x79   : > { %14871 = vmatpush3.bf16.msra.mxu0 %v16019_v28  ;;  %v16061_v28 = vld [vmem:[%s17542_s21 + $0x140] sm:$0xff]   ;;  %v16082_v52 = vld [vmem:[%s17547_s25 + $0xd8] sm:$0xff]  }
  0x7a   : > { %14893 = vmatpush3.bf16.msra.mxu1 %v16020_v29  ;;  %14872 = vmatprep.subr.bf16.mxu0 %v16021_v30  ;;  %v16062_v29 = vld [vmem:[%s17542_s21 + $0x1c0] sm:$0xff]  }
  0x7b   : > { %14894 = vmatprep.subr.bf16.mxu1 %v16022_v31  ;;  %v16063_v30 = vld [vmem:[%s17542_s21 + $0x100] sm:$0xff]  }
  0x7c   : > { %v16064_v31 = vld [vmem:[%s17542_s21 + $0x180] sm:$0xff]  }
  0x7d   : > { %14873 = vmatpush3.bf16.msra.mxu0 %v16023_v32  ;;  %v16065_v32 = vld [vmem:[%s17547_s25 + $0x78] sm:$0xff]  }
  0x7e   : > { %14895 = vmatpush3.bf16.msra.mxu1 %v16024_v33  ;;  %14874 = vmatprep.subr.bf16.mxu0 %v16025_v34  ;;  %v16066_v33 = vld [vmem:[%s17547_s25 + $0xf8] sm:$0xff]  }
  0x7f   : > { %14896 = vmatprep.subr.bf16.mxu1 %v16026_v35  ;;  %v16067_v34 = vld [vmem:[%s17547_s25 + $0x38] sm:$0xff]  }
  0x80   : > { %v16068_v35 = vld [vmem:[%s17547_s25 + $0xb8] sm:$0xff]  }
  0x81   : > { %14875 = vmatpush3.bf16.msra.mxu0 %v16027_v36  ;;  %v16069_v36 = vld [vmem:[%s17547_s25 + $0x70] sm:$0xff]  }
  0x82   : > { %14897 = vmatpush3.bf16.msra.mxu1 %v16028_v37  ;;  %14876 = vmatprep.subr.bf16.mxu0 %v16029_v38  ;;  %v16070_v37 = vld [vmem:[%s17547_s25 + $0xf0] sm:$0xff]  }
  0x83   : > { %14898 = vmatprep.subr.bf16.mxu1 %v16030_v39  ;;  %v16071_v38 = vld [vmem:[%s17547_s25 + $0x30] sm:$0xff]  }
  0x84   : > { %v16072_v39 = vld [vmem:[%s17547_s25 + $0xb0] sm:$0xff]  }
  0x85   : > { %14877 = vmatpush3.bf16.msra.mxu0 %v16031_v40  ;;  %v16073_v40 = vld [vmem:[%s17547_s25 + $0x68] sm:$0xff]  }
  0x86   : > { %14899 = vmatpush3.bf16.msra.mxu1 %v16032_v41  ;;  %14906 = vmatprep.subr.bf16.mxu0 %v16033_v42  ;;  %v16074_v41 = vld [vmem:[%s17547_s25 + $0xe8] sm:$0xff]  }
  0x87   : > { %14928 = vmatprep.subr.bf16.mxu1 %v16034_v43  ;;  %v16075_v42 = vld [vmem:[%s17547_s25 + $0x28] sm:$0xff]  }
  0x88   : > { %v16076_v43 = vld [vmem:[%s17547_s25 + $0xa8] sm:$0xff]  }
  0xf6   : > { %v3063_v11 = vpop.xlane.xlu0 %3062 }
  0xf7   : > { %v3065_v12 = vmul.f32 0.00390625, %v3063_v11  ;;  %v16044_v11 = vld [vmem:[%s17542_s21 + $0x1a8] sm:$0xff]  }
  0xf9   : > { %v17802_v13 = vsub.f32 %v3059_v0, %v3065_v12  ;;  %v17804_v14 = vsub.f32 %v3060_v1, %v3065_v12  ;;  %v16035_v0 = vld [vmem:[%s17542_s21 + $0x138] sm:$0xff]   ;;  %v16045_v12 = vld [vmem:[%s17542_s21 + $0x160] sm:$0xff]  }
  0xfa   : > { %v16036_v1 = vld [vmem:[%s17542_s21 + $0x1b8] sm:$0xff]  }
  0xfb   : > { %v3068_v15 = vmul.f32 %v17802_v13, %v17802_v13  ;;  %v3069_v16 = vmul.f32 %v17804_v14, %v17804_v14 }
  0xfd   : > { %v3070_v17 = vadd.f32 %v3069_v16, %v3068_v15  ;;  %v16048_v15 = vld [vmem:[%s17542_s21 + $0x1a0] sm:$0xff]   ;;  %v16049_v16 = vld [vmem:[%s17542_s21 + $0x158] sm:$0xff]  }
  0xff   : > { %3071 = vadd.xlane.f32.xlu0 %v3070_v17  ;;  %v16050_v17 = vld [vmem:[%s17542_s21 + $0x1d8] sm:$0xff]  }
 0x188   : > { %v3072_v44 = vpop.xlane.xlu0 %3071 }
 0x189   : > { %v3073_v45 = vmul.f32 0.00390625, %v3072_v44  ;;  %v16077_v44 = vld [vmem:[%s17547_s25 + $0x60] sm:$0xff]  }
 0x18b   : > { %v3074_v46 = vadd.f32 1e-05, %v3073_v45  ;;  %v16078_v45 = vld [vmem:[%s17547_s25 + $0xe0] sm:$0xff]  }
 0x18d   : > { %17327 = vrsqrt.f32 %v3074_v46  ;;  %v16079_v46 = vld [vmem:[%s17547_s25 + $0x20] sm:$0xff]  }
 0x19a   : > { %v17328_v55 = vpop.eup %17327 }
 0x19b   : > { %v3076_v58 = vmul.f32 %v17328_v55, %v17802_v13  ;;  %v3077_v59 = vmul.f32 %v17328_v55, %v17804_v14  ;;  %v16046_v13 = vld [vmem:[%s17542_s21 + $0x1e0] sm:$0xff]   ;;  %v16085_v55 = vld [vmem:[%s17547_s25 + $0x50] sm:$0xff]  }
 0x19c   : > { %v16047_v14 = vld [vmem:[%s17542_s21 + $0x120] sm:$0xff]  }
 0x19d   : > { %v3089_v60 = vmul.f32 %v3082_v53, %v3076_v58  ;;  %v3090_v61 = vmul.f32 %v3086_v54, %v3077_v59  ;;  %v16083_v53 = vld [vmem:[%s17547_s25 + $0x18] sm:$0xff]   ;;  %v16088_v58 = vld [vmem:[%s17547_s25 + $0x90] sm:$0xff]   ;;  %v16089_v59 = vld [vmem:[%s17547_s25 + $0x48] sm:$0xff]  }
 0x19e   : > { %v16084_v54 = vld [vmem:[%s17547_s25 + $0x98] sm:$0xff]  }
 0x19f   : > { %v3102_v62 = vadd.f32 %v3095_v56, %v3089_v60  ;;  %v3103_v63 = vadd.f32 %v3099_v57, %v3090_v61  ;;  %v16086_v56 = vld [vmem:[%s17547_s25 + $0xd0] sm:$0xff]   ;;  %v16090_v60 = vld [vmem:[%s17547_s25 + $0xc8] sm:$0xff]  }
 0x1a0   : > { %v16087_v57 = vld [vmem:[%s17547_s25 + $0x10] sm:$0xff]   ;;  %v16091_v61 = vld [vmem:[%s17547_s25 + $0x8] sm:$0xff]  }
 0x1a1   : > { %v17854_v2 = vpack.c.bf16 %v3102_v62, %v3102_v62  ;;  %v17856_v3 = vpack.c.bf16 %v3103_v63, %v3103_v63  ;;  %v16092_v62 = vld [vmem:[%s17547_s25 + $0x88] sm:$0xff]   ;;  %v16093_v63 = vld [vmem:[%s17547_s25 + $0x40] sm:$0xff]  }
 0x1a3   : > { %3234 = vmatprep.mubr.bf16.mxu0 %v17856_v3  ;;  %3370 = vmatprep.mubr.bf16.mxu1 %v17856_v3 }
 0x1a4   : > { %3235 = vmatmul.mubr.bf16.vlgmr.msra.gmra.mxu0 %v17854_v2  ;;  %3371 = vmatmul.mubr.bf16.vlgmr.msra.gmra.mxu1 %v17854_v2 }
 0x1a5   : > { %14907 = vmatpush3.bf16.msra.mxu0 %v16035_v0  ;;  %14929 = vmatpush3.bf16.msra.mxu1 %v16036_v1  ;;  %v16094_v0 = vld [vmem:[%s17547_s25 + $0xc0] sm:$0xff]  }
 0x1a6   : > { %3506 = vmatprep.mubr.bf16.mxu0 %v17856_v3  ;;  %3642 = vmatprep.mubr.bf16.mxu1 %v17856_v3  ;;  %v16095_v1 = vld [vmem:[%s17547_s25] sm:$0xff]  }
 0x1a7   : > { %14908 = vmatprep.subr.bf16.mxu0 %v16037_v4  ;;  %14930 = vmatprep.subr.bf16.mxu1 %v16038_v5  ;;  %v16096_v4 = vld [vmem:[%s17547_s25 + $0x80] sm:$0xff]   ;;  %v16097_v5 = vld [vmem:[%s17547_s25 + $0x178] sm:$0xff]  }
 0x1a9   : > { %14909 = vmatpush3.bf16.msra.mxu0 %v16039_v6  ;;  %14931 = vmatpush3.bf16.msra.mxu1 %v16040_v7  ;;  %v16098_v6 = vld [vmem:[%s17547_s25 + $0x1f8] sm:$0xff]  }
 0x1aa   : > { %14910 = vmatprep.subr.bf16.mxu0 %v16041_v8  ;;  %14932 = vmatprep.subr.bf16.mxu1 %v16042_v9  ;;  %v16099_v7 = vld [vmem:[%s17547_s25 + $0x138] sm:$0xff]   ;;  %v16101_v9 = vld [vmem:[%s17547_s25 + $0x170] sm:$0xff]  }
 0x1ab   : > { %v16100_v8 = vld [vmem:[%s17547_s25 + $0x1b8] sm:$0xff]  }
 0x1ad   : > { %14911 = vmatpush3.bf16.msra.mxu0 %v16043_v10  ;;  %14933 = vmatpush3.bf16.msra.mxu1 %v16044_v11  ;;  %v16102_v10 = vld [vmem:[%s17547_s25 + $0x1f0] sm:$0xff]  }
 0x1ae   : > { %14912 = vmatprep.subr.bf16.mxu0 %v16045_v12  ;;  %14934 = vmatprep.subr.bf16.mxu1 %v16046_v13  ;;  %v16103_v11 = vld [vmem:[%s17547_s25 + $0x130] sm:$0xff]   ;;  %v16105_v13 = vld [vmem:[%s17547_s25 + $0x168] sm:$0xff]  }
 0x1af   : > { %v16104_v12 = vld [vmem:[%s17547_s25 + $0x1b0] sm:$0xff]  }
 0x1b1   : > { %14913 = vmatpush3.bf16.msra.mxu0 %v16047_v14  ;;  %14935 = vmatpush3.bf16.msra.mxu1 %v16048_v15  ;;  %v16106_v14 = vld [vmem:[%s17547_s25 + $0x1e8] sm:$0xff]  }
 0x1b2   : > { %14914 = vmatprep.subr.bf16.mxu0 %v16049_v16  ;;  %14936 = vmatprep.subr.bf16.mxu1 %v16050_v17  ;;  %v16107_v15 = vld [vmem:[%s17547_s25 + $0x128] sm:$0xff]   ;;  %v16109_v17 = vld [vmem:[%s17547_s25 + $0x160] sm:$0xff]  }
 0x1b3   : > { %v16108_v16 = vld [vmem:[%s17547_s25 + $0x1a8] sm:$0xff]  }
 0x1b5   : > { %14915 = vmatpush3.bf16.msra.mxu0 %v16051_v18  ;;  %14937 = vmatpush3.bf16.msra.mxu1 %v16052_v19  ;;  %v16110_v18 = vld [vmem:[%s17547_s25 + $0x1e0] sm:$0xff]  }
 0x1b6   : > { %14916 = vmatprep.subr.bf16.mxu0 %v16053_v20  ;;  %14938 = vmatprep.subr.bf16.mxu1 %v16054_v21  ;;  %v16111_v19 = vld [vmem:[%s17547_s25 + $0x120] sm:$0xff]   ;;  %v16113_v21 = vld [vmem:[%s17547_s25 + $0x158] sm:$0xff]  }
 0x1b7   : > { %v16112_v20 = vld [vmem:[%s17547_s25 + $0x1a0] sm:$0xff]  }
 0x1b9   : > { %14917 = vmatpush3.bf16.msra.mxu0 %v16055_v22  ;;  %14939 = vmatpush3.bf16.msra.mxu1 %v16056_v23  ;;  %v16114_v22 = vld [vmem:[%s17547_s25 + $0x1d8] sm:$0xff]  }
 0x1ba   : > { %14918 = vmatprep.subr.bf16.mxu0 %v16057_v24  ;;  %14940 = vmatprep.subr.bf16.mxu1 %v16058_v25  ;;  %v16115_v23 = vld [vmem:[%s17547_s25 + $0x118] sm:$0xff]   ;;  %v16117_v25 = vld [vmem:[%s17547_s25 + $0x150] sm:$0xff]  }
 0x1bb   : > { %v16116_v24 = vld [vmem:[%s17547_s25 + $0x198] sm:$0xff]  }
 0x1bd   : > { %14919 = vmatpush3.bf16.msra.mxu0 %v16059_v26  ;;  %14941 = vmatpush3.bf16.msra.mxu1 %v16060_v27  ;;  %v16118_v26 = vld [vmem:[%s17547_s25 + $0x1d0] sm:$0xff]  }
 0x1be   : > { %14920 = vmatprep.subr.bf16.mxu0 %v16061_v28  ;;  %14942 = vmatprep.subr.bf16.mxu1 %v16062_v29  ;;  %v16119_v27 = vld [vmem:[%s17547_s25 + $0x110] sm:$0xff]   ;;  %v16121_v29 = vld [vmem:[%s17547_s25 + $0x148] sm:$0xff]  }
 0x1bf   : > { %v16120_v28 = vld [vmem:[%s17547_s25 + $0x190] sm:$0xff]  }
 0x1c1   : > { %14921 = vmatpush3.bf16.msra.mxu0 %v16063_v30  ;;  %14943 = vmatpush3.bf16.msra.mxu1 %v16064_v31  ;;  %v16122_v30 = vld [vmem:[%s17547_s25 + $0x1c8] sm:$0xff]  }
 0x1c2   : > { %14950 = vmatprep.subr.bf16.mxu0 %v16065_v32  ;;  %14972 = vmatprep.subr.bf16.mxu1 %v16066_v33  ;;  %v16123_v31 = vld [vmem:[%s17547_s25 + $0x108] sm:$0xff]   ;;  %v16125_v33 = vld [vmem:[%s17547_s25 + $0x140] sm:$0xff]  }
 0x1c3   : > { %v16124_v32 = vld [vmem:[%s17547_s25 + $0x188] sm:$0xff]  }
 0x1c4   : > { %3507 = vmatmul.mubr.bf16.vlgmr.msra.gmra.mxu0 %v17854_v2  ;;  %3643 = vmatmul.mubr.bf16.vlgmr.msra.gmra.mxu1 %v17854_v2 }
 0x1c5   : > { %14951 = vmatpush3.bf16.msra.mxu0 %v16067_v34  ;;  %3778 = vmatprep.mubr.bf16.mxu0 %v17856_v3  ;;  %v16126_v34 = vld [vmem:[%s17547_s25 + $0x1c0] sm:$0xff]  }
 0x1c6   : > { %14973 = vmatpush3.bf16.msra.mxu1 %v16068_v35  ;;  %3914 = vmatprep.mubr.bf16.mxu1 %v17856_v3  ;;  %v16127_v35 = vld [vmem:[%s17547_s25 + $0x100] sm:$0xff]  }
 0x1c7   : > { %14952 = vmatprep.subr.bf16.mxu0 %v16069_v36  ;;  %14974 = vmatprep.subr.bf16.mxu1 %v16070_v37  ;;  %v16128_v36 = vld [vmem:[%s17547_s25 + $0x180] sm:$0xff]   ;;  %v16129_v37 = vld [vmem:[%s17552_s29 + $0x78] sm:$0xff]  }
 0x1c9   : > { %14953 = vmatpush3.bf16.msra.mxu0 %v16071_v38  ;;  %v16130_v38 = vld [vmem:[%s17552_s29 + $0xf8] sm:$0xff]  }
 0x1ca   : > { %14975 = vmatpush3.bf16.msra.mxu1 %v16072_v39  ;;  %14954 = vmatprep.subr.bf16.mxu0 %v16073_v40  ;;  %v16131_v39 = vld [vmem:[%s17552_s29 + $0x38] sm:$0xff]  }
 0x1cb   : > { %14976 = vmatprep.subr.bf16.mxu1 %v16074_v41  ;;  %v16132_v40 = vld [vmem:[%s17552_s29 + $0xb8] sm:$0xff]   ;;  %v16133_v41 = vld [vmem:[%s17552_s29 + $0x70] sm:$0xff]  }
 0x1cd   : > { %14955 = vmatpush3.bf16.msra.mxu0 %v16075_v42  ;;  %v16134_v42 = vld [vmem:[%s17552_s29 + $0xf0] sm:$0xff]  }
 0x1ce   : > { %14977 = vmatpush3.bf16.msra.mxu1 %v16076_v43  ;;  %14956 = vmatprep.subr.bf16.mxu0 %v16077_v44  ;;  %v16135_v43 = vld [vmem:[%s17552_s29 + $0x30] sm:$0xff]  }
 0x1cf   : > { %14978 = vmatprep.subr.bf16.mxu1 %v16078_v45  ;;  %v16136_v44 = vld [vmem:[%s17552_s29 + $0xb0] sm:$0xff]   ;;  %v16137_v45 = vld [vmem:[%s17552_s29 + $0x68] sm:$0xff]  }
 0x1d1   : > { %14957 = vmatpush3.bf16.msra.mxu0 %v16079_v46  ;;  %v16138_v46 = vld [vmem:[%s17552_s29 + $0xe8] sm:$0xff]  }
 0x1d2   : > { %14979 = vmatpush3.bf16.msra.mxu1 %v16080_v47  ;;  %14958 = vmatprep.subr.bf16.mxu0 %v16081_v51  ;;  %v16139_v47 = vld [vmem:[%s17552_s29 + $0x28] sm:$0xff]  }
 0x1d3   : > { %14980 = vmatprep.subr.bf16.mxu1 %v16082_v52  ;;  %v16140_v51 = vld [vmem:[%s17552_s29 + $0xa8] sm:$0xff]   ;;  %v16141_v52 = vld [vmem:[%s17552_s29 + $0x60] sm:$0xff]  }
 0x1d5   : > { %14959 = vmatpush3.bf16.msra.mxu0 %v16083_v53  ;;  %v16142_v53 = vld [vmem:[%s17552_s29 + $0xe0] sm:$0xff]  }
 0x1d6   : > { %14981 = vmatpush3.bf16.msra.mxu1 %v16084_v54  ;;  %14960 = vmatprep.subr.bf16.mxu0 %v16085_v55  ;;  %v16143_v54 = vld [vmem:[%s17552_s29 + $0x20] sm:$0xff]  }
 0x1d7   : > { %14982 = vmatprep.subr.bf16.mxu1 %v16086_v56  ;;  %v16144_v55 = vld [vmem:[%s17552_s29 + $0xa0] sm:$0xff]   ;;  %v16145_v56 = vld [vmem:[%s17552_s29 + $0x58] sm:$0xff]  }
 0x1d9   : > { %14961 = vmatpush3.bf16.msra.mxu0 %v16087_v57  ;;  %v16146_v57 = vld [vmem:[%s17552_s29 + $0xd8] sm:$0xff]  }
 0x1da   : > { %14983 = vmatpush3.bf16.msra.mxu1 %v16088_v58  ;;  %14962 = vmatprep.subr.bf16.mxu0 %v16089_v59  ;;  %v16147_v58 = vld [vmem:[%s17552_s29 + $0x18] sm:$0xff]  }
 0x1db   : > { %14984 = vmatprep.subr.bf16.mxu1 %v16090_v60  ;;  %v16148_v59 = vld [vmem:[%s17552_s29 + $0x98] sm:$0xff]   ;;  %v16149_v60 = vld [vmem:[%s17552_s29 + $0x50] sm:$0xff]  }
 0x1dd   : > { %14963 = vmatpush3.bf16.msra.mxu0 %v16091_v61  ;;  %v16150_v61 = vld [vmem:[%s17552_s29 + $0xd0] sm:$0xff]  }
 0x1de   : > { %14985 = vmatpush3.bf16.msra.mxu1 %v16092_v62  ;;  %14964 = vmatprep.subr.bf16.mxu0 %v16093_v63  ;;  %v16151_v62 = vld [vmem:[%s17552_s29 + $0x10] sm:$0xff]  }
 0x1df   : > { %14986 = vmatprep.subr.bf16.mxu1 %v16094_v0  ;;  %v16152_v63 = vld [vmem:[%s17552_s29 + $0x90] sm:$0xff]   ;;  %v16153_v0 = vld [vmem:[%s17552_s29 + $0x48] sm:$0xff]  }
 0x1e1   : > { %14965 = vmatpush3.bf16.msra.mxu0 %v16095_v1  ;;  %v16154_v1 = vld [vmem:[%s17552_s29 + $0xc8] sm:$0xff]  }
 0x1e2   : > { %14987 = vmatpush3.bf16.msra.mxu1 %v16096_v4  ;;  %14994 = vmatprep.subr.bf16.mxu0 %v16097_v5  ;;  %v16155_v4 = vld [vmem:[%s17552_s29 + $0x8] sm:$0xff]  }
 0x1e3   : > { %15016 = vmatprep.subr.bf16.mxu1 %v16098_v6  ;;  %v16156_v5 = vld [vmem:[%s17552_s29 + $0x88] sm:$0xff]   ;;  %v16157_v6 = vld [vmem:[%s17552_s29 + $0x40] sm:$0xff]  }
 0x1e4   : > { %3779 = vmatmul.mubr.bf16.vlgmr.msra.gmra.mxu0 %v17854_v2 }
 0x1e5   : > { %3915 = vmatmul.mubr.bf16.vlgmr.msra.gmra.mxu1 %v17854_v2  ;;  %14995 = vmatpush3.bf16.msra.mxu0 %v16099_v7  ;;  %v16158_v7 = vld [vmem:[%s17552_s29 + $0xc0] sm:$0xff]  }
 0x1e6   : > { %4050 = vmatprep.mubr.bf16.mxu0 %v17856_v3  ;;  %15017 = vmatpush3.bf16.msra.mxu1 %v16100_v8  ;;  %v16159_v8 = vld [vmem:[%s17552_s29] sm:$0xff]  }
 0x1e7   : > { %4186 = vmatprep.mubr.bf16.mxu1 %v17856_v3  ;;  %14996 = vmatprep.subr.bf16.mxu0 %v16101_v9  ;;  %v16160_v9 = vld [vmem:[%s17552_s29 + $0x80] sm:$0xff]  }
 0x1e8   : > { %15018 = vmatprep.subr.bf16.mxu1 %v16102_v10  ;;  %v16161_v10 = vld [vmem:[%s17552_s29 + $0x178] sm:$0xff]  }
 0x1e9   : > { %14997 = vmatpush3.bf16.msra.mxu0 %v16103_v11  ;;  %v16162_v11 = vld [vmem:[%s17552_s29 + $0x1f8] sm:$0xff]  }
 0x1ea   : > { %15019 = vmatpush3.bf16.msra.mxu1 %v16104_v12  ;;  %14998 = vmatprep.subr.bf16.mxu0 %v16105_v13  ;;  %v16163_v12 = vld [vmem:[%s17552_s29 + $0x138] sm:$0xff]  }
 0x1eb   : > { %15020 = vmatprep.subr.bf16.mxu1 %v16106_v14  ;;  %v16164_v13 = vld [vmem:[%s17552_s29 + $0x1b8] sm:$0xff]   ;;  %v16165_v14 = vld [vmem:[%s17552_s29 + $0x170] sm:$0xff]  }
 0x1ed   : > { %14999 = vmatpush3.bf16.msra.mxu0 %v16107_v15  ;;  %v16166_v15 = vld [vmem:[%s17552_s29 + $0x1f0] sm:$0xff]  }
 0x1ee   : > { %15021 = vmatpush3.bf16.msra.mxu1 %v16108_v16  ;;  %15000 = vmatprep.subr.bf16.mxu0 %v16109_v17  ;;  %v16167_v16 = vld [vmem:[%s17552_s29 + $0x130] sm:$0xff]  }
 0x1ef   : > { %15022 = vmatprep.subr.bf16.mxu1 %v16110_v18  ;;  %v16168_v17 = vld [vmem:[%s17552_s29 + $0x1b0] sm:$0xff]   ;;  %v16169_v18 = vld [vmem:[%s17552_s29 + $0x168] sm:$0xff]  }
 0x1f1   : > { %15001 = vmatpush3.bf16.msra.mxu0 %v16111_v19  ;;  %v16170_v19 = vld [vmem:[%s17552_s29 + $0x1e8] sm:$0xff]  }
 0x1f2   : > { %15023 = vmatpush3.bf16.msra.mxu1 %v16112_v20  ;;  %15002 = vmatprep.subr.bf16.mxu0 %v16113_v21  ;;  %v16171_v20 = vld [vmem:[%s17552_s29 + $0x128] sm:$0xff]  }
 0x1f3   : > { %15024 = vmatprep.subr.bf16.mxu1 %v16114_v22  ;;  %v16172_v21 = vld [vmem:[%s17552_s29 + $0x1a8] sm:$0xff]   ;;  %v16173_v22 = vld [vmem:[%s17552_s29 + $0x160] sm:$0xff]  }
 0x1f5   : > { %15003 = vmatpush3.bf16.msra.mxu0 %v16115_v23  ;;  %v16174_v23 = vld [vmem:[%s17552_s29 + $0x1e0] sm:$0xff]  }
 0x1f6   : > { %15025 = vmatpush3.bf16.msra.mxu1 %v16116_v24  ;;  %15004 = vmatprep.subr.bf16.mxu0 %v16117_v25  ;;  %v16175_v24 = vld [vmem:[%s17552_s29 + $0x120] sm:$0xff]  }
 0x1f7   : > { %15026 = vmatprep.subr.bf16.mxu1 %v16118_v26  ;;  %v16176_v25 = vld [vmem:[%s17552_s29 + $0x1a0] sm:$0xff]   ;;  %v16177_v26 = vld [vmem:[%s17552_s29 + $0x158] sm:$0xff]  }
 0x1f9   : > { %15005 = vmatpush3.bf16.msra.mxu0 %v16119_v27  ;;  %v16179_v27 = vld [vmem:[%s17552_s29 + $0x118] sm:$0xff]  }
 0x1fa   : > { %15027 = vmatpush3.bf16.msra.mxu1 %v16120_v28  ;;  %15006 = vmatprep.subr.bf16.mxu0 %v16121_v29  ;;  %v16180_v28 = vld [vmem:[%s17552_s29 + $0x198] sm:$0xff]   ;;  %v16181_v29 = vld [vmem:[%s17552_s29 + $0x150] sm:$0xff]  }
 0x1fb   : > { %15028 = vmatprep.subr.bf16.mxu1 %v16122_v30  ;;  %v16182_v30 = vld [vmem:[%s17552_s29 + $0x1d0] sm:$0xff]  }
 0x1fd   : > { %15007 = vmatpush3.bf16.msra.mxu0 %v16123_v31  ;;  %v16183_v31 = vld [vmem:[%s17552_s29 + $0x110] sm:$0xff]  }
 0x1fe   : > { %15029 = vmatpush3.bf16.msra.mxu1 %v16124_v32  ;;  %15008 = vmatprep.subr.bf16.mxu0 %v16125_v33  ;;  %v16184_v32 = vld [vmem:[%s17552_s29 + $0x190] sm:$0xff]   ;;  %v16185_v33 = vld [vmem:[%s17552_s29 + $0x148] sm:$0xff]  }
 0x1ff   : > { %15030 = vmatprep.subr.bf16.mxu1 %v16126_v34  ;;  %v16186_v34 = vld [vmem:[%s17552_s29 + $0x1c8] sm:$0xff]  }
 0x201   : > { %15009 = vmatpush3.bf16.msra.mxu0 %v16127_v35  ;;  %v16187_v35 = vld [vmem:[%s17552_s29 + $0x108] sm:$0xff]  }
 0x202   : > { %15031 = vmatpush3.bf16.msra.mxu1 %v16128_v36  ;;  %15038 = vmatprep.subr.bf16.mxu0 %v16129_v37  ;;  %v16188_v36 = vld [vmem:[%s17552_s29 + $0x188] sm:$0xff]   ;;  %v16189_v37 = vld [vmem:[%s17552_s29 + $0x140] sm:$0xff]  }
 0x203   : > { %15060 = vmatprep.subr.bf16.mxu1 %v16130_v38  ;;  %v16190_v38 = vld [vmem:[%s17552_s29 + $0x1c0] sm:$0xff]  }
 0x204   : > { %4051 = vmatmul.mubr.bf16.vlgmr.msra.gmra.mxu0 %v17854_v2 }
 0x205   : > { %4187 = vmatmul.mubr.bf16.vlgmr.msra.gmra.mxu1 %v17854_v2  ;;  %15039 = vmatpush3.bf16.msra.mxu0 %v16131_v39  ;;  %v16191_v39 = vld [vmem:[%s17552_s29 + $0x100] sm:$0xff]  }
 0x206   : > { %4322 = vmatprep.mubr.bf16.mxu0 %v17856_v3  ;;  %15061 = vmatpush3.bf16.msra.mxu1 %v16132_v40  ;;  %v16192_v40 = vld [vmem:[%s17552_s29 + $0x180] sm:$0xff]  }
 0x207   : > { %4458 = vmatprep.mubr.bf16.mxu1 %v17856_v3  ;;  %15040 = vmatprep.subr.bf16.mxu0 %v16133_v41  ;;  %v17509_v41 = vmov 0.0  }
 0x208   : > { %15062 = vmatprep.subr.bf16.mxu1 %v16134_v42 }
 0x209   : > { %15041 = vmatpush3.bf16.msra.mxu0 %v16135_v43 }
 0x20a   : > { %15063 = vmatpush3.bf16.msra.mxu1 %v16136_v44  ;;  %15042 = vmatprep.subr.bf16.mxu0 %v16137_v45 }
 0x20b   : > { %15064 = vmatprep.subr.bf16.mxu1 %v16138_v46 }
 0x20d   : > { %15043 = vmatpush3.bf16.msra.mxu0 %v16139_v47 }
 0x20e   : > { %15065 = vmatpush3.bf16.msra.mxu1 %v16140_v51  ;;  %15044 = vmatprep.subr.bf16.mxu0 %v16141_v52 }
 0x20f   : > { %15066 = vmatprep.subr.bf16.mxu1 %v16142_v53 }
 0x211   : > { %15045 = vmatpush3.bf16.msra.mxu0 %v16143_v54 }
 0x212   : > { %15067 = vmatpush3.bf16.msra.mxu1 %v16144_v55  ;;  %15046 = vmatprep.subr.bf16.mxu0 %v16145_v56 }
 0x213   : > { %15068 = vmatprep.subr.bf16.mxu1 %v16146_v57 }
 0x215   : > { %15047 = vmatpush3.bf16.msra.mxu0 %v16147_v58 }
 0x216   : > { %15069 = vmatpush3.bf16.msra.mxu1 %v16148_v59  ;;  %15048 = vmatprep.subr.bf16.mxu0 %v16149_v60 }
 0x217   : > { %15070 = vmatprep.subr.bf16.mxu1 %v16150_v61 }
 0x219   : > { %15049 = vmatpush3.bf16.msra.mxu0 %v16151_v62 }
 0x21a   : > { %15071 = vmatpush3.bf16.msra.mxu1 %v16152_v63  ;;  %15050 = vmatprep.subr.bf16.mxu0 %v16153_v0 }
 0x21b   : > { %15072 = vmatprep.subr.bf16.mxu1 %v16154_v1 }
 0x21d   : > { %15051 = vmatpush3.bf16.msra.mxu0 %v16155_v4 }
 0x21e   : > { %15073 = vmatpush3.bf16.msra.mxu1 %v16156_v5  ;;  %15052 = vmatprep.subr.bf16.mxu0 %v16157_v6 }
 0x21f   : > { %15074 = vmatprep.subr.bf16.mxu1 %v16158_v7 }
 0x221   : > { %15053 = vmatpush3.bf16.msra.mxu0 %v16159_v8 }
 0x222   : > { %15075 = vmatpush3.bf16.msra.mxu1 %v16160_v9  ;;  %15082 = vmatprep.subr.bf16.mxu0 %v16161_v10 }
 0x223   : > { %15104 = vmatprep.subr.bf16.mxu1 %v16162_v11 }
 0x224   : > { %4323 = vmatmul.mubr.bf16.vlgmr.msra.gmra.mxu0 %v17854_v2 }
 0x225   : > { %4459 = vmatmul.mubr.bf16.vlgmr.msra.gmra.mxu1 %v17854_v2  ;;  %15083 = vmatpush3.bf16.msra.mxu0 %v16163_v12 }
 0x226   : > { %4594 = vmatprep.mubr.bf16.mxu0 %v17856_v3  ;;  %15105 = vmatpush3.bf16.msra.mxu1 %v16164_v13 }
 0x227   : > { %4730 = vmatprep.mubr.bf16.mxu1 %v17856_v3  ;;  %15084 = vmatprep.subr.bf16.mxu0 %v16165_v14  ;;  %v16178_v3 = vld [vmem:[%s17552_s29 + $0x1d8] sm:$0xff]  }
 0x228   : > { %15106 = vmatprep.subr.bf16.mxu1 %v16166_v15 }
 0x229   : > { %15085 = vmatpush3.bf16.msra.mxu0 %v16167_v16 }
 0x22a   : > { %15107 = vmatpush3.bf16.msra.mxu1 %v16168_v17  ;;  %15086 = vmatprep.subr.bf16.mxu0 %v16169_v18 }
 0x22b   : > { %15108 = vmatprep.subr.bf16.mxu1 %v16170_v19 }
 0x22d   : > { %15087 = vmatpush3.bf16.msra.mxu0 %v16171_v20 }
 0x22e   : > { %15109 = vmatpush3.bf16.msra.mxu1 %v16172_v21  ;;  %15088 = vmatprep.subr.bf16.mxu0 %v16173_v22 }
 0x22f   : > { %15110 = vmatprep.subr.bf16.mxu1 %v16174_v23 }
 0x231   : > { %15089 = vmatpush3.bf16.msra.mxu0 %v16175_v24 }
 0x232   : > { %15111 = vmatpush3.bf16.msra.mxu1 %v16176_v25  ;;  %15090 = vmatprep.subr.bf16.mxu0 %v16177_v26 }
 0x233   : > { %15112 = vmatprep.subr.bf16.mxu1 %v16178_v3 }
 0x235   : > { %15091 = vmatpush3.bf16.msra.mxu0 %v16179_v27 }
 0x236   : > { %15113 = vmatpush3.bf16.msra.mxu1 %v16180_v28  ;;  %15092 = vmatprep.subr.bf16.mxu0 %v16181_v29 }
 0x237   : > { %15114 = vmatprep.subr.bf16.mxu1 %v16182_v30 }
 0x239   : > { %15093 = vmatpush3.bf16.msra.mxu0 %v16183_v31 }
 0x23a   : > { %15115 = vmatpush3.bf16.msra.mxu1 %v16184_v32  ;;  %15094 = vmatprep.subr.bf16.mxu0 %v16185_v33 }
 0x23b   : > { %15116 = vmatprep.subr.bf16.mxu1 %v16186_v34 }
 0x23d   : > { %15095 = vmatpush3.bf16.msra.mxu0 %v16187_v35 }
 0x23e   : > { %15117 = vmatpush3.bf16.msra.mxu1 %v16188_v36  ;;  %15096 = vmatprep.subr.bf16.mxu0 %v16189_v37 }
 0x23f   : > { %15118 = vmatprep.subr.bf16.mxu1 %v16190_v38 }
 0x241   : > { %15097 = vmatpush3.bf16.msra.mxu0 %v16191_v39 }
 0x242   : > { %15119 = vmatpush3.bf16.msra.mxu1 %v16192_v40  ;;  %15800 = vmatprep.subr.bf16.mxu0 %v17509_v41 }
 0x243   : > { %15788 = vmatprep.subr.bf16.mxu1 %v17509_v41 }
 0x244   : > { %4595 = vmatmul.mubr.bf16.vlgmr.msra.gmra.mxu0 %v17854_v2 }
 0x245   : > { %4731 = vmatmul.mubr.bf16.vlgmr.msra.gmra.mxu1 %v17854_v2  ;;  %15802 = vmatprep.mubr.msk.bf16.mxu0 %vm17510_vm0, %v17509_v41 }
 0x246   : > { %15790 = vmatprep.mubr.msk.bf16.mxu1 %vm17510_vm0, %v17509_v41 }
 0x264   : > { %v14878_v42 = vpop.f32.mrf.mxu0  ;;  %v14900_v43 = vpop.f32.mrf.mxu1 }
 0x266   : > { %v14879_v44 = vpop.f32.mrf.mxu0  ;;  %v14901_v45 = vpop.f32.mrf.mxu1 }
 0x267   : > { %v14880_v46 = vadd.f32 %v14879_v44, %v14878_v42  ;;  %v14902_v47 = vadd.f32 %v14901_v45, %v14900_v43 }
 0x268   : > { %v14881_v51 = vpop.f32.mrf.mxu0  ;;  %v14903_v52 = vpop.f32.mrf.mxu1 }
 0x269   : > { %v4738_v15 = vpack.c.bf16 %v14880_v46, %v14880_v46  ;;  %v4739_v17 = vpack.c.bf16 %v14902_v47, %v14902_v47 }
 0x26a   : > { %v14882_v53 = vpop.f32.mrf.mxu0  ;;  %v14904_v54 = vpop.f32.mrf.mxu1 }
 0x284   : > { %v14922_v55 = vpop.f32.mrf.mxu0  ;;  %v14944_v56 = vpop.f32.mrf.mxu1 }
 0x286   : > { %v14923_v2 = vpop.f32.mrf.mxu0  ;;  %v14945_v57 = vpop.f32.mrf.mxu1 }
 0x287   : > { %v14924_v58 = vadd.f32 %v14923_v2, %v14922_v55  ;;  %v14946_v59 = vadd.f32 %v14945_v57, %v14944_v56 }
 0x288   : > { %v14925_v60 = vpop.f32.mrf.mxu0  ;;  %v14947_v61 = vpop.f32.mrf.mxu1 }
 0x289   : > { %v4740_v31 = vpack.c.bf16 %v14924_v58, %v14924_v58  ;;  %v4741_v32 = vpack.c.bf16 %v14946_v59, %v14946_v59 }
 0x28a   : > { %v14926_v62 = vpop.f32.mrf.mxu0  ;;  %v14948_v63 = vpop.f32.mrf.mxu1 }
 0x2a4   : > { %v14966_v0 = vpop.f32.mrf.mxu0 }
 0x2a5   : > { %v14988_v1 = vpop.f32.mrf.mxu1 }
 0x2a6   : > { %v14967_v4 = vpop.f32.mrf.mxu0 }
 0x2a7   : > { %v14968_v5 = vadd.f32 %v14967_v4, %v14966_v0  ;;  %v14989_v6 = vpop.f32.mrf.mxu1 }
 0x2a8   : > { %v14969_v7 = vpop.f32.mrf.mxu0  ;;  %v14990_v10 = vadd.f32 %v14989_v6, %v14988_v1 }
 0x2a9   : > { %v4742_v8 = vpack.c.bf16 %v14968_v5, %v14968_v5  ;;  %v14991_v9 = vpop.f32.mrf.mxu1 }
 0x2aa   : > { %v14970_v11 = vpop.f32.mrf.mxu0  ;;  %v4743_v14 = vpack.c.bf16 %v14990_v10, %v14990_v10 }
 0x2ab   : > { %v4751_v12 = vsel %vm4746_vm1, %v4742_v8, 0  ;;  %v14992_v13 = vpop.f32.mrf.mxu1 }
 0x2ac   : > { %15789 = vmatpush3.bf16.xpose.msra.mxu1 %v4751_v12  ;;  %v4797_v16 = vsel %vm4746_vm1, %v4743_v14, 0 }
 0x2ad   : > { %15794 = vmatprep.subr.bf16.mxu1 %v17509_v41 }
 0x2b3   : > { %15791 = vmatmul.mubr.msk.bf16.vlgmr.msra.gmra.mxu1 %vm4746_vm1, %v4738_v15 }
 0x2b4   : > { %15795 = vmatpush3.bf16.xpose.msra.mxu1 %v4797_v16  ;;  %15796 = vmatprep.mubr.msk.bf16.mxu1 %vm17510_vm0, %v17509_v41 }
 0x2b5   : > { %15806 = vmatprep.subr.bf16.mxu1 %v17509_v41 }
 0x2bb   : > { %15797 = vmatmul.mubr.msk.bf16.vlgmr.msra.gmra.mxu1 %vm4746_vm1, %v4739_v17 }
 0x2bc   : > { %15808 = vmatprep.mubr.msk.bf16.mxu1 %vm17510_vm0, %v17509_v41 }
 0x2c4   : > { %v15010_v18 = vpop.f32.mrf.mxu0 }
 0x2c5   : > { %v15032_v19 = vpop.f32.mrf.mxu1 }
 0x2c6   : > { %v15011_v20 = vpop.f32.mrf.mxu0 }
 0x2c7   : > { %v15012_v21 = vadd.f32 %v15011_v20, %v15010_v18  ;;  %v15033_v22 = vpop.f32.mrf.mxu1 }
 0x2c8   : > { %v15034_v23 = vadd.f32 %v15033_v22, %v15032_v19  ;;  %v15013_v24 = vpop.f32.mrf.mxu0 }
 0x2c9   : > { %v4744_v25 = vpack.c.bf16 %v15012_v21, %v15012_v21  ;;  %v15035_v26 = vpop.f32.mrf.mxu1 }
 0x2ca   : > { %v4745_v3 = vpack.c.bf16 %v15034_v23, %v15034_v23  ;;  %v15014_v27 = vpop.f32.mrf.mxu0 }
 0x2cb   : > { %v4843_v28 = vsel %vm4746_vm1, %v4744_v25, 0  ;;  %v15036_v29 = vpop.f32.mrf.mxu1 }
 0x2cc   : > { %v4889_v30 = vsel %vm4746_vm1, %v4745_v3, 0  ;;  %15801 = vmatpush3.bf16.xpose.msra.mxu0 %v4843_v28 }
 0x2cd   : > { %15807 = vmatpush3.bf16.xpose.msra.mxu1 %v4889_v30  ;;  %15812 = vmatprep.subr.bf16.mxu0 %v17509_v41 }
 0x2ce   : > { %15818 = vmatprep.subr.bf16.mxu1 %v17509_v41 }
 0x2d3   : > { %15803 = vmatmul.mubr.msk.bf16.vlgmr.msra.gmra.mxu0 %vm4746_vm1, %v4740_v31 }
 0x2d4   : > { %15809 = vmatmul.mubr.msk.bf16.vlgmr.msra.gmra.mxu1 %vm4746_vm1, %v4741_v32  ;;  %15814 = vmatprep.mubr.msk.bf16.mxu0 %vm17510_vm0, %v17509_v41 }
 0x2d5   : > { %15820 = vmatprep.mubr.msk.bf16.mxu1 %vm17510_vm0, %v17509_v41 }
 0x2e4   : > { %v15054_v33 = vpop.f32.mrf.mxu0 }
 0x2e5   : > { %v15076_v34 = vpop.f32.mrf.mxu1 }
 0x2e6   : > { %v15055_v35 = vpop.f32.mrf.mxu0 }
 0x2e7   : > { %v15056_v36 = vadd.f32 %v15055_v35, %v15054_v33  ;;  %v15077_v37 = vpop.f32.mrf.mxu1 }
 0x2e8   : > { %v15078_v38 = vadd.f32 %v15077_v37, %v15076_v34  ;;  %v15057_v39 = vpop.f32.mrf.mxu0 }
 0x2e9   : > { %v4984_v40 = vpack.c.bf16 %v15056_v36, %v15056_v36  ;;  %v15079_v42 = vpop.f32.mrf.mxu1 }
 0x2ea   : > { %v4985_v43 = vpack.c.bf16 %v15078_v38, %v15078_v38  ;;  %v15058_v44 = vpop.f32.mrf.mxu0 }
 0x2eb   : > { %v4993_v45 = vsel %vm4991_vm2, %v4984_v40, 0  ;;  %v15080_v46 = vpop.f32.mrf.mxu1 }
 0x2ec   : > { %v5039_v47 = vsel %vm4991_vm2, %v4985_v43, 0  ;;  %15813 = vmatpush3.bf16.msra.mxu0 %v4993_v45 }
 0x2ed   : > { %15819 = vmatpush3.bf16.msra.mxu1 %v5039_v47  ;;  %15824 = vmatprep.subr.bf16.mxu0 %v17509_v41 }
 0x2ee   : > { %15830 = vmatprep.subr.bf16.mxu1 %v17509_v41 }
 0x304   : > { %v15098_v51 = vpop.f32.mrf.mxu0 }
 0x305   : > { %v15120_v52 = vpop.f32.mrf.mxu1 }
 0x306   : > { %v15099_v53 = vpop.f32.mrf.mxu0 }
 0x307   : > { %v18068_v54 = vadd.f32 %v15099_v53, %v15098_v51  ;;  %v15121_v55 = vpop.f32.mrf.mxu1  ;;  %v16195_v51 = vld [vmem:[%s19567_s3 + $0x14] ss:$8 sps:$4 sm:$0xff]  }
 0x308   : > { %v18070_v56 = vadd.f32 %v15121_v55, %v15120_v52  ;;  %v15101_v2 = vpop.f32.mrf.mxu0 }
 0x309   : > { %v15123_v57 = vpop.f32.mrf.mxu1  ;;  %v4986_v45 = vpack.c.bf16 %v18068_v54, %v18068_v54 }
 0x30a   : > { %v15102_v58 = vpop.f32.mrf.mxu0  ;;  %v4987_v55 = vpack.c.bf16 %v18070_v56, %v18070_v56 }
 0x30b   : > { %v15124_v59 = vpop.f32.mrf.mxu1  ;;  %v5085_v52 = vsel %vm4991_vm2, %v4986_v45, 0 }
 0x30c   : > { %v5131_v57 = vsel %vm4991_vm2, %v4987_v55, 0 }
 0x373   : > { %v4787_v60 = vpop.f32.mrf.mxu1 }
 0x374   : > { %v4931_v61 = vmul.f32 0.17677669, %v4787_v60 }
 0x375   : > { %v15792_v62 = vpop.f32.mrf.mxu1 }
 0x376   : > { %v4936_v63 = vsel %vm4935_vm3, %v4931_v61, -inf }
 0x377   : > { %4937 = vmax.xlane.f32.xlu1 %v4936_v63  ;;  %v4790_v0 = vpop.f32.mrf.mxu1  ;;  %v16193_v63 = vld [vmem:[%s19567_s3 + $0x10] ss:$8 sps:$4 sm:$0xff]  }
 0x379   : > { %v15793_v1 = vpop.f32.mrf.mxu1 }
 0x37a   : > { %v16198_v1 = vld [vmem:[%s19567_s3 + $0x4] ss:$8 sps:$4 sm:$0xff]  }
 0x37b   : > { %v4833_v4 = vpop.f32.mrf.mxu1 }
 0x37c   : > { %v4932_v5 = vmul.f32 0.17677669, %v4833_v4 }
 0x37d   : > { %v15798_v6 = vpop.f32.mrf.mxu1 }
 0x37e   : > { %v4939_v7 = vsel %vm4935_vm3, %v4932_v5, -inf  ;;  %v17511_v6 = vmov 0  }
 0x37f   : > { %4940 = vmax.xlane.f32.xlu1 %v4939_v7  ;;  %v4836_v8 = vpop.f32.mrf.mxu1  ;;  %v16199_v7 = vld [vmem:[%s19567_s3 + $0x30] ss:$8 sps:$4 sm:$0xff]  }
 0x380   : > { %v16201_v8 = vld [vmem:[%s19567_s3 + $0x34] ss:$8 sps:$4 sm:$0xff]  }
 0x381   : > { %v15799_v9 = vpop.f32.mrf.mxu1 }
 0x382   : > { %v16202_v9 = vld [vmem:[%s19567_s3 + $0x20] ss:$8 sps:$4 sm:$0xff]  }
 0x393   : > { %v4879_v10 = vpop.f32.mrf.mxu0 }
 0x394   : > { %v4933_v11 = vmul.f32 0.17677669, %v4879_v10  ;;  %v4925_v12 = vpop.f32.mrf.mxu1  ;;  %v16204_v10 = vld [vmem:[%s19567_s3 + $0x24] ss:$8 sps:$4 sm:$0xff]  }
 0x395   : > { %v4934_v13 = vmul.f32 0.17677669, %v4925_v12  ;;  %v15804_v14 = vpop.f32.mrf.mxu0  ;;  %v16210_v12 = vld [vmem:[%s19567_s3 + $0x74] ss:$8 sps:$4 sm:$0xff]  }
 0x396   : > { %v15810_v15 = vpop.f32.mrf.mxu1  ;;  %v4942_v16 = vsel %vm4935_vm3, %v4933_v11, -inf  ;;  %v16205_v14 = vld [vmem:[%s19567_s3 + $0x50] ss:$8 sps:$4 sm:$0xff]  }
 0x397   : > { %4943 = vmax.xlane.f32.xlu0 %v4942_v16  ;;  %v4882_v17 = vpop.f32.mrf.mxu0  ;;  %v4945_v18 = vsel %vm4935_vm3, %v4934_v13, -inf  ;;  %v16213_v16 = vld [vmem:[%s19567_s3 + $0x44] ss:$8 sps:$4 sm:$0xff]  }
 0x398   : > { %4946 = vmax.xlane.f32.xlu1 %v4945_v18  ;;  %v4928_v19 = vpop.f32.mrf.mxu1 }
 0x399   : > { %v15805_v20 = vpop.f32.mrf.mxu0  ;;  %v16211_v19 = vld [vmem:[%s19567_s3 + $0x40] ss:$8 sps:$4 sm:$0xff]  }
 0x39a   : > { %v15811_v21 = vpop.f32.mrf.mxu1 }
 0x400   : > { %v4938_v22 = vpop.xlane.xlu1 %4937 }
 0x401   : > { %v4948_v23 = vsub.f32 %v4931_v61, %v4938_v22  ;;  %v16208_v22 = vld [vmem:[%s19567_s3 + $0x70] ss:$8 sps:$4 sm:$0xff]  }
 0x403   : > { %v4952_v24 = vmul.f32 1.442695, %v4948_v23 }
 0x405   : > { %17329 = vpow2.f32 %v4952_v24  ;;  %v16216_v24 = vld [vmem:[%s19567_s3 + $0x64] ss:$8 sps:$4 sm:$0xff]  }
 0x408   : > { %v4941_v25 = vpop.xlane.xlu1 %4940 }
 0x409   : > { %v4949_v26 = vsub.f32 %v4932_v5, %v4941_v25  ;;  %v16196_v5 = vld [vmem:[%s19567_s3] ss:$8 sps:$4 sm:$0xff]  }
 0x40b   : > { %v4954_v3 = vmul.f32 1.442695, %v4949_v26 }
 0x40d   : > { %17331 = vpow2.f32 %v4954_v3  ;;  %v16214_v3 = vld [vmem:[%s19567_s3 + $0x60] ss:$8 sps:$4 sm:$0xff]  }
 0x412   : > { %v17330_v27 = vpop.eup %17329 }
 0x413   : > { %v4960_v28 = vsel %vm4935_vm3, %v17330_v27, 0.0 }
 0x414   : > { %4961 = vadd.xlane.f32.xlu0 %v4960_v28 }
 0x41a   : > { %v17332_v29 = vpop.eup %17331 }
 0x41b   : > { %v4963_v30 = vsel %vm4935_vm3, %v17332_v29, 0.0 }
 0x41c   : > { %4964 = vadd.xlane.f32.xlu1 %v4963_v30 }
 0x420   : > { %v4944_v31 = vpop.xlane.xlu0 %4943 }
 0x421   : > { %v4950_v32 = vsub.f32 %v4933_v11, %v4944_v31  ;;  %v4947_v33 = vpop.xlane.xlu1 %4946  ;;  %v16207_v11 = vld [vmem:[%s19567_s3 + $0x54] ss:$8 sps:$4 sm:$0xff]   ;;  %s19581_s3 = sld [smem:[#allocation19_spill]] }
 0x422   : > { %v4951_v34 = vsub.f32 %v4934_v13, %v4947_v33 }
 0x423   : > { %v4956_v35 = vmul.f32 1.442695, %v4950_v32 }
 0x424   : > { %v4958_v36 = vmul.f32 1.442695, %v4951_v34 }
 0x425   : > { %17333 = vpow2.f32 %v4956_v35 }
 0x426   : > { %17335 = vpow2.f32 %v4958_v36 }
 0x432   : > { %v17334_v37 = vpop.eup %17333 }
 0x433   : > { %v17336_v38 = vpop.eup %17335  ;;  %v4966_v39 = vsel %vm4935_vm3, %v17334_v37, 0.0 }
 0x434   : > { %4967 = vadd.xlane.f32.xlu0 %v4966_v39  ;;  %v4969_v40 = vsel %vm4935_vm3, %v17336_v38, 0.0 }
 0x435   : > { %4970 = vadd.xlane.f32.xlu1 %v4969_v40 }
 0x49d   : > { %v4962_v42 = vpop.xlane.xlu0 %4961 }
 0x49e   : > { %17337 = vrcp.f32 %v4962_v42 }
 0x4a5   : > { %v4965_v43 = vpop.xlane.xlu1 %4964 }
 0x4a6   : > { %17339 = vrcp.f32 %v4965_v43 }
 0x4ab   : > { %v17338_v44 = vpop.eup %17337 }
 0x4ac   : > { %v4976_v46 = vmul.f32 %v17338_v44, %v17330_v27 }
 0x4ae   : > { %v4980_v47 = vpack.c.bf16 %v4976_v46, %v4976_v46 }
 0x4b0   : > { %15815 = vmatmul.mubr.msk.bf16.vlgmr.msra.gmra.mxu0 %vm4935_vm3, %v4980_v47  ;;  %v18124_v47 = vld [vmem:[%s18121_s1] sm:$0xff] }
 0x4b1   : > { %15825 = vmatpush3.bf16.msra.mxu0 %v5085_v52  ;;  %15826 = vmatprep.mubr.msk.bf16.mxu0 %vm17510_vm0, %v17509_v41  ;;  %v18129_v52 = vcombine.high %v18124_v47, %v18124_v47 }
 0x4b2   : > { %5212 = vmatprep.subr.bf16.mxu0 %v16195_v51  ;;  %v1687_v51 = vld [vmem:[%s19573_s8] sm:$0x3] }
 0x4b3   : > { %v17340_v53 = vpop.eup %17339 }
 0x4b4   : > { %v4977_v2 = vmul.f32 %v17340_v53, %v17332_v29 }
 0x4b6   : > { %v4981_v54 = vpack.c.bf16 %v4977_v2, %v4977_v2 }
 0x4b8   : > { %15821 = vmatmul.mubr.msk.bf16.vlgmr.msra.gmra.mxu1 %vm4935_vm3, %v4981_v54 }
 0x4b9   : > { %15831 = vmatpush3.bf16.msra.mxu1 %v5131_v57  ;;  %15832 = vmatprep.mubr.msk.bf16.mxu1 %vm17510_vm0, %v17509_v41 }
 0x4ba   : > { %5276 = vmatprep.subr.bf16.mxu1 %v16201_v8 }
 0x4bd   : > { %v4968_v58 = vpop.xlane.xlu0 %4967 }
 0x4be   : > { %17341 = vrcp.f32 %v4968_v58  ;;  %v4971_v59 = vpop.xlane.xlu1 %4970  ;;  %v5443_v58 = vrot.slane %v1687_v51, %v17839_v49 }
 0x4bf   : > { %17343 = vrcp.f32 %v4971_v59 }
 0x4cb   : > { %v17342_v60 = vpop.eup %17341 }
 0x4cc   : > { %v17344_v61 = vpop.eup %17343  ;;  %v4978_v56 = vmul.f32 %v17342_v60, %v17334_v37  ;;  %v6456_v60 = vsel %vm4991_vm2, %v18124_v47, 0.0 }
 0x4cd   : > { %v4979_v62 = vmul.f32 %v17344_v61, %v17336_v38  ;;  %v6457_v61 = vsel %vm4991_vm2, %v18129_v52, 0.0 }
 0x4ce   : > { %v4982_v0 = vpack.c.bf16 %v4978_v56, %v4978_v56  ;;  %v18137_v56 = vld [vmem:[%s18121_s1 + $0x8] sm:$0xff] }
 0x4cf   : > { %v4983_v4 = vpack.c.bf16 %v4979_v62, %v4979_v62 }
 0x4d0   : > { %15827 = vmatmul.mubr.msk.bf16.vlgmr.msra.gmra.mxu0 %vm4935_vm3, %v4982_v0 }
 0x4d1   : > { %15833 = vmatmul.mubr.msk.bf16.vlgmr.msra.gmra.mxu1 %vm4935_vm3, %v4983_v4  ;;  %5213 = vmatpush1.bf16.msra.mxu0 %v16193_v63 }
 0x4d2   : > { %5214 = vmatprep.subr.bf16.mxu0 %v16198_v1  ;;  %5232 = vmatprep.mubr.bf16.mxu0 %v17511_v6  ;;  %v5447_v1 = vrot.slane %v1687_v51, %v17842_v50  ;;  %v16257_v51 = vld [vmem:[%s17577_s24 + $0x24] ss:$16 sps:$4 sm:$0xff]  }
 0x4d3   : > { %5296 = vmatprep.mubr.bf16.mxu1 %v17511_v6  ;;  %5277 = vmatpush1.bf16.msra.mxu1 %v16199_v7 }
 0x4d4   : > { %5278 = vmatprep.subr.bf16.mxu1 %v16204_v10 }
 0x4d5   : > { %5215 = vmatpush1.bf16.msra.mxu0 %v16196_v5 }
 0x4d6   : > { %5340 = vmatprep.subr.bf16.mxu0 %v16207_v11  ;;  %v18142_v11 = vcombine.high %v18137_v56, %v18137_v56 }
 0x4d7   : > { %5279 = vmatpush1.bf16.msra.mxu1 %v16202_v9  ;;  %v6458_v9 = vadd.f32 %v6457_v61, %v6456_v60  ;;  %v16269_v60 = vld [vmem:[%s17577_s24 + $0x1e4] ss:$16 sps:$4 sm:$0xff]   ;;  %v16272_v61 = vld [vmem:[%s17577_s24 + $0x1ec] ss:$16 sps:$4 sm:$0xff]  }
 0x4d8   : > { %5404 = vmatprep.subr.bf16.mxu1 %v16210_v12  ;;  %v6459_v12 = vsel %vm4991_vm2, %v18137_v56, 0.0 }
 0x570   : > { %v5029_v13 = vpop.f32.mrf.mxu0 }
 0x571   : > { %v5173_v15 = vpack.c.bf16 %v5029_v13, %v5029_v13 }
 0x572   : > { %v15816_v17 = vpop.f32.mrf.mxu0 }
 0x573   : > { %13932 = vmatmul.mubr.msk.bf16.vlgmr.msra.gmra.mxu0 %vm4746_vm1, %v5173_v15  ;;  %v17401_v15 = vld [vmem:[%s17790_s28] sm:$0xff]  ;;  %v17402_v17 = vld [vmem:[%s17790_s28 + $0x8] sm:$0xff]  ;;  %s19576_s28 = sld [smem:[#allocation14_spill]] }
 0x574   : > { %v5032_v18 = vpop.f32.mrf.mxu0  ;;  %5341 = vmatpush1.bf16.msra.mxu0 %v16205_v14  ;;  %5360 = vmatprep.mubr.bf16.mxu0 %v17511_v6 }
 0x575   : > { %5342 = vmatprep.subr.bf16.mxu0 %v16213_v16 }
 0x576   : > { %v15817_v20 = vpop.f32.mrf.mxu0 }
 0x577   : > { %v6461_v20 = vsel %vm4991_vm2, %v18142_v11, 0.0 }
 0x578   : > { %v5075_v21 = vpop.f32.mrf.mxu1  ;;  %5343 = vmatpush1.bf16.msra.mxu0 %v16211_v19  ;;  %v6460_v19 = vadd.f32 %v6459_v12, %v6458_v9 }
 0x579   : > { %v5174_v23 = vpack.c.bf16 %v5075_v21, %v5075_v21 }
 0x57a   : > { %v15822_v25 = vpop.f32.mrf.mxu1 }
 0x57b   : > { %13937 = vmatmul.mubr.msk.bf16.vlgmr.msra.gmra.mxu1 %vm4746_vm1, %v5174_v23  ;;  %v16219_v23 = vld [vmem:[%s17577_s24 + $0xe0] ss:$16 sps:$4 sm:$0xff]   ;;  %v16222_v25 = vld [vmem:[%s17577_s24 + $0xe8] ss:$16 sps:$4 sm:$0xff]  }
 0x57c   : > { %v5078_v26 = vpop.f32.mrf.mxu1  ;;  %5405 = vmatpush1.bf16.msra.mxu1 %v16208_v22  ;;  %5424 = vmatprep.mubr.bf16.mxu1 %v17511_v6  ;;  %v6462_v22 = vadd.f32 %v6461_v20, %v6460_v19 }
 0x57d   : > { %5406 = vmatprep.subr.bf16.mxu1 %v16216_v24  ;;  %v16221_v24 = vld [vmem:[%s17577_s24 + $0xe4] ss:$16 sps:$4 sm:$0xff]   ;;  %v16224_v26 = vld [vmem:[%s17577_s24 + $0xec] ss:$16 sps:$4 sm:$0xff]  }
 0x57e   : > { %v15823_v27 = vpop.f32.mrf.mxu1  ;;  %5839 = vmatprep.subr.bf16.mxu0 %v16221_v24 }
 0x57f   : > { %v16230_v27 = vld [vmem:[%s17577_s24 + $0xcc] ss:$16 sps:$4 sm:$0xff]  }
 0x580   : > { %5407 = vmatpush1.bf16.msra.mxu1 %v16214_v3  ;;  %v16227_v3 = vld [vmem:[%s17577_s24 + $0xc4] ss:$16 sps:$4 sm:$0xff]  }
 0x581   : > { %5880 = vmatprep.subr.bf16.mxu1 %v16224_v26 }
 0x590   : > { %v5121_v28 = vpop.f32.mrf.mxu0 }
 0x591   : > { %v5175_v29 = vpack.c.bf16 %v5121_v28, %v5121_v28  ;;  %v5167_v30 = vpop.f32.mrf.mxu1  ;;  %v16225_v28 = vld [vmem:[%s17577_s24 + $0xc0] ss:$16 sps:$4 sm:$0xff]  }
 0x592   : > { %v5176_v31 = vpack.c.bf16 %v5167_v30, %v5167_v30  ;;  %v15828_v32 = vpop.f32.mrf.mxu0  ;;  %v16233_v30 = vld [vmem:[%s17577_s24 + $0xa4] ss:$16 sps:$4 sm:$0xff]  }
 0x593   : > { %v15834_v33 = vpop.f32.mrf.mxu1  ;;  %13942 = vmatmul.mubr.msk.bf16.vlgmr.msra.gmra.mxu0 %vm4746_vm1, %v5175_v29  ;;  %v16228_v29 = vld [vmem:[%s17577_s24 + $0xc8] ss:$16 sps:$4 sm:$0xff]   ;;  %v16231_v32 = vld [vmem:[%s17577_s24 + $0xa0] ss:$16 sps:$4 sm:$0xff]  }
 0x594   : > { %13947 = vmatmul.mubr.msk.bf16.vlgmr.msra.gmra.mxu1 %vm4746_vm1, %v5176_v31  ;;  %v5124_v34 = vpop.f32.mrf.mxu0  ;;  %5840 = vmatpush1.bf16.msra.mxu0 %v16219_v23  ;;  %v16236_v31 = vld [vmem:[%s17577_s24 + $0xac] ss:$16 sps:$4 sm:$0xff]   ;;  %v16234_v33 = vld [vmem:[%s17577_s24 + $0xa8] ss:$16 sps:$4 sm:$0xff]  }
 0x595   : > { %v5170_v35 = vpop.f32.mrf.mxu1  ;;  %5881 = vmatpush1.bf16.msra.mxu1 %v16222_v25  ;;  %5841 = vmatprep.subr.bf16.mxu0 %v16227_v3  ;;  %v16237_v34 = vld [vmem:[%s17577_s24 + $0x80] ss:$16 sps:$4 sm:$0xff]  }
 0x596   : > { %v15829_v36 = vpop.f32.mrf.mxu0  ;;  %5882 = vmatprep.subr.bf16.mxu1 %v16230_v27  ;;  %v16239_v35 = vld [vmem:[%s17577_s24 + $0x84] ss:$16 sps:$4 sm:$0xff]  }
 0x597   : > { %v15835_v37 = vpop.f32.mrf.mxu1  ;;  %v16240_v36 = vld [vmem:[%s17577_s24 + $0x88] ss:$16 sps:$4 sm:$0xff]  }
 0x598   : > { %5842 = vmatpush1.bf16.msra.mxu0 %v16225_v28  ;;  %v16242_v37 = vld [vmem:[%s17577_s24 + $0x8c] ss:$16 sps:$4 sm:$0xff]  }
 0x599   : > { %5883 = vmatpush1.bf16.msra.mxu1 %v16228_v29  ;;  %5843 = vmatprep.subr.bf16.mxu0 %v16233_v30 }
 0x59a   : > { %5884 = vmatprep.subr.bf16.mxu1 %v16236_v31 }
 0x59c   : > { %5844 = vmatpush1.bf16.msra.mxu0 %v16231_v32 }
 0x59d   : > { %5885 = vmatpush1.bf16.msra.mxu1 %v16234_v33  ;;  %5845 = vmatprep.subr.bf16.mxu0 %v16239_v35  ;;  %v16284_v35 = vld [vmem:[%s17577_s24 + $0x1ac] ss:$16 sps:$4 sm:$0xff]  }
 0x59e   : > { %5886 = vmatprep.subr.bf16.mxu1 %v16242_v37  ;;  %v16282_v37 = vld [vmem:[%s17577_s24 + $0x1a8] ss:$16 sps:$4 sm:$0xff]  }
 0x5a0   : > { %5846 = vmatpush1.bf16.msra.mxu0 %v16237_v34  ;;  %v16281_v34 = vld [vmem:[%s17577_s24 + $0x1a4] ss:$16 sps:$4 sm:$0xff]  }
 0x5a1   : > { %5887 = vmatpush1.bf16.msra.mxu1 %v16240_v36  ;;  %v16279_v36 = vld [vmem:[%s17577_s24 + $0x1a0] ss:$16 sps:$4 sm:$0xff]  }
 0x633   : > { %v5234_v38 = vpop.f32.mrf.mxu0 }
 0x635   : > { %v5236_v39 = vpop.f32.mrf.mxu0 }
 0x637   : > { %v5238_v40 = vpop.f32.mrf.mxu0 }
 0x638   : > { %v16243_v40 = vld [vmem:[%s17577_s24 + $0x60] ss:$16 sps:$4 sm:$0xff]  }
 0x639   : > { %v5239_v42 = vpop.f32.mrf.mxu0 }
 0x63a   : > { %v16246_v42 = vld [vmem:[%s17577_s24 + $0x68] ss:$16 sps:$4 sm:$0xff]  }
 0x63b   : > { %v5298_v43 = vpop.f32.mrf.mxu1 }
 0x63c   : > { %v5433_v53 = vadd.f32 %v5298_v43, %v5234_v38  ;;  %v16245_v38 = vld [vmem:[%s17577_s24 + $0x64] ss:$16 sps:$4 sm:$0xff]  }
 0x63d   : > { %v5300_v44 = vpop.f32.mrf.mxu1  ;;  %5847 = vmatprep.subr.bf16.mxu0 %v16245_v38  ;;  %v16251_v43 = vld [vmem:[%s17577_s24 + $0x44] ss:$16 sps:$4 sm:$0xff]  }
 0x63e   : > { %v5436_v2 = vadd.f32 %v5300_v44, %v5236_v39  ;;  %v16248_v39 = vld [vmem:[%s17577_s24 + $0x6c] ss:$16 sps:$4 sm:$0xff]   ;;  %5848 = vmatpush1.bf16.msra.mxu0 %v16243_v40  ;;  %v16287_v38 = vld [vmem:[%s17577_s24 + $0x184] ss:$16 sps:$4 sm:$0xff]   ;;  %v16285_v40 = vld [vmem:[%s17577_s24 + $0x180] ss:$16 sps:$4 sm:$0xff]  }
 0x63f   : > { %v5302_v45 = vpop.f32.mrf.mxu1  ;;  %5888 = vmatprep.subr.bf16.mxu1 %v16248_v39  ;;  %v16254_v44 = vld [vmem:[%s17577_s24 + $0x4c] ss:$16 sps:$4 sm:$0xff]   ;;  %5849 = vmatprep.subr.bf16.mxu0 %v16251_v43  ;;  %v16293_v43 = vld [vmem:[%s17577_s24 + $0x164] ss:$16 sps:$4 sm:$0xff]  }
 0x640   : > { %v16249_v45 = vld [vmem:[%s17577_s24 + $0x40] ss:$16 sps:$4 sm:$0xff]   ;;  %5889 = vmatpush1.bf16.msra.mxu1 %v16246_v42  ;;  %v16290_v39 = vld [vmem:[%s17577_s24 + $0x18c] ss:$16 sps:$4 sm:$0xff]   ;;  %v16288_v42 = vld [vmem:[%s17577_s24 + $0x188] ss:$16 sps:$4 sm:$0xff]  }
 0x641   : > { %v5303_v46 = vpop.f32.mrf.mxu1  ;;  %5890 = vmatprep.subr.bf16.mxu1 %v16254_v44  ;;  %v16296_v44 = vld [vmem:[%s17577_s24 + $0x16c] ss:$16 sps:$4 sm:$0xff]  }
 0x642   : > { %v16252_v46 = vld [vmem:[%s17577_s24 + $0x48] ss:$16 sps:$4 sm:$0xff]   ;;  %5850 = vmatpush1.bf16.msra.mxu0 %v16249_v45  ;;  %v16291_v45 = vld [vmem:[%s17577_s24 + $0x160] ss:$16 sps:$4 sm:$0xff]  }
 0x643   : > { %5851 = vmatprep.subr.bf16.mxu0 %v16257_v51  ;;  %v16299_v51 = vld [vmem:[%s17577_s24 + $0x144] ss:$16 sps:$4 sm:$0xff]  }
 0x644   : > { %5891 = vmatpush1.bf16.msra.mxu1 %v16252_v46  ;;  %v16294_v46 = vld [vmem:[%s17577_s24 + $0x168] ss:$16 sps:$4 sm:$0xff]  }
 0x653   : > { %v5362_v55 = vpop.f32.mrf.mxu0 }
 0x654   : > { %v5434_v54 = vadd.f32 %v5433_v53, %v5362_v55  ;;  %v5426_v57 = vpop.f32.mrf.mxu1  ;;  %v16260_v53 = vld [vmem:[%s17577_s24 + $0x2c] ss:$16 sps:$4 sm:$0xff]   ;;  %v16255_v55 = vld [vmem:[%s17577_s24 + $0x20] ss:$16 sps:$4 sm:$0xff]  }
 0x655   : > { %v5364_v59 = vpop.f32.mrf.mxu0  ;;  %5892 = vmatprep.subr.bf16.mxu1 %v16260_v53  ;;  %5852 = vmatpush1.bf16.msra.mxu0 %v16255_v55  ;;  %v16302_v53 = vld [vmem:[%s17577_s24 + $0x14c] ss:$16 sps:$4 sm:$0xff]   ;;  %v16297_v55 = vld [vmem:[%s17577_s24 + $0x140] ss:$16 sps:$4 sm:$0xff]  }
 0x656   : > { %v5435_v62 = vadd.f32 %v5434_v54, %v5426_v57  ;;  %v5437_v63 = vadd.f32 %v5436_v2, %v5364_v59  ;;  %v5428_v0 = vpop.f32.mrf.mxu1  ;;  %v16258_v2 = vld [vmem:[%s17577_s24 + $0x28] ss:$16 sps:$4 sm:$0xff]   ;;  %v16263_v54 = vld [vmem:[%s17577_s24 + $0x4] ss:$16 sps:$4 sm:$0xff]   ;;  %v16266_v57 = vld [vmem:[%s17577_s24 + $0xc] ss:$16 sps:$4 sm:$0xff]  }
 0x657   : > { %v5366_v4 = vpop.f32.mrf.mxu0  ;;  %5893 = vmatpush1.bf16.msra.mxu1 %v16258_v2  ;;  %5853 = vmatprep.subr.bf16.mxu0 %v16263_v54  ;;  %v16264_v59 = vld [vmem:[%s17577_s24 + $0x8] ss:$16 sps:$4 sm:$0xff]   ;;  %v16305_v54 = vld [vmem:[%s17577_s24 + $0x124] ss:$16 sps:$4 sm:$0xff]  }
 0x658   : > { %v5450_v5 = vadd.f32 %v5443_v58, %v5435_v62  ;;  %v5438_v7 = vadd.f32 %v5437_v63, %v5428_v0  ;;  %v5430_v8 = vpop.f32.mrf.mxu1  ;;  %v16261_v58 = vld [vmem:[%s17577_s24] ss:$16 sps:$4 sm:$0xff]   ;;  %5894 = vmatprep.subr.bf16.mxu1 %v16266_v57  ;;  %v16270_v63 = vld [vmem:[%s17577_s24 + $0x1e8] ss:$16 sps:$4 sm:$0xff]   ;;  %v16275_v0 = vld [vmem:[%s17577_s24 + $0x1c4] ss:$16 sps:$4 sm:$0xff]  }
 0x659   : > { %v5367_v10 = vpop.f32.mrf.mxu0  ;;  %5854 = vmatpush1.bf16.msra.mxu0 %v16261_v58  ;;  %v16267_v62 = vld [vmem:[%s17577_s24 + $0x1e0] ss:$16 sps:$4 sm:$0xff]   ;;  %v16300_v2 = vld [vmem:[%s17577_s24 + $0x148] ss:$16 sps:$4 sm:$0xff]   ;;  %v16308_v57 = vld [vmem:[%s17577_s24 + $0x12c] ss:$16 sps:$4 sm:$0xff]  }
 0x65a   : > { %v5451_v13 = vadd.f32 %v5447_v1, %v5438_v7  ;;  %v5431_v14 = vpop.f32.mrf.mxu1  ;;  %v18147_v16 = vadd.f32 %v17401_v15, %v5450_v5  ;;  %5855 = vmatprep.subr.bf16.mxu0 %v16269_v60  ;;  %v16278_v1 = vld [vmem:[%s17577_s24 + $0x1cc] ss:$16 sps:$4 sm:$0xff]   ;;  %v16273_v4 = vld [vmem:[%s17577_s24 + $0x1c0] ss:$16 sps:$4 sm:$0xff]   ;;  %v16276_v5 = vld [vmem:[%s17577_s24 + $0x1c8] ss:$16 sps:$4 sm:$0xff]  }
 0x65b   : > { %5895 = vmatpush1.bf16.msra.mxu1 %v16264_v59  ;;  %v17512_v7 = vmov 839922192   ;;  %v16303_v58 = vld [vmem:[%s17577_s24 + $0x120] ss:$16 sps:$4 sm:$0xff]   ;;  %v16306_v59 = vld [vmem:[%s17577_s24 + $0x128] ss:$16 sps:$4 sm:$0xff]  }
 0x65c   : > { %v18150_v18 = vadd.f32 %v17402_v17, %v5451_v13  ;;  %5896 = vmatprep.subr.bf16.mxu1 %v16272_v61  ;;  %v6469_v8 = vunpack.c.l.s4 %v17512_v7  ;;  %v16311_v60 = vld [vmem:[%s17577_s24 + $0x104] ss:$16 sps:$4 sm:$0xff]   ;;  %v16314_v61 = vld [vmem:[%s17577_s24 + $0x10c] ss:$16 sps:$4 sm:$0xff]  }
 0x65d   : > { %5856 = vmatpush2.bf16.msra.mxu0 %v16267_v62  ;;  %v16309_v62 = vld [vmem:[%s17577_s24 + $0x100] ss:$16 sps:$4 sm:$0xff]  }
 0x65e   : > { %v5454_v21 = vadd.f32 %v18150_v18, %v18147_v16  ;;  %5857 = vmatprep.subr.bf16.mxu0 %v16275_v0  ;;  %v6470_v9 = vunpack.c.0.s8 %v6469_v8  ;;  %v16317_v0 = vld [vmem:[%s19565_s6 + $0x74] ss:$8 sps:$4 sm:$0xff]   ;;  %v1688_v8 = vld [vmem:[%s17567_s14] sm:$0x3] }
 0x65f   : > { %5897 = vmatpush2.bf16.msra.mxu1 %v16270_v63  ;;  %v16312_v63 = vld [vmem:[%s17577_s24 + $0x108] ss:$16 sps:$4 sm:$0xff]  }
 0x660   : > { %5455 = vadd.xlane.f32.xlu0 %v5454_v21  ;;  %5898 = vmatprep.subr.bf16.mxu1 %v16278_v1  ;;  %v18203_v15 = vsub.s32 %v6470_v9, %v17836_v48  ;;  %v16320_v1 = vld [vmem:[%s19565_s6 + $0x174] ss:$8 sps:$4 sm:$0xff]   ;;  %v1689_v9 = vld [vmem:[%s17572_s19] sm:$0x3] }
 0x661   : > { %5858 = vmatpush2.bf16.msra.mxu0 %v16273_v4 }
 0x662   : > { %5859 = vmatprep.subr.bf16.mxu0 %v16281_v34  ;;  %v16327_v34 = vld [vmem:[%s19565_s6 + $0x50] ss:$8 sps:$4 sm:$0xff]  }
 0x663   : > { %5899 = vmatpush2.bf16.msra.mxu1 %v16276_v5 }
 0x664   : > { %6463 = vadd.xlane.f32.xlu0 %v6462_v22  ;;  %5900 = vmatprep.subr.bf16.mxu1 %v16284_v35  ;;  %v16330_v35 = vld [vmem:[%s19565_s6 + $0x150] ss:$8 sps:$4 sm:$0xff]  }
 0x665   : > { %5860 = vmatpush2.bf16.msra.mxu0 %v16279_v36  ;;  %v16335_v36 = vld [vmem:[%s19565_s6 + $0x44] ss:$8 sps:$4 sm:$0xff]  }
 0x666   : > { %5861 = vmatprep.subr.bf16.mxu0 %v16287_v38  ;;  %v16333_v38 = vld [vmem:[%s19565_s6 + $0x40] ss:$8 sps:$4 sm:$0xff]  }
 0x667   : > { %5901 = vmatpush2.bf16.msra.mxu1 %v16282_v37  ;;  %v16338_v37 = vld [vmem:[%s19565_s6 + $0x144] ss:$8 sps:$4 sm:$0xff]  }
 0x668   : > { %5902 = vmatprep.subr.bf16.mxu1 %v16290_v39  ;;  %v16336_v39 = vld [vmem:[%s19565_s6 + $0x140] ss:$8 sps:$4 sm:$0xff]  }
 0x669   : > { %5862 = vmatpush2.bf16.msra.mxu0 %v16285_v40  ;;  %v16341_v40 = vld [vmem:[%s19565_s6 + $0x34] ss:$8 sps:$4 sm:$0xff]  }
 0x66a   : > { %5863 = vmatprep.subr.bf16.mxu0 %v16293_v43  ;;  %v16339_v43 = vld [vmem:[%s19565_s6 + $0x30] ss:$8 sps:$4 sm:$0xff]  }
 0x66b   : > { %5903 = vmatpush2.bf16.msra.mxu1 %v16288_v42  ;;  %v16344_v42 = vld [vmem:[%s19565_s6 + $0x134] ss:$8 sps:$4 sm:$0xff]  }
 0x66c   : > { %5904 = vmatprep.subr.bf16.mxu1 %v16296_v44  ;;  %v16342_v44 = vld [vmem:[%s19565_s6 + $0x130] ss:$8 sps:$4 sm:$0xff]  }
 0x66d   : > { %5864 = vmatpush2.bf16.msra.mxu0 %v16291_v45  ;;  %v16347_v45 = vld [vmem:[%s19565_s6 + $0x24] ss:$8 sps:$4 sm:$0xff]  }
 0x66e   : > { %5865 = vmatprep.subr.bf16.mxu0 %v16299_v51  ;;  %v16345_v51 = vld [vmem:[%s19565_s6 + $0x20] ss:$8 sps:$4 sm:$0xff]  }
 0x66f   : > { %5905 = vmatpush2.bf16.msra.mxu1 %v16294_v46  ;;  %v16350_v46 = vld [vmem:[%s19565_s6 + $0x124] ss:$8 sps:$4 sm:$0xff]  }
 0x670   : > { %5906 = vmatprep.subr.bf16.mxu1 %v16302_v53  ;;  %v16348_v53 = vld [vmem:[%s19565_s6 + $0x120] ss:$8 sps:$4 sm:$0xff]  }
 0x671   : > { %5866 = vmatpush2.bf16.msra.mxu0 %v16297_v55  ;;  %v16353_v55 = vld [vmem:[%s19565_s6 + $0x14] ss:$8 sps:$4 sm:$0xff]  }
 0x672   : > { %5867 = vmatprep.subr.bf16.mxu0 %v16305_v54  ;;  %v16351_v54 = vld [vmem:[%s19565_s6 + $0x10] ss:$8 sps:$4 sm:$0xff]  }
 0x673   : > { %5907 = vmatpush2.bf16.msra.mxu1 %v16300_v2  ;;  %v16356_v2 = vld [vmem:[%s19565_s6 + $0x114] ss:$8 sps:$4 sm:$0xff]  }
 0x674   : > { %5908 = vmatprep.subr.bf16.mxu1 %v16308_v57  ;;  %v16354_v57 = vld [vmem:[%s19565_s6 + $0x110] ss:$8 sps:$4 sm:$0xff]  }
 0x675   : > { %5868 = vmatpush2.bf16.msra.mxu0 %v16303_v58  ;;  %v16359_v58 = vld [vmem:[%s19565_s6 + $0x4] ss:$8 sps:$4 sm:$0xff]  }
 0x676   : > { %5869 = vmatprep.subr.bf16.mxu0 %v16311_v60  ;;  %v16357_v60 = vld [vmem:[%s19565_s6] ss:$8 sps:$4 sm:$0xff]  }
 0x677   : > { %5909 = vmatpush2.bf16.msra.mxu1 %v16306_v59  ;;  %v16362_v59 = vld [vmem:[%s19565_s6 + $0x104] ss:$8 sps:$4 sm:$0xff]  }
 0x678   : > { %5910 = vmatprep.subr.bf16.mxu1 %v16314_v61  ;;  %v16360_v61 = vld [vmem:[%s19565_s6 + $0x100] ss:$8 sps:$4 sm:$0xff]  }
 0x679   : > { %5870 = vmatpush2.bf16.msra.mxu0 %v16309_v62  ;;  %v16365_v62 = vld [vmem:[%s19565_s6 + $0xf4] ss:$8 sps:$4 sm:$0xff]  }
 0x67a   : > { %6364 = vmatprep.subr.bf16.mxu0 %v16317_v0  ;;  %v16363_v0 = vld [vmem:[%s19565_s6 + $0xf0] ss:$8 sps:$4 sm:$0xff]  }
 0x67b   : > { %5911 = vmatpush2.bf16.msra.mxu1 %v16312_v63  ;;  %v16368_v63 = vld [vmem:[%s19565_s6 + $0x1f4] ss:$8 sps:$4 sm:$0xff]  }
 0x67c   : > { %6405 = vmatprep.subr.bf16.mxu1 %v16320_v1  ;;  %v16366_v1 = vld [vmem:[%s19565_s6 + $0x1f0] ss:$8 sps:$4 sm:$0xff]  }
 0x6e9   : > { %v5456_v10 = vpop.xlane.xlu0 %5455 }
 0x6ea   : > { %v5457_v12 = vmul.f32 0.00390625, %v5456_v10  ;;  %v5474_v10 = vrot.slane %v1688_v8, %v17839_v49 }
 0x6ec   : > { %v18197_v13 = vsub.f32 %v18147_v16, %v5457_v12  ;;  %v18200_v14 = vsub.f32 %v18150_v18, %v5457_v12  ;;  %v5478_v12 = vrot.slane %v1688_v8, %v17842_v50  ;;  %v16372_v8 = vld [vmem:[%s19565_s6 + $0x1e0] ss:$8 sps:$4 sm:$0xff]  }
 0x6ed   : > { %v6464_v17 = vpop.xlane.xlu0 %6463 }
 0x6ee   : > { %v5460_v19 = vmul.f32 %v18197_v13, %v18197_v13  ;;  %v5461_v20 = vmul.f32 %v18200_v14, %v18200_v14  ;;  %v6466_v21 = vmul.f32 0.001953125, %v6464_v17 }
 0x6f0   : > { %v5462_v22 = vadd.f32 %v5461_v20, %v5460_v19  ;;  %v6474_v23 = vrot.slane %v6466_v21, %v18203_v15  ;;  %v5487_v20 = vrot.slane %v1689_v9, %v17839_v49  ;;  %v5491_v21 = vrot.slane %v1689_v9, %v17842_v50  ;;  %v16377_v9 = vld [vmem:[%s19565_s6 + $0xd4] ss:$8 sps:$4 sm:$0xff]  }
 0x6f2   : > { %5463 = vadd.xlane.f32.xlu1 %v5462_v22  ;;  %v18211_v24 = vsub.f32 %v18124_v47, %v6474_v23  ;;  %v18214_v25 = vsub.f32 %v18137_v56, %v6474_v23 }
 0x6f4   : > { %v6478_v26 = vmul.f32 %v18211_v24, %v18211_v24  ;;  %v6479_v3 = vmul.f32 %v18214_v25, %v18214_v25 }
 0x6f6   : > { %v6482_v27 = vcombine.high %v6478_v26, %v6478_v26  ;;  %v6483_v28 = vcombine.high %v6479_v3, %v6479_v3  ;;  %v6486_v29 = vsel %vm4991_vm2, %v6478_v26, 0.0  ;;  %v6489_v30 = vsel %vm4991_vm2, %v6479_v3, 0.0 }
 0x6f8   : > { %v6487_v47 = vsel %vm4991_vm2, %v6482_v27, 0.0  ;;  %v6491_v31 = vsel %vm4991_vm2, %v6483_v28, 0.0 }
 0x6f9   : > { %v6488_v56 = vadd.f32 %v6487_v47, %v6486_v29  ;;  %v16315_v47 = vld [vmem:[%s19565_s6 + $0x70] ss:$8 sps:$4 sm:$0xff]  }
 0x6fb   : > { %v6490_v32 = vadd.f32 %v6489_v30, %v6488_v56  ;;  %v16318_v30 = vld [vmem:[%s19565_s6 + $0x170] ss:$8 sps:$4 sm:$0xff]   ;;  %v16323_v56 = vld [vmem:[%s19565_s6 + $0x64] ss:$8 sps:$4 sm:$0xff]  }
 0x6fd   : > { %v6492_v33 = vadd.f32 %v6491_v31, %v6490_v32  ;;  %v16324_v31 = vld [vmem:[%s19565_s6 + $0x160] ss:$8 sps:$4 sm:$0xff]   ;;  %v16329_v32 = vld [vmem:[%s19565_s6 + $0x54] ss:$8 sps:$4 sm:$0xff]  }
 0x6ff   : > { %6493 = vadd.xlane.f32.xlu1 %v6492_v33  ;;  %v16332_v33 = vld [vmem:[%s19565_s6 + $0x154] ss:$8 sps:$4 sm:$0xff]  }
 0x77b   : > { %v5464_v4 = vpop.xlane.xlu1 %5463 }
 0x77c   : > { %v5465_v5 = vmul.f32 0.00390625, %v5464_v4  ;;  %v16371_v4 = vld [vmem:[%s19565_s6 + $0xe4] ss:$8 sps:$4 sm:$0xff]  }
 0x77e   : > { %v5466_v7 = vadd.f32 1e-05, %v5465_v5  ;;  %v16374_v5 = vld [vmem:[%s19565_s6 + $0x1e4] ss:$8 sps:$4 sm:$0xff]  }
 0x780   : > { %17345 = vrsqrt.f32 %v5466_v7  ;;  %v16369_v7 = vld [vmem:[%s19565_s6 + $0xe0] ss:$8 sps:$4 sm:$0xff]  }
 0x78d   : > { %v17346_v17 = vpop.eup %17345 }
 0x78e   : > { %v5469_v19 = vmul.f32 %v17346_v17, %v18200_v14  ;;  %v5468_v22 = vmul.f32 %v17346_v17, %v18197_v13  ;;  %v16326_v14 = vld [vmem:[%s19565_s6 + $0x164] ss:$8 sps:$4 sm:$0xff]   ;;  %v16321_v13 = vld [vmem:[%s19565_s6 + $0x60] ss:$8 sps:$4 sm:$0xff]   ;;  %v16378_v17 = vld [vmem:[%s19565_s6 + $0x1d0] ss:$8 sps:$4 sm:$0xff]  }
 0x790   : > { %v5482_v23 = vmul.f32 %v5478_v12, %v5469_v19  ;;  %v5481_v26 = vmul.f32 %v5474_v10, %v5468_v22  ;;  %v16380_v10 = vld [vmem:[%s19565_s6 + $0x1d4] ss:$8 sps:$4 sm:$0xff]   ;;  %v16375_v12 = vld [vmem:[%s19565_s6 + $0xd0] ss:$8 sps:$4 sm:$0xff]   ;;  %v16383_v19 = vld [vmem:[%s19565_s6 + $0xc4] ss:$8 sps:$4 sm:$0xff]  }
 0x791   : > { %v16384_v22 = vld [vmem:[%s19565_s6 + $0x1c0] ss:$8 sps:$4 sm:$0xff]  }
 0x792   : > { %v5495_v3 = vadd.f32 %v5491_v21, %v5482_v23  ;;  %v5494_v27 = vadd.f32 %v5487_v20, %v5481_v26  ;;  %v16386_v20 = vld [vmem:[%s19565_s6 + $0x1c4] ss:$8 sps:$4 sm:$0xff]   ;;  %v16381_v21 = vld [vmem:[%s19565_s6 + $0xc0] ss:$8 sps:$4 sm:$0xff]   ;;  %v16389_v23 = vld [vmem:[%s19565_s6 + $0xb4] ss:$8 sps:$4 sm:$0xff]  }
 0x793   : > { %v16392_v26 = vld [vmem:[%s19565_s6 + $0x1b4] ss:$8 sps:$4 sm:$0xff]  }
 0x794   : > { %v5497_v28 = vpack.c.bf16 %v5495_v3, %v5495_v3  ;;  %v5496_v29 = vpack.c.bf16 %v5494_v27, %v5494_v27  ;;  %v16387_v3 = vld [vmem:[%s19565_s6 + $0xb0] ss:$8 sps:$4 sm:$0xff]  }
 0x795   : > { %v16390_v27 = vld [vmem:[%s19565_s6 + $0x1b0] ss:$8 sps:$4 sm:$0xff]  }
 0x796   : > { %5871 = vmatprep.mubr.bf16.mxu0 %v5497_v28  ;;  %5912 = vmatprep.mubr.bf16.mxu1 %v5497_v28  ;;  %v16395_v28 = vld [vmem:[%s19565_s6 + $0xa4] ss:$8 sps:$4 sm:$0xff]  }
 0x797   : > { %5872 = vmatmul.mubr.bf16.vlgmr.msra.gmra.mxu0 %v5496_v29  ;;  %5913 = vmatmul.mubr.bf16.vlgmr.msra.gmra.mxu1 %v5496_v29  ;;  %v16398_v29 = vld [vmem:[%s19565_s6 + $0x1a4] ss:$8 sps:$4 sm:$0xff]  }
 0x798   : > { %6365 = vmatpush1.bf16.msra.mxu0 %v16315_v47  ;;  %6406 = vmatpush1.bf16.msra.mxu1 %v16318_v30  ;;  %v16393_v47 = vld [vmem:[%s19565_s6 + $0xa0] ss:$8 sps:$4 sm:$0xff]  }
 0x799   : > { %6366 = vmatprep.subr.bf16.mxu0 %v16323_v56  ;;  %6407 = vmatprep.subr.bf16.mxu1 %v16326_v14  ;;  %v16396_v30 = vld [vmem:[%s19565_s6 + $0x1a0] ss:$8 sps:$4 sm:$0xff]   ;;  %v16401_v56 = vld [vmem:[%s19565_s6 + $0x94] ss:$8 sps:$4 sm:$0xff]  }
 0x79a   : > { %v16404_v14 = vld [vmem:[%s19565_s6 + $0x194] ss:$8 sps:$4 sm:$0xff]  }
 0x79c   : > { %6367 = vmatpush1.bf16.msra.mxu0 %v16321_v13  ;;  %6408 = vmatpush1.bf16.msra.mxu1 %v16324_v31  ;;  %v16399_v13 = vld [vmem:[%s19565_s6 + $0x90] ss:$8 sps:$4 sm:$0xff]  }
 0x79d   : > { %6368 = vmatprep.subr.bf16.mxu0 %v16329_v32  ;;  %6409 = vmatprep.subr.bf16.mxu1 %v16332_v33  ;;  %v16402_v31 = vld [vmem:[%s19565_s6 + $0x190] ss:$8 sps:$4 sm:$0xff]   ;;  %v16405_v32 = vld [vmem:[%s19565_s6 + $0x80] ss:$8 sps:$4 sm:$0xff]   ;;  %v16407_v33 = vld [vmem:[%s19565_s6 + $0x84] ss:$8 sps:$4 sm:$0xff]  }
 0x7a0   : > { %6369 = vmatpush1.bf16.msra.mxu0 %v16327_v34  ;;  %6410 = vmatpush1.bf16.msra.mxu1 %v16330_v35  ;;  %v16408_v34 = vld [vmem:[%s19565_s6 + $0x180] ss:$8 sps:$4 sm:$0xff]   ;;  %v16410_v35 = vld [vmem:[%s19565_s6 + $0x184] ss:$8 sps:$4 sm:$0xff]  }
 0x7a1   : > { %6370 = vmatprep.subr.bf16.mxu0 %v16335_v36  ;;  %6411 = vmatprep.subr.bf16.mxu1 %v16338_v37  ;;  %v16411_v36 = vld [vmem:[%s19566_s4 + $0x78] sm:$0xff]  }
 0x7a2   : > { %v16412_v37 = vld [vmem:[%s19566_s4 + $0xf8] sm:$0xff]  }
 0x7a4   : > { %6371 = vmatpush1.bf16.msra.mxu0 %v16333_v38  ;;  %6412 = vmatpush1.bf16.msra.mxu1 %v16336_v39  ;;  %v1754_v38 = vld [vmem:[%s19574_s11] sm:$0xf]  ;;  %v18324_v39 = vsub.s32 2, %v17836_v48  ;;  %s19577_s11 = sld [smem:[#allocation16_spill]] }
 0x7a5   : > { %6372 = vmatprep.subr.bf16.mxu0 %v16341_v40  ;;  %6413 = vmatprep.subr.bf16.mxu1 %v16344_v42  ;;  %v5502_v40 = vrot.slane %v1754_v38, %v17839_v49 }
 0x7a6   : > { %v5510_v42 = vrot.slane %v1754_v38, %v18324_v39 }
 0x7a8   : > { %6373 = vmatpush1.bf16.msra.mxu0 %v16339_v43  ;;  %6414 = vmatpush1.bf16.msra.mxu1 %v16342_v44  ;;  %v18329_v43 = vsub.s32 3, %v17836_v48 }
 0x7a9   : > { %6374 = vmatprep.subr.bf16.mxu0 %v16347_v45  ;;  %6415 = vmatprep.subr.bf16.mxu1 %v16350_v46  ;;  %v5506_v46 = vrot.slane %v1754_v38, %v17842_v50 }
 0x7ac   : > { %6375 = vmatpush1.bf16.msra.mxu0 %v16345_v51  ;;  %6416 = vmatpush1.bf16.msra.mxu1 %v16348_v53  ;;  %v5514_v51 = vrot.slane %v1754_v38, %v18329_v43 }
 0x7ad   : > { %6376 = vmatprep.subr.bf16.mxu0 %v16353_v55  ;;  %6417 = vmatprep.subr.bf16.mxu1 %v16356_v2 }
 0x7b0   : > { %6377 = vmatpush1.bf16.msra.mxu0 %v16351_v54  ;;  %6418 = vmatpush1.bf16.msra.mxu1 %v16354_v57 }
 0x7b1   : > { %6378 = vmatprep.subr.bf16.mxu0 %v16359_v58  ;;  %6419 = vmatprep.subr.bf16.mxu1 %v16362_v59 }
 0x7b4   : > { %6379 = vmatpush1.bf16.msra.mxu0 %v16357_v60  ;;  %6420 = vmatpush1.bf16.msra.mxu1 %v16360_v61 }
 0x7b5   : > { %6380 = vmatprep.subr.bf16.mxu0 %v16365_v62  ;;  %6421 = vmatprep.subr.bf16.mxu1 %v16368_v63 }
 0x7b8   : > { %6381 = vmatpush2.bf16.msra.mxu0 %v16363_v0  ;;  %6422 = vmatpush2.bf16.msra.mxu1 %v16366_v1 }
 0x7b9   : > { %6382 = vmatprep.subr.bf16.mxu0 %v16371_v4  ;;  %6423 = vmatprep.subr.bf16.mxu1 %v16374_v5 }
 0x7bc   : > { %6383 = vmatpush2.bf16.msra.mxu0 %v16369_v7  ;;  %6424 = vmatpush2.bf16.msra.mxu1 %v16372_v8 }
 0x7bd   : > { %6384 = vmatprep.subr.bf16.mxu0 %v16377_v9  ;;  %6425 = vmatprep.subr.bf16.mxu1 %v16380_v10 }
 0x7c0   : > { %6385 = vmatpush2.bf16.msra.mxu0 %v16375_v12  ;;  %6426 = vmatpush2.bf16.msra.mxu1 %v16378_v17 }
 0x7c1   : > { %6386 = vmatprep.subr.bf16.mxu0 %v16383_v19  ;;  %6427 = vmatprep.subr.bf16.mxu1 %v16386_v20 }
 0x7c4   : > { %6387 = vmatpush2.bf16.msra.mxu0 %v16381_v21  ;;  %6428 = vmatpush2.bf16.msra.mxu1 %v16384_v22  ;;  %v6494_v22 = vpop.xlane.xlu1 %6493 }
 0x7c5   : > { %6388 = vmatprep.subr.bf16.mxu0 %v16389_v23  ;;  %6429 = vmatprep.subr.bf16.mxu1 %v16392_v26  ;;  %v6495_v26 = vmul.f32 0.001953125, %v6494_v22 }
 0x7c8   : > { %6389 = vmatpush2.bf16.msra.mxu0 %v16387_v3  ;;  %6430 = vmatpush2.bf16.msra.mxu1 %v16390_v27 }
 0x7c9   : > { %6390 = vmatprep.subr.bf16.mxu0 %v16395_v28  ;;  %6431 = vmatprep.subr.bf16.mxu1 %v16398_v29  ;;  %v6496_v28 = vadd.f32 1e-05, %v6495_v26 }
 0x7cc   : > { %6391 = vmatpush2.bf16.msra.mxu0 %v16393_v47  ;;  %6432 = vmatpush2.bf16.msra.mxu1 %v16396_v30 }
 0x7cd   : > { %6392 = vmatprep.subr.bf16.mxu0 %v16401_v56  ;;  %6433 = vmatprep.subr.bf16.mxu1 %v16404_v14 }
 0x7d0   : > { %6393 = vmatpush2.bf16.msra.mxu0 %v16399_v13  ;;  %6434 = vmatpush2.bf16.msra.mxu1 %v16402_v31 }
 0x7d1   : > { %6394 = vmatprep.subr.bf16.mxu0 %v16407_v33  ;;  %6435 = vmatprep.subr.bf16.mxu1 %v16410_v35 }
 0x7d4   : > { %6395 = vmatpush2.bf16.msra.mxu0 %v16405_v32  ;;  %6436 = vmatpush2.bf16.msra.mxu1 %v16408_v34 }
 0x7d5   : > { %15142 = vmatprep.subr.bf16.mxu0 %v16411_v36  ;;  %15164 = vmatprep.subr.bf16.mxu1 %v16412_v37 }
 0x857   : > { %v5873_v44 = vpop.f32.mrf.mxu0  ;;  %v5914_v45 = vpop.f32.mrf.mxu1 }
 0x858   : > { %v18333_v53 = vadd.f32 %v5873_v44, %v5502_v40  ;;  %v18335_v55 = vadd.f32 %v5914_v45, %v5510_v42 }
 0x859   : > { %v5875_v2 = vpop.f32.mrf.mxu0  ;;  %v5916_v54 = vpop.f32.mrf.mxu1 }
 0x85a   : > { %v18338_v57 = vmul.f32 0.70710677, %v18333_v53  ;;  %v18341_v58 = vmul.f32 0.70710677, %v18335_v55  ;;  %v18343_v48 = vadd.f32 %v5875_v2, %v5506_v46  ;;  %v18345_v59 = vadd.f32 %v5916_v54, %v5514_v51 }
 0x85b   : > { %v5877_v60 = vpop.f32.mrf.mxu0  ;;  %v5918_v61 = vpop.f32.mrf.mxu1 }
 0x85c   : > { %v5925_v62 = vand.u32 2147483647, %v18338_v57  ;;  %v5927_v63 = vand.u32 2147483647, %v18341_v58  ;;  %v18350_v0 = vmul.f32 0.70710677, %v18343_v48 }
 0x85d   : > { %v18353_v1 = vmul.f32 0.70710677, %v18345_v59  ;;  %v5878_v4 = vpop.f32.mrf.mxu0  ;;  %v5919_v5 = vpop.f32.mrf.mxu1  ;;  %vm6005_vm4 = vcmp.ge.f32.partialorder %v18338_v57, 0.0  ;;  %vm6007_vm5 = vcmp.ge.f32.partialorder %v18341_v58, 0.0  ;;  %v6018_v58 = vmul.f32 0.5, %v18343_v48 }
 0x85e   : > { %v5929_v7 = vmul.f32 0.3275911, %v5925_v62  ;;  %v5931_v8 = vmul.f32 0.3275911, %v5927_v63  ;;  %v5926_v9 = vand.u32 2147483647, %v18350_v0 }
 0x85f   : > { %v5928_v10 = vand.u32 2147483647, %v18353_v1  ;;  %v5981_v3 = vsub.f32 0.0, %v5925_v62  ;;  %v5983_v27 = vsub.f32 0.0, %v5927_v63  ;;  %vm6006_vm6 = vcmp.ge.f32.partialorder %v18350_v0, 0.0 }
 0x860   : > { %v5933_v12 = vadd.f32 1.0, %v5929_v7  ;;  %v5935_v17 = vadd.f32 1.0, %v5931_v8  ;;  %v5930_v19 = vmul.f32 0.3275911, %v5926_v9  ;;  %v5982_v47 = vsub.f32 0.0, %v5926_v9 }
 0x861   : > { %v5932_v20 = vmul.f32 0.3275911, %v5928_v10  ;;  %v5985_v29 = vmul.f32 %v5981_v3, %v5925_v62  ;;  %v5987_v30 = vmul.f32 %v5983_v27, %v5927_v63  ;;  %v5984_v56 = vsub.f32 0.0, %v5928_v10 }
 0x862   : > { %17347 = vrcp.f32 %v5933_v12  ;;  %v5934_v21 = vadd.f32 1.0, %v5930_v19  ;;  %v5986_v33 = vmul.f32 %v5982_v47, %v5926_v9  ;;  %v1820_v19 = vld [vmem:[%s19575_s23] sm:$0xf]  ;;  %vm6008_vm7 = vcmp.ge.f32.partialorder %v18353_v1, 0.0  ;;  %s19578_s23 = sld [smem:[#allocation12_spill]] }
 0x863   : > { %17349 = vrcp.f32 %v5935_v17  ;;  %v5936_v23 = vadd.f32 1.0, %v5932_v20  ;;  %v5989_v32 = vmul.f32 1.442695, %v5985_v29  ;;  %v5993_v35 = vmul.f32 1.442695, %v5987_v30 }
 0x864   : > { %17351 = vrcp.f32 %v5934_v21  ;;  %v5988_v36 = vmul.f32 %v5984_v56, %v5928_v10  ;;  %v5991_v44 = vmul.f32 1.442695, %v5986_v33  ;;  %v6513_v29 = vrot.slane %v1820_v19, %v17839_v49 }
 0x865   : > { %17353 = vrcp.f32 %v5936_v23  ;;  %v6517_v47 = vrot.slane %v1820_v19, %v17842_v50  ;;  %v6020_v0 = vmul.f32 0.5, %v18345_v59  ;;  %v16414_v59 = vld [vmem:[%s19566_s4 + $0xb8] sm:$0xff]  }
 0x866   : > { %17355 = vrsqrt.f32 %v6496_v28  ;;  %v5995_v2 = vmul.f32 1.442695, %v5988_v36  ;;  %v1821_v28 = vld [vmem:[%s19576_s28] sm:$0xf]  ;;  %v6525_v36 = vrot.slane %v1820_v19, %v18329_v43  ;;  %s19579_s28 = sld [smem:[#allocation17_spill]] }
 0x867   : > { %17357 = vpow2.f32 %v5989_v32 }
 0x868   : > { %17359 = vpow2.f32 %v5993_v35  ;;  %v6521_v35 = vrot.slane %v1820_v19, %v18324_v39 }
 0x869   : > { %17361 = vpow2.f32 %v5991_v44 }
 0x86a   : > { %17363 = vpow2.f32 %v5995_v2  ;;  %v6526_v2 = vcombine.low %v6513_v29, %v6517_v47 }
 0x86f   : > { %v17348_v14 = vpop.eup %17347 }
 0x870   : > { %v17350_v13 = vpop.eup %17349  ;;  %v5945_v31 = vmul.f32 1.0614054, %v17348_v14 }
 0x871   : > { %v5947_v34 = vmul.f32 1.0614054, %v17350_v13  ;;  %v17352_v38 = vpop.eup %17351 }
 0x872   : > { %v5949_v37 = vadd.f32 -1.4531521, %v5945_v31  ;;  %v5946_v45 = vmul.f32 1.0614054, %v17352_v38  ;;  %v17354_v46 = vpop.eup %17353 }
 0x873   : > { %v5951_v40 = vadd.f32 -1.4531521, %v5947_v34  ;;  %v5948_v61 = vmul.f32 1.0614054, %v17354_v46  ;;  %v17356_v17 = vpop.eup %17355 }
 0x874   : > { %v5953_v42 = vmul.f32 %v17348_v14, %v5949_v37  ;;  %v5950_v60 = vadd.f32 -1.4531521, %v5946_v45  ;;  %v6505_v30 = vrot.slane %v17356_v17, %v18203_v15  ;;  %v17358_v34 = vpop.eup %17357 }
 0x875   : > { %v5955_v51 = vmul.f32 %v17350_v13, %v5951_v40  ;;  %v5952_v5 = vadd.f32 -1.4531521, %v5948_v61  ;;  %v17360_v40 = vpop.eup %17359 }
 0x876   : > { %v5957_v54 = vadd.f32 1.4214138, %v5953_v42  ;;  %v5954_v4 = vmul.f32 %v17352_v38, %v5950_v60  ;;  %v6536_v42 = vrot.slane %v1821_v28, %v17839_v49  ;;  %v6507_v15 = vmul.f32 %v6505_v30, %v18211_v24 }
 0x877   : > { %v5959_v62 = vadd.f32 1.4214138, %v5955_v51  ;;  %v5956_v10 = vmul.f32 %v17354_v46, %v5952_v5  ;;  %v6544_v60 = vrot.slane %v1821_v28, %v18324_v39  ;;  %v6527_v5 = vcombine.low %v6521_v35, %v6525_v36 }
 0x878   : > { %v5961_v63 = vmul.f32 %v17348_v14, %v5957_v54  ;;  %v5958_v9 = vadd.f32 1.4214138, %v5954_v4  ;;  %v6540_v54 = vrot.slane %v1821_v28, %v17842_v50  ;;  %v17362_v4 = vpop.eup %17361 }
 0x879   : > { %v5963_v7 = vmul.f32 %v17350_v13, %v5959_v62  ;;  %v5960_v22 = vadd.f32 1.4214138, %v5956_v10  ;;  %v17364_v17 = vpop.eup %17363 }
 0x87a   : > { %v5965_v8 = vadd.f32 -0.28449672, %v5961_v63  ;;  %v5962_v21 = vmul.f32 %v17352_v38, %v5958_v9  ;;  %v6549_v19 = vcombine.low %v6536_v42, %v6540_v54  ;;  %v16413_v42 = vld [vmem:[%s19566_s4 + $0x38] sm:$0xff]   ;;  %v16416_v54 = vld [vmem:[%s19566_s4 + $0xf0] sm:$0xff]  }
 0x87b   : > { %v5967_v12 = vadd.f32 -0.28449672, %v5963_v7  ;;  %v5964_v27 = vmul.f32 %v17354_v46, %v5960_v22  ;;  %v6508_v7 = vmul.f32 %v6505_v30, %v18214_v25 }
 0x87c   : > { %v5969_v20 = vmul.f32 %v17348_v14, %v5965_v8  ;;  %v5966_v3 = vadd.f32 -0.28449672, %v5962_v21 }
 0x87d   : > { %v5971_v23 = vmul.f32 %v17350_v13, %v5967_v12  ;;  %v5968_v33 = vadd.f32 -0.28449672, %v5964_v27 }
 0x87e   : > { %v5973_v26 = vadd.f32 0.2548296, %v5969_v20  ;;  %v5970_v32 = vmul.f32 %v17352_v38, %v5966_v3  ;;  %v6530_v20 = vmul.f32 %v6526_v2, %v6507_v15  ;;  %v16415_v2 = vld [vmem:[%s19566_s4 + $0x70] sm:$0xff]  }
 0x87f   : > { %v5975_v56 = vadd.f32 0.2548296, %v5971_v23  ;;  %v5972_v51 = vmul.f32 %v17354_v46, %v5968_v33  ;;  %v6019_v33 = vmul.f32 0.5, %v18335_v55 }
 0x880   : > { %v5977_v31 = vmul.f32 %v17348_v14, %v5973_v26  ;;  %v5974_v45 = vadd.f32 0.2548296, %v5970_v32  ;;  %v6531_v26 = vmul.f32 %v6527_v5, %v6508_v7  ;;  %v18372_v29 = vadd.f32 %v6549_v19, %v6530_v20  ;;  %v16422_v5 = vld [vmem:[%s19566_s4 + $0xa8] sm:$0xff]   ;;  %v16425_v7 = vld [vmem:[%s19566_s4 + $0x20] sm:$0xff]   ;;  %v16430_v19 = vld [vmem:[%s19566_s4 + $0x98] sm:$0xff]  }
 0x881   : > { %v5979_v37 = vmul.f32 %v17350_v13, %v5975_v56  ;;  %v5976_v63 = vadd.f32 0.2548296, %v5972_v51  ;;  %v6548_v13 = vrot.slane %v1821_v28, %v18329_v43  ;;  %v16432_v20 = vld [vmem:[%s19566_s4 + $0xd0] sm:$0xff]  }
 0x882   : > { %v5997_v44 = vmul.f32 %v17358_v34, %v5977_v31  ;;  %v5978_v62 = vmul.f32 %v17352_v38, %v5974_v45  ;;  %v6557_v36 = vcombine.high %v18372_v29, %v18372_v29 }
 0x883   : > { %v5999_v14 = vmul.f32 %v17360_v40, %v5979_v37  ;;  %v5980_v12 = vmul.f32 %v17354_v46, %v5976_v63  ;;  %v6550_v23 = vcombine.low %v6544_v60, %v6548_v13  ;;  %v6017_v46 = vmul.f32 0.5, %v18333_v53  ;;  %v16419_v60 = vld [vmem:[%s19566_s4 + $0x68] sm:$0xff]   ;;  %v16424_v13 = vld [vmem:[%s19566_s4 + $0xe0] sm:$0xff]  }
 0x884   : > { %v6001_v61 = vsub.f32 1.0, %v5997_v44  ;;  %v5998_v10 = vmul.f32 %v17362_v4, %v5978_v62  ;;  %v18388_v45 = vpack.c.bf16 %v6557_v36, %v6557_v36  ;;  %v16420_v62 = vld [vmem:[%s19566_s4 + $0xe8] sm:$0xff]   ;;  %v16423_v4 = vld [vmem:[%s19566_s4 + $0x60] sm:$0xff]  }
 0x885   : > { %v6003_v8 = vsub.f32 1.0, %v5999_v14  ;;  %v6000_v22 = vmul.f32 %v17364_v17, %v5980_v12  ;;  %v18376_v56 = vadd.f32 %v6550_v23, %v6531_v26  ;;  %v16417_v14 = vld [vmem:[%s19566_s4 + $0x30] sm:$0xff]   ;;  %v16421_v63 = vld [vmem:[%s19566_s4 + $0x28] sm:$0xff]   ;;  %v16429_v12 = vld [vmem:[%s19566_s4 + $0x18] sm:$0xff]  }
 0x886   : > { %v6009_v9 = vsub.f32 0.0, %v6001_v61  ;;  %v6002_v38 = vsub.f32 1.0, %v5998_v10  ;;  %v16428_v10 = vld [vmem:[%s19566_s4 + $0xd8] sm:$0xff]   ;;  %v16431_v17 = vld [vmem:[%s19566_s4 + $0x50] sm:$0xff]   ;;  %v16437_v23 = vld [vmem:[%s19566_s4 + $0x8] sm:$0xff]  }
 0x887   : > { %v6011_v24 = vsub.f32 0.0, %v6003_v8  ;;  %v6004_v28 = vsub.f32 1.0, %v6000_v22  ;;  %v6558_v48 = vcombine.high %v18376_v56, %v18376_v56  ;;  %v16436_v22 = vld [vmem:[%s19566_s4 + $0xc8] sm:$0xff]   ;;  %v16439_v26 = vld [vmem:[%s19566_s4 + $0x40] sm:$0xff]  }
 0x888   : > { %v6013_v21 = vsel %vm6005_vm4, %v6001_v61, %v6009_v9  ;;  %v6010_v25 = vsub.f32 0.0, %v6002_v38  ;;  %v16418_v61 = vld [vmem:[%s19566_s4 + $0xb0] sm:$0xff]   ;;  %v16426_v9 = vld [vmem:[%s19566_s4 + $0xa0] sm:$0xff]   ;;  %v16454_v36 = vld [vmem:[%s19566_s4 + $0x1a8] sm:$0xff]   ;;  %vm13552_vm4 = vcmask 523264  }
 0x889   : > { %v6015_v3 = vsel %vm6007_vm5, %v6003_v8, %v6011_v24  ;;  %v6021_v27 = vadd.f32 1.0, %v6013_v21  ;;  %v6012_v30 = vsub.f32 0.0, %v6004_v28  ;;  %v18392_v15 = vpack.c.bf16 %v6558_v48, %v6558_v48  ;;  %v16427_v8 = vld [vmem:[%s19566_s4 + $0x58] sm:$0xff]   ;;  %v16433_v24 = vld [vmem:[%s19566_s4 + $0x10] sm:$0xff]   ;;  %v16435_v21 = vld [vmem:[%s19566_s4 + $0x48] sm:$0xff]  }
 0x88a   : > { %v6023_v47 = vadd.f32 1.0, %v6015_v3  ;;  %v6014_v57 = vsel %vm6006_vm6, %v6002_v38, %v6010_v25  ;;  %v16434_v38 = vld [vmem:[%s19566_s4 + $0x90] sm:$0xff]   ;;  %v16438_v3 = vld [vmem:[%s19566_s4 + $0x88] sm:$0xff]   ;;  %v16441_v25 = vld [vmem:[%s19566_s4] sm:$0xff]   ;;  %vm13596_vm5 = vcmask 73728  }
 0x88b   : > { %v6022_v31 = vadd.f32 1.0, %v6014_v57  ;;  %v6025_v32 = vmul.f32 %v6021_v27, %v6017_v46  ;;  %v6016_v34 = vsel %vm6008_vm7, %v6004_v28, %v6012_v30  ;;  %v16440_v27 = vld [vmem:[%s19566_s4 + $0xc0] sm:$0xff]   ;;  %v16443_v28 = vld [vmem:[%s19566_s4 + $0x178] sm:$0xff]   ;;  %v18427_v30 = vpack.c.bf16 %v18372_v29, %v18372_v29  ;;  %v16449_v29 = vld [vmem:[%s19566_s4 + $0x130] sm:$0xff]  }
 0x88c   : > { %v6024_v35 = vadd.f32 1.0, %v6016_v34  ;;  %v6027_v37 = vmul.f32 %v6023_v47, %v6019_v33  ;;  %v16442_v46 = vld [vmem:[%s19566_s4 + $0x80] sm:$0xff]   ;;  %v16444_v47 = vld [vmem:[%s19566_s4 + $0x1f8] sm:$0xff]   ;;  %v16448_v33 = vld [vmem:[%s19566_s4 + $0x1f0] sm:$0xff]  }
 0x88d   : > { %v6026_v53 = vmul.f32 %v6022_v31, %v6018_v58  ;;  %v6029_v55 = vpack.c.bf16 %v6025_v32, %v6025_v32  ;;  %v16445_v57 = vld [vmem:[%s19566_s4 + $0x138] sm:$0xff]   ;;  %v16447_v58 = vld [vmem:[%s19566_s4 + $0x170] sm:$0xff]   ;;  %v18433_v32 = vpack.c.bf16 %v18376_v56, %v18376_v56  ;;  %v16451_v34 = vld [vmem:[%s19566_s4 + $0x168] sm:$0xff]  }
 0x88e   : > { %v6028_v40 = vmul.f32 %v6024_v35, %v6020_v0  ;;  %v6031_v51 = vpack.c.bf16 %v6027_v37, %v6027_v37  ;;  %v16446_v31 = vld [vmem:[%s19566_s4 + $0x1b8] sm:$0xff]   ;;  %v16450_v56 = vld [vmem:[%s19566_s4 + $0x1b0] sm:$0xff]   ;;  %v16452_v0 = vld [vmem:[%s19566_s4 + $0x1e8] sm:$0xff]  }
 0x88f   : > { %v6030_v1 = vpack.c.bf16 %v6026_v53, %v6026_v53  ;;  %v16453_v53 = vld [vmem:[%s19566_s4 + $0x128] sm:$0xff]   ;;  %v16455_v35 = vld [vmem:[%s19566_s4 + $0x160] sm:$0xff]  }
 0x890   : > { %v6032_v44 = vpack.c.bf16 %v6028_v40, %v6028_v40  ;;  %v16456_v37 = vld [vmem:[%s19566_s4 + $0x1e0] sm:$0xff]  }
 0x891   : > { %6396 = vmatprep.mubr.bf16.mxu0 %v6030_v1  ;;  %v16457_v48 = vld [vmem:[%s19566_s4 + $0x120] sm:$0xff]   ;;  %v16459_v1 = vld [vmem:[%s19566_s4 + $0x158] sm:$0xff]  }
 0x892   : > { %6397 = vmatmul.mubr.bf16.vlgmr.msra.gmra.mxu0 %v6029_v55  ;;  %6437 = vmatprep.mubr.bf16.mxu1 %v6032_v44  ;;  %v16458_v40 = vld [vmem:[%s19566_s4 + $0x1a0] sm:$0xff]   ;;  %v16461_v55 = vld [vmem:[%s19566_s4 + $0x118] sm:$0xff]   ;;  %v16463_v44 = vld [vmem:[%s19566_s4 + $0x150] sm:$0xff]  }
 0x893   : > { %15143 = vmatpush3.bf16.msra.mxu0 %v16413_v42  ;;  %6438 = vmatmul.mubr.bf16.vlgmr.msra.gmra.mxu1 %v6031_v51  ;;  %v16460_v42 = vld [vmem:[%s19566_s4 + $0x1d8] sm:$0xff]   ;;  %v16464_v51 = vld [vmem:[%s19566_s4 + $0x1d0] sm:$0xff]  }
 0x894   : > { %6789 = vmatprep.mubr.bf16.mxu0 %v18388_v45  ;;  %15165 = vmatpush3.bf16.msra.mxu1 %v16414_v59  ;;  %v16462_v59 = vld [vmem:[%s19566_s4 + $0x198] sm:$0xff]  }
 0x895   : > { %6829 = vmatprep.mubr.bf16.mxu1 %v18392_v15  ;;  %15144 = vmatprep.subr.bf16.mxu0 %v16415_v2  ;;  %v16465_v2 = vld [vmem:[%s19566_s4 + $0x110] sm:$0xff]  }
 0x896   : > { %15166 = vmatprep.subr.bf16.mxu1 %v16416_v54  ;;  %v16467_v54 = vld [vmem:[%s19566_s4 + $0x148] sm:$0xff]  }
 0x897   : > { %15145 = vmatpush3.bf16.msra.mxu0 %v16417_v14  ;;  %v16466_v14 = vld [vmem:[%s19566_s4 + $0x190] sm:$0xff]  }
 0x898   : > { %15146 = vmatprep.subr.bf16.mxu0 %v16419_v60  ;;  %15167 = vmatpush3.bf16.msra.mxu1 %v16418_v61  ;;  %v16468_v60 = vld [vmem:[%s19566_s4 + $0x1c8] sm:$0xff]  }
 0x899   : > { %15168 = vmatprep.subr.bf16.mxu1 %v16420_v62  ;;  %v16469_v61 = vld [vmem:[%s19566_s4 + $0x108] sm:$0xff]   ;;  %v16471_v62 = vld [vmem:[%s19566_s4 + $0x140] sm:$0xff]  }
 0x89b   : > { %15147 = vmatpush3.bf16.msra.mxu0 %v16421_v63  ;;  %v16470_v63 = vld [vmem:[%s19566_s4 + $0x188] sm:$0xff]  }
 0x89c   : > { %15148 = vmatprep.subr.bf16.mxu0 %v16423_v4  ;;  %15169 = vmatpush3.bf16.msra.mxu1 %v16422_v5  ;;  %v16472_v4 = vld [vmem:[%s19566_s4 + $0x1c0] sm:$0xff]  }
 0x89d   : > { %15170 = vmatprep.subr.bf16.mxu1 %v16424_v13  ;;  %v16473_v5 = vld [vmem:[%s19566_s4 + $0x100] sm:$0xff]   ;;  %v16475_v13 = vld [vmem:[%s19566_s4 + $0x278] sm:$0xff]  }
 0x89f   : > { %15149 = vmatpush3.bf16.msra.mxu0 %v16425_v7  ;;  %v16474_v7 = vld [vmem:[%s19566_s4 + $0x180] sm:$0xff]  }
 0x8a0   : > { %15150 = vmatprep.subr.bf16.mxu0 %v16427_v8  ;;  %15171 = vmatpush3.bf16.msra.mxu1 %v16426_v9  ;;  %v16476_v8 = vld [vmem:[%s19566_s4 + $0x2f8] sm:$0xff]  }
 0x8a1   : > { %15172 = vmatprep.subr.bf16.mxu1 %v16428_v10  ;;  %v16477_v9 = vld [vmem:[%s19566_s4 + $0x238] sm:$0xff]   ;;  %v16479_v10 = vld [vmem:[%s19566_s4 + $0x270] sm:$0xff]  }
 0x8a3   : > { %15151 = vmatpush3.bf16.msra.mxu0 %v16429_v12  ;;  %v16478_v12 = vld [vmem:[%s19566_s4 + $0x2b8] sm:$0xff]  }
 0x8a4   : > { %15152 = vmatprep.subr.bf16.mxu0 %v16431_v17  ;;  %15173 = vmatpush3.bf16.msra.mxu1 %v16430_v19  ;;  %v16480_v17 = vld [vmem:[%s19566_s4 + $0x2f0] sm:$0xff]  }
 0x8a5   : > { %15174 = vmatprep.subr.bf16.mxu1 %v16432_v20  ;;  %v16481_v19 = vld [vmem:[%s19566_s4 + $0x230] sm:$0xff]   ;;  %v16483_v20 = vld [vmem:[%s19566_s4 + $0x268] sm:$0xff]  }
 0x8a7   : > { %15153 = vmatpush3.bf16.msra.mxu0 %v16433_v24  ;;  %v16482_v24 = vld [vmem:[%s19566_s4 + $0x2b0] sm:$0xff]  }
 0x8a8   : > { %15154 = vmatprep.subr.bf16.mxu0 %v16435_v21  ;;  %15175 = vmatpush3.bf16.msra.mxu1 %v16434_v38  ;;  %v16484_v21 = vld [vmem:[%s19566_s4 + $0x2e8] sm:$0xff]  }
 0x8a9   : > { %15176 = vmatprep.subr.bf16.mxu1 %v16436_v22  ;;  %v16485_v38 = vld [vmem:[%s19566_s4 + $0x228] sm:$0xff]   ;;  %v16487_v22 = vld [vmem:[%s19566_s4 + $0x260] sm:$0xff]  }
 0x8ab   : > { %15155 = vmatpush3.bf16.msra.mxu0 %v16437_v23  ;;  %v16486_v23 = vld [vmem:[%s19566_s4 + $0x2a8] sm:$0xff]  }
 0x8ac   : > { %15156 = vmatprep.subr.bf16.mxu0 %v16439_v26  ;;  %15177 = vmatpush3.bf16.msra.mxu1 %v16438_v3  ;;  %v16488_v26 = vld [vmem:[%s19566_s4 + $0x2e0] sm:$0xff]  }
 0x8ad   : > { %15178 = vmatprep.subr.bf16.mxu1 %v16440_v27  ;;  %v16489_v3 = vld [vmem:[%s19566_s4 + $0x220] sm:$0xff]   ;;  %v16491_v27 = vld [vmem:[%s19566_s4 + $0x258] sm:$0xff]  }
 0x8af   : > { %15157 = vmatpush3.bf16.msra.mxu0 %v16441_v25  ;;  %v16490_v25 = vld [vmem:[%s19566_s4 + $0x2a0] sm:$0xff]  }
 0x8b0   : > { %15186 = vmatprep.subr.bf16.mxu0 %v16443_v28  ;;  %15179 = vmatpush3.bf16.msra.mxu1 %v16442_v46  ;;  %v16492_v28 = vld [vmem:[%s19566_s4 + $0x2d8] sm:$0xff]  }
 0x8b1   : > { %15208 = vmatprep.subr.bf16.mxu1 %v16444_v47  ;;  %v16493_v46 = vld [vmem:[%s19566_s4 + $0x218] sm:$0xff]   ;;  %v16495_v47 = vld [vmem:[%s19566_s4 + $0x250] sm:$0xff]  }
 0x8b2   : > { %6790 = vmatmul.mubr.bf16.vlgmr.msra.gmra.mxu0 %v18427_v30 }
 0x8b3   : > { %15187 = vmatpush3.bf16.msra.mxu0 %v16445_v57  ;;  %7061 = vmatprep.mubr.bf16.mxu0 %v18388_v45  ;;  %v16494_v57 = vld [vmem:[%s19566_s4 + $0x298] sm:$0xff]  }
 0x8b4   : > { %6830 = vmatmul.mubr.bf16.vlgmr.msra.gmra.mxu1 %v18433_v32  ;;  %15188 = vmatprep.subr.bf16.mxu0 %v16447_v58  ;;  %v16496_v58 = vld [vmem:[%s19566_s4 + $0x2d0] sm:$0xff]  }
 0x8b5   : > { %15209 = vmatpush3.bf16.msra.mxu1 %v16446_v31  ;;  %7101 = vmatprep.mubr.bf16.mxu1 %v18392_v15  ;;  %v16497_v31 = vld [vmem:[%s19566_s4 + $0x210] sm:$0xff]  }
 0x8b6   : > { %15210 = vmatprep.subr.bf16.mxu1 %v16448_v33  ;;  %v16499_v33 = vld [vmem:[%s19566_s4 + $0x248] sm:$0xff]  }
 0x8b7   : > { %15189 = vmatpush3.bf16.msra.mxu0 %v16449_v29  ;;  %v16498_v29 = vld [vmem:[%s19566_s4 + $0x290] sm:$0xff]  }
 0x8b8   : > { %15190 = vmatprep.subr.bf16.mxu0 %v16451_v34  ;;  %v16500_v34 = vld [vmem:[%s19566_s4 + $0x2c8] sm:$0xff]  }
 0x8b9   : > { %15211 = vmatpush3.bf16.msra.mxu1 %v16450_v56  ;;  %v16501_v56 = vld [vmem:[%s19566_s4 + $0x208] sm:$0xff]  }
 0x8ba   : > { %15212 = vmatprep.subr.bf16.mxu1 %v16452_v0  ;;  %v16503_v0 = vld [vmem:[%s19566_s4 + $0x240] sm:$0xff]  }
 0x8bb   : > { %15191 = vmatpush3.bf16.msra.mxu0 %v16453_v53  ;;  %v16502_v53 = vld [vmem:[%s19566_s4 + $0x288] sm:$0xff]  }
 0x8bc   : > { %15192 = vmatprep.subr.bf16.mxu0 %v16455_v35  ;;  %v16504_v35 = vld [vmem:[%s19566_s4 + $0x2c0] sm:$0xff]  }
 0x8bd   : > { %15213 = vmatpush3.bf16.msra.mxu1 %v16454_v36  ;;  %v16505_v36 = vld [vmem:[%s19566_s4 + $0x200] sm:$0xff]  }
 0x8be   : > { %15214 = vmatprep.subr.bf16.mxu1 %v16456_v37  ;;  %v16507_v37 = vld [vmem:[%s19566_s4 + $0x378] sm:$0xff]  }
 0x8bf   : > { %15193 = vmatpush3.bf16.msra.mxu0 %v16457_v48  ;;  %v16506_v48 = vld [vmem:[%s19566_s4 + $0x280] sm:$0xff]  }
 0x8c0   : > { %15194 = vmatprep.subr.bf16.mxu0 %v16459_v1  ;;  %v16508_v1 = vld [vmem:[%s19566_s4 + $0x3f8] sm:$0xff]  }
 0x8c1   : > { %15215 = vmatpush3.bf16.msra.mxu1 %v16458_v40  ;;  %v16509_v40 = vld [vmem:[%s19566_s4 + $0x338] sm:$0xff]  }
 0x8c2   : > { %15216 = vmatprep.subr.bf16.mxu1 %v16460_v42  ;;  %v16511_v42 = vld [vmem:[%s19566_s4 + $0x370] sm:$0xff]  }
 0x8c3   : > { %15195 = vmatpush3.bf16.msra.mxu0 %v16461_v55  ;;  %v16510_v55 = vld [vmem:[%s19566_s4 + $0x3b8] sm:$0xff]  }
 0x8c4   : > { %15196 = vmatprep.subr.bf16.mxu0 %v16463_v44  ;;  %v16512_v44 = vld [vmem:[%s19566_s4 + $0x3f0] sm:$0xff]  }
 0x8c5   : > { %15217 = vmatpush3.bf16.msra.mxu1 %v16462_v59  ;;  %v16513_v59 = vld [vmem:[%s19566_s4 + $0x330] sm:$0xff]  }
 0x8c6   : > { %15218 = vmatprep.subr.bf16.mxu1 %v16464_v51  ;;  %v16515_v51 = vld [vmem:[%s19566_s4 + $0x368] sm:$0xff]  }
 0x8c7   : > { %15197 = vmatpush3.bf16.msra.mxu0 %v16465_v2  ;;  %v16514_v2 = vld [vmem:[%s19566_s4 + $0x3b0] sm:$0xff]  }
 0x8c8   : > { %15198 = vmatprep.subr.bf16.mxu0 %v16467_v54  ;;  %v16516_v54 = vld [vmem:[%s19566_s4 + $0x3e8] sm:$0xff]  }
 0x8c9   : > { %15219 = vmatpush3.bf16.msra.mxu1 %v16466_v14  ;;  %v16517_v14 = vld [vmem:[%s19566_s4 + $0x328] sm:$0xff]  }
 0x8ca   : > { %15220 = vmatprep.subr.bf16.mxu1 %v16468_v60  ;;  %v16519_v60 = vld [vmem:[%s19566_s4 + $0x360] sm:$0xff]  }
 0x8cb   : > { %15199 = vmatpush3.bf16.msra.mxu0 %v16469_v61  ;;  %v16518_v61 = vld [vmem:[%s19566_s4 + $0x3a8] sm:$0xff]  }
 0x8cc   : > { %15200 = vmatprep.subr.bf16.mxu0 %v16471_v62  ;;  %v16520_v62 = vld [vmem:[%s19566_s4 + $0x3e0] sm:$0xff]  }
 0x8cd   : > { %15221 = vmatpush3.bf16.msra.mxu1 %v16470_v63  ;;  %v16521_v63 = vld [vmem:[%s19566_s4 + $0x320] sm:$0xff]  }
 0x8ce   : > { %15222 = vmatprep.subr.bf16.mxu1 %v16472_v4  ;;  %v16523_v4 = vld [vmem:[%s19566_s4 + $0x358] sm:$0xff]  }
 0x8cf   : > { %15201 = vmatpush3.bf16.msra.mxu0 %v16473_v5  ;;  %v16522_v5 = vld [vmem:[%s19566_s4 + $0x3a0] sm:$0xff]  }
 0x8d0   : > { %15230 = vmatprep.subr.bf16.mxu0 %v16475_v13  ;;  %v16524_v13 = vld [vmem:[%s19566_s4 + $0x3d8] sm:$0xff]  }
 0x8d1   : > { %15223 = vmatpush3.bf16.msra.mxu1 %v16474_v7  ;;  %v16525_v7 = vld [vmem:[%s19566_s4 + $0x318] sm:$0xff]  }
 0x8d2   : > { %7062 = vmatmul.mubr.bf16.vlgmr.msra.gmra.mxu0 %v18427_v30  ;;  %15252 = vmatprep.subr.bf16.mxu1 %v16476_v8  ;;  %v16527_v8 = vld [vmem:[%s19566_s4 + $0x350] sm:$0xff]  }
 0x8d3   : > { %15231 = vmatpush3.bf16.msra.mxu0 %v16477_v9  ;;  %7333 = vmatprep.mubr.bf16.mxu0 %v18388_v45  ;;  %v16526_v9 = vld [vmem:[%s19566_s4 + $0x398] sm:$0xff]  }
 0x8d4   : > { %7102 = vmatmul.mubr.bf16.vlgmr.msra.gmra.mxu1 %v18433_v32  ;;  %15232 = vmatprep.subr.bf16.mxu0 %v16479_v10  ;;  %v16528_v10 = vld [vmem:[%s19566_s4 + $0x3d0] sm:$0xff]  }
 0x8d5   : > { %15253 = vmatpush3.bf16.msra.mxu1 %v16478_v12  ;;  %7373 = vmatprep.mubr.bf16.mxu1 %v18392_v15  ;;  %v16529_v12 = vld [vmem:[%s19566_s4 + $0x310] sm:$0xff]  }
 0x8d6   : > { %15254 = vmatprep.subr.bf16.mxu1 %v16480_v17  ;;  %v16531_v17 = vld [vmem:[%s19566_s4 + $0x348] sm:$0xff]  }
 0x8d7   : > { %15233 = vmatpush3.bf16.msra.mxu0 %v16481_v19  ;;  %v16530_v19 = vld [vmem:[%s19566_s4 + $0x390] sm:$0xff]  }
 0x8d8   : > { %15234 = vmatprep.subr.bf16.mxu0 %v16483_v20  ;;  %v16532_v20 = vld [vmem:[%s19566_s4 + $0x3c8] sm:$0xff]  }
 0x8d9   : > { %15255 = vmatpush3.bf16.msra.mxu1 %v16482_v24  ;;  %v16533_v24 = vld [vmem:[%s19566_s4 + $0x308] sm:$0xff]  }
 0x8da   : > { %15256 = vmatprep.subr.bf16.mxu1 %v16484_v21  ;;  %v16535_v21 = vld [vmem:[%s19566_s4 + $0x340] sm:$0xff]  }
 0x8db   : > { %15235 = vmatpush3.bf16.msra.mxu0 %v16485_v38  ;;  %v16534_v38 = vld [vmem:[%s19566_s4 + $0x388] sm:$0xff]  }
 0x8dc   : > { %15236 = vmatprep.subr.bf16.mxu0 %v16487_v22  ;;  %v16536_v22 = vld [vmem:[%s19566_s4 + $0x3c0] sm:$0xff]  }
 0x8dd   : > { %15257 = vmatpush3.bf16.msra.mxu1 %v16486_v23  ;;  %v16537_v23 = vld [vmem:[%s19566_s4 + $0x300] sm:$0xff]  }
 0x8de   : > { %15258 = vmatprep.subr.bf16.mxu1 %v16488_v26  ;;  %v16539_v26 = vld [vmem:[%s19577_s11 + $0x78] sm:$0xff]  }
 0x8df   : > { %15237 = vmatpush3.bf16.msra.mxu0 %v16489_v3  ;;  %v16538_v3 = vld [vmem:[%s19566_s4 + $0x380] sm:$0xff]   ;;  %s19584_s4 = sld [smem:[#allocation21_spill]] }
 0x8e0   : > { %15238 = vmatprep.subr.bf16.mxu0 %v16491_v27  ;;  %v16540_v27 = vld [vmem:[%s19577_s11 + $0xf8] sm:$0xff]  }
 0x8e1   : > { %15259 = vmatpush3.bf16.msra.mxu1 %v16490_v25  ;;  %v16541_v25 = vld [vmem:[%s19577_s11 + $0x38] sm:$0xff]  }
 0x8e2   : > { %15260 = vmatprep.subr.bf16.mxu1 %v16492_v28  ;;  %v16543_v28 = vld [vmem:[%s19577_s11 + $0x70] sm:$0xff]  }
 0x8e3   : > { %15239 = vmatpush3.bf16.msra.mxu0 %v16493_v46  ;;  %v16542_v46 = vld [vmem:[%s19577_s11 + $0xb8] sm:$0xff]  }
 0x8e4   : > { %15240 = vmatprep.subr.bf16.mxu0 %v16495_v47  ;;  %v16544_v47 = vld [vmem:[%s19577_s11 + $0xf0] sm:$0xff]  }
 0x8e5   : > { %15261 = vmatpush3.bf16.msra.mxu1 %v16494_v57  ;;  %v16545_v57 = vld [vmem:[%s19577_s11 + $0x30] sm:$0xff]  }
 0x8e6   : > { %15262 = vmatprep.subr.bf16.mxu1 %v16496_v58  ;;  %v16547_v58 = vld [vmem:[%s19577_s11 + $0x68] sm:$0xff]  }
 0x8e7   : > { %15241 = vmatpush3.bf16.msra.mxu0 %v16497_v31  ;;  %v16546_v31 = vld [vmem:[%s19577_s11 + $0xb0] sm:$0xff]  }
 0x8e8   : > { %15242 = vmatprep.subr.bf16.mxu0 %v16499_v33  ;;  %v16548_v33 = vld [vmem:[%s19577_s11 + $0xe8] sm:$0xff]  }
 0x8e9   : > { %15263 = vmatpush3.bf16.msra.mxu1 %v16498_v29  ;;  %v16549_v29 = vld [vmem:[%s19577_s11 + $0x28] sm:$0xff]  }
 0x8ea   : > { %15264 = vmatprep.subr.bf16.mxu1 %v16500_v34  ;;  %v16551_v34 = vld [vmem:[%s19577_s11 + $0x60] sm:$0xff]  }
 0x8eb   : > { %15243 = vmatpush3.bf16.msra.mxu0 %v16501_v56  ;;  %v16550_v56 = vld [vmem:[%s19577_s11 + $0xa8] sm:$0xff]  }
 0x8ec   : > { %15244 = vmatprep.subr.bf16.mxu0 %v16503_v0  ;;  %v16552_v0 = vld [vmem:[%s19577_s11 + $0xe0] sm:$0xff]  }
 0x8ed   : > { %15265 = vmatpush3.bf16.msra.mxu1 %v16502_v53  ;;  %v16553_v53 = vld [vmem:[%s19577_s11 + $0x20] sm:$0xff]  }
 0x8ee   : > { %15266 = vmatprep.subr.bf16.mxu1 %v16504_v35  ;;  %v16555_v35 = vld [vmem:[%s19577_s11 + $0x58] sm:$0xff]  }
 0x8ef   : > { %15245 = vmatpush3.bf16.msra.mxu0 %v16505_v36  ;;  %v16554_v36 = vld [vmem:[%s19577_s11 + $0xa0] sm:$0xff]  }
 0x8f0   : > { %15274 = vmatprep.subr.bf16.mxu0 %v16507_v37  ;;  %v16556_v37 = vld [vmem:[%s19577_s11 + $0xd8] sm:$0xff]  }
 0x8f1   : > { %15267 = vmatpush3.bf16.msra.mxu1 %v16506_v48  ;;  %v16557_v48 = vld [vmem:[%s19577_s11 + $0x18] sm:$0xff]  }
 0x8f2   : > { %7334 = vmatmul.mubr.bf16.vlgmr.msra.gmra.mxu0 %v18427_v30  ;;  %15296 = vmatprep.subr.bf16.mxu1 %v16508_v1  ;;  %v16559_v1 = vld [vmem:[%s19577_s11 + $0x50] sm:$0xff]  }
 0x8f3   : > { %15275 = vmatpush3.bf16.msra.mxu0 %v16509_v40  ;;  %7605 = vmatprep.mubr.bf16.mxu0 %v18388_v45  ;;  %v16558_v40 = vld [vmem:[%s19577_s11 + $0x98] sm:$0xff]  }
 0x8f4   : > { %7374 = vmatmul.mubr.bf16.vlgmr.msra.gmra.mxu1 %v18433_v32  ;;  %15276 = vmatprep.subr.bf16.mxu0 %v16511_v42  ;;  %v16560_v42 = vld [vmem:[%s19577_s11 + $0xd0] sm:$0xff]  }
 0x8f5   : > { %15297 = vmatpush3.bf16.msra.mxu1 %v16510_v55  ;;  %7645 = vmatprep.mubr.bf16.mxu1 %v18392_v15  ;;  %v16561_v55 = vld [vmem:[%s19577_s11 + $0x10] sm:$0xff]  }
 0x8f6   : > { %15298 = vmatprep.subr.bf16.mxu1 %v16512_v44  ;;  %v16563_v44 = vld [vmem:[%s19577_s11 + $0x48] sm:$0xff]  }
 0x8f7   : > { %15277 = vmatpush3.bf16.msra.mxu0 %v16513_v59  ;;  %v16562_v59 = vld [vmem:[%s19577_s11 + $0x90] sm:$0xff]  }
 0x8f8   : > { %15278 = vmatprep.subr.bf16.mxu0 %v16515_v51  ;;  %v16564_v51 = vld [vmem:[%s19577_s11 + $0xc8] sm:$0xff]  }
 0x8f9   : > { %15299 = vmatpush3.bf16.msra.mxu1 %v16514_v2  ;;  %v16565_v2 = vld [vmem:[%s19577_s11 + $0x8] sm:$0xff]  }
 0x8fa   : > { %15300 = vmatprep.subr.bf16.mxu1 %v16516_v54  ;;  %v16567_v54 = vld [vmem:[%s19577_s11 + $0x40] sm:$0xff]  }
 0x8fb   : > { %15279 = vmatpush3.bf16.msra.mxu0 %v16517_v14  ;;  %v16566_v14 = vld [vmem:[%s19577_s11 + $0x88] sm:$0xff]  }
 0x8fc   : > { %15280 = vmatprep.subr.bf16.mxu0 %v16519_v60  ;;  %v16568_v60 = vld [vmem:[%s19577_s11 + $0xc0] sm:$0xff]  }
 0x8fd   : > { %15301 = vmatpush3.bf16.msra.mxu1 %v16518_v61  ;;  %v16569_v61 = vld [vmem:[%s19577_s11] sm:$0xff]  }
 0x8fe   : > { %15302 = vmatprep.subr.bf16.mxu1 %v16520_v62  ;;  %v16571_v62 = vld [vmem:[%s19577_s11 + $0x178] sm:$0xff]  }
 0x8ff   : > { %15281 = vmatpush3.bf16.msra.mxu0 %v16521_v63  ;;  %v16570_v63 = vld [vmem:[%s19577_s11 + $0x80] sm:$0xff]  }
 0x900   : > { %15282 = vmatprep.subr.bf16.mxu0 %v16523_v4  ;;  %v16572_v4 = vld [vmem:[%s19577_s11 + $0x1f8] sm:$0xff]  }
 0x901   : > { %15303 = vmatpush3.bf16.msra.mxu1 %v16522_v5  ;;  %v16573_v5 = vld [vmem:[%s19577_s11 + $0x138] sm:$0xff]  }
 0x902   : > { %15304 = vmatprep.subr.bf16.mxu1 %v16524_v13  ;;  %v16575_v13 = vld [vmem:[%s19577_s11 + $0x170] sm:$0xff]  }
 0x903   : > { %15283 = vmatpush3.bf16.msra.mxu0 %v16525_v7  ;;  %v16574_v7 = vld [vmem:[%s19577_s11 + $0x1b8] sm:$0xff]  }
 0x904   : > { %15284 = vmatprep.subr.bf16.mxu0 %v16527_v8  ;;  %v16576_v8 = vld [vmem:[%s19577_s11 + $0x1f0] sm:$0xff]  }
 0x905   : > { %15305 = vmatpush3.bf16.msra.mxu1 %v16526_v9  ;;  %v16577_v9 = vld [vmem:[%s19577_s11 + $0x130] sm:$0xff]  }
 0x906   : > { %15306 = vmatprep.subr.bf16.mxu1 %v16528_v10  ;;  %v16579_v10 = vld [vmem:[%s19577_s11 + $0x168] sm:$0xff]  }
 0x907   : > { %15285 = vmatpush3.bf16.msra.mxu0 %v16529_v12  ;;  %v16578_v12 = vld [vmem:[%s19577_s11 + $0x1b0] sm:$0xff]  }
 0x908   : > { %15286 = vmatprep.subr.bf16.mxu0 %v16531_v17  ;;  %v16580_v17 = vld [vmem:[%s19577_s11 + $0x1e8] sm:$0xff]  }
 0x909   : > { %15307 = vmatpush3.bf16.msra.mxu1 %v16530_v19  ;;  %v16581_v19 = vld [vmem:[%s19577_s11 + $0x128] sm:$0xff]  }
 0x90a   : > { %15308 = vmatprep.subr.bf16.mxu1 %v16532_v20  ;;  %v16583_v20 = vld [vmem:[%s19577_s11 + $0x160] sm:$0xff]  }
 0x90b   : > { %15287 = vmatpush3.bf16.msra.mxu0 %v16533_v24  ;;  %v16582_v24 = vld [vmem:[%s19577_s11 + $0x1a8] sm:$0xff]  }
 0x90c   : > { %15288 = vmatprep.subr.bf16.mxu0 %v16535_v21  ;;  %v16584_v21 = vld [vmem:[%s19577_s11 + $0x1e0] sm:$0xff]  }
 0x90d   : > { %15309 = vmatpush3.bf16.msra.mxu1 %v16534_v38  ;;  %v16585_v38 = vld [vmem:[%s19577_s11 + $0x120] sm:$0xff]  }
 0x90e   : > { %15310 = vmatprep.subr.bf16.mxu1 %v16536_v22  ;;  %v16587_v22 = vld [vmem:[%s19577_s11 + $0x158] sm:$0xff]  }
 0x90f   : > { %15289 = vmatpush3.bf16.msra.mxu0 %v16537_v23  ;;  %v16586_v23 = vld [vmem:[%s19577_s11 + $0x1a0] sm:$0xff]  }
 0x910   : > { %15318 = vmatprep.subr.bf16.mxu0 %v16539_v26  ;;  %v16588_v26 = vld [vmem:[%s19577_s11 + $0x1d8] sm:$0xff]  }
 0x911   : > { %15311 = vmatpush3.bf16.msra.mxu1 %v16538_v3  ;;  %v16589_v3 = vld [vmem:[%s19577_s11 + $0x118] sm:$0xff]  }
 0x912   : > { %7606 = vmatmul.mubr.bf16.vlgmr.msra.gmra.mxu0 %v18427_v30  ;;  %15340 = vmatprep.subr.bf16.mxu1 %v16540_v27  ;;  %v16591_v27 = vld [vmem:[%s19577_s11 + $0x150] sm:$0xff]  }
 0x913   : > { %15319 = vmatpush3.bf16.msra.mxu0 %v16541_v25  ;;  %7877 = vmatprep.mubr.bf16.mxu0 %v18388_v45  ;;  %v16590_v25 = vld [vmem:[%s19577_s11 + $0x198] sm:$0xff]  }
 0x914   : > { %7646 = vmatmul.mubr.bf16.vlgmr.msra.gmra.mxu1 %v18433_v32  ;;  %15320 = vmatprep.subr.bf16.mxu0 %v16543_v28  ;;  %v16592_v28 = vld [vmem:[%s19577_s11 + $0x1d0] sm:$0xff]  }
 0x915   : > { %15341 = vmatpush3.bf16.msra.mxu1 %v16542_v46  ;;  %7917 = vmatprep.mubr.bf16.mxu1 %v18392_v15  ;;  %v16593_v46 = vld [vmem:[%s19577_s11 + $0x110] sm:$0xff]  }
 0x916   : > { %15342 = vmatprep.subr.bf16.mxu1 %v16544_v47  ;;  %v16595_v47 = vld [vmem:[%s19577_s11 + $0x148] sm:$0xff]  }
 0x917   : > { %15321 = vmatpush3.bf16.msra.mxu0 %v16545_v57  ;;  %v16594_v57 = vld [vmem:[%s19577_s11 + $0x190] sm:$0xff]  }
 0x918   : > { %15322 = vmatprep.subr.bf16.mxu0 %v16547_v58  ;;  %v16596_v58 = vld [vmem:[%s19577_s11 + $0x1c8] sm:$0xff]  }
 0x919   : > { %15343 = vmatpush3.bf16.msra.mxu1 %v16546_v31  ;;  %v16597_v31 = vld [vmem:[%s19577_s11 + $0x108] sm:$0xff]  }
 0x91a   : > { %15344 = vmatprep.subr.bf16.mxu1 %v16548_v33  ;;  %v16599_v33 = vld [vmem:[%s19577_s11 + $0x140] sm:$0xff]  }
 0x91b   : > { %15323 = vmatpush3.bf16.msra.mxu0 %v16549_v29  ;;  %v16598_v29 = vld [vmem:[%s19577_s11 + $0x188] sm:$0xff]  }
 0x91c   : > { %15324 = vmatprep.subr.bf16.mxu0 %v16551_v34  ;;  %v16600_v34 = vld [vmem:[%s19577_s11 + $0x1c0] sm:$0xff]  }
 0x91d   : > { %15345 = vmatpush3.bf16.msra.mxu1 %v16550_v56  ;;  %v16601_v56 = vld [vmem:[%s19577_s11 + $0x100] sm:$0xff]  }
 0x91e   : > { %15346 = vmatprep.subr.bf16.mxu1 %v16552_v0  ;;  %v16603_v0 = vld [vmem:[%s19577_s11 + $0x278] sm:$0xff]  }
 0x91f   : > { %15325 = vmatpush3.bf16.msra.mxu0 %v16553_v53  ;;  %v1819_v53 = vld [vmem:[%s19578_s23] sm:$0x3]  ;;  %s19580_s23 = sld [smem:[#allocation18_spill]] }
 0x920   : > { %15326 = vmatprep.subr.bf16.mxu0 %v16555_v35  ;;  %v16602_v35 = vld [vmem:[%s19577_s11 + $0x180] sm:$0xff]  }
 0x921   : > { %15347 = vmatpush3.bf16.msra.mxu1 %v16554_v36  ;;  %v16604_v36 = vld [vmem:[%s19577_s11 + $0x2f8] sm:$0xff]  }
 0x922   : > { %15348 = vmatprep.subr.bf16.mxu1 %v16556_v37  ;;  %v6037_v37 = vrot.slane %v1819_v53, %v17839_v49 }
 0x923   : > { %15327 = vmatpush3.bf16.msra.mxu0 %v16557_v48  ;;  %v16605_v48 = vld [vmem:[%s19577_s11 + $0x238] sm:$0xff]  }
 0x924   : > { %15328 = vmatprep.subr.bf16.mxu0 %v16559_v1  ;;  %v16607_v1 = vld [vmem:[%s19577_s11 + $0x270] sm:$0xff]  }
 0x925   : > { %15349 = vmatpush3.bf16.msra.mxu1 %v16558_v40  ;;  %v16606_v40 = vld [vmem:[%s19577_s11 + $0x2b8] sm:$0xff]  }
 0x926   : > { %15350 = vmatprep.subr.bf16.mxu1 %v16560_v42  ;;  %v6041_v42 = vrot.slane %v1819_v53, %v17842_v50  ;;  %v16639_v53 = vld [vmem:[%s19577_s11 + $0x370] sm:$0xff]  }
 0x927   : > { %15329 = vmatpush3.bf16.msra.mxu0 %v16561_v55 }
 0x928   : > { %15330 = vmatprep.subr.bf16.mxu0 %v16563_v44  ;;  %v16608_v44 = vld [vmem:[%s19577_s11 + $0x2f0] sm:$0xff]  }
 0x929   : > { %15351 = vmatpush3.bf16.msra.mxu1 %v16562_v59 }
 0x92a   : > { %15352 = vmatprep.subr.bf16.mxu1 %v16564_v51  ;;  %v16609_v51 = vld [vmem:[%s19577_s11 + $0x230] sm:$0xff]  }
 0x92b   : > { %15331 = vmatpush3.bf16.msra.mxu0 %v16565_v2 }
 0x92c   : > { %15332 = vmatprep.subr.bf16.mxu0 %v16567_v54 }
 0x92d   : > { %15353 = vmatpush3.bf16.msra.mxu1 %v16566_v14  ;;  %v16611_v14 = vld [vmem:[%s19577_s11 + $0x268] sm:$0xff]  }
 0x92e   : > { %15354 = vmatprep.subr.bf16.mxu1 %v16568_v60 }
 0x92f   : > { %15333 = vmatpush3.bf16.msra.mxu0 %v16569_v61 }
 0x930   : > { %15362 = vmatprep.subr.bf16.mxu0 %v16571_v62  ;;  %v16610_v62 = vld [vmem:[%s19577_s11 + $0x2b0] sm:$0xff]  }
 0x931   : > { %15355 = vmatpush3.bf16.msra.mxu1 %v16570_v63 }
 0x932   : > { %7878 = vmatmul.mubr.bf16.vlgmr.msra.gmra.mxu0 %v18427_v30  ;;  %15384 = vmatprep.subr.bf16.mxu1 %v16572_v4 }
 0x933   : > { %15363 = vmatpush3.bf16.msra.mxu0 %v16573_v5  ;;  %8149 = vmatprep.mubr.bf16.mxu0 %v18388_v45  ;;  %v16612_v5 = vld [vmem:[%s19577_s11 + $0x2e8] sm:$0xff]  }
 0x934   : > { %7918 = vmatmul.mubr.bf16.vlgmr.msra.gmra.mxu1 %v18433_v32  ;;  %15364 = vmatprep.subr.bf16.mxu0 %v16575_v13 }
 0x935   : > { %15385 = vmatpush3.bf16.msra.mxu1 %v16574_v7  ;;  %8189 = vmatprep.mubr.bf16.mxu1 %v18392_v15  ;;  %v16613_v7 = vld [vmem:[%s19577_s11 + $0x228] sm:$0xff]  }
 0x936   : > { %15386 = vmatprep.subr.bf16.mxu1 %v16576_v8 }
 0x937   : > { %15365 = vmatpush3.bf16.msra.mxu0 %v16577_v9 }
 0x938   : > { %15366 = vmatprep.subr.bf16.mxu0 %v16579_v10  ;;  %v16615_v10 = vld [vmem:[%s19577_s11 + $0x260] sm:$0xff]  }
 0x939   : > { %15387 = vmatpush3.bf16.msra.mxu1 %v16578_v12  ;;  %v16614_v12 = vld [vmem:[%s19577_s11 + $0x2a8] sm:$0xff]  }
 0x93a   : > { %15388 = vmatprep.subr.bf16.mxu1 %v16580_v17 }
 0x93b   : > { %15367 = vmatpush3.bf16.msra.mxu0 %v16581_v19  ;;  %v16616_v19 = vld [vmem:[%s19577_s11 + $0x2e0] sm:$0xff]  }
 0x93c   : > { %15368 = vmatprep.subr.bf16.mxu0 %v16583_v20  ;;  %v16617_v20 = vld [vmem:[%s19577_s11 + $0x220] sm:$0xff]  }
 0x93d   : > { %15389 = vmatpush3.bf16.msra.mxu1 %v16582_v24  ;;  %v16619_v24 = vld [vmem:[%s19577_s11 + $0x258] sm:$0xff]  }
 0x93e   : > { %15390 = vmatprep.subr.bf16.mxu1 %v16584_v21  ;;  %v16618_v21 = vld [vmem:[%s19577_s11 + $0x2a0] sm:$0xff]  }
 0x93f   : > { %15369 = vmatpush3.bf16.msra.mxu0 %v16585_v38  ;;  %v16620_v38 = vld [vmem:[%s19577_s11 + $0x2d8] sm:$0xff]  }
 0x940   : > { %15370 = vmatprep.subr.bf16.mxu0 %v16587_v22  ;;  %v16621_v22 = vld [vmem:[%s19577_s11 + $0x218] sm:$0xff]  }
 0x941   : > { %15391 = vmatpush3.bf16.msra.mxu1 %v16586_v23  ;;  %v16623_v23 = vld [vmem:[%s19577_s11 + $0x250] sm:$0xff]  }
 0x942   : > { %15392 = vmatprep.subr.bf16.mxu1 %v16588_v26  ;;  %v16622_v26 = vld [vmem:[%s19577_s11 + $0x298] sm:$0xff]  }
 0x943   : > { %15371 = vmatpush3.bf16.msra.mxu0 %v16589_v3  ;;  %v16624_v3 = vld [vmem:[%s19577_s11 + $0x2d0] sm:$0xff]  }
 0x944   : > { %15372 = vmatprep.subr.bf16.mxu0 %v16591_v27  ;;  %v16625_v27 = vld [vmem:[%s19577_s11 + $0x210] sm:$0xff]  }
 0x945   : > { %15393 = vmatpush3.bf16.msra.mxu1 %v16590_v25  ;;  %v16627_v25 = vld [vmem:[%s19577_s11 + $0x248] sm:$0xff]  }
 0x946   : > { %15394 = vmatprep.subr.bf16.mxu1 %v16592_v28  ;;  %v16626_v28 = vld [vmem:[%s19577_s11 + $0x290] sm:$0xff]  }
 0x947   : > { %15373 = vmatpush3.bf16.msra.mxu0 %v16593_v46  ;;  %v16628_v46 = vld [vmem:[%s19577_s11 + $0x2c8] sm:$0xff]  }
 0x948   : > { %15374 = vmatprep.subr.bf16.mxu0 %v16595_v47  ;;  %v16629_v47 = vld [vmem:[%s19577_s11 + $0x208] sm:$0xff]  }
 0x949   : > { %15395 = vmatpush3.bf16.msra.mxu1 %v16594_v57  ;;  %v16631_v57 = vld [vmem:[%s19577_s11 + $0x240] sm:$0xff]  }
 0x94a   : > { %15396 = vmatprep.subr.bf16.mxu1 %v16596_v58  ;;  %v16630_v58 = vld [vmem:[%s19577_s11 + $0x288] sm:$0xff]  }
 0x94b   : > { %15375 = vmatpush3.bf16.msra.mxu0 %v16597_v31  ;;  %v16632_v31 = vld [vmem:[%s19577_s11 + $0x2c0] sm:$0xff]  }
 0x94c   : > { %15376 = vmatprep.subr.bf16.mxu0 %v16599_v33  ;;  %v16633_v33 = vld [vmem:[%s19577_s11 + $0x200] sm:$0xff]  }
 0x94d   : > { %15397 = vmatpush3.bf16.msra.mxu1 %v16598_v29  ;;  %v16635_v29 = vld [vmem:[%s19577_s11 + $0x378] sm:$0xff]  }
 0x94e   : > { %15398 = vmatprep.subr.bf16.mxu1 %v16600_v34  ;;  %v16634_v34 = vld [vmem:[%s19577_s11 + $0x280] sm:$0xff]  }
 0x94f   : > { %15377 = vmatpush3.bf16.msra.mxu0 %v16601_v56  ;;  %v16636_v56 = vld [vmem:[%s19577_s11 + $0x3f8] sm:$0xff]  }
 0x950   : > { %15406 = vmatprep.subr.bf16.mxu0 %v16603_v0  ;;  %v16637_v0 = vld [vmem:[%s19577_s11 + $0x338] sm:$0xff]  }
 0x951   : > { %15399 = vmatpush3.bf16.msra.mxu1 %v16602_v35  ;;  %v16638_v35 = vld [vmem:[%s19577_s11 + $0x3b8] sm:$0xff]  }
 0x952   : > { %8150 = vmatmul.mubr.bf16.vlgmr.msra.gmra.mxu0 %v18427_v30  ;;  %15428 = vmatprep.subr.bf16.mxu1 %v16604_v36  ;;  %v6398_v55 = vpop.f32.mrf.mxu0 }
 0x953   : > { %v6399_v59 = vadd.f32 %v6398_v55, %v6037_v37  ;;  %15407 = vmatpush3.bf16.msra.mxu0 %v16605_v48  ;;  %8421 = vmatprep.mubr.bf16.mxu0 %v18388_v45  ;;  %v6439_v2 = vpop.f32.mrf.mxu1  ;;  %v16640_v37 = vld [vmem:[%s19577_s11 + $0x3f0] sm:$0xff]  }
 0x954   : > { %8190 = vmatmul.mubr.bf16.vlgmr.msra.gmra.mxu1 %v18433_v32  ;;  %v6400_v54 = vpop.f32.mrf.mxu0  ;;  %15408 = vmatprep.subr.bf16.mxu0 %v16607_v1  ;;  %v16641_v48 = vld [vmem:[%s19577_s11 + $0x330] sm:$0xff]  }
 0x955   : > { %v18624_v60 = vadd.f32 %v6439_v2, %v6399_v59  ;;  %15429 = vmatpush3.bf16.msra.mxu1 %v16606_v40  ;;  %8461 = vmatprep.mubr.bf16.mxu1 %v18392_v15  ;;  %v6401_v61 = vadd.f32 %v6400_v54, %v6041_v42  ;;  %v6441_v63 = vpop.f32.mrf.mxu1  ;;  %v16643_v42 = vld [vmem:[%s19577_s11 + $0x368] sm:$0xff]  }
 0x956   : > { %15430 = vmatprep.subr.bf16.mxu1 %v16608_v44  ;;  %v6402_v4 = vpop.f32.mrf.mxu0  ;;  %v16642_v44 = vld [vmem:[%s19577_s11 + $0x3b0] sm:$0xff]   ;;  %v16644_v2 = vld [vmem:[%s19577_s11 + $0x3e8] sm:$0xff]  }
 0x957   : > { %v18629_v13 = vadd.f32 %v6441_v63, %v6401_v61  ;;  %15409 = vmatpush3.bf16.msra.mxu0 %v16609_v51  ;;  %v6443_v8 = vpop.f32.mrf.mxu1  ;;  %v16647_v63 = vld [vmem:[%s19577_s11 + $0x360] sm:$0xff]  }
 0x958   : > { %v6403_v9 = vpop.f32.mrf.mxu0  ;;  %15410 = vmatprep.subr.bf16.mxu0 %v16611_v14  ;;  %v16645_v14 = vld [vmem:[%s19577_s11 + $0x328] sm:$0xff]   ;;  %v16648_v8 = vld [vmem:[%s19577_s11 + $0x3e0] sm:$0xff]  }
 0x959   : > { %15431 = vmatpush3.bf16.msra.mxu1 %v16610_v62  ;;  %v6444_v17 = vpop.f32.mrf.mxu1  ;;  %v16649_v9 = vld [vmem:[%s19577_s11 + $0x320] sm:$0xff]  }
 0x95a   : > { %15432 = vmatprep.subr.bf16.mxu1 %v16612_v5  ;;  %v16646_v5 = vld [vmem:[%s19577_s11 + $0x3a8] sm:$0xff]   ;;  %v16652_v17 = vld [vmem:[%s19577_s11 + $0x3d8] sm:$0xff]  }
 0x95b   : > { %15411 = vmatpush3.bf16.msra.mxu0 %v16613_v7 }
 0x95c   : > { %15412 = vmatprep.subr.bf16.mxu0 %v16615_v10  ;;  %v16651_v10 = vld [vmem:[%s19577_s11 + $0x358] sm:$0xff]  }
 0x95d   : > { %15433 = vmatpush3.bf16.msra.mxu1 %v16614_v12  ;;  %v16650_v12 = vld [vmem:[%s19577_s11 + $0x3a0] sm:$0xff]  }
 0x95e   : > { %15434 = vmatprep.subr.bf16.mxu1 %v16616_v19  ;;  %v16653_v19 = vld [vmem:[%s19577_s11 + $0x318] sm:$0xff]  }
 0x95f   : > { %15413 = vmatpush3.bf16.msra.mxu0 %v16617_v20  ;;  %v16655_v20 = vld [vmem:[%s19577_s11 + $0x350] sm:$0xff]  }
 0x960   : > { %15414 = vmatprep.subr.bf16.mxu0 %v16619_v24  ;;  %v16654_v24 = vld [vmem:[%s19577_s11 + $0x398] sm:$0xff]  }
 0x961   : > { %15435 = vmatpush3.bf16.msra.mxu1 %v16618_v21  ;;  %v16656_v21 = vld [vmem:[%s19577_s11 + $0x3d0] sm:$0xff]  }
 0x962   : > { %15436 = vmatprep.subr.bf16.mxu1 %v16620_v38  ;;  %v16657_v38 = vld [vmem:[%s19577_s11 + $0x310] sm:$0xff]  }
 0x963   : > { %15415 = vmatpush3.bf16.msra.mxu0 %v16621_v22  ;;  %v16659_v22 = vld [vmem:[%s19577_s11 + $0x348] sm:$0xff]  }
 0x964   : > { %15416 = vmatprep.subr.bf16.mxu0 %v16623_v23  ;;  %v16658_v23 = vld [vmem:[%s19577_s11 + $0x390] sm:$0xff]  }
 0x965   : > { %15437 = vmatpush3.bf16.msra.mxu1 %v16622_v26  ;;  %v16660_v26 = vld [vmem:[%s19577_s11 + $0x3c8] sm:$0xff]  }
 0x966   : > { %15438 = vmatprep.subr.bf16.mxu1 %v16624_v3  ;;  %v16661_v3 = vld [vmem:[%s19577_s11 + $0x308] sm:$0xff]  }
 0x967   : > { %15417 = vmatpush3.bf16.msra.mxu0 %v16625_v27  ;;  %v16663_v27 = vld [vmem:[%s19577_s11 + $0x340] sm:$0xff]  }
 0x968   : > { %15418 = vmatprep.subr.bf16.mxu0 %v16627_v25  ;;  %v16662_v25 = vld [vmem:[%s19577_s11 + $0x388] sm:$0xff]  }
 0x969   : > { %15439 = vmatpush3.bf16.msra.mxu1 %v16626_v28  ;;  %v16664_v28 = vld [vmem:[%s19577_s11 + $0x3c0] sm:$0xff]  }
 0x96a   : > { %15440 = vmatprep.subr.bf16.mxu1 %v16628_v46  ;;  %v16665_v46 = vld [vmem:[%s19577_s11 + $0x300] sm:$0xff]  }
 0x96b   : > { %15419 = vmatpush3.bf16.msra.mxu0 %v16629_v47  ;;  %v16667_v47 = vld [vmem:[%s19579_s28 + $0x78] sm:$0xff]  }
 0x96c   : > { %15420 = vmatprep.subr.bf16.mxu0 %v16631_v57  ;;  %v16666_v57 = vld [vmem:[%s19577_s11 + $0x380] sm:$0xff]  }
 0x96d   : > { %15441 = vmatpush3.bf16.msra.mxu1 %v16630_v58  ;;  %v16668_v58 = vld [vmem:[%s19579_s28 + $0xf8] sm:$0xff]  }
 0x96e   : > { %15442 = vmatprep.subr.bf16.mxu1 %v16632_v31  ;;  %v16669_v31 = vld [vmem:[%s19579_s28 + $0x38] sm:$0xff]  }
 0x96f   : > { %15421 = vmatpush3.bf16.msra.mxu0 %v16633_v33  ;;  %v16671_v33 = vld [vmem:[%s19579_s28 + $0x70] sm:$0xff]  }
 0x970   : > { %15450 = vmatprep.subr.bf16.mxu0 %v16635_v29  ;;  %v16670_v29 = vld [vmem:[%s19579_s28 + $0xb8] sm:$0xff]  }
 0x971   : > { %15443 = vmatpush3.bf16.msra.mxu1 %v16634_v34 }
 0x972   : > { %v15158_v36 = vpop.f32.mrf.mxu0  ;;  %8422 = vmatmul.mubr.bf16.vlgmr.msra.gmra.mxu0 %v18427_v30  ;;  %15472 = vmatprep.subr.bf16.mxu1 %v16636_v56  ;;  %v16672_v56 = vld [vmem:[%s19579_s28 + $0xf0] sm:$0xff]  }
 0x973   : > { %15451 = vmatpush3.bf16.msra.mxu0 %v16637_v0  ;;  %8693 = vmatprep.mubr.bf16.mxu0 %v18388_v45  ;;  %v16673_v0 = vld [vmem:[%s19579_s28 + $0x30] sm:$0xff]  }
 0x974   : > { %v15180_v1 = vpop.f32.mrf.mxu1  ;;  %8462 = vmatmul.mubr.bf16.vlgmr.msra.gmra.mxu1 %v18433_v32  ;;  %v15159_v40 = vpop.f32.mrf.mxu0  ;;  %15452 = vmatprep.subr.bf16.mxu0 %v16639_v53 }
 0x975   : > { %15473 = vmatpush3.bf16.msra.mxu1 %v16638_v35  ;;  %8733 = vmatprep.mubr.bf16.mxu1 %v18392_v15  ;;  %v15160_v55 = vadd.f32 %v15159_v40, %v15158_v36  ;;  %v16675_v36 = vld [vmem:[%s19579_s28 + $0x68] sm:$0xff]  }
 0x976   : > { %v15181_v59 = vpop.f32.mrf.mxu1  ;;  %v15161_v51 = vpop.f32.mrf.mxu0  ;;  %15474 = vmatprep.subr.bf16.mxu1 %v16640_v37 }
 0x977   : > { %v15182_v54 = vadd.f32 %v15181_v59, %v15180_v1  ;;  %15453 = vmatpush3.bf16.msra.mxu0 %v16641_v48  ;;  %v16674_v48 = vld [vmem:[%s19579_s28 + $0xb0] sm:$0xff]  }
 0x978   : > { %v15183_v61 = vpop.f32.mrf.mxu1  ;;  %v15162_v62 = vpop.f32.mrf.mxu0  ;;  %15454 = vmatprep.subr.bf16.mxu0 %v16643_v42  ;;  %v16676_v42 = vld [vmem:[%s19579_s28 + $0xe8] sm:$0xff]  }
 0x979   : > { %v18669_v4 = vadd.f32 %v15182_v54, %v15160_v55  ;;  %15475 = vmatpush3.bf16.msra.mxu1 %v16642_v44  ;;  %v16677_v44 = vld [vmem:[%s19579_s28 + $0x28] sm:$0xff]   ;;  %v16680_v62 = vld [vmem:[%s19579_s28 + $0xe0] sm:$0xff]  }
 0x97a   : > { %v15184_v7 = vpop.f32.mrf.mxu1  ;;  %15476 = vmatprep.subr.bf16.mxu1 %v16644_v2  ;;  %v16679_v2 = vld [vmem:[%s19579_s28 + $0x60] sm:$0xff]  }
 0x97b   : > { %15455 = vmatpush3.bf16.msra.mxu0 %v16645_v14  ;;  %v16678_v14 = vld [vmem:[%s19579_s28 + $0xa8] sm:$0xff]   ;;  %v16682_v7 = vld [vmem:[%s19579_s28 + $0xa0] sm:$0xff]  }
 0x97c   : > { %15456 = vmatprep.subr.bf16.mxu0 %v16647_v63  ;;  %v16681_v63 = vld [vmem:[%s19579_s28 + $0x20] sm:$0xff]  }
 0x97d   : > { %15477 = vmatpush3.bf16.msra.mxu1 %v16646_v5  ;;  %v16683_v5 = vld [vmem:[%s19579_s28 + $0x58] sm:$0xff]  }
 0x97e   : > { %15478 = vmatprep.subr.bf16.mxu1 %v16648_v8  ;;  %v16684_v8 = vld [vmem:[%s19579_s28 + $0xd8] sm:$0xff]  }
 0x97f   : > { %15457 = vmatpush3.bf16.msra.mxu0 %v16649_v9  ;;  %v16685_v9 = vld [vmem:[%s19579_s28 + $0x18] sm:$0xff]  }
 0x980   : > { %15458 = vmatprep.subr.bf16.mxu0 %v16651_v10  ;;  %v16687_v10 = vld [vmem:[%s19579_s28 + $0x50] sm:$0xff]  }
 0x981   : > { %15479 = vmatpush3.bf16.msra.mxu1 %v16650_v12  ;;  %v16686_v12 = vld [vmem:[%s19579_s28 + $0x98] sm:$0xff]  }
 0x982   : > { %15480 = vmatprep.subr.bf16.mxu1 %v16652_v17  ;;  %v16688_v17 = vld [vmem:[%s19579_s28 + $0xd0] sm:$0xff]  }
 0x983   : > { %15459 = vmatpush3.bf16.msra.mxu0 %v16653_v19  ;;  %v16689_v19 = vld [vmem:[%s19579_s28 + $0x10] sm:$0xff]  }
 0x984   : > { %15460 = vmatprep.subr.bf16.mxu0 %v16655_v20  ;;  %v16691_v20 = vld [vmem:[%s19579_s28 + $0x48] sm:$0xff]  }
 0x985   : > { %15481 = vmatpush3.bf16.msra.mxu1 %v16654_v24  ;;  %v16690_v24 = vld [vmem:[%s19579_s28 + $0x90] sm:$0xff]  }
 0x986   : > { %15482 = vmatprep.subr.bf16.mxu1 %v16656_v21  ;;  %v16692_v21 = vld [vmem:[%s19579_s28 + $0xc8] sm:$0xff]  }
 0x987   : > { %15461 = vmatpush3.bf16.msra.mxu0 %v16657_v38  ;;  %v16693_v38 = vld [vmem:[%s19579_s28 + $0x8] sm:$0xff]  }
 0x988   : > { %15462 = vmatprep.subr.bf16.mxu0 %v16659_v22  ;;  %v16695_v22 = vld [vmem:[%s19579_s28 + $0x40] sm:$0xff]  }
 0x989   : > { %15483 = vmatpush3.bf16.msra.mxu1 %v16658_v23  ;;  %v16694_v23 = vld [vmem:[%s19579_s28 + $0x88] sm:$0xff]  }
 0x98a   : > { %15484 = vmatprep.subr.bf16.mxu1 %v16660_v26  ;;  %v16696_v26 = vld [vmem:[%s19579_s28 + $0xc0] sm:$0xff]  }
 0x98b   : > { %15463 = vmatpush3.bf16.msra.mxu0 %v16661_v3  ;;  %v16697_v3 = vld [vmem:[%s19579_s28] sm:$0xff]  }
 0x98c   : > { %15464 = vmatprep.subr.bf16.mxu0 %v16663_v27  ;;  %v16699_v27 = vld [vmem:[%s19579_s28 + $0x178] sm:$0xff]  }
 0x98d   : > { %15485 = vmatpush3.bf16.msra.mxu1 %v16662_v25  ;;  %v16698_v25 = vld [vmem:[%s19579_s28 + $0x80] sm:$0xff]  }
 0x98e   : > { %15486 = vmatprep.subr.bf16.mxu1 %v16664_v28  ;;  %v16700_v28 = vld [vmem:[%s19579_s28 + $0x1f8] sm:$0xff]  }
 0x98f   : > { %15465 = vmatpush3.bf16.msra.mxu0 %v16665_v46  ;;  %v16701_v46 = vld [vmem:[%s19579_s28 + $0x138] sm:$0xff]  }
 0x990   : > { %15494 = vmatprep.subr.bf16.mxu0 %v16667_v47  ;;  %v16703_v47 = vld [vmem:[%s19579_s28 + $0x170] sm:$0xff]  }
 0x991   : > { %15487 = vmatpush3.bf16.msra.mxu1 %v16666_v57  ;;  %v16702_v57 = vld [vmem:[%s19579_s28 + $0x1b8] sm:$0xff]  }
 0x992   : > { %v15202_v34 = vpop.f32.mrf.mxu0  ;;  %8694 = vmatmul.mubr.bf16.vlgmr.msra.gmra.mxu0 %v18427_v30  ;;  %15516 = vmatprep.subr.bf16.mxu1 %v16668_v58 }
 0x993   : > { %15495 = vmatpush3.bf16.msra.mxu0 %v16669_v31  ;;  %8965 = vmatprep.mubr.bf16.mxu0 %v18388_v45  ;;  %v16704_v31 = vld [vmem:[%s19579_s28 + $0x1f0] sm:$0xff]  }
 0x994   : > { %v15224_v53 = vpop.f32.mrf.mxu1  ;;  %8734 = vmatmul.mubr.bf16.vlgmr.msra.gmra.mxu1 %v18433_v32  ;;  %v15203_v35 = vpop.f32.mrf.mxu0  ;;  %15496 = vmatprep.subr.bf16.mxu0 %v16671_v33  ;;  %v16705_v33 = vld [vmem:[%s19579_s28 + $0x130] sm:$0xff]  }
 0x995   : > { %15517 = vmatpush3.bf16.msra.mxu1 %v16670_v29  ;;  %9005 = vmatprep.mubr.bf16.mxu1 %v18392_v15  ;;  %v15204_v37 = vadd.f32 %v15203_v35, %v15202_v34 }
 0x996   : > { %v15225_v1 = vpop.f32.mrf.mxu1  ;;  %v15205_v40 = vpop.f32.mrf.mxu0  ;;  %15518 = vmatprep.subr.bf16.mxu1 %v16672_v56  ;;  %v16707_v56 = vld [vmem:[%s19579_s28 + $0x168] sm:$0xff]  }
 0x997   : > { %v15226_v55 = vadd.f32 %v15225_v1, %v15224_v53  ;;  %15497 = vmatpush3.bf16.msra.mxu0 %v16673_v0  ;;  %v16706_v53 = vld [vmem:[%s19579_s28 + $0x1b0] sm:$0xff]   ;;  %v16709_v1 = vld [vmem:[%s19579_s28 + $0x128] sm:$0xff]  }
 0x998   : > { %v15227_v59 = vpop.f32.mrf.mxu1  ;;  %v15206_v51 = vpop.f32.mrf.mxu0  ;;  %15498 = vmatprep.subr.bf16.mxu0 %v16675_v36 }
 0x999   : > { %v18707_v54 = vadd.f32 %v15226_v55, %v15204_v37  ;;  %15519 = vmatpush3.bf16.msra.mxu1 %v16674_v48  ;;  %v16708_v37 = vld [vmem:[%s19579_s28 + $0x1e8] sm:$0xff]   ;;  %v16711_v55 = vld [vmem:[%s19579_s28 + $0x160] sm:$0xff]  }
 0x99a   : > { %v15228_v61 = vpop.f32.mrf.mxu1  ;;  %15520 = vmatprep.subr.bf16.mxu1 %v16676_v42  ;;  %v16710_v59 = vld [vmem:[%s19579_s28 + $0x1a8] sm:$0xff]  }
 0x99b   : > { %15499 = vmatpush3.bf16.msra.mxu0 %v16677_v44  ;;  %v16715_v61 = vld [vmem:[%s19579_s28 + $0x158] sm:$0xff]  }
 0x99c   : > { %15500 = vmatprep.subr.bf16.mxu0 %v16679_v2  ;;  %v16712_v2 = vld [vmem:[%s19579_s28 + $0x1e0] sm:$0xff]  }
 0x99d   : > { %15521 = vmatpush3.bf16.msra.mxu1 %v16678_v14  ;;  %v16713_v14 = vld [vmem:[%s19579_s28 + $0x120] sm:$0xff]  }
 0x99e   : > { %15522 = vmatprep.subr.bf16.mxu1 %v16680_v62  ;;  %v16714_v62 = vld [vmem:[%s19579_s28 + $0x1a0] sm:$0xff]  }
 0x99f   : > { %15501 = vmatpush3.bf16.msra.mxu0 %v16681_v63  ;;  %v16716_v63 = vld [vmem:[%s19579_s28 + $0x1d8] sm:$0xff]  }
 0x9a0   : > { %15502 = vmatprep.subr.bf16.mxu0 %v16683_v5  ;;  %v16717_v5 = vld [vmem:[%s19579_s28 + $0x118] sm:$0xff]  }
 0x9a1   : > { %15523 = vmatpush3.bf16.msra.mxu1 %v16682_v7  ;;  %v16719_v7 = vld [vmem:[%s19579_s28 + $0x150] sm:$0xff]  }
 0x9a2   : > { %15524 = vmatprep.subr.bf16.mxu1 %v16684_v8  ;;  %v16718_v8 = vld [vmem:[%s19579_s28 + $0x198] sm:$0xff]  }
 0x9a3   : > { %15503 = vmatpush3.bf16.msra.mxu0 %v16685_v9  ;;  %v16720_v9 = vld [vmem:[%s19579_s28 + $0x1d0] sm:$0xff]  }
 0x9a4   : > { %15504 = vmatprep.subr.bf16.mxu0 %v16687_v10  ;;  %v16721_v10 = vld [vmem:[%s19579_s28 + $0x110] sm:$0xff]  }
 0x9a5   : > { %15525 = vmatpush3.bf16.msra.mxu1 %v16686_v12  ;;  %v16723_v12 = vld [vmem:[%s19579_s28 + $0x148] sm:$0xff]  }
 0x9a6   : > { %15526 = vmatprep.subr.bf16.mxu1 %v16688_v17  ;;  %v16722_v17 = vld [vmem:[%s19579_s28 + $0x190] sm:$0xff]  }
 0x9a7   : > { %15505 = vmatpush3.bf16.msra.mxu0 %v16689_v19  ;;  %v16724_v19 = vld [vmem:[%s19579_s28 + $0x1c8] sm:$0xff]  }
 0x9a8   : > { %15506 = vmatprep.subr.bf16.mxu0 %v16691_v20  ;;  %v16725_v20 = vld [vmem:[%s19579_s28 + $0x108] sm:$0xff]  }
 0x9a9   : > { %15527 = vmatpush3.bf16.msra.mxu1 %v16690_v24  ;;  %v16727_v24 = vld [vmem:[%s19579_s28 + $0x140] sm:$0xff]  }
 0x9aa   : > { %15528 = vmatprep.subr.bf16.mxu1 %v16692_v21  ;;  %v16726_v21 = vld [vmem:[%s19579_s28 + $0x188] sm:$0xff]  }
 0x9ab   : > { %15507 = vmatpush3.bf16.msra.mxu0 %v16693_v38  ;;  %v16728_v38 = vld [vmem:[%s19579_s28 + $0x1c0] sm:$0xff]  }
 0x9ac   : > { %15508 = vmatprep.subr.bf16.mxu0 %v16695_v22  ;;  %v16729_v22 = vld [vmem:[%s19579_s28 + $0x100] sm:$0xff]  }
 0x9ad   : > { %15529 = vmatpush3.bf16.msra.mxu1 %v16694_v23  ;;  %v16731_v23 = vld [vmem:[%s19579_s28 + $0x278] sm:$0xff]  }
 0x9ae   : > { %15530 = vmatprep.subr.bf16.mxu1 %v16696_v26  ;;  %v16730_v26 = vld [vmem:[%s19579_s28 + $0x180] sm:$0xff]  }
 0x9af   : > { %15509 = vmatpush3.bf16.msra.mxu0 %v16697_v3  ;;  %v16732_v3 = vld [vmem:[%s19579_s28 + $0x2f8] sm:$0xff]  }
 0x9b0   : > { %15538 = vmatprep.subr.bf16.mxu0 %v16699_v27  ;;  %v16733_v27 = vld [vmem:[%s19579_s28 + $0x238] sm:$0xff]  }
 0x9b1   : > { %15531 = vmatpush3.bf16.msra.mxu1 %v16698_v25  ;;  %v16735_v25 = vld [vmem:[%s19579_s28 + $0x270] sm:$0xff]  }
 0x9b2   : > { %v15246_v58 = vpop.f32.mrf.mxu0  ;;  %8966 = vmatmul.mubr.bf16.vlgmr.msra.gmra.mxu0 %v18427_v30  ;;  %15560 = vmatprep.subr.bf16.mxu1 %v16700_v28  ;;  %v16734_v28 = vld [vmem:[%s19579_s28 + $0x2b8] sm:$0xff]  }
 0x9b3   : > { %15539 = vmatpush3.bf16.msra.mxu0 %v16701_v46  ;;  %9237 = vmatprep.mubr.bf16.mxu0 %v18388_v45 }
 0x9b4   : > { %v15268_v29 = vpop.f32.mrf.mxu1  ;;  %9006 = vmatmul.mubr.bf16.vlgmr.msra.gmra.mxu1 %v18433_v32  ;;  %v15247_v34 = vpop.f32.mrf.mxu0  ;;  %15540 = vmatprep.subr.bf16.mxu0 %v16703_v47  ;;  %v16736_v47 = vld [vmem:[%s19579_s28 + $0x2f0] sm:$0xff]  }
 0x9b5   : > { %15561 = vmatpush3.bf16.msra.mxu1 %v16702_v57  ;;  %9277 = vmatprep.mubr.bf16.mxu1 %v18392_v15  ;;  %v15248_v0 = vadd.f32 %v15247_v34, %v15246_v58  ;;  %v16737_v57 = vld [vmem:[%s19579_s28 + $0x230] sm:$0xff]  }
 0x9b6   : > { %v15269_v35 = vpop.f32.mrf.mxu1  ;;  %v15249_v36 = vpop.f32.mrf.mxu0  ;;  %15562 = vmatprep.subr.bf16.mxu1 %v16704_v31  ;;  %v16738_v34 = vld [vmem:[%s19579_s28 + $0x2b0] sm:$0xff]  }
 0x9b7   : > { %v15270_v48 = vadd.f32 %v15269_v35, %v15268_v29  ;;  %15541 = vmatpush3.bf16.msra.mxu0 %v16705_v33  ;;  %v16739_v33 = vld [vmem:[%s19579_s28 + $0x268] sm:$0xff]  }
 0x9b8   : > { %v15271_v40 = vpop.f32.mrf.mxu1  ;;  %v15250_v42 = vpop.f32.mrf.mxu0  ;;  %15542 = vmatprep.subr.bf16.mxu0 %v16707_v56  ;;  %v16741_v36 = vld [vmem:[%s19579_s28 + $0x228] sm:$0xff]  }
 0x9b9   : > { %v18745_v44 = vadd.f32 %v15270_v48, %v15248_v0  ;;  %15563 = vmatpush3.bf16.msra.mxu1 %v16706_v53  ;;  %v16740_v53 = vld [vmem:[%s19579_s28 + $0x2e8] sm:$0xff]  }
 0x9ba   : > { %v15272_v51 = vpop.f32.mrf.mxu1  ;;  %15564 = vmatprep.subr.bf16.mxu1 %v16708_v37  ;;  %v16742_v42 = vld [vmem:[%s19579_s28 + $0x2a8] sm:$0xff]  }
 0x9bb   : > { %15543 = vmatpush3.bf16.msra.mxu0 %v16709_v1  ;;  %v16743_v1 = vld [vmem:[%s19579_s28 + $0x260] sm:$0xff]  }
 0x9bc   : > { %15544 = vmatprep.subr.bf16.mxu0 %v16711_v55  ;;  %v16745_v51 = vld [vmem:[%s19579_s28 + $0x220] sm:$0xff]  }
 0x9bd   : > { %15565 = vmatpush3.bf16.msra.mxu1 %v16710_v59  ;;  %v16744_v59 = vld [vmem:[%s19579_s28 + $0x2e0] sm:$0xff]  }
 0x9be   : > { %15566 = vmatprep.subr.bf16.mxu1 %v16712_v2  ;;  %v16747_v2 = vld [vmem:[%s19579_s28 + $0x258] sm:$0xff]  }
 0x9bf   : > { %15545 = vmatpush3.bf16.msra.mxu0 %v16713_v14  ;;  %v16746_v14 = vld [vmem:[%s19579_s28 + $0x2a0] sm:$0xff]  }
 0x9c0   : > { %15546 = vmatprep.subr.bf16.mxu0 %v16715_v61  ;;  %v16748_v61 = vld [vmem:[%s19579_s28 + $0x2d8] sm:$0xff]  }
 0x9c1   : > { %15567 = vmatpush3.bf16.msra.mxu1 %v16714_v62  ;;  %v16749_v62 = vld [vmem:[%s19579_s28 + $0x218] sm:$0xff]  }
 0x9c2   : > { %15568 = vmatprep.subr.bf16.mxu1 %v16716_v63  ;;  %v16751_v63 = vld [vmem:[%s19579_s28 + $0x250] sm:$0xff]  }
 0x9c3   : > { %15547 = vmatpush3.bf16.msra.mxu0 %v16717_v5  ;;  %v16750_v5 = vld [vmem:[%s19579_s28 + $0x298] sm:$0xff]  }
 0x9c4   : > { %15548 = vmatprep.subr.bf16.mxu0 %v16719_v7  ;;  %v16752_v7 = vld [vmem:[%s19579_s28 + $0x2d0] sm:$0xff]  }
 0x9c5   : > { %15569 = vmatpush3.bf16.msra.mxu1 %v16718_v8  ;;  %v16753_v8 = vld [vmem:[%s19579_s28 + $0x210] sm:$0xff]  }
 0x9c6   : > { %15570 = vmatprep.subr.bf16.mxu1 %v16720_v9  ;;  %v16755_v9 = vld [vmem:[%s19579_s28 + $0x248] sm:$0xff]  }
 0x9c7   : > { %15549 = vmatpush3.bf16.msra.mxu0 %v16721_v10  ;;  %v16754_v10 = vld [vmem:[%s19579_s28 + $0x290] sm:$0xff]  }
 0x9c8   : > { %15550 = vmatprep.subr.bf16.mxu0 %v16723_v12  ;;  %v16756_v12 = vld [vmem:[%s19579_s28 + $0x2c8] sm:$0xff]  }
 0x9c9   : > { %15571 = vmatpush3.bf16.msra.mxu1 %v16722_v17  ;;  %v16757_v17 = vld [vmem:[%s19579_s28 + $0x208] sm:$0xff]  }
 0x9ca   : > { %15572 = vmatprep.subr.bf16.mxu1 %v16724_v19  ;;  %v16759_v19 = vld [vmem:[%s19579_s28 + $0x240] sm:$0xff]  }
 0x9cb   : > { %15551 = vmatpush3.bf16.msra.mxu0 %v16725_v20  ;;  %v16758_v20 = vld [vmem:[%s19579_s28 + $0x288] sm:$0xff]  }
 0x9cc   : > { %15552 = vmatprep.subr.bf16.mxu0 %v16727_v24  ;;  %v16760_v24 = vld [vmem:[%s19579_s28 + $0x2c0] sm:$0xff]  }
 0x9cd   : > { %15573 = vmatpush3.bf16.msra.mxu1 %v16726_v21  ;;  %v16761_v21 = vld [vmem:[%s19579_s28 + $0x200] sm:$0xff]  }
 0x9ce   : > { %15574 = vmatprep.subr.bf16.mxu1 %v16728_v38  ;;  %v16763_v38 = vld [vmem:[%s19579_s28 + $0x378] sm:$0xff]  }
 0x9cf   : > { %15553 = vmatpush3.bf16.msra.mxu0 %v16729_v22  ;;  %v16762_v22 = vld [vmem:[%s19579_s28 + $0x280] sm:$0xff]  }
 0x9d0   : > { %15582 = vmatprep.subr.bf16.mxu0 %v16731_v23  ;;  %v16764_v23 = vld [vmem:[%s19579_s28 + $0x3f8] sm:$0xff]  }
 0x9d1   : > { %15575 = vmatpush3.bf16.msra.mxu1 %v16730_v26  ;;  %v16765_v26 = vld [vmem:[%s19579_s28 + $0x338] sm:$0xff]  }
 0x9d2   : > { %v15290_v46 = vpop.f32.mrf.mxu0  ;;  %9238 = vmatmul.mubr.bf16.vlgmr.msra.gmra.mxu0 %v18427_v30  ;;  %15604 = vmatprep.subr.bf16.mxu1 %v16732_v3  ;;  %v16767_v3 = vld [vmem:[%s19579_s28 + $0x370] sm:$0xff]  }
 0x9d3   : > { %15583 = vmatpush3.bf16.msra.mxu0 %v16733_v27  ;;  %9509 = vmatprep.mubr.bf16.mxu0 %v18388_v45  ;;  %v16766_v27 = vld [vmem:[%s19579_s28 + $0x3b8] sm:$0xff]  }
 0x9d4   : > { %v15312_v58 = vpop.f32.mrf.mxu1  ;;  %9278 = vmatmul.mubr.bf16.vlgmr.msra.gmra.mxu1 %v18433_v32  ;;  %v15291_v31 = vpop.f32.mrf.mxu0  ;;  %15584 = vmatprep.subr.bf16.mxu0 %v16735_v25 }
 0x9d5   : > { %15605 = vmatpush3.bf16.msra.mxu1 %v16734_v28  ;;  %9549 = vmatprep.mubr.bf16.mxu1 %v18392_v15  ;;  %v15292_v29 = vadd.f32 %v15291_v31, %v15290_v46  ;;  %v16768_v28 = vld [vmem:[%s19579_s28 + $0x3f0] sm:$0xff]  }
 0x9d6   : > { %v15313_v56 = vpop.f32.mrf.mxu1  ;;  %v15293_v0 = vpop.f32.mrf.mxu0  ;;  %15606 = vmatprep.subr.bf16.mxu1 %v16736_v47  ;;  %v16769_v46 = vld [vmem:[%s19579_s28 + $0x330] sm:$0xff]  }
 0x9d7   : > { %v15314_v35 = vadd.f32 %v15313_v56, %v15312_v58  ;;  %15585 = vmatpush3.bf16.msra.mxu0 %v16737_v57  ;;  %v16771_v58 = vld [vmem:[%s19579_s28 + $0x368] sm:$0xff]   ;;  %v16770_v31 = vld [vmem:[%s19579_s28 + $0x3b0] sm:$0xff]  }
 0x9d8   : > { %v15315_v37 = vpop.f32.mrf.mxu1  ;;  %v15294_v48 = vpop.f32.mrf.mxu0  ;;  %15586 = vmatprep.subr.bf16.mxu0 %v16739_v33 }
 0x9d9   : > { %v18783_v40 = vadd.f32 %v15314_v35, %v15292_v29  ;;  %15607 = vmatpush3.bf16.msra.mxu1 %v16738_v34  ;;  %v16773_v34 = vld [vmem:[%s19579_s28 + $0x328] sm:$0xff]   ;;  %v16777_v37 = vld [vmem:[%s19579_s28 + $0x320] sm:$0xff]   ;;  %v16779_v48 = vld [vmem:[%s19579_s28 + $0x358] sm:$0xff]  }
 0x9da   : > { %v15316_v55 = vpop.f32.mrf.mxu1  ;;  %15608 = vmatprep.subr.bf16.mxu1 %v16740_v53  ;;  %v16775_v53 = vld [vmem:[%s19579_s28 + $0x360] sm:$0xff]  }
 0x9db   : > { %15587 = vmatpush3.bf16.msra.mxu0 %v16741_v36  ;;  %v16776_v36 = vld [vmem:[%s19579_s28 + $0x3e0] sm:$0xff]   ;;  %v16781_v55 = vld [vmem:[%s19579_s28 + $0x318] sm:$0xff]  }
 0x9dc   : > { %15588 = vmatprep.subr.bf16.mxu0 %v16743_v1  ;;  %v16778_v1 = vld [vmem:[%s19579_s28 + $0x3a0] sm:$0xff]  }
 0x9dd   : > { %15609 = vmatpush3.bf16.msra.mxu1 %v16742_v42  ;;  %v16780_v42 = vld [vmem:[%s19579_s28 + $0x3d8] sm:$0xff]  }
 0x9de   : > { %15610 = vmatprep.subr.bf16.mxu1 %v16744_v59  ;;  %v16783_v59 = vld [vmem:[%s19579_s28 + $0x350] sm:$0xff]  }
 0x9df   : > { %15589 = vmatpush3.bf16.msra.mxu0 %v16745_v51  ;;  %v16782_v51 = vld [vmem:[%s19579_s28 + $0x398] sm:$0xff]  }
 0x9e0   : > { %15590 = vmatprep.subr.bf16.mxu0 %v16747_v2  ;;  %v16784_v2 = vld [vmem:[%s19579_s28 + $0x3d0] sm:$0xff]  }
 0x9e1   : > { %15611 = vmatpush3.bf16.msra.mxu1 %v16746_v14  ;;  %v16785_v14 = vld [vmem:[%s19579_s28 + $0x310] sm:$0xff]  }
 0x9e2   : > { %15612 = vmatprep.subr.bf16.mxu1 %v16748_v61  ;;  %v16787_v61 = vld [vmem:[%s19579_s28 + $0x348] sm:$0xff]  }
 0x9e3   : > { %15591 = vmatpush3.bf16.msra.mxu0 %v16749_v62  ;;  %v16786_v62 = vld [vmem:[%s19579_s28 + $0x390] sm:$0xff]  }
 0x9e4   : > { %15592 = vmatprep.subr.bf16.mxu0 %v16751_v63 }
 0x9e5   : > { %15613 = vmatpush3.bf16.msra.mxu1 %v16750_v5 }
 0x9e6   : > { %15614 = vmatprep.subr.bf16.mxu1 %v16752_v7  ;;  %v16788_v7 = vld [vmem:[%s19579_s28 + $0x3c8] sm:$0xff]  }
 0x9e7   : > { %15593 = vmatpush3.bf16.msra.mxu0 %v16753_v8  ;;  %v16789_v8 = vld [vmem:[%s19579_s28 + $0x308] sm:$0xff]  }
 0x9e8   : > { %15594 = vmatprep.subr.bf16.mxu0 %v16755_v9  ;;  %v16791_v9 = vld [vmem:[%s19579_s28 + $0x340] sm:$0xff]  }
 0x9e9   : > { %15615 = vmatpush3.bf16.msra.mxu1 %v16754_v10  ;;  %v16790_v10 = vld [vmem:[%s19579_s28 + $0x388] sm:$0xff]  }
 0x9ea   : > { %15616 = vmatprep.subr.bf16.mxu1 %v16756_v12 }
 0x9eb   : > { %15595 = vmatpush3.bf16.msra.mxu0 %v16757_v17  ;;  %v16792_v17 = vld [vmem:[%s19579_s28 + $0x3c0] sm:$0xff]  }
 0x9ec   : > { %15596 = vmatprep.subr.bf16.mxu0 %v16759_v19  ;;  %v16793_v19 = vld [vmem:[%s19579_s28 + $0x300] sm:$0xff]  }
 0x9ed   : > { %15617 = vmatpush3.bf16.msra.mxu1 %v16758_v20  ;;  %v16794_v20 = vld [vmem:[%s19579_s28 + $0x380] sm:$0xff]  }
 0x9ee   : > { %15618 = vmatprep.subr.bf16.mxu1 %v16760_v24 }
 0x9ef   : > { %15597 = vmatpush3.bf16.msra.mxu0 %v16761_v21 }
 0x9f0   : > { %15626 = vmatprep.subr.bf16.mxu0 %v16763_v38 }
 0x9f1   : > { %15619 = vmatpush3.bf16.msra.mxu1 %v16762_v22 }
 0x9f2   : > { %v15334_v25 = vpop.f32.mrf.mxu0  ;;  %9510 = vmatmul.mubr.bf16.vlgmr.msra.gmra.mxu0 %v18427_v30  ;;  %15648 = vmatprep.subr.bf16.mxu1 %v16764_v23 }
 0x9f3   : > { %15627 = vmatpush3.bf16.msra.mxu0 %v16765_v26  ;;  %9781 = vmatprep.mubr.bf16.mxu0 %v18388_v45  ;;  %v16772_v45 = vld [vmem:[%s19579_s28 + $0x3e8] sm:$0xff]  }
 0x9f4   : > { %v15356_v47 = vpop.f32.mrf.mxu1  ;;  %9550 = vmatmul.mubr.bf16.vlgmr.msra.gmra.mxu1 %v18433_v32  ;;  %v15335_v57 = vpop.f32.mrf.mxu0  ;;  %15628 = vmatprep.subr.bf16.mxu0 %v16767_v3 }
 0x9f5   : > { %15649 = vmatpush3.bf16.msra.mxu1 %v16766_v27  ;;  %9821 = vmatprep.mubr.bf16.mxu1 %v18392_v15  ;;  %v16774_v15 = vld [vmem:[%s19579_s28 + $0x3a8] sm:$0xff]   ;;  %v15336_v63 = vadd.f32 %v15335_v57, %v15334_v25  ;;  %v9829_v25 = vpack.c.bf16 %v18669_v4, %v18669_v4 }
 0x9f6   : > { %v15357_v33 = vpop.f32.mrf.mxu1  ;;  %v15337_v29 = vpop.f32.mrf.mxu0  ;;  %15650 = vmatprep.subr.bf16.mxu1 %v16768_v28 }
 0x9f7   : > { %15629 = vmatpush3.bf16.msra.mxu0 %v16769_v46  ;;  %v15358_v5 = vadd.f32 %v15357_v33, %v15356_v47 }
 0x9f8   : > { %v15359_v56 = vpop.f32.mrf.mxu1  ;;  %v15338_v0 = vpop.f32.mrf.mxu0  ;;  %15630 = vmatprep.subr.bf16.mxu0 %v16771_v58 }
 0x9f9   : > { %15651 = vmatpush3.bf16.msra.mxu1 %v16770_v31  ;;  %v7920_v12 = vadd.f32 %v15358_v5, %v15336_v63  ;;  %v9830_v31 = vpack.c.bf16 %v18707_v54, %v18707_v54  ;;  %v9831_v54 = vpack.c.bf16 %v18745_v44, %v18745_v44  ;;  %v9832_v44 = vpack.c.bf16 %v18783_v40, %v18783_v40 }
 0x9fa   : > { %v15360_v35 = vpop.f32.mrf.mxu1  ;;  %15652 = vmatprep.subr.bf16.mxu1 %v16772_v45 }
 0x9fb   : > { %15631 = vmatpush3.bf16.msra.mxu0 %v16773_v34  ;;  %v9833_v24 = vpack.c.bf16 %v7920_v12, %v7920_v12 }
 0x9fc   : > { %15632 = vmatprep.subr.bf16.mxu0 %v16775_v53 }
 0x9fd   : > { %15653 = vmatpush3.bf16.msra.mxu1 %v16774_v15  ;;  %v9841_v38 = vsel %vm4746_vm1, %v9833_v24, 0 }
 0x9fe   : > { %15654 = vmatprep.subr.bf16.mxu1 %v16776_v36 }
 0x9ff   : > { %15633 = vmatpush3.bf16.msra.mxu0 %v16777_v37 }
 0xa00   : > { %15634 = vmatprep.subr.bf16.mxu0 %v16779_v48 }
 0xa01   : > { %15655 = vmatpush3.bf16.msra.mxu1 %v16778_v1 }
 0xa02   : > { %15656 = vmatprep.subr.bf16.mxu1 %v16780_v42 }
 0xa03   : > { %15635 = vmatpush3.bf16.msra.mxu0 %v16781_v55 }
 0xa04   : > { %15636 = vmatprep.subr.bf16.mxu0 %v16783_v59 }
 0xa05   : > { %15657 = vmatpush3.bf16.msra.mxu1 %v16782_v51 }
 0xa06   : > { %15658 = vmatprep.subr.bf16.mxu1 %v16784_v2 }
 0xa07   : > { %15637 = vmatpush3.bf16.msra.mxu0 %v16785_v14 }
 0xa08   : > { %15638 = vmatprep.subr.bf16.mxu0 %v16787_v61 }
 0xa09   : > { %15659 = vmatpush3.bf16.msra.mxu1 %v16786_v62 }
 0xa0a   : > { %15660 = vmatprep.subr.bf16.mxu1 %v16788_v7 }
 0xa0b   : > { %15639 = vmatpush3.bf16.msra.mxu0 %v16789_v8 }
 0xa0c   : > { %15640 = vmatprep.subr.bf16.mxu0 %v16791_v9 }
 0xa0d   : > { %15661 = vmatpush3.bf16.msra.mxu1 %v16790_v10 }
 0xa0e   : > { %15662 = vmatprep.subr.bf16.mxu1 %v16792_v17 }
 0xa0f   : > { %15641 = vmatpush3.bf16.msra.mxu0 %v16793_v19 }
 0xa10   : > { %15836 = vmatprep.subr.bf16.mxu0 %v17509_v41 }
 0xa11   : > { %15663 = vmatpush3.bf16.msra.mxu1 %v16794_v20 }
 0xa12   : > { %v15378_v21 = vpop.f32.mrf.mxu0  ;;  %9782 = vmatmul.mubr.bf16.vlgmr.msra.gmra.mxu0 %v18427_v30  ;;  %15842 = vmatprep.subr.bf16.mxu1 %v17509_v41 }
 0xa13   : > { %15837 = vmatpush3.bf16.xpose.msra.mxu0 %v9841_v38  ;;  %15838 = vmatprep.mubr.msk.bf16.mxu0 %vm17510_vm0, %v17509_v41 }
 0xa14   : > { %v15400_v22 = vpop.f32.mrf.mxu1  ;;  %9822 = vmatmul.mubr.bf16.vlgmr.msra.gmra.mxu1 %v18433_v32  ;;  %v15379_v23 = vpop.f32.mrf.mxu0  ;;  %15848 = vmatprep.subr.bf16.mxu0 %v17509_v41 }
 0xa15   : > { %v15380_v26 = vadd.f32 %v15379_v23, %v15378_v21  ;;  %15844 = vmatprep.mubr.msk.bf16.mxu1 %vm17510_vm0, %v17509_v41 }
 0xa16   : > { %v15401_v3 = vpop.f32.mrf.mxu1  ;;  %v15381_v30 = vpop.f32.mrf.mxu0 }
 0xa17   : > { %v15402_v27 = vadd.f32 %v15401_v3, %v15400_v22 }
 0xa18   : > { %v15403_v28 = vpop.f32.mrf.mxu1  ;;  %v15382_v46 = vpop.f32.mrf.mxu0 }
 0xa19   : > { %v8192_v47 = vadd.f32 %v15402_v27, %v15380_v26 }
 0xa1a   : > { %v15404_v57 = vpop.f32.mrf.mxu1  ;;  %15839 = vmatmul.mubr.msk.bf16.vlgmr.msra.gmra.mxu0 %vm4746_vm1, %v9829_v25 }
 0xa1b   : > { %v9834_v32 = vpack.c.bf16 %v8192_v47, %v8192_v47  ;;  %15850 = vmatprep.mubr.msk.bf16.mxu0 %vm17510_vm0, %v17509_v41 }
 0xa1d   : > { %v9887_v58 = vsel %vm4746_vm1, %v9834_v32, 0 }
 0xa1e   : > { %15843 = vmatpush3.bf16.xpose.msra.mxu1 %v9887_v58 }
 0xa1f   : > { %15854 = vmatprep.subr.bf16.mxu1 %v17509_v41 }
 0xa25   : > { %15845 = vmatmul.mubr.msk.bf16.vlgmr.msra.gmra.mxu1 %vm4746_vm1, %v9830_v31 }
 0xa26   : > { %15856 = vmatprep.mubr.msk.bf16.mxu1 %vm17510_vm0, %v17509_v41 }
 0xa32   : > { %v15422_v4 = vpop.f32.mrf.mxu0 }
 0xa34   : > { %v15444_v33 = vpop.f32.mrf.mxu1  ;;  %v15423_v29 = vpop.f32.mrf.mxu0 }
 0xa35   : > { %v15424_v45 = vadd.f32 %v15423_v29, %v15422_v4 }
 0xa36   : > { %v15445_v34 = vpop.f32.mrf.mxu1  ;;  %v15425_v56 = vpop.f32.mrf.mxu0 }
 0xa37   : > { %v15446_v0 = vadd.f32 %v15445_v34, %v15444_v33 }
 0xa38   : > { %v15447_v53 = vpop.f32.mrf.mxu1  ;;  %v15426_v15 = vpop.f32.mrf.mxu0 }
 0xa39   : > { %v8464_v35 = vadd.f32 %v15446_v0, %v15424_v45 }
 0xa3a   : > { %v15448_v36 = vpop.f32.mrf.mxu1 }
 0xa3b   : > { %v9835_v37 = vpack.c.bf16 %v8464_v35, %v8464_v35 }
 0xa3d   : > { %v9933_v48 = vsel %vm4746_vm1, %v9835_v37, 0 }
 0xa3e   : > { %15849 = vmatpush3.bf16.xpose.msra.mxu0 %v9933_v48 }
 0xa3f   : > { %15860 = vmatprep.subr.bf16.mxu0 %v17509_v41 }
 0xa45   : > { %15851 = vmatmul.mubr.msk.bf16.vlgmr.msra.gmra.mxu0 %vm4746_vm1, %v9831_v54 }
 0xa46   : > { %15862 = vmatprep.mubr.msk.bf16.mxu0 %vm17510_vm0, %v17509_v41 }
 0xa52   : > { %v15466_v1 = vpop.f32.mrf.mxu0 }
 0xa54   : > { %v15488_v42 = vpop.f32.mrf.mxu1  ;;  %v15467_v55 = vpop.f32.mrf.mxu0 }
 0xa55   : > { %v15468_v59 = vadd.f32 %v15467_v55, %v15466_v1 }
 0xa56   : > { %v15489_v51 = vpop.f32.mrf.mxu1  ;;  %v15469_v2 = vpop.f32.mrf.mxu0 }
 0xa57   : > { %v15490_v14 = vadd.f32 %v15489_v51, %v15488_v42 }
 0xa58   : > { %v15491_v61 = vpop.f32.mrf.mxu1  ;;  %v15470_v62 = vpop.f32.mrf.mxu0 }
 0xa59   : > { %v8736_v63 = vadd.f32 %v15490_v14, %v15468_v59 }
 0xa5a   : > { %v15492_v5 = vpop.f32.mrf.mxu1 }
 0xa5b   : > { %v9836_v7 = vpack.c.bf16 %v8736_v63, %v8736_v63 }
 0xa5d   : > { %v9979_v8 = vsel %vm4746_vm1, %v9836_v7, 0 }
 0xa5e   : > { %15855 = vmatpush3.bf16.xpose.msra.mxu1 %v9979_v8 }
 0xa5f   : > { %15866 = vmatprep.subr.bf16.mxu1 %v17509_v41 }
 0xa65   : > { %15857 = vmatmul.mubr.msk.bf16.vlgmr.msra.gmra.mxu1 %vm4746_vm1, %v9832_v44 }
 0xa66   : > { %15868 = vmatprep.mubr.msk.bf16.mxu1 %vm17510_vm0, %v17509_v41 }
 0xa72   : > { %v15510_v9 = vpop.f32.mrf.mxu0 }
 0xa74   : > { %v15532_v10 = vpop.f32.mrf.mxu1  ;;  %v15511_v12 = vpop.f32.mrf.mxu0 }
 0xa75   : > { %v15512_v17 = vadd.f32 %v15511_v12, %v15510_v9 }
 0xa76   : > { %v15533_v19 = vpop.f32.mrf.mxu1  ;;  %v15513_v20 = vpop.f32.mrf.mxu0 }
 0xa77   : > { %v15534_v24 = vadd.f32 %v15533_v19, %v15532_v10 }
 0xa78   : > { %v15535_v21 = vpop.f32.mrf.mxu1  ;;  %v15514_v38 = vpop.f32.mrf.mxu0 }
 0xa79   : > { %v9008_v22 = vadd.f32 %v15534_v24, %v15512_v17 }
 0xa7a   : > { %v15536_v23 = vpop.f32.mrf.mxu1 }
 0xa7b   : > { %v10074_v26 = vpack.c.bf16 %v9008_v22, %v9008_v22 }
 0xa7d   : > { %v10084_v40 = vsel %vm10082_vm8, %v10074_v26, 0 }
 0xa7e   : > { %15861 = vmatpush3.bf16.msra.mxu0 %v10084_v40 }
 0xa7f   : > { %15872 = vmatprep.subr.bf16.mxu0 %v17509_v41 }
 0xa92   : > { %v15554_v3 = vpop.f32.mrf.mxu0 }
 0xa94   : > { %v15576_v30 = vpop.f32.mrf.mxu1  ;;  %v15555_v27 = vpop.f32.mrf.mxu0 }
 0xa95   : > { %v15556_v25 = vadd.f32 %v15555_v27, %v15554_v3 }
 0xa96   : > { %v15577_v28 = vpop.f32.mrf.mxu1  ;;  %v15557_v46 = vpop.f32.mrf.mxu0 }
 0xa97   : > { %v15578_v47 = vadd.f32 %v15577_v28, %v15576_v30 }
 0xa98   : > { %v15579_v57 = vpop.f32.mrf.mxu1  ;;  %v15558_v32 = vpop.f32.mrf.mxu0 }
 0xa99   : > { %v9280_v58 = vadd.f32 %v15578_v47, %v15556_v25 }
 0xa9a   : > { %v15580_v31 = vpop.f32.mrf.mxu1 }
 0xa9b   : > { %v10075_v4 = vpack.c.bf16 %v9280_v58, %v9280_v58 }
 0xa9d   : > { %v10130_v33 = vsel %vm10082_vm8, %v10075_v4, 0 }
 0xa9e   : > { %15867 = vmatpush3.bf16.msra.mxu1 %v10130_v33 }
 0xa9f   : > { %15878 = vmatprep.subr.bf16.mxu1 %v17509_v41 }
 0xab2   : > { %v15598_v29 = vpop.f32.mrf.mxu0 }
 0xab4   : > { %v15620_v45 = vpop.f32.mrf.mxu1  ;;  %v15599_v34 = vpop.f32.mrf.mxu0 }
 0xab5   : > { %v15600_v56 = vadd.f32 %v15599_v34, %v15598_v29 }
 0xab6   : > { %v15621_v0 = vpop.f32.mrf.mxu1  ;;  %v15601_v53 = vpop.f32.mrf.mxu0 }
 0xab7   : > { %v15622_v15 = vadd.f32 %v15621_v0, %v15620_v45 }
 0xab8   : > { %v15623_v35 = vpop.f32.mrf.mxu1  ;;  %v15602_v36 = vpop.f32.mrf.mxu0 }
 0xab9   : > { %v18881_v37 = vadd.f32 %v15622_v15, %v15600_v56 }
 0xaba   : > { %v15624_v48 = vpop.f32.mrf.mxu1 }
 0xad2   : > { %v15642_v54 = vpop.f32.mrf.mxu0 }
 0xad4   : > { %v15664_v1 = vpop.f32.mrf.mxu1  ;;  %v15643_v42 = vpop.f32.mrf.mxu0 }
 0xad5   : > { %v15644_v55 = vadd.f32 %v15643_v42, %v15642_v54 }
 0xad6   : > { %v15665_v59 = vpop.f32.mrf.mxu1  ;;  %v15645_v51 = vpop.f32.mrf.mxu0 }
 0xad7   : > { %v15666_v2 = vadd.f32 %v15665_v59, %v15664_v1 }
 0xad8   : > { %v15667_v14 = vpop.f32.mrf.mxu1  ;;  %v15646_v61 = vpop.f32.mrf.mxu0 }
 0xad9   : > { %v18883_v62 = vadd.f32 %v15666_v2, %v15644_v55  ;;  %v10076_v14 = vpack.c.bf16 %v18881_v37, %v18881_v37 }
 0xada   : > { %v15668_v63 = vpop.f32.mrf.mxu1  ;;  %v9877_v5 = vpop.f32.mrf.mxu0 }
 0xadb   : > { %v10021_v7 = vmul.f32 0.17677669, %v9877_v5  ;;  %v16797_v5 = vld [vmem:[%s19580_s23 + $0x24] ss:$16 sps:$4 sm:$0xff]  }
 0xadc   : > { %v15840_v8 = vpop.f32.mrf.mxu0 }
 0xadd   : > { %v10026_v44 = vsel %vm10025_vm9, %v10021_v7, -inf }
 0xade   : > { %10027 = vmax.xlane.f32.xlu0 %v10026_v44  ;;  %v9880_v9 = vpop.f32.mrf.mxu0  ;;  %v10077_v44 = vpack.c.bf16 %v18883_v62, %v18883_v62  ;;  %v16795_v62 = vld [vmem:[%s19580_s23 + $0x20] ss:$16 sps:$4 sm:$0xff]  }
 0xae0   : > { %v15841_v10 = vpop.f32.mrf.mxu0 }
 0xae1   : > { %v16800_v10 = vld [vmem:[%s19580_s23 + $0x2c] ss:$16 sps:$4 sm:$0xff]  }
 0xae5   : > { %v9923_v12 = vpop.f32.mrf.mxu1 }
 0xae6   : > { %v10022_v17 = vmul.f32 0.17677669, %v9923_v12  ;;  %v10222_v12 = vsel %vm10082_vm8, %v10077_v44, 0  ;;  %v16842_v44 = vld [vmem:[%s19580_s23 + $0xcc] ss:$16 sps:$4 sm:$0xff]  }
 0xae7   : > { %v15846_v19 = vpop.f32.mrf.mxu1 }
 0xae8   : > { %v10029_v20 = vsel %vm10025_vm9, %v10022_v17, -inf }
 0xae9   : > { %10030 = vmax.xlane.f32.xlu1 %v10029_v20  ;;  %v9926_v24 = vpop.f32.mrf.mxu1 }
 0xaeb   : > { %v15847_v21 = vpop.f32.mrf.mxu1 }
 0xaec   : > { %v16803_v21 = vld [vmem:[%s19580_s23 + $0x4] ss:$16 sps:$4 sm:$0xff]  }
 0xb05   : > { %v9969_v38 = vpop.f32.mrf.mxu0 }
 0xb06   : > { %v10023_v22 = vmul.f32 0.17677669, %v9969_v38  ;;  %v16801_v38 = vld [vmem:[%s19580_s23] ss:$16 sps:$4 sm:$0xff]  }
 0xb07   : > { %v15852_v23 = vpop.f32.mrf.mxu0 }
 0xb08   : > { %v10032_v26 = vsel %vm10025_vm9, %v10023_v22, -inf  ;;  %v16809_v23 = vld [vmem:[%s19580_s23 + $0x64] ss:$16 sps:$4 sm:$0xff]  }
 0xb09   : > { %10033 = vmax.xlane.f32.xlu0 %v10032_v26  ;;  %v9972_v40 = vpop.f32.mrf.mxu0 }
 0xb0b   : > { %v15853_v3 = vpop.f32.mrf.mxu0 }
 0xb0c   : > { %v16798_v3 = vld [vmem:[%s19580_s23 + $0x28] ss:$16 sps:$4 sm:$0xff]  }
 0xb25   : > { %v10015_v30 = vpop.f32.mrf.mxu1 }
 0xb26   : > { %v10024_v27 = vmul.f32 0.17677669, %v10015_v30 }
 0xb27   : > { %v15858_v25 = vpop.f32.mrf.mxu1 }
 0xb28   : > { %v10035_v28 = vsel %vm10025_vm9, %v10024_v27, -inf  ;;  %v16804_v25 = vld [vmem:[%s19580_s23 + $0x8] ss:$16 sps:$4 sm:$0xff]  }
 0xb29   : > { %10036 = vmax.xlane.f32.xlu1 %v10035_v28  ;;  %v10018_v46 = vpop.f32.mrf.mxu1  ;;  %v16812_v28 = vld [vmem:[%s19580_s23 + $0x6c] ss:$16 sps:$4 sm:$0xff]  }
 0xb2b   : > { %v15859_v47 = vpop.f32.mrf.mxu1 }
 0xb2c   : > { %v16807_v47 = vld [vmem:[%s19580_s23 + $0x60] ss:$16 sps:$4 sm:$0xff]  }
 0xb67   : > { %v10028_v57 = vpop.xlane.xlu0 %10027 }
 0xb68   : > { %v10038_v32 = vsub.f32 %v10021_v7, %v10028_v57  ;;  %v10176_v7 = vsel %vm10082_vm8, %v10076_v14, 0  ;;  %v16810_v57 = vld [vmem:[%s19580_s23 + $0x68] ss:$16 sps:$4 sm:$0xff]  }
 0xb6a   : > { %v10042_v58 = vmul.f32 1.442695, %v10038_v32 }
 0xb6c   : > { %17365 = vpow2.f32 %v10042_v58  ;;  %v16815_v58 = vld [vmem:[%s19580_s23 + $0x44] ss:$16 sps:$4 sm:$0xff]  }
 0xb72   : > { %v10031_v31 = vpop.xlane.xlu1 %10030 }
 0xb73   : > { %v10039_v4 = vsub.f32 %v10022_v17, %v10031_v31  ;;  %v16818_v31 = vld [vmem:[%s19580_s23 + $0x4c] ss:$16 sps:$4 sm:$0xff]  }
 0xb75   : > { %v10044_v33 = vmul.f32 1.442695, %v10039_v4 }
 0xb77   : > { %17367 = vpow2.f32 %v10044_v33 }
 0xb79   : > { %v17366_v29 = vpop.eup %17365 }
 0xb7a   : > { %v10050_v45 = vsel %vm10025_vm9, %v17366_v29, 0.0 }
 0xb7b   : > { %10051 = vadd.xlane.f32.xlu0 %v10050_v45  ;;  %v16816_v45 = vld [vmem:[%s19580_s23 + $0x48] ss:$16 sps:$4 sm:$0xff]  }
 0xb84   : > { %v17368_v34 = vpop.eup %17367 }
 0xb85   : > { %v10053_v56 = vsel %vm10025_vm9, %v17368_v34, 0.0 }
 0xb86   : > { %10054 = vadd.xlane.f32.xlu1 %v10053_v56  ;;  %v16824_v56 = vld [vmem:[%s19580_s23 + $0xac] ss:$16 sps:$4 sm:$0xff]  }
 0xb92   : > { %v10034_v0 = vpop.xlane.xlu0 %10033 }
 0xb93   : > { %v10040_v53 = vsub.f32 %v10023_v22, %v10034_v0 }
 0xb95   : > { %v10046_v15 = vmul.f32 1.442695, %v10040_v53 }
 0xb97   : > { %17369 = vpow2.f32 %v10046_v15  ;;  %v16819_v15 = vld [vmem:[%s19580_s23 + $0xa0] ss:$16 sps:$4 sm:$0xff]  }
 0xba4   : > { %v17370_v35 = vpop.eup %17369 }
 0xba5   : > { %v10056_v36 = vsel %vm10025_vm9, %v17370_v35, 0.0 }
 0xba6   : > { %10057 = vadd.xlane.f32.xlu0 %v10056_v36 }
 0xbb2   : > { %v10037_v48 = vpop.xlane.xlu1 %10036 }
 0xbb3   : > { %v10041_v54 = vsub.f32 %v10024_v27, %v10037_v48  ;;  %v16806_v27 = vld [vmem:[%s19580_s23 + $0xc] ss:$16 sps:$4 sm:$0xff]   ;;  %v16827_v48 = vld [vmem:[%s19580_s23 + $0x84] ss:$16 sps:$4 sm:$0xff]  }
 0xbb5   : > { %v10048_v1 = vmul.f32 1.442695, %v10041_v54  ;;  %v16830_v54 = vld [vmem:[%s19580_s23 + $0x8c] ss:$16 sps:$4 sm:$0xff]  }
 0xbb7   : > { %17371 = vpow2.f32 %v10048_v1 }
 0xbc4   : > { %v17372_v42 = vpop.eup %17371 }
 0xbc5   : > { %v10059_v55 = vsel %vm10025_vm9, %v17372_v42, 0.0 }
 0xbc6   : > { %10060 = vadd.xlane.f32.xlu1 %v10059_v55  ;;  %v16825_v55 = vld [vmem:[%s19580_s23 + $0x80] ss:$16 sps:$4 sm:$0xff]  }
 0xc04   : > { %v10052_v59 = vpop.xlane.xlu0 %10051 }
 0xc05   : > { %17373 = vrcp.f32 %v10052_v59  ;;  %v16828_v59 = vld [vmem:[%s19580_s23 + $0x88] ss:$16 sps:$4 sm:$0xff]  }
 0xc0f   : > { %v10055_v51 = vpop.xlane.xlu1 %10054 }
 0xc10   : > { %17375 = vrcp.f32 %v10055_v51  ;;  %v16833_v51 = vld [vmem:[%s19580_s23 + $0xe4] ss:$16 sps:$4 sm:$0xff]  }
 0xc12   : > { %v17374_v2 = vpop.eup %17373 }
 0xc13   : > { %v10066_v61 = vmul.f32 %v17374_v2, %v17366_v29  ;;  %v16813_v29 = vld [vmem:[%s19580_s23 + $0x40] ss:$16 sps:$4 sm:$0xff]   ;;  %v16836_v2 = vld [vmem:[%s19580_s23 + $0xec] ss:$16 sps:$4 sm:$0xff]  }
 0xc15   : > { %v10070_v63 = vpack.c.bf16 %v10066_v61, %v10066_v61 }
 0xc17   : > { %15863 = vmatmul.mubr.msk.bf16.vlgmr.msra.gmra.mxu0 %vm10078_vm10, %v10070_v63  ;;  %v16831_v63 = vld [vmem:[%s19580_s23 + $0xe0] ss:$16 sps:$4 sm:$0xff]  }
 0xc18   : > { %15873 = vmatpush3.bf16.msra.mxu0 %v10176_v7  ;;  %15874 = vmatprep.mubr.msk.bf16.mxu0 %vm17510_vm0, %v17509_v41 }
 0xc19   : > { %10323 = vmatprep.subr.bf16.mxu0 %v16797_v5  ;;  %v16834_v5 = vld [vmem:[%s19580_s23 + $0xe8] ss:$16 sps:$4 sm:$0xff]  }
 0xc1d   : > { %v17376_v8 = vpop.eup %17375 }
 0xc1e   : > { %v10067_v37 = vmul.f32 %v17376_v8, %v17368_v34  ;;  %v16821_v34 = vld [vmem:[%s19580_s23 + $0xa4] ss:$16 sps:$4 sm:$0xff]  }
 0xc1f   : > { %v16839_v8 = vld [vmem:[%s19580_s23 + $0xc4] ss:$16 sps:$4 sm:$0xff]  }
 0xc20   : > { %v10071_v9 = vpack.c.bf16 %v10067_v37, %v10067_v37 }
 0xc22   : > { %15869 = vmatmul.mubr.msk.bf16.vlgmr.msra.gmra.mxu1 %vm10078_vm10, %v10071_v9 }
 0xc23   : > { %15879 = vmatpush3.bf16.msra.mxu1 %v10222_v12  ;;  %15880 = vmatprep.mubr.msk.bf16.mxu1 %vm17510_vm0, %v17509_v41  ;;  %v16840_v12 = vld [vmem:[%s19580_s23 + $0xc8] ss:$16 sps:$4 sm:$0xff]  }
 0xc24   : > { %10364 = vmatprep.subr.bf16.mxu1 %v16800_v10  ;;  %v16837_v10 = vld [vmem:[%s19580_s23 + $0xc0] ss:$16 sps:$4 sm:$0xff]  }
 0xc2f   : > { %v10058_v17 = vpop.xlane.xlu0 %10057 }
 0xc30   : > { %17377 = vrcp.f32 %v10058_v17 }
 0xc3d   : > { %v17378_v19 = vpop.eup %17377 }
 0xc3e   : > { %v10068_v20 = vmul.f32 %v17378_v19, %v17370_v35  ;;  %v16822_v35 = vld [vmem:[%s19580_s23 + $0xa8] ss:$16 sps:$4 sm:$0xff]  }
 0xc40   : > { %v10072_v24 = vpack.c.bf16 %v10068_v20, %v10068_v20 }
 0xc42   : > { %15875 = vmatmul.mubr.msk.bf16.vlgmr.msra.gmra.mxu0 %vm10078_vm10, %v10072_v24 }
 0xc43   : > { %10324 = vmatpush1.bf16.msra.mxu0 %v16795_v62  ;;  %10343 = vmatprep.mubr.bf16.mxu0 %v17511_v6 }
 0xc44   : > { %10325 = vmatprep.subr.bf16.mxu0 %v16803_v21 }
 0xc47   : > { %10326 = vmatpush1.bf16.msra.mxu0 %v16801_v38 }
 0xc48   : > { %10448 = vmatprep.subr.bf16.mxu0 %v16809_v23 }
 0xc4f   : > { %v10061_v22 = vpop.xlane.xlu1 %10060 }
 0xc50   : > { %17379 = vrcp.f32 %v10061_v22 }
 0xc5d   : > { %v17380_v26 = vpop.eup %17379 }
 0xc5e   : > { %v10069_v40 = vmul.f32 %v17380_v26, %v17372_v42 }
 0xc60   : > { %v10073_v30 = vpack.c.bf16 %v10069_v40, %v10069_v40 }
 0xc62   : > { %15881 = vmatmul.mubr.msk.bf16.vlgmr.msra.gmra.mxu1 %vm10078_vm10, %v10073_v30 }
 0xc63   : > { %10365 = vmatpush1.bf16.msra.mxu1 %v16798_v3  ;;  %10384 = vmatprep.mubr.bf16.mxu1 %v17511_v6 }
 0xc64   : > { %10366 = vmatprep.subr.bf16.mxu1 %v16806_v27 }
 0xc67   : > { %10367 = vmatpush1.bf16.msra.mxu1 %v16804_v25 }
 0xc68   : > { %10489 = vmatprep.subr.bf16.mxu1 %v16812_v28 }
 0xcd7   : > { %v10120_v46 = vpop.f32.mrf.mxu0 }
 0xcd8   : > { %v10264_v32 = vpack.c.bf16 %v10120_v46, %v10120_v46 }
 0xcd9   : > { %v15864_v4 = vpop.f32.mrf.mxu0 }
 0xcda   : > { %14476 = vmatmul.mubr.msk.bf16.vlgmr.msra.gmra.mxu0 %vm4746_vm1, %v10264_v32  ;;  %14477 = vmatmul.mubr.msk.bf16.vlgmr.msra.gmra.mxu1 %vm4746_vm1, %v10264_v32 }
 0xcdb   : > { %v10123_v33 = vpop.f32.mrf.mxu0  ;;  %10449 = vmatpush1.bf16.msra.mxu0 %v16807_v47  ;;  %10490 = vmatpush1.bf16.msra.mxu1 %v16810_v57 }
 0xcdc   : > { %10450 = vmatprep.subr.bf16.mxu0 %v16815_v58  ;;  %10491 = vmatprep.subr.bf16.mxu1 %v16818_v31 }
 0xcdd   : > { %v15865_v0 = vpop.f32.mrf.mxu0  ;;  %10468 = vmatprep.mubr.bf16.mxu0 %v17511_v6  ;;  %10509 = vmatprep.mubr.bf16.mxu1 %v17511_v6 }
 0xcdf   : > { %10451 = vmatpush1.bf16.msra.mxu0 %v16813_v29  ;;  %10492 = vmatpush1.bf16.msra.mxu1 %v16816_v45 }
 0xce0   : > { %10573 = vmatprep.subr.bf16.mxu0 %v16821_v34  ;;  %10614 = vmatprep.subr.bf16.mxu1 %v16824_v56 }
 0xce2   : > { %v10166_v53 = vpop.f32.mrf.mxu1 }
 0xce3   : > { %v10265_v36 = vpack.c.bf16 %v10166_v53, %v10166_v53 }
 0xce4   : > { %v15870_v1 = vpop.f32.mrf.mxu1 }
 0xce5   : > { %14486 = vmatmul.mubr.msk.bf16.vlgmr.msra.gmra.mxu0 %vm4746_vm1, %v10265_v36  ;;  %14487 = vmatmul.mubr.msk.bf16.vlgmr.msra.gmra.mxu1 %vm4746_vm1, %v10265_v36 }
 0xce6   : > { %v10169_v42 = vpop.f32.mrf.mxu1  ;;  %10574 = vmatpush1.bf16.msra.mxu0 %v16819_v15  ;;  %10615 = vmatpush1.bf16.msra.mxu1 %v16822_v35 }
 0xce7   : > { %10575 = vmatprep.subr.bf16.mxu0 %v16827_v48  ;;  %10616 = vmatprep.subr.bf16.mxu1 %v16830_v54 }
 0xce8   : > { %v15871_v14 = vpop.f32.mrf.mxu1  ;;  %10593 = vmatprep.mubr.bf16.mxu0 %v17511_v6  ;;  %10634 = vmatprep.mubr.bf16.mxu1 %v17511_v6 }
 0xcea   : > { %10576 = vmatpush1.bf16.msra.mxu0 %v16825_v55  ;;  %10617 = vmatpush1.bf16.msra.mxu1 %v16828_v59  ;;  %v2622_v55 = vld [vmem:[%s19581_s3] sm:$0xf]  ;;  %s19582_s3 = sld [smem:[#allocation22_spill]] }
 0xceb   : > { %10698 = vmatprep.subr.bf16.mxu0 %v16833_v51  ;;  %10739 = vmatprep.subr.bf16.mxu1 %v16836_v2 }
 0xd02   : > { %v10212_v61 = vpop.f32.mrf.mxu0 }
 0xd03   : > { %v10266_v7 = vpack.c.bf16 %v10212_v61, %v10212_v61 }
 0xd04   : > { %v15876_v37 = vpop.f32.mrf.mxu0 }
 0xd05   : > { %14496 = vmatmul.mubr.msk.bf16.vlgmr.msra.gmra.mxu0 %vm4746_vm1, %v10266_v7  ;;  %14497 = vmatmul.mubr.msk.bf16.vlgmr.msra.gmra.mxu1 %vm4746_vm1, %v10266_v7 }
 0xd06   : > { %v10215_v9 = vpop.f32.mrf.mxu0  ;;  %10699 = vmatpush1.bf16.msra.mxu0 %v16831_v63  ;;  %10740 = vmatpush1.bf16.msra.mxu1 %v16834_v5 }
 0xd07   : > { %10700 = vmatprep.subr.bf16.mxu0 %v16839_v8  ;;  %10741 = vmatprep.subr.bf16.mxu1 %v16842_v44  ;;  %v10800_v8 = vrot.slane %v2622_v55, %v17839_v49 }
 0xd08   : > { %v15877_v17 = vpop.f32.mrf.mxu0  ;;  %10718 = vmatprep.mubr.bf16.mxu0 %v17511_v6  ;;  %10759 = vmatprep.mubr.bf16.mxu1 %v17511_v6 }
 0xd09   : > { %v10808_v17 = vrot.slane %v2622_v55, %v18324_v39 }
 0xd0a   : > { %10701 = vmatpush1.bf16.msra.mxu0 %v16837_v10  ;;  %10742 = vmatpush1.bf16.msra.mxu1 %v16840_v12 }
 0xd22   : > { %v10258_v19 = vpop.f32.mrf.mxu1 }
 0xd23   : > { %v10267_v20 = vpack.c.bf16 %v10258_v19, %v10258_v19 }
 0xd24   : > { %v15882_v62 = vpop.f32.mrf.mxu1 }
 0xd25   : > { %14506 = vmatmul.mubr.msk.bf16.vlgmr.msra.gmra.mxu0 %vm4746_vm1, %v10267_v20  ;;  %14507 = vmatmul.mubr.msk.bf16.vlgmr.msra.gmra.mxu1 %vm4746_vm1, %v10267_v20  ;;  %v10804_v62 = vrot.slane %v2622_v55, %v17842_v50 }
 0xd26   : > { %v10261_v24 = vpop.f32.mrf.mxu1 }
 0xd27   : > { %v10812_v24 = vrot.slane %v2622_v55, %v18329_v43  ;;  %v16848_v55 = vld [vmem:[%s19582_s3 + $0x2e4] ss:$16 sps:$4 sm:$0xff]  }
 0xd28   : > { %v15883_v21 = vpop.f32.mrf.mxu1  ;;  %11615 = vmatprep.subr.bf16.mxu1 %v16848_v55 }
 0xd9a   : > { %v10345_v38 = vpop.f32.mrf.mxu0  ;;  %v10386_v22 = vpop.f32.mrf.mxu1 }
 0xd9b   : > { %v10782_v46 = vsel %vm4991_vm2, %v10386_v22, 0.0  ;;  %v10768_v59 = vsel %vm4991_vm2, %v10345_v38, 0.0 }
 0xd9c   : > { %v10347_v23 = vpop.f32.mrf.mxu0  ;;  %v10388_v26 = vpop.f32.mrf.mxu1 }
 0xd9d   : > { %v10789_v31 = vsel %vm4991_vm2, %v10388_v26, 0.0  ;;  %v10775_v63 = vsel %vm4991_vm2, %v10347_v23, 0.0 }
 0xd9e   : > { %v10349_v40 = vpop.f32.mrf.mxu0  ;;  %v10390_v3 = vpop.f32.mrf.mxu1 }
 0xda0   : > { %v10350_v30 = vpop.f32.mrf.mxu0  ;;  %v10391_v27 = vpop.f32.mrf.mxu1 }
 0xda5   : > { %v10470_v25 = vpop.f32.mrf.mxu0  ;;  %v10511_v28 = vpop.f32.mrf.mxu1 }
 0xda6   : > { %v10783_v47 = vsel %vm4991_vm2, %v10511_v28, 0.0  ;;  %v10769_v42 = vsel %vm4991_vm2, %v10470_v25, 0.0 }
 0xda7   : > { %v10784_v57 = vadd.f32 %v10783_v47, %v10782_v46  ;;  %v10472_v32 = vpop.f32.mrf.mxu0  ;;  %v10513_v58 = vpop.f32.mrf.mxu1  ;;  %v10770_v61 = vadd.f32 %v10769_v42, %v10768_v59  ;;  %v16846_v42 = vld [vmem:[%s19582_s3 + $0x2e0] ss:$16 sps:$4 sm:$0xff]   ;;  %v16851_v59 = vld [vmem:[%s19582_s3 + $0xc4] ss:$16 sps:$4 sm:$0xff]  }
 0xda8   : > { %v10790_v4 = vsel %vm4991_vm2, %v10513_v58, 0.0  ;;  %v10776_v51 = vsel %vm4991_vm2, %v10472_v32, 0.0  ;;  %v17403_v32 = vld [vmem:[%s18121_s1] sm:$0xff]  ;;  %11616 = vmatpush1.bf16.msra.mxu1 %v16846_v42 }
 0xda9   : > { %v10791_v33 = vadd.f32 %v10790_v4, %v10789_v31  ;;  %v10474_v29 = vpop.f32.mrf.mxu0  ;;  %v10515_v45 = vpop.f32.mrf.mxu1  ;;  %v10777_v44 = vadd.f32 %v10776_v51, %v10775_v63  ;;  %v16854_v51 = vld [vmem:[%s19582_s3 + $0x2c4] ss:$16 sps:$4 sm:$0xff]  }
 0xdaa   : > { %v17404_v45 = vld [vmem:[%s18121_s1 + $0x8] sm:$0xff]  ;;  %11617 = vmatprep.subr.bf16.mxu1 %v16854_v51  ;;  %v16860_v63 = vld [vmem:[%s19582_s3 + $0x2a4] ss:$16 sps:$4 sm:$0xff]   ;;  %s19583_s1 = sld [smem:[#allocation20_spill]] }
 0xdab   : > { %v10475_v34 = vpop.f32.mrf.mxu0  ;;  %v10516_v56 = vpop.f32.mrf.mxu1 }
 0xdc5   : > { %v10595_v0 = vpop.f32.mrf.mxu0  ;;  %v10636_v53 = vpop.f32.mrf.mxu1 }
 0xdc6   : > { %v10771_v2 = vsel %vm4991_vm2, %v10595_v0, 0.0  ;;  %v10785_v14 = vsel %vm4991_vm2, %v10636_v53, 0.0 }
 0xdc7   : > { %v10597_v15 = vpop.f32.mrf.mxu0  ;;  %v10638_v35 = vpop.f32.mrf.mxu1  ;;  %v10772_v37 = vadd.f32 %v10771_v2, %v10770_v61  ;;  %v10786_v9 = vadd.f32 %v10785_v14, %v10784_v57  ;;  %v16849_v2 = vld [vmem:[%s19582_s3 + $0xc0] ss:$16 sps:$4 sm:$0xff]   ;;  %v16857_v61 = vld [vmem:[%s19582_s3 + $0xa4] ss:$16 sps:$4 sm:$0xff]  }
 0xdc8   : > { %v10778_v5 = vsel %vm4991_vm2, %v10597_v15, 0.0  ;;  %v10792_v7 = vsel %vm4991_vm2, %v10638_v35, 0.0  ;;  %v16852_v14 = vld [vmem:[%s19582_s3 + $0x2c0] ss:$16 sps:$4 sm:$0xff]  }
 0xdc9   : > { %v10599_v36 = vpop.f32.mrf.mxu0  ;;  %v10640_v48 = vpop.f32.mrf.mxu1  ;;  %v10779_v21 = vadd.f32 %v10778_v5, %v10777_v44  ;;  %v10793_v38 = vadd.f32 %v10792_v7, %v10791_v33  ;;  %v16855_v5 = vld [vmem:[%s19582_s3 + $0xa0] ss:$16 sps:$4 sm:$0xff]   ;;  %11618 = vmatpush1.bf16.msra.mxu1 %v16852_v14  ;;  %v16866_v44 = vld [vmem:[%s19582_s3 + $0x284] ss:$16 sps:$4 sm:$0xff]  }
 0xdca   : > { %v16858_v7 = vld [vmem:[%s19582_s3 + $0x2a0] ss:$16 sps:$4 sm:$0xff]   ;;  %11619 = vmatprep.subr.bf16.mxu1 %v16860_v63  ;;  %v16905_v14 = vld [vmem:[%s19582_s3 + $0x1a4] ss:$16 sps:$4 sm:$0xff]  }
 0xdcb   : > { %v10600_v54 = vpop.f32.mrf.mxu0  ;;  %v10641_v1 = vpop.f32.mrf.mxu1  ;;  %v16903_v63 = vld [vmem:[%s19582_s3 + $0x1a0] ss:$16 sps:$4 sm:$0xff]  }
 0xdcc   : > { %v16845_v1 = vld [vmem:[%s19582_s3 + $0xe4] ss:$16 sps:$4 sm:$0xff]  }
 0xdcd   : > { %11574 = vmatprep.subr.bf16.mxu0 %v16845_v1  ;;  %11620 = vmatpush1.bf16.msra.mxu1 %v16858_v7  ;;  %v16909_v7 = vld [vmem:[%s19582_s3 + $0x180] ss:$16 sps:$4 sm:$0xff]  }
 0xdce   : > { %11621 = vmatprep.subr.bf16.mxu1 %v16866_v44  ;;  %v16912_v44 = vld [vmem:[%s19582_s3 + $0x380] ss:$16 sps:$4 sm:$0xff]  }
 0xde5   : > { %v10720_v10 = vpop.f32.mrf.mxu0  ;;  %v10761_v12 = vpop.f32.mrf.mxu1 }
 0xde6   : > { %v10773_v19 = vsel %vm4991_vm2, %v10720_v10, 0.0  ;;  %v10787_v20 = vsel %vm4991_vm2, %v10761_v12, 0.0  ;;  %v16869_v10 = vld [vmem:[%s19582_s3 + $0x64] ss:$16 sps:$4 sm:$0xff]  }
 0xde7   : > { %v10774_v22 = vadd.f32 %v10773_v19, %v10772_v37  ;;  %v10788_v23 = vadd.f32 %v10787_v20, %v10786_v9  ;;  %v10722_v26 = vpop.f32.mrf.mxu0  ;;  %v10763_v40 = vpop.f32.mrf.mxu1  ;;  %v16861_v37 = vld [vmem:[%s19582_s3 + $0x80] ss:$16 sps:$4 sm:$0xff]   ;;  %v16872_v12 = vld [vmem:[%s19582_s3 + $0x264] ss:$16 sps:$4 sm:$0xff]  }
 0xde8   : > { %v10780_v3 = vsel %vm4991_vm2, %v10722_v26, 0.0  ;;  %v10794_v30 = vsel %vm4991_vm2, %v10763_v40, 0.0  ;;  %v16864_v9 = vld [vmem:[%s19582_s3 + $0x280] ss:$16 sps:$4 sm:$0xff]   ;;  %v16875_v20 = vld [vmem:[%s19582_s3 + $0x44] ss:$16 sps:$4 sm:$0xff]  }
 0xde9   : > { %v10817_v27 = vadd.f32 %v10800_v8, %v10774_v22  ;;  %v10819_v25 = vadd.f32 %v10808_v17, %v10788_v23  ;;  %v10781_v28 = vadd.f32 %v10780_v3, %v10779_v21  ;;  %v10795_v46 = vadd.f32 %v10794_v30, %v10793_v38  ;;  %v10724_v47 = vpop.f32.mrf.mxu0  ;;  %v10765_v57 = vpop.f32.mrf.mxu1  ;;  %v16863_v8 = vld [vmem:[%s19582_s3 + $0x84] ss:$16 sps:$4 sm:$0xff]   ;;  %v16867_v17 = vld [vmem:[%s19582_s3 + $0x60] ss:$16 sps:$4 sm:$0xff]   ;;  %11622 = vmatpush1.bf16.msra.mxu1 %v16864_v9 }
 0xdea   : > { %v16870_v19 = vld [vmem:[%s19582_s3 + $0x260] ss:$16 sps:$4 sm:$0xff]   ;;  %11623 = vmatprep.subr.bf16.mxu1 %v16872_v12  ;;  %v16881_v38 = vld [vmem:[%s19582_s3 + $0x24] ss:$16 sps:$4 sm:$0xff]  }
 0xdeb   : > { %v18977_v58 = vadd.f32 %v17403_v32, %v10817_v27  ;;  %v10818_v31 = vadd.f32 %v10804_v62, %v10781_v28  ;;  %v10820_v4 = vadd.f32 %v10812_v24, %v10795_v46  ;;  %v10725_v33 = vpop.f32.mrf.mxu0  ;;  %v10766_v29 = vpop.f32.mrf.mxu1  ;;  %v18980_v34 = vadd.f32 %v17404_v45, %v10819_v25  ;;  %v16878_v62 = vld [vmem:[%s19582_s3 + $0x244] ss:$16 sps:$4 sm:$0xff]   ;;  %v16873_v24 = vld [vmem:[%s19582_s3 + $0x40] ss:$16 sps:$4 sm:$0xff]  }
 0xdec   : > { %v16876_v21 = vld [vmem:[%s19582_s3 + $0x240] ss:$16 sps:$4 sm:$0xff]   ;;  %v16884_v22 = vld [vmem:[%s19582_s3 + $0x224] ss:$16 sps:$4 sm:$0xff]  }
 0xded   : > { %v18983_v56 = vadd.f32 %v10818_v31, %v18129_v52  ;;  %v18986_v0 = vadd.f32 %v10820_v4, %v18142_v11  ;;  %v10825_v53 = vsel %vm4991_vm2, %v18977_v58, 0.0  ;;  %v10828_v36 = vsel %vm4991_vm2, %v18980_v34, 0.0  ;;  %v16843_v11 = vld [vmem:[%s19582_s3 + $0xe0] ss:$16 sps:$4 sm:$0xff]   ;;  %11624 = vmatpush1.bf16.msra.mxu1 %v16870_v19  ;;  %v16887_v40 = vld [vmem:[%s19582_s3 + $0x4] ss:$16 sps:$4 sm:$0xff]  }
 0xdee   : > { %11575 = vmatpush1.bf16.msra.mxu0 %v16843_v11  ;;  %11625 = vmatprep.subr.bf16.mxu1 %v16878_v62  ;;  %v16879_v23 = vld [vmem:[%s19582_s3 + $0x20] ss:$16 sps:$4 sm:$0xff]   ;;  %v16890_v3 = vld [vmem:[%s19582_s3 + $0x204] ss:$16 sps:$4 sm:$0xff]  }
 0xdef   : > { %v10826_v15 = vsel %vm4991_vm2, %v18983_v56, 0.0  ;;  %v10830_v52 = vsel %vm4991_vm2, %v18986_v0, 0.0  ;;  %11576 = vmatprep.subr.bf16.mxu0 %v16851_v59  ;;  %v16882_v26 = vld [vmem:[%s19582_s3 + $0x220] ss:$16 sps:$4 sm:$0xff]   ;;  %v16893_v25 = vld [vmem:[%s19582_s3 + $0x1e4] ss:$16 sps:$4 sm:$0xff]  }
 0xdf0   : > { %v10827_v35 = vadd.f32 %v10826_v15, %v10825_v53  ;;  %v16885_v30 = vld [vmem:[%s19582_s3] ss:$16 sps:$4 sm:$0xff]   ;;  %v16896_v28 = vld [vmem:[%s19582_s3 + $0x3e4] ss:$16 sps:$4 sm:$0xff]  }
 0xdf1   : > { %11626 = vmatpush1.bf16.msra.mxu1 %v16876_v21  ;;  %v16888_v27 = vld [vmem:[%s19582_s3 + $0x200] ss:$16 sps:$4 sm:$0xff]   ;;  %v16899_v57 = vld [vmem:[%s19582_s3 + $0x1c4] ss:$16 sps:$4 sm:$0xff]  }
 0xdf2   : > { %v10829_v48 = vadd.f32 %v10828_v36, %v10827_v35  ;;  %11577 = vmatpush1.bf16.msra.mxu0 %v16849_v2  ;;  %11627 = vmatprep.subr.bf16.mxu1 %v16884_v22  ;;  %v16891_v46 = vld [vmem:[%s19582_s3 + $0x1e0] ss:$16 sps:$4 sm:$0xff]   ;;  %v16902_v32 = vld [vmem:[%s19582_s3 + $0x3c4] ss:$16 sps:$4 sm:$0xff]  }
 0xdf3   : > { %11578 = vmatprep.subr.bf16.mxu0 %v16857_v61  ;;  %v16894_v47 = vld [vmem:[%s19582_s3 + $0x3e0] ss:$16 sps:$4 sm:$0xff]   ;;  %v16908_v61 = vld [vmem:[%s19582_s3 + $0x3a4] ss:$16 sps:$4 sm:$0xff]  }
 0xdf4   : > { %v10831_v54 = vadd.f32 %v10830_v52, %v10829_v48  ;;  %v16897_v31 = vld [vmem:[%s19582_s3 + $0x1c0] ss:$16 sps:$4 sm:$0xff]   ;;  %v16917_v9 = vld [vmem:[%s19582_s3 + $0x164] ss:$16 sps:$4 sm:$0xff]  }
 0xdf5   : > { %11628 = vmatpush1.bf16.msra.mxu1 %v16882_v26  ;;  %v16900_v4 = vld [vmem:[%s19582_s3 + $0x3c0] ss:$16 sps:$4 sm:$0xff]   ;;  %v16923_v19 = vld [vmem:[%s19582_s3 + $0x144] ss:$16 sps:$4 sm:$0xff]  }
 0xdf6   : > { %10832 = vadd.xlane.f32.xlu0 %v10831_v54  ;;  %11579 = vmatpush1.bf16.msra.mxu0 %v16855_v5  ;;  %v16906_v5 = vld [vmem:[%s19582_s3 + $0x3a0] ss:$16 sps:$4 sm:$0xff]   ;;  %v16929_v21 = vld [vmem:[%s19582_s3 + $0x124] ss:$16 sps:$4 sm:$0xff]  }
 0xdf7   : > { %11580 = vmatprep.subr.bf16.mxu0 %v16863_v8  ;;  %11629 = vmatprep.subr.bf16.mxu1 %v16890_v3  ;;  %v16911_v8 = vld [vmem:[%s19582_s3 + $0x184] ss:$16 sps:$4 sm:$0xff]   ;;  %v16915_v12 = vld [vmem:[%s19582_s3 + $0x160] ss:$16 sps:$4 sm:$0xff]  }
 0xdf8   : > { %v16921_v62 = vld [vmem:[%s19582_s3 + $0x140] ss:$16 sps:$4 sm:$0xff]   ;;  %v16935_v26 = vld [vmem:[%s19582_s3 + $0x104] ss:$16 sps:$4 sm:$0xff]  }
 0xdf9   : > { %11630 = vmatpush1.bf16.msra.mxu1 %v16888_v27  ;;  %v16927_v22 = vld [vmem:[%s19582_s3 + $0x120] ss:$16 sps:$4 sm:$0xff]   ;;  %v16941_v27 = vld [vmem:[%s19582_s3 + $0xec] ss:$16 sps:$4 sm:$0xff]  }
 0xdfa   : > { %11581 = vmatpush1.bf16.msra.mxu0 %v16861_v37  ;;  %11631 = vmatprep.subr.bf16.mxu1 %v16896_v28  ;;  %v16914_v37 = vld [vmem:[%s19582_s3 + $0x384] ss:$16 sps:$4 sm:$0xff]   ;;  %v16933_v3 = vld [vmem:[%s19582_s3 + $0x100] ss:$16 sps:$4 sm:$0xff]  }
 0xdfb   : > { %11582 = vmatprep.subr.bf16.mxu0 %v16869_v10  ;;  %v16920_v10 = vld [vmem:[%s19582_s3 + $0x364] ss:$16 sps:$4 sm:$0xff]  }
 0xdfd   : > { %11632 = vmatpush2.bf16.msra.mxu1 %v16894_v47 }
 0xdfe   : > { %11583 = vmatpush1.bf16.msra.mxu0 %v16867_v17  ;;  %11633 = vmatprep.subr.bf16.mxu1 %v16902_v32  ;;  %v16918_v17 = vld [vmem:[%s19582_s3 + $0x360] ss:$16 sps:$4 sm:$0xff]  }
 0xdff   : > { %11584 = vmatprep.subr.bf16.mxu0 %v16875_v20  ;;  %v16926_v20 = vld [vmem:[%s19582_s3 + $0x344] ss:$16 sps:$4 sm:$0xff]   ;;  %v2624_v32 = vld [vmem:[%s19584_s4] sm:$0xf]  ;;  %s19585_s4 = sld [smem:[#allocation24_spill]] }
 0xe01   : > { %11634 = vmatpush2.bf16.msra.mxu1 %v16900_v4 }
 0xe02   : > { %11585 = vmatpush1.bf16.msra.mxu0 %v16873_v24  ;;  %11635 = vmatprep.subr.bf16.mxu1 %v16908_v61  ;;  %v16924_v24 = vld [vmem:[%s19582_s3 + $0x340] ss:$16 sps:$4 sm:$0xff]  }
 0xe03   : > { %11586 = vmatprep.subr.bf16.mxu0 %v16881_v38  ;;  %v16932_v38 = vld [vmem:[%s19582_s3 + $0x324] ss:$16 sps:$4 sm:$0xff]  }
 0xe05   : > { %11636 = vmatpush2.bf16.msra.mxu1 %v16906_v5 }
 0xe06   : > { %11587 = vmatpush1.bf16.msra.mxu0 %v16879_v23  ;;  %11637 = vmatprep.subr.bf16.mxu1 %v16914_v37  ;;  %v16930_v23 = vld [vmem:[%s19582_s3 + $0x320] ss:$16 sps:$4 sm:$0xff]   ;;  %v16939_v37 = vld [vmem:[%s19582_s3 + $0xe8] ss:$16 sps:$4 sm:$0xff]  }
 0xe07   : > { %11588 = vmatprep.subr.bf16.mxu0 %v16887_v40  ;;  %v16938_v40 = vld [vmem:[%s19582_s3 + $0x304] ss:$16 sps:$4 sm:$0xff]  }
 0xe09   : > { %11638 = vmatpush2.bf16.msra.mxu1 %v16912_v44 }
 0xe0a   : > { %11589 = vmatpush1.bf16.msra.mxu0 %v16885_v30  ;;  %11639 = vmatprep.subr.bf16.mxu1 %v16920_v10  ;;  %v16936_v30 = vld [vmem:[%s19582_s3 + $0x300] ss:$16 sps:$4 sm:$0xff]   ;;  %v16950_v10 = vld [vmem:[%s19582_s3 + $0x2cc] ss:$16 sps:$4 sm:$0xff]  }
 0xe0b   : > { %11590 = vmatprep.subr.bf16.mxu0 %v16893_v25  ;;  %v16944_v25 = vld [vmem:[%s19582_s3 + $0x2ec] ss:$16 sps:$4 sm:$0xff]  }
 0xe0d   : > { %11640 = vmatpush2.bf16.msra.mxu1 %v16918_v17  ;;  %v16948_v17 = vld [vmem:[%s19582_s3 + $0x2c8] ss:$16 sps:$4 sm:$0xff]  }
 0xe0e   : > { %11591 = vmatpush2.bf16.msra.mxu0 %v16891_v46  ;;  %11641 = vmatprep.subr.bf16.mxu1 %v16926_v20  ;;  %v16956_v20 = vld [vmem:[%s19582_s3 + $0x2ac] ss:$16 sps:$4 sm:$0xff]  }
 0xe0f   : > { %11592 = vmatprep.subr.bf16.mxu0 %v16899_v57  ;;  %v2623_v57 = vld [vmem:[%s19583_s1] sm:$0xf]  ;;  %s19586_s1 = sld [smem:[#allocation23_spill]] }
 0xe10   : > { %v10875_v4 = vrot.slane %v2623_v57, %v18329_v43 }
 0xe11   : > { %11642 = vmatpush2.bf16.msra.mxu1 %v16924_v24  ;;  %v16954_v24 = vld [vmem:[%s19582_s3 + $0x2a8] ss:$16 sps:$4 sm:$0xff]  }
 0xe12   : > { %11593 = vmatpush2.bf16.msra.mxu0 %v16897_v31  ;;  %11643 = vmatprep.subr.bf16.mxu1 %v16932_v38  ;;  %v10867_v31 = vrot.slane %v2623_v57, %v17842_v50  ;;  %v16962_v38 = vld [vmem:[%s19582_s3 + $0x28c] ss:$16 sps:$4 sm:$0xff]  }
 0xe13   : > { %11594 = vmatprep.subr.bf16.mxu0 %v16905_v14 }
 0xe15   : > { %11644 = vmatpush2.bf16.msra.mxu1 %v16930_v23  ;;  %v16960_v23 = vld [vmem:[%s19582_s3 + $0x288] ss:$16 sps:$4 sm:$0xff]  }
 0xe16   : > { %11595 = vmatpush2.bf16.msra.mxu0 %v16903_v63  ;;  %11645 = vmatprep.subr.bf16.mxu1 %v16938_v40  ;;  %v16968_v40 = vld [vmem:[%s19582_s3 + $0x26c] ss:$16 sps:$4 sm:$0xff]  }
 0xe17   : > { %11596 = vmatprep.subr.bf16.mxu0 %v16911_v8 }
 0xe19   : > { %11646 = vmatpush2.bf16.msra.mxu1 %v16936_v30  ;;  %v16966_v30 = vld [vmem:[%s19582_s3 + $0x268] ss:$16 sps:$4 sm:$0xff]  }
 0xe1a   : > { %11597 = vmatpush2.bf16.msra.mxu0 %v16909_v7  ;;  %11697 = vmatprep.subr.bf16.mxu1 %v16944_v25  ;;  %v16974_v25 = vld [vmem:[%s19582_s3 + $0x24c] ss:$16 sps:$4 sm:$0xff]  }
 0xe1b   : > { %11598 = vmatprep.subr.bf16.mxu0 %v16917_v9  ;;  %v16947_v9 = vld [vmem:[%s19582_s3 + $0xcc] ss:$16 sps:$4 sm:$0xff]  }
 0xe1e   : > { %11599 = vmatpush2.bf16.msra.mxu0 %v16915_v12  ;;  %v16945_v12 = vld [vmem:[%s19582_s3 + $0xc8] ss:$16 sps:$4 sm:$0xff]  }
 0xe1f   : > { %11600 = vmatprep.subr.bf16.mxu0 %v16923_v19  ;;  %v16953_v19 = vld [vmem:[%s19582_s3 + $0xac] ss:$16 sps:$4 sm:$0xff]  }
 0xe22   : > { %11601 = vmatpush2.bf16.msra.mxu0 %v16921_v62  ;;  %v16951_v62 = vld [vmem:[%s19582_s3 + $0xa8] ss:$16 sps:$4 sm:$0xff]  }
 0xe23   : > { %11602 = vmatprep.subr.bf16.mxu0 %v16929_v21  ;;  %v16959_v21 = vld [vmem:[%s19582_s3 + $0x8c] ss:$16 sps:$4 sm:$0xff]  }
 0xe26   : > { %11603 = vmatpush2.bf16.msra.mxu0 %v16927_v22  ;;  %v16957_v22 = vld [vmem:[%s19582_s3 + $0x88] ss:$16 sps:$4 sm:$0xff]  }
 0xe27   : > { %11604 = vmatprep.subr.bf16.mxu0 %v16935_v26  ;;  %v16965_v26 = vld [vmem:[%s19582_s3 + $0x6c] ss:$16 sps:$4 sm:$0xff]  }
 0xe2a   : > { %11605 = vmatpush2.bf16.msra.mxu0 %v16933_v3  ;;  %v16963_v3 = vld [vmem:[%s19582_s3 + $0x68] ss:$16 sps:$4 sm:$0xff]  }
 0xe2b   : > { %11656 = vmatprep.subr.bf16.mxu0 %v16941_v27  ;;  %v16971_v27 = vld [vmem:[%s19582_s3 + $0x4c] ss:$16 sps:$4 sm:$0xff]  }
 0xe7f   : > { %v10833_v33 = vpop.xlane.xlu0 %10832 }
 0xe80   : > { %v10834_v29 = vmul.f32 0.001953125, %v10833_v33  ;;  %v10863_v33 = vrot.slane %v2623_v57, %v17839_v49 }
 0xe82   : > { %v19037_v45 = vsub.f32 %v18977_v58, %v10834_v29  ;;  %v19040_v53 = vsub.f32 %v18983_v56, %v10834_v29  ;;  %v19043_v15 = vsub.f32 %v18980_v34, %v10834_v29  ;;  %v19046_v35 = vsub.f32 %v18986_v0, %v10834_v29 }
 0xe83   : > { %v10871_v29 = vrot.slane %v2623_v57, %v18324_v39  ;;  %v16980_v57 = vld [vmem:[%s19582_s3 + $0x22c] ss:$16 sps:$4 sm:$0xff]  }
 0xe84   : > { %v10839_v36 = vmul.f32 %v19037_v45, %v19037_v45  ;;  %v10840_v48 = vmul.f32 %v19040_v53, %v19040_v53  ;;  %v10841_v52 = vmul.f32 %v19043_v15, %v19043_v15  ;;  %v10842_v54 = vmul.f32 %v19046_v35, %v19046_v35 }
 0xe86   : > { %v10843_v11 = vsel %vm4991_vm2, %v10839_v36, 0.0  ;;  %v10844_v1 = vsel %vm4991_vm2, %v10840_v48, 0.0  ;;  %v10846_v55 = vsel %vm4991_vm2, %v10841_v52, 0.0  ;;  %v10848_v51 = vsel %vm4991_vm2, %v10842_v54, 0.0 }
 0xe87   : > { %v10845_v42 = vadd.f32 %v10844_v1, %v10843_v11  ;;  %v10892_v48 = vrot.slane %v2624_v32, %v17842_v50  ;;  %v10900_v52 = vrot.slane %v2624_v32, %v18329_v43  ;;  %v10888_v54 = vrot.slane %v2624_v32, %v17839_v49 }
 0xe88   : > { %v10896_v11 = vrot.slane %v2624_v32, %v18324_v39  ;;  %v16975_v32 = vld [vmem:[%s19582_s3 + $0x28] ss:$16 sps:$4 sm:$0xff]  }
 0xe89   : > { %v10847_v59 = vadd.f32 %v10846_v55, %v10845_v42 }
 0xe8b   : > { %v10849_v2 = vadd.f32 %v10848_v51, %v10847_v59 }
 0xe8d   : > { %10850 = vadd.xlane.f32.xlu1 %v10849_v2 }
 0xf16   : > { %v10851_v28 = vpop.xlane.xlu1 %10850 }
 0xf17   : > { %v10852_v46 = vmul.f32 0.001953125, %v10851_v28  ;;  %v16969_v28 = vld [vmem:[%s19582_s3 + $0x48] ss:$16 sps:$4 sm:$0xff]  }
 0xf19   : > { %v10853_v47 = vadd.f32 1e-05, %v10852_v46  ;;  %v16972_v46 = vld [vmem:[%s19582_s3 + $0x248] ss:$16 sps:$4 sm:$0xff]  }
 0xf1b   : > { %17381 = vrsqrt.f32 %v10853_v47  ;;  %v16977_v47 = vld [vmem:[%s19582_s3 + $0x2c] ss:$16 sps:$4 sm:$0xff]  }
 0xf28   : > { %v17382_v36 = vpop.eup %17381 }
 0xf29   : > { %v10856_v1 = vmul.f32 %v17382_v36, %v19040_v53  ;;  %v10858_v42 = vmul.f32 %v17382_v36, %v19046_v35  ;;  %v10855_v55 = vmul.f32 %v17382_v36, %v19037_v45  ;;  %v10857_v59 = vmul.f32 %v17382_v36, %v19043_v15  ;;  %v16942_v35 = vld [vmem:[%s19582_s3 + $0x2e8] ss:$16 sps:$4 sm:$0xff]  }
 0xf2a   : > { %v16984_v36 = vld [vmem:[%s19582_s3 + $0x208] ss:$16 sps:$4 sm:$0xff]  }
 0xf2b   : > { %v10881_v51 = vmul.f32 %v10867_v31, %v10856_v1  ;;  %v10883_v2 = vmul.f32 %v10875_v4, %v10858_v42  ;;  %v10880_v14 = vmul.f32 %v10863_v33, %v10855_v55  ;;  %v10882_v61 = vmul.f32 %v10871_v29, %v10857_v59  ;;  %v16978_v31 = vld [vmem:[%s19582_s3 + $0x228] ss:$16 sps:$4 sm:$0xff]   ;;  %v16983_v4 = vld [vmem:[%s19582_s3 + $0xc] ss:$16 sps:$4 sm:$0xff]  }
 0xf2c   : > { %v16986_v33 = vld [vmem:[%s19582_s3 + $0x20c] ss:$16 sps:$4 sm:$0xff]   ;;  %v16981_v29 = vld [vmem:[%s19582_s3 + $0x8] ss:$16 sps:$4 sm:$0xff]  }
 0xf2d   : > { %v10906_v63 = vadd.f32 %v10892_v48, %v10881_v51  ;;  %v10908_v5 = vadd.f32 %v10900_v52, %v10883_v2  ;;  %v10905_v7 = vadd.f32 %v10888_v54, %v10880_v14  ;;  %v10907_v8 = vadd.f32 %v10896_v11, %v10882_v61  ;;  %v16989_v48 = vld [vmem:[%s19582_s3 + $0x1ec] ss:$16 sps:$4 sm:$0xff]   ;;  %v16987_v54 = vld [vmem:[%s19582_s3 + $0x1e8] ss:$16 sps:$4 sm:$0xff]  }
 0xf2e   : > { %v16992_v52 = vld [vmem:[%s19582_s3 + $0x3ec] ss:$16 sps:$4 sm:$0xff]   ;;  %v16990_v11 = vld [vmem:[%s19582_s3 + $0x3e8] ss:$16 sps:$4 sm:$0xff]  }
 0xf2f   : > { %v10910_v44 = vpack.c.bf16 %v10906_v63, %v10906_v63  ;;  %v10912_v53 = vpack.c.bf16 %v10908_v5, %v10908_v5  ;;  %v19102_v45 = vpack.c.bf16 %v10905_v7, %v10905_v7  ;;  %v19104_v15 = vpack.c.bf16 %v10907_v8, %v10907_v8  ;;  %v16995_v1 = vld [vmem:[%s19582_s3 + $0x1cc] ss:$16 sps:$4 sm:$0xff]   ;;  %v16993_v55 = vld [vmem:[%s19582_s3 + $0x1c8] ss:$16 sps:$4 sm:$0xff]  }
 0xf30   : > { %v16998_v42 = vld [vmem:[%s19582_s3 + $0x3cc] ss:$16 sps:$4 sm:$0xff]   ;;  %v16996_v59 = vld [vmem:[%s19582_s3 + $0x3c8] ss:$16 sps:$4 sm:$0xff]  }
 0xf31   : > { %11606 = vmatprep.mubr.bf16.mxu0 %v10910_v44  ;;  %11647 = vmatprep.mubr.bf16.mxu1 %v10912_v53  ;;  %v17001_v51 = vld [vmem:[%s19582_s3 + $0x1ac] ss:$16 sps:$4 sm:$0xff]   ;;  %v16999_v14 = vld [vmem:[%s19582_s3 + $0x1a8] ss:$16 sps:$4 sm:$0xff]  }
 0xf32   : > { %11607 = vmatmul.mubr.bf16.vlgmr.msra.gmra.mxu0 %v19102_v45  ;;  %11648 = vmatmul.mubr.bf16.vlgmr.msra.gmra.mxu1 %v19104_v15  ;;  %v17004_v2 = vld [vmem:[%s19582_s3 + $0x3ac] ss:$16 sps:$4 sm:$0xff]   ;;  %v17002_v61 = vld [vmem:[%s19582_s3 + $0x3a8] ss:$16 sps:$4 sm:$0xff]  }
 0xf33   : > { %11657 = vmatpush1.bf16.msra.mxu0 %v16939_v37  ;;  %11698 = vmatpush1.bf16.msra.mxu1 %v16942_v35  ;;  %v17007_v63 = vld [vmem:[%s19582_s3 + $0x18c] ss:$16 sps:$4 sm:$0xff]   ;;  %v17005_v7 = vld [vmem:[%s19582_s3 + $0x188] ss:$16 sps:$4 sm:$0xff]  }
 0xf34   : > { %11688 = vmatprep.mubr.bf16.mxu0 %v10910_v44  ;;  %11729 = vmatprep.mubr.bf16.mxu1 %v10912_v53  ;;  %v17010_v5 = vld [vmem:[%s19582_s3 + $0x38c] ss:$16 sps:$4 sm:$0xff]   ;;  %v17008_v8 = vld [vmem:[%s19582_s3 + $0x388] ss:$16 sps:$4 sm:$0xff]  }
 0xf35   : > { %11658 = vmatprep.subr.bf16.mxu0 %v16947_v9  ;;  %11699 = vmatprep.subr.bf16.mxu1 %v16950_v10  ;;  %v17013_v44 = vld [vmem:[%s19582_s3 + $0x16c] ss:$16 sps:$4 sm:$0xff]   ;;  %v17011_v37 = vld [vmem:[%s19582_s3 + $0x168] ss:$16 sps:$4 sm:$0xff]  }
 0xf36   : > { %v17016_v53 = vld [vmem:[%s19582_s3 + $0x36c] ss:$16 sps:$4 sm:$0xff]   ;;  %v17014_v35 = vld [vmem:[%s19582_s3 + $0x368] ss:$16 sps:$4 sm:$0xff]  }
 0xf37   : > { %11659 = vmatpush1.bf16.msra.mxu0 %v16945_v12  ;;  %11700 = vmatpush1.bf16.msra.mxu1 %v16948_v17  ;;  %v17019_v9 = vld [vmem:[%s19582_s3 + $0x14c] ss:$16 sps:$4 sm:$0xff]   ;;  %v17017_v12 = vld [vmem:[%s19582_s3 + $0x148] ss:$16 sps:$4 sm:$0xff]  }
 0xf38   : > { %11660 = vmatprep.subr.bf16.mxu0 %v16953_v19  ;;  %11701 = vmatprep.subr.bf16.mxu1 %v16956_v20  ;;  %v17022_v10 = vld [vmem:[%s19582_s3 + $0x34c] ss:$16 sps:$4 sm:$0xff]   ;;  %v17020_v17 = vld [vmem:[%s19582_s3 + $0x348] ss:$16 sps:$4 sm:$0xff]  }
 0xf39   : > { %v17025_v19 = vld [vmem:[%s19582_s3 + $0x12c] ss:$16 sps:$4 sm:$0xff]  }
 0xf3a   : > { %v17028_v20 = vld [vmem:[%s19582_s3 + $0x32c] ss:$16 sps:$4 sm:$0xff]  }
 0xf3b   : > { %11661 = vmatpush1.bf16.msra.mxu0 %v16951_v62  ;;  %11702 = vmatpush1.bf16.msra.mxu1 %v16954_v24  ;;  %v17023_v62 = vld [vmem:[%s19582_s3 + $0x128] ss:$16 sps:$4 sm:$0xff]  }
 0xf3c   : > { %11662 = vmatprep.subr.bf16.mxu0 %v16959_v21  ;;  %11703 = vmatprep.subr.bf16.mxu1 %v16962_v38  ;;  %v17026_v24 = vld [vmem:[%s19582_s3 + $0x328] ss:$16 sps:$4 sm:$0xff]   ;;  %v17031_v21 = vld [vmem:[%s19582_s3 + $0x10c] ss:$16 sps:$4 sm:$0xff]  }
 0xf3d   : > { %v17034_v38 = vld [vmem:[%s19582_s3 + $0x30c] ss:$16 sps:$4 sm:$0xff]  }
 0xf3f   : > { %11663 = vmatpush1.bf16.msra.mxu0 %v16957_v22  ;;  %11704 = vmatpush1.bf16.msra.mxu1 %v16960_v23  ;;  %v17029_v22 = vld [vmem:[%s19582_s3 + $0x108] ss:$16 sps:$4 sm:$0xff]  }
 0xf40   : > { %11664 = vmatprep.subr.bf16.mxu0 %v16965_v26  ;;  %11705 = vmatprep.subr.bf16.mxu1 %v16968_v40  ;;  %v17032_v23 = vld [vmem:[%s19582_s3 + $0x308] ss:$16 sps:$4 sm:$0xff]   ;;  %v17037_v26 = vld [vmem:[%s19585_s4 + $0xe4] ss:$16 sps:$4 sm:$0xff]   ;;  %v17035_v40 = vld [vmem:[%s19585_s4 + $0xe0] ss:$16 sps:$4 sm:$0xff]  }
 0xf41   : > { %s19589_s3 = sld [smem:[#allocation25_spill]] }
 0xf43   : > { %11665 = vmatpush1.bf16.msra.mxu0 %v16963_v3  ;;  %11706 = vmatpush1.bf16.msra.mxu1 %v16966_v30  ;;  %v17040_v3 = vld [vmem:[%s19585_s4 + $0xc4] ss:$16 sps:$4 sm:$0xff]   ;;  %v17038_v30 = vld [vmem:[%s19585_s4 + $0xc0] ss:$16 sps:$4 sm:$0xff]  }
 0xf44   : > { %11666 = vmatprep.subr.bf16.mxu0 %v16971_v27  ;;  %11707 = vmatprep.subr.bf16.mxu1 %v16974_v25  ;;  %v17043_v27 = vld [vmem:[%s19585_s4 + $0xa4] ss:$16 sps:$4 sm:$0xff]   ;;  %v17041_v25 = vld [vmem:[%s19585_s4 + $0xa0] ss:$16 sps:$4 sm:$0xff]  }
 0xf47   : > { %11667 = vmatpush1.bf16.msra.mxu0 %v16969_v28  ;;  %11708 = vmatpush1.bf16.msra.mxu1 %v16972_v46  ;;  %v17046_v28 = vld [vmem:[%s19585_s4 + $0x84] ss:$16 sps:$4 sm:$0xff]   ;;  %v17044_v46 = vld [vmem:[%s19585_s4 + $0x80] ss:$16 sps:$4 sm:$0xff]  }
 0xf48   : > { %11668 = vmatprep.subr.bf16.mxu0 %v16977_v47  ;;  %11709 = vmatprep.subr.bf16.mxu1 %v16980_v57  ;;  %v17052_v47 = vld [vmem:[%s19585_s4 + $0x44] ss:$16 sps:$4 sm:$0xff]   ;;  %v17050_v57 = vld [vmem:[%s19585_s4 + $0x40] ss:$16 sps:$4 sm:$0xff]  }
 0xf4b   : > { %11669 = vmatpush1.bf16.msra.mxu0 %v16975_v32  ;;  %11710 = vmatpush1.bf16.msra.mxu1 %v16978_v31  ;;  %v17055_v32 = vld [vmem:[%s19585_s4 + $0x24] ss:$16 sps:$4 sm:$0xff]   ;;  %v17053_v31 = vld [vmem:[%s19585_s4 + $0x20] ss:$16 sps:$4 sm:$0xff]  }
 0xf4c   : > { %11670 = vmatprep.subr.bf16.mxu0 %v16983_v4  ;;  %11711 = vmatprep.subr.bf16.mxu1 %v16986_v33  ;;  %v17058_v4 = vld [vmem:[%s19585_s4 + $0x4] ss:$16 sps:$4 sm:$0xff]   ;;  %v17056_v33 = vld [vmem:[%s19585_s4] ss:$16 sps:$4 sm:$0xff]  }
 0xf4f   : > { %11671 = vmatpush1.bf16.msra.mxu0 %v16981_v29  ;;  %11712 = vmatpush1.bf16.msra.mxu1 %v16984_v36  ;;  %v17061_v29 = vld [vmem:[%s19585_s4 + $0x1e4] ss:$16 sps:$4 sm:$0xff]   ;;  %v17059_v36 = vld [vmem:[%s19585_s4 + $0x1e0] ss:$16 sps:$4 sm:$0xff]  }
 0xf50   : > { %11672 = vmatprep.subr.bf16.mxu0 %v16989_v48  ;;  %11713 = vmatprep.subr.bf16.mxu1 %v16992_v52  ;;  %v17064_v48 = vld [vmem:[%s19585_s4 + $0x1c4] ss:$16 sps:$4 sm:$0xff]   ;;  %v17062_v52 = vld [vmem:[%s19585_s4 + $0x1c0] ss:$16 sps:$4 sm:$0xff]  }
 0xf53   : > { %11673 = vmatpush2.bf16.msra.mxu0 %v16987_v54  ;;  %11714 = vmatpush2.bf16.msra.mxu1 %v16990_v11  ;;  %v17067_v54 = vld [vmem:[%s19585_s4 + $0x1a4] ss:$16 sps:$4 sm:$0xff]   ;;  %v17065_v11 = vld [vmem:[%s19585_s4 + $0x1a0] ss:$16 sps:$4 sm:$0xff]  }
 0xf54   : > { %11674 = vmatprep.subr.bf16.mxu0 %v16995_v1  ;;  %11715 = vmatprep.subr.bf16.mxu1 %v16998_v42  ;;  %v17070_v1 = vld [vmem:[%s19585_s4 + $0x184] ss:$16 sps:$4 sm:$0xff]   ;;  %v17068_v42 = vld [vmem:[%s19585_s4 + $0x180] ss:$16 sps:$4 sm:$0xff]  }
 0xf57   : > { %11675 = vmatpush2.bf16.msra.mxu0 %v16993_v55  ;;  %11716 = vmatpush2.bf16.msra.mxu1 %v16996_v59  ;;  %v17073_v55 = vld [vmem:[%s19585_s4 + $0x164] ss:$16 sps:$4 sm:$0xff]   ;;  %v17071_v59 = vld [vmem:[%s19585_s4 + $0x160] ss:$16 sps:$4 sm:$0xff]  }
 0xf58   : > { %11676 = vmatprep.subr.bf16.mxu0 %v17001_v51  ;;  %11717 = vmatprep.subr.bf16.mxu1 %v17004_v2  ;;  %v17076_v51 = vld [vmem:[%s19585_s4 + $0x144] ss:$16 sps:$4 sm:$0xff]   ;;  %v17074_v2 = vld [vmem:[%s19585_s4 + $0x140] ss:$16 sps:$4 sm:$0xff]  }
 0xf5b   : > { %11677 = vmatpush2.bf16.msra.mxu0 %v16999_v14  ;;  %11718 = vmatpush2.bf16.msra.mxu1 %v17002_v61  ;;  %v17079_v14 = vld [vmem:[%s19585_s4 + $0x124] ss:$16 sps:$4 sm:$0xff]   ;;  %v17077_v61 = vld [vmem:[%s19585_s4 + $0x120] ss:$16 sps:$4 sm:$0xff]  }
 0xf5c   : > { %11678 = vmatprep.subr.bf16.mxu0 %v17007_v63  ;;  %11719 = vmatprep.subr.bf16.mxu1 %v17010_v5  ;;  %v17082_v63 = vld [vmem:[%s19585_s4 + $0x104] ss:$16 sps:$4 sm:$0xff]   ;;  %v17083_v5 = vld [vmem:[%s19585_s4 + $0x2e0] ss:$16 sps:$4 sm:$0xff]  }
 0xf5f   : > { %11679 = vmatpush2.bf16.msra.mxu0 %v17005_v7  ;;  %11720 = vmatpush2.bf16.msra.mxu1 %v17008_v8  ;;  %v17085_v7 = vld [vmem:[%s19585_s4 + $0x2e4] ss:$16 sps:$4 sm:$0xff]   ;;  %v17080_v8 = vld [vmem:[%s19585_s4 + $0x100] ss:$16 sps:$4 sm:$0xff]  }
 0xf60   : > { %11680 = vmatprep.subr.bf16.mxu0 %v17013_v44  ;;  %11721 = vmatprep.subr.bf16.mxu1 %v17016_v53  ;;  %v17088_v44 = vld [vmem:[%s19585_s4 + $0xec] ss:$16 sps:$4 sm:$0xff]   ;;  %v17091_v53 = vld [vmem:[%s19585_s4 + $0x2c4] ss:$16 sps:$4 sm:$0xff]  }
 0xf63   : > { %11681 = vmatpush2.bf16.msra.mxu0 %v17011_v37  ;;  %11722 = vmatpush2.bf16.msra.mxu1 %v17014_v35  ;;  %v17089_v37 = vld [vmem:[%s19585_s4 + $0x2c0] ss:$16 sps:$4 sm:$0xff]   ;;  %v17097_v35 = vld [vmem:[%s19585_s4 + $0x2a4] ss:$16 sps:$4 sm:$0xff]  }
 0xf64   : > { %11682 = vmatprep.subr.bf16.mxu0 %v17019_v9  ;;  %11723 = vmatprep.subr.bf16.mxu1 %v17022_v10  ;;  %v17095_v9 = vld [vmem:[%s19585_s4 + $0x2a0] ss:$16 sps:$4 sm:$0xff]   ;;  %v17103_v10 = vld [vmem:[%s19585_s4 + $0x284] ss:$16 sps:$4 sm:$0xff]  }
 0xf67   : > { %11683 = vmatpush2.bf16.msra.mxu0 %v17017_v12  ;;  %11724 = vmatpush2.bf16.msra.mxu1 %v17020_v17  ;;  %v17101_v12 = vld [vmem:[%s19585_s4 + $0x280] ss:$16 sps:$4 sm:$0xff]   ;;  %v17109_v17 = vld [vmem:[%s19585_s4 + $0x264] ss:$16 sps:$4 sm:$0xff]  }
 0xf68   : > { %11684 = vmatprep.subr.bf16.mxu0 %v17025_v19  ;;  %11725 = vmatprep.subr.bf16.mxu1 %v17028_v20  ;;  %v17107_v19 = vld [vmem:[%s19585_s4 + $0x260] ss:$16 sps:$4 sm:$0xff]   ;;  %v17115_v20 = vld [vmem:[%s19585_s4 + $0x244] ss:$16 sps:$4 sm:$0xff]  }
 0xf6b   : > { %11685 = vmatpush2.bf16.msra.mxu0 %v17023_v62  ;;  %11726 = vmatpush2.bf16.msra.mxu1 %v17026_v24  ;;  %v17113_v62 = vld [vmem:[%s19585_s4 + $0x240] ss:$16 sps:$4 sm:$0xff]   ;;  %v17121_v24 = vld [vmem:[%s19585_s4 + $0x224] ss:$16 sps:$4 sm:$0xff]  }
 0xf6c   : > { %11686 = vmatprep.subr.bf16.mxu0 %v17031_v21  ;;  %11727 = vmatprep.subr.bf16.mxu1 %v17034_v38  ;;  %v17119_v21 = vld [vmem:[%s19585_s4 + $0x220] ss:$16 sps:$4 sm:$0xff]   ;;  %v17127_v38 = vld [vmem:[%s19585_s4 + $0x204] ss:$16 sps:$4 sm:$0xff]  }
 0xf6f   : > { %11687 = vmatpush2.bf16.msra.mxu0 %v17029_v22  ;;  %11728 = vmatpush2.bf16.msra.mxu1 %v17032_v23  ;;  %v17125_v22 = vld [vmem:[%s19585_s4 + $0x200] ss:$16 sps:$4 sm:$0xff]   ;;  %v17133_v23 = vld [vmem:[%s19585_s4 + $0x3e4] ss:$16 sps:$4 sm:$0xff]  }
 0xf70   : > { %12511 = vmatprep.subr.bf16.mxu0 %v17037_v26  ;;  %12552 = vmatprep.subr.bf16.mxu1 %v17085_v7  ;;  %v17131_v26 = vld [vmem:[%s19585_s4 + $0x3e0] ss:$16 sps:$4 sm:$0xff]  }
 0xf72   : > { %11689 = vmatmul.mubr.bf16.vlgmr.msra.gmra.mxu0 %v19102_v45  ;;  %11730 = vmatmul.mubr.bf16.vlgmr.msra.gmra.mxu1 %v19104_v15  ;;  %v17049_v45 = vld [vmem:[%s19585_s4 + $0x64] ss:$16 sps:$4 sm:$0xff]   ;;  %v17047_v15 = vld [vmem:[%s19585_s4 + $0x60] ss:$16 sps:$4 sm:$0xff]  }
 0xf73   : > { %12512 = vmatpush1.bf16.msra.mxu0 %v17035_v40  ;;  %12553 = vmatpush1.bf16.msra.mxu1 %v17083_v5  ;;  %v17139_v40 = vld [vmem:[%s19585_s4 + $0x3c4] ss:$16 sps:$4 sm:$0xff]  }
 0xf74   : > { %12513 = vmatprep.subr.bf16.mxu0 %v17040_v3  ;;  %12554 = vmatprep.subr.bf16.mxu1 %v17091_v53  ;;  %v17137_v3 = vld [vmem:[%s19585_s4 + $0x3c0] ss:$16 sps:$4 sm:$0xff]  }
 0xf77   : > { %12514 = vmatpush1.bf16.msra.mxu0 %v17038_v30  ;;  %12555 = vmatpush1.bf16.msra.mxu1 %v17089_v37  ;;  %v17145_v30 = vld [vmem:[%s19585_s4 + $0x3a4] ss:$16 sps:$4 sm:$0xff]  }
 0xf78   : > { %12515 = vmatprep.subr.bf16.mxu0 %v17043_v27  ;;  %12556 = vmatprep.subr.bf16.mxu1 %v17097_v35  ;;  %v17143_v27 = vld [vmem:[%s19585_s4 + $0x3a0] ss:$16 sps:$4 sm:$0xff]  }
 0xf7b   : > { %12516 = vmatpush1.bf16.msra.mxu0 %v17041_v25  ;;  %12557 = vmatpush1.bf16.msra.mxu1 %v17095_v9  ;;  %v17151_v25 = vld [vmem:[%s19585_s4 + $0x384] ss:$16 sps:$4 sm:$0xff]  }
 0xf7c   : > { %12517 = vmatprep.subr.bf16.mxu0 %v17046_v28  ;;  %12558 = vmatprep.subr.bf16.mxu1 %v17103_v10  ;;  %v17149_v28 = vld [vmem:[%s19585_s4 + $0x380] ss:$16 sps:$4 sm:$0xff]  }
 0xf7f   : > { %12518 = vmatpush1.bf16.msra.mxu0 %v17044_v46  ;;  %12559 = vmatpush1.bf16.msra.mxu1 %v17101_v12  ;;  %v17157_v46 = vld [vmem:[%s19585_s4 + $0x364] ss:$16 sps:$4 sm:$0xff]  }
 0xf80   : > { %12519 = vmatprep.subr.bf16.mxu0 %v17049_v45  ;;  %12560 = vmatprep.subr.bf16.mxu1 %v17109_v17  ;;  %v17155_v45 = vld [vmem:[%s19585_s4 + $0x360] ss:$16 sps:$4 sm:$0xff]  }
 0xf83   : > { %12520 = vmatpush1.bf16.msra.mxu0 %v17047_v15  ;;  %12561 = vmatpush1.bf16.msra.mxu1 %v17107_v19  ;;  %v17163_v15 = vld [vmem:[%s19585_s4 + $0x344] ss:$16 sps:$4 sm:$0xff]  }
 0xf84   : > { %12521 = vmatprep.subr.bf16.mxu0 %v17052_v47  ;;  %12562 = vmatprep.subr.bf16.mxu1 %v17115_v20  ;;  %v17161_v47 = vld [vmem:[%s19585_s4 + $0x340] ss:$16 sps:$4 sm:$0xff]  }
 0xf87   : > { %12522 = vmatpush1.bf16.msra.mxu0 %v17050_v57  ;;  %12563 = vmatpush1.bf16.msra.mxu1 %v17113_v62  ;;  %v17169_v57 = vld [vmem:[%s19585_s4 + $0x324] ss:$16 sps:$4 sm:$0xff]  }
 0xf88   : > { %12523 = vmatprep.subr.bf16.mxu0 %v17055_v32  ;;  %12564 = vmatprep.subr.bf16.mxu1 %v17121_v24  ;;  %v17167_v32 = vld [vmem:[%s19585_s4 + $0x320] ss:$16 sps:$4 sm:$0xff]  }
 0xf8b   : > { %12524 = vmatpush1.bf16.msra.mxu0 %v17053_v31  ;;  %12565 = vmatpush1.bf16.msra.mxu1 %v17119_v21  ;;  %v17175_v31 = vld [vmem:[%s19585_s4 + $0x304] ss:$16 sps:$4 sm:$0xff]  }
 0xf8c   : > { %12525 = vmatprep.subr.bf16.mxu0 %v17058_v4  ;;  %12566 = vmatprep.subr.bf16.mxu1 %v17127_v38  ;;  %v17173_v4 = vld [vmem:[%s19585_s4 + $0x300] ss:$16 sps:$4 sm:$0xff]  }
 0xf8f   : > { %12526 = vmatpush1.bf16.msra.mxu0 %v17056_v33  ;;  %12567 = vmatpush1.bf16.msra.mxu1 %v17125_v22  ;;  %v19236_v33 = vld [vmem:[%s19586_s1] sm:$0xf]  ;;  %s19587_s1 = sld [smem:[#allocation26_spill]] }
 0xf90   : > { %12527 = vmatprep.subr.bf16.mxu0 %v17061_v29  ;;  %12568 = vmatprep.subr.bf16.mxu1 %v17133_v23  ;;  %v17181_v29 = vld [vmem:[%s19585_s4 + $0x2ec] ss:$16 sps:$4 sm:$0xff]  }
 0xf93   : > { %12528 = vmatpush2.bf16.msra.mxu0 %v17059_v36  ;;  %12569 = vmatpush2.bf16.msra.mxu1 %v17131_v26  ;;  %v10917_v36 = vrot.slane %v19236_v33, %v17839_v49 }
 0xf94   : > { %12529 = vmatprep.subr.bf16.mxu0 %v17064_v48  ;;  %12570 = vmatprep.subr.bf16.mxu1 %v17139_v40  ;;  %v10921_v48 = vrot.slane %v19236_v33, %v17842_v50 }
 0xf97   : > { %12530 = vmatpush2.bf16.msra.mxu0 %v17062_v52  ;;  %12571 = vmatpush2.bf16.msra.mxu1 %v17137_v3 }
 0xf98   : > { %12531 = vmatprep.subr.bf16.mxu0 %v17067_v54  ;;  %12572 = vmatprep.subr.bf16.mxu1 %v17145_v30 }
 0xf9b   : > { %12532 = vmatpush2.bf16.msra.mxu0 %v17065_v11  ;;  %12573 = vmatpush2.bf16.msra.mxu1 %v17143_v27 }
 0xf9c   : > { %12533 = vmatprep.subr.bf16.mxu0 %v17070_v1  ;;  %12574 = vmatprep.subr.bf16.mxu1 %v17151_v25 }
 0xf9f   : > { %12534 = vmatpush2.bf16.msra.mxu0 %v17068_v42  ;;  %12575 = vmatpush2.bf16.msra.mxu1 %v17149_v28 }
 0xfa0   : > { %12535 = vmatprep.subr.bf16.mxu0 %v17073_v55  ;;  %12576 = vmatprep.subr.bf16.mxu1 %v17157_v46 }
 0xfa3   : > { %12536 = vmatpush2.bf16.msra.mxu0 %v17071_v59  ;;  %12577 = vmatpush2.bf16.msra.mxu1 %v17155_v45 }
 0xfa4   : > { %12537 = vmatprep.subr.bf16.mxu0 %v17076_v51  ;;  %12578 = vmatprep.subr.bf16.mxu1 %v17163_v15 }
 0xfa7   : > { %12538 = vmatpush2.bf16.msra.mxu0 %v17074_v2  ;;  %12579 = vmatpush2.bf16.msra.mxu1 %v17161_v47 }
 0xfa8   : > { %12539 = vmatprep.subr.bf16.mxu0 %v17079_v14  ;;  %12580 = vmatprep.subr.bf16.mxu1 %v17169_v57 }
 0xfab   : > { %12540 = vmatpush2.bf16.msra.mxu0 %v17077_v61  ;;  %12581 = vmatpush2.bf16.msra.mxu1 %v17167_v32 }
 0xfac   : > { %12541 = vmatprep.subr.bf16.mxu0 %v17082_v63  ;;  %12582 = vmatprep.subr.bf16.mxu1 %v17175_v31 }
 0xfaf   : > { %12542 = vmatpush2.bf16.msra.mxu0 %v17080_v8  ;;  %12583 = vmatpush2.bf16.msra.mxu1 %v17173_v4 }
 0xfb0   : > { %12593 = vmatprep.subr.bf16.mxu0 %v17088_v44  ;;  %12634 = vmatprep.subr.bf16.mxu1 %v17181_v29 }
 0xff2   : > { %v11608_v52 = vpop.f32.mrf.mxu0  ;;  %v11649_v54 = vpop.f32.mrf.mxu1 }
 0xff3   : > { %v11609_v11 = vadd.f32 %v11608_v52, %v10917_v36 }
 0xff4   : > { %v11610_v1 = vpop.f32.mrf.mxu0  ;;  %v11651_v42 = vpop.f32.mrf.mxu1 }
 0xff5   : > { %v11650_v55 = vadd.f32 %v11649_v54, %v11609_v11  ;;  %v11611_v59 = vadd.f32 %v11610_v1, %v10921_v48 }
 0xff6   : > { %v11612_v51 = vpop.f32.mrf.mxu0  ;;  %v11653_v2 = vpop.f32.mrf.mxu1 }
 0xff7   : > { %v11738_v14 = vmul.f32 0.70710677, %v11650_v55  ;;  %v11652_v61 = vadd.f32 %v11651_v42, %v11611_v59  ;;  %v11834_v2 = vmul.f32 0.5, %v11650_v55  ;;  %v17092_v55 = vld [vmem:[%s19585_s4 + $0xc8] ss:$16 sps:$4 sm:$0xff]  }
 0xff8   : > { %v11613_v63 = vpop.f32.mrf.mxu0  ;;  %v11654_v5 = vpop.f32.mrf.mxu1 }
 0xff9   : > { %v11742_v7 = vand.u32 2147483647, %v11738_v14  ;;  %v11739_v8 = vmul.f32 0.70710677, %v11652_v61  ;;  %vm11822_vm11 = vcmp.ge.f32.partialorder %v11738_v14, 0.0  ;;  %v11835_v5 = vmul.f32 0.5, %v11652_v61 }
 0xffa   : > { %v10925_v14 = vrot.slane %v19236_v33, %v18324_v39  ;;  %v10929_v61 = vrot.slane %v19236_v33, %v18329_v43 }
 0xffb   : > { %v11746_v44 = vmul.f32 0.3275911, %v11742_v7  ;;  %v11743_v53 = vand.u32 2147483647, %v11739_v8  ;;  %v11798_v10 = vsub.f32 0.0, %v11742_v7  ;;  %vm11823_vm12 = vcmp.ge.f32.partialorder %v11739_v8, 0.0 }
 0xffd   : > { %v11750_v37 = vadd.f32 1.0, %v11746_v44  ;;  %v11747_v35 = vmul.f32 0.3275911, %v11743_v53  ;;  %v11799_v12 = vsub.f32 0.0, %v11743_v53  ;;  %v11802_v17 = vmul.f32 %v11798_v10, %v11742_v7  ;;  %v17094_v10 = vld [vmem:[%s19585_s4 + $0xcc] ss:$16 sps:$4 sm:$0xff]  }
 0xfff   : > { %17383 = vrcp.f32 %v11750_v37  ;;  %v11751_v9 = vadd.f32 1.0, %v11747_v35  ;;  %v11803_v20 = vmul.f32 %v11799_v12, %v11743_v53  ;;  %v11806_v24 = vmul.f32 1.442695, %v11802_v17  ;;  %v17086_v35 = vld [vmem:[%s19585_s4 + $0xe8] ss:$16 sps:$4 sm:$0xff]  }
0x1000   : > { %v17100_v17 = vld [vmem:[%s19585_s4 + $0xac] ss:$16 sps:$4 sm:$0xff]  }
0x1001   : > { %17385 = vrcp.f32 %v11751_v9  ;;  %v11808_v22 = vmul.f32 1.442695, %v11803_v20 }
0x1002   : > { %17387 = vpow2.f32 %v11806_v24 }
0x1003   : > { %17389 = vpow2.f32 %v11808_v22 }
0x100c   : > { %v17384_v19 = vpop.eup %17383 }
0x100d   : > { %v11762_v62 = vmul.f32 1.0614054, %v17384_v19 }
0x100e   : > { %v17386_v21 = vpop.eup %17385 }
0x100f   : > { %v11766_v38 = vadd.f32 -1.4531521, %v11762_v62  ;;  %v11763_v23 = vmul.f32 1.0614054, %v17386_v21  ;;  %v17388_v31 = vpop.eup %17387 }
0x1010   : > { %v17390_v48 = vpop.eup %17389 }
0x1011   : > { %v11770_v26 = vmul.f32 %v17384_v19, %v11766_v38  ;;  %v11767_v40 = vadd.f32 -1.4531521, %v11763_v23  ;;  %v17098_v38 = vld [vmem:[%s19585_s4 + $0xa8] ss:$16 sps:$4 sm:$0xff]  }
0x1013   : > { %v11774_v3 = vadd.f32 1.4214138, %v11770_v26  ;;  %v11771_v30 = vmul.f32 %v17386_v21, %v11767_v40  ;;  %v17106_v26 = vld [vmem:[%s19585_s4 + $0x8c] ss:$16 sps:$4 sm:$0xff]  }
0x1015   : > { %v11778_v27 = vmul.f32 %v17384_v19, %v11774_v3  ;;  %v11775_v25 = vadd.f32 1.4214138, %v11771_v30 }
0x1017   : > { %v11782_v28 = vadd.f32 -0.28449672, %v11778_v27  ;;  %v11779_v46 = vmul.f32 %v17386_v21, %v11775_v25 }
0x1019   : > { %v11786_v45 = vmul.f32 %v17384_v19, %v11782_v28  ;;  %v11783_v15 = vadd.f32 -0.28449672, %v11779_v46  ;;  %v17104_v28 = vld [vmem:[%s19585_s4 + $0x88] ss:$16 sps:$4 sm:$0xff]   ;;  %v17112_v46 = vld [vmem:[%s19585_s4 + $0x6c] ss:$16 sps:$4 sm:$0xff]  }
0x101b   : > { %v11790_v47 = vadd.f32 0.2548296, %v11786_v45  ;;  %v11787_v57 = vmul.f32 %v17386_v21, %v11783_v15 }
0x101d   : > { %v11794_v32 = vmul.f32 %v17384_v19, %v11790_v47  ;;  %v11791_v4 = vadd.f32 0.2548296, %v11787_v57 }
0x101f   : > { %v11814_v29 = vmul.f32 %v17388_v31, %v11794_v32  ;;  %v11795_v36 = vmul.f32 %v17386_v21, %v11791_v4  ;;  %v17110_v32 = vld [vmem:[%s19585_s4 + $0x68] ss:$16 sps:$4 sm:$0xff]   ;;  %v17118_v31 = vld [vmem:[%s19585_s4 + $0x4c] ss:$16 sps:$4 sm:$0xff]  }
0x1021   : > { %v11818_v52 = vsub.f32 1.0, %v11814_v29  ;;  %v11815_v54 = vmul.f32 %v17390_v48, %v11795_v36  ;;  %v17116_v29 = vld [vmem:[%s19585_s4 + $0x48] ss:$16 sps:$4 sm:$0xff]   ;;  %v17124_v36 = vld [vmem:[%s19585_s4 + $0x2c] ss:$16 sps:$4 sm:$0xff]  }
0x1023   : > { %v11826_v11 = vsub.f32 0.0, %v11818_v52  ;;  %v11819_v1 = vsub.f32 1.0, %v11815_v54  ;;  %v17130_v54 = vld [vmem:[%s19585_s4 + $0xc] ss:$16 sps:$4 sm:$0xff]  }
0x1025   : > { %v11830_v42 = vsel %vm11822_vm11, %v11818_v52, %v11826_v11  ;;  %v11827_v51 = vsub.f32 0.0, %v11819_v1  ;;  %v17122_v52 = vld [vmem:[%s19585_s4 + $0x28] ss:$16 sps:$4 sm:$0xff]  }
0x1026   : > { %v11838_v59 = vadd.f32 1.0, %v11830_v42  ;;  %v17128_v42 = vld [vmem:[%s19585_s4 + $0x8] ss:$16 sps:$4 sm:$0xff]  }
0x1027   : > { %v11831_v63 = vsel %vm11823_vm12, %v11819_v1, %v11827_v51 }
0x1028   : > { %v11839_v7 = vadd.f32 1.0, %v11831_v63  ;;  %v11842_v44 = vmul.f32 %v11838_v59, %v11834_v2  ;;  %v17136_v59 = vld [vmem:[%s19585_s4 + $0x1ec] ss:$16 sps:$4 sm:$0xff]  }
0x102a   : > { %v11843_v53 = vmul.f32 %v11839_v7, %v11835_v5  ;;  %v19244_v9 = vpack.c.bf16 %v11842_v44, %v11842_v44  ;;  %v17134_v7 = vld [vmem:[%s19585_s4 + $0x1e8] ss:$16 sps:$4 sm:$0xff]   ;;  %v17142_v44 = vld [vmem:[%s19585_s4 + $0x1cc] ss:$16 sps:$4 sm:$0xff]  }
0x102c   : > { %v11847_v37 = vpack.c.bf16 %v11843_v53, %v11843_v53 }
0x102e   : > { %12543 = vmatprep.mubr.bf16.mxu0 %v11847_v37 }
0x102f   : > { %12544 = vmatmul.mubr.bf16.vlgmr.msra.gmra.mxu0 %v19244_v9 }
0x1030   : > { %12594 = vmatpush1.bf16.msra.mxu0 %v17086_v35  ;;  %12625 = vmatprep.mubr.bf16.mxu0 %v11847_v37 }
0x1031   : > { %12595 = vmatprep.subr.bf16.mxu0 %v17094_v10 }
0x1032   : > { %v11690_v8 = vpop.f32.mrf.mxu0  ;;  %v11731_v12 = vpop.f32.mrf.mxu1 }
0x1033   : > { %v11691_v19 = vadd.f32 %v11690_v8, %v10925_v14 }
0x1034   : > { %v11692_v20 = vpop.f32.mrf.mxu0  ;;  %v11733_v62 = vpop.f32.mrf.mxu1  ;;  %12596 = vmatpush1.bf16.msra.mxu0 %v17092_v55  ;;  %v17140_v55 = vld [vmem:[%s19585_s4 + $0x1c8] ss:$16 sps:$4 sm:$0xff]  }
0x1035   : > { %v19254_v24 = vadd.f32 %v11731_v12, %v11691_v19  ;;  %v11693_v21 = vadd.f32 %v11692_v20, %v10929_v61  ;;  %12597 = vmatprep.subr.bf16.mxu0 %v17100_v17  ;;  %v17148_v61 = vld [vmem:[%s19585_s4 + $0x1ac] ss:$16 sps:$4 sm:$0xff]   ;;  %v6447_v17 = vadd.f32 %v18629_v13, %v18150_v18 }
0x1036   : > { %v11694_v22 = vpop.f32.mrf.mxu0  ;;  %v11735_v23 = vpop.f32.mrf.mxu1 }
0x1037   : > { %v19259_v33 = vmul.f32 0.70710677, %v19254_v24  ;;  %v19261_v40 = vadd.f32 %v11733_v62, %v11693_v21  ;;  %v17146_v62 = vld [vmem:[%s19585_s4 + $0x1a8] ss:$16 sps:$4 sm:$0xff]   ;;  %v17154_v21 = vld [vmem:[%s19585_s4 + $0x18c] ss:$16 sps:$4 sm:$0xff]  }
0x1038   : > { %v11695_v3 = vpop.f32.mrf.mxu0  ;;  %v11736_v30 = vpop.f32.mrf.mxu1  ;;  %12598 = vmatpush1.bf16.msra.mxu0 %v17098_v38  ;;  %v12685_v23 = vrot.slane %v6447_v17, 4 }
0x1039   : > { %v11744_v27 = vand.u32 2147483647, %v19259_v33  ;;  %v19265_v25 = vmul.f32 0.70710677, %v19261_v40  ;;  %12599 = vmatprep.subr.bf16.mxu0 %v17106_v26  ;;  %v17152_v30 = vld [vmem:[%s19585_s4 + $0x188] ss:$16 sps:$4 sm:$0xff]  }
0x103a   : > { %vm11824_vm13 = vcmp.ge.f32.partialorder %v19259_v33, 0.0  ;;  %v11837_v33 = vmul.f32 0.5, %v19261_v40  ;;  %v17183_v40 = vld [vmem:[%s19587_s1 + $0x38] sm:$0xff]  }
0x103b   : > { %v11748_v45 = vmul.f32 0.3275911, %v11744_v27  ;;  %v11745_v15 = vand.u32 2147483647, %v19265_v25  ;;  %v11800_v48 = vsub.f32 0.0, %v11744_v27  ;;  %vm11825_vm14 = vcmp.ge.f32.partialorder %v19265_v25, 0.0 }
0x103c   : > { %12600 = vmatpush1.bf16.msra.mxu0 %v17104_v28  ;;  %v12686_v28 = vadd.f32 %v12685_v23, %v6447_v17  ;;  %v17186_v17 = vld [vmem:[%s19585_s4 + $0x2cc] ss:$16 sps:$4 sm:$0xff]   ;;  %v17189_v23 = vld [vmem:[%s19585_s4 + $0x2a8] ss:$16 sps:$4 sm:$0xff]  }
0x103d   : > { %v11752_v47 = vadd.f32 1.0, %v11748_v45  ;;  %v11749_v57 = vmul.f32 0.3275911, %v11745_v15  ;;  %12601 = vmatprep.subr.bf16.mxu0 %v17112_v46  ;;  %v11801_v11 = vsub.f32 0.0, %v11745_v15  ;;  %v11804_v1 = vmul.f32 %v11800_v48, %v11744_v27  ;;  %v17160_v27 = vld [vmem:[%s19585_s4 + $0x16c] ss:$16 sps:$4 sm:$0xff]  }
0x103f   : > { %17391 = vrcp.f32 %v11752_v47  ;;  %v11753_v4 = vadd.f32 1.0, %v11749_v57  ;;  %v11805_v2 = vmul.f32 %v11801_v11, %v11745_v15  ;;  %v11810_v5 = vmul.f32 1.442695, %v11804_v1  ;;  %v17158_v15 = vld [vmem:[%s19585_s4 + $0x168] ss:$16 sps:$4 sm:$0xff]  }
0x1040   : > { %12602 = vmatpush1.bf16.msra.mxu0 %v17110_v32  ;;  %v17166_v57 = vld [vmem:[%s19585_s4 + $0x14c] ss:$16 sps:$4 sm:$0xff]  }
0x1041   : > { %17393 = vrcp.f32 %v11753_v4  ;;  %12603 = vmatprep.subr.bf16.mxu0 %v17118_v31  ;;  %v11812_v35 = vmul.f32 1.442695, %v11805_v2  ;;  %v12687_v4 = vrot.slane %v12686_v28, 2  ;;  %v17170_v2 = vld [vmem:[%s19585_s4 + $0x128] ss:$16 sps:$4 sm:$0xff]  }
0x1042   : > { %17395 = vpow2.f32 %v11810_v5  ;;  %v17178_v5 = vld [vmem:[%s19585_s4 + $0x10c] ss:$16 sps:$4 sm:$0xff]  }
0x1043   : > { %17397 = vpow2.f32 %v11812_v35  ;;  %v17176_v35 = vld [vmem:[%s19585_s4 + $0x108] ss:$16 sps:$4 sm:$0xff]  }
0x1044   : > { %12604 = vmatpush1.bf16.msra.mxu0 %v17116_v29 }
0x1045   : > { %12605 = vmatprep.subr.bf16.mxu0 %v17124_v36 }
0x1048   : > { %12606 = vmatpush1.bf16.msra.mxu0 %v17122_v52  ;;  %v17164_v52 = vld [vmem:[%s19585_s4 + $0x148] ss:$16 sps:$4 sm:$0xff]  }
0x1049   : > { %12607 = vmatprep.subr.bf16.mxu0 %v17130_v54  ;;  %v17172_v54 = vld [vmem:[%s19585_s4 + $0x12c] ss:$16 sps:$4 sm:$0xff]  }
0x104c   : > { %v17392_v51 = vpop.eup %17391  ;;  %12608 = vmatpush1.bf16.msra.mxu0 %v17128_v42 }
0x104d   : > { %v11764_v63 = vmul.f32 1.0614054, %v17392_v51  ;;  %12609 = vmatprep.subr.bf16.mxu0 %v17136_v59  ;;  %v12688_v59 = vadd.f32 %v12687_v4, %v12686_v28  ;;  %v17202_v28 = vld [vmem:[%s19587_s1 + $0x58] sm:$0xff]  }
0x104e   : > { %v17394_v53 = vpop.eup %17393  ;;  %v17211_v4 = vld [vmem:[%s19585_s4 + $0x22c] ss:$16 sps:$4 sm:$0xff]  }
0x104f   : > { %v11768_v37 = vadd.f32 -1.4531521, %v11764_v63  ;;  %v11765_v10 = vmul.f32 1.0614054, %v17394_v53  ;;  %v17396_v47 = vpop.eup %17395 }
0x1050   : > { %12610 = vmatpush2.bf16.msra.mxu0 %v17134_v7  ;;  %v17398_v36 = vpop.eup %17397 }
0x1051   : > { %v11772_v14 = vmul.f32 %v17392_v51, %v11768_v37  ;;  %12611 = vmatprep.subr.bf16.mxu0 %v17142_v44  ;;  %v11769_v8 = vadd.f32 -1.4531521, %v11765_v10  ;;  %v11836_v44 = vmul.f32 0.5, %v19254_v24  ;;  %v12689_v37 = vrot.slane %v12688_v59, 1  ;;  %v17179_v24 = vld [vmem:[%s19585_s4 + $0x2e8] ss:$16 sps:$4 sm:$0xff]  }
0x1053   : > { %v11776_v12 = vadd.f32 1.4214138, %v11772_v14  ;;  %v11773_v19 = vmul.f32 %v17394_v53, %v11769_v8  ;;  %v12690_v8 = vadd.f32 %v12689_v37, %v12688_v59  ;;  %v17218_v59 = vld [vmem:[%s19587_s1] sm:$0xff]   ;;  %v17225_v37 = vld [vmem:[%s19585_s4 + $0x3a8] ss:$16 sps:$4 sm:$0xff]  }
0x1054   : > { %12612 = vmatpush2.bf16.msra.mxu0 %v17140_v55  ;;  %v17182_v55 = vld [vmem:[%s19587_s1 + $0x78] sm:$0xff]  }
0x1055   : > { %v11780_v20 = vmul.f32 %v17392_v51, %v11776_v12  ;;  %12613 = vmatprep.subr.bf16.mxu0 %v17148_v61  ;;  %v11777_v38 = vadd.f32 1.4214138, %v11773_v19  ;;  %v17187_v19 = vld [vmem:[%s19587_s1 + $0x70] sm:$0xff]  }
0x1057   : > { %v11784_v22 = vadd.f32 -0.28449672, %v11780_v20  ;;  %v11781_v26 = vmul.f32 %v17394_v53, %v11777_v38  ;;  %v12720_v20 = vpack.c.bf16 %v12690_v8, %v12690_v8  ;;  %v17191_v38 = vld [vmem:[%s19585_s4 + $0x2ac] ss:$16 sps:$4 sm:$0xff]  }
0x1058   : > { %12614 = vmatpush2.bf16.msra.mxu0 %v17146_v62  ;;  %v17184_v62 = vld [vmem:[%s19585_s4 + $0x2c8] ss:$16 sps:$4 sm:$0xff]   ;;  %v17239_v8 = vld [vmem:[%s19585_s4 + $0x32c] ss:$16 sps:$4 sm:$0xff]  }
0x1059   : > { %v11788_v3 = vmul.f32 %v17392_v51, %v11784_v22  ;;  %12615 = vmatprep.subr.bf16.mxu0 %v17154_v21  ;;  %v11785_v18 = vadd.f32 -0.28449672, %v11781_v26  ;;  %v17188_v21 = vld [vmem:[%s19587_s1 + $0x30] sm:$0xff]   ;;  %v6446_v22 = vadd.f32 %v18624_v60, %v18147_v16  ;;  %v17193_v26 = vld [vmem:[%s19587_s1 + $0x28] sm:$0xff]   ;;  %v17198_v60 = vld [vmem:[%s19587_s1 + $0x20] sm:$0xff]  }
0x105a   : > { %v17194_v16 = vld [vmem:[%s19585_s4 + $0x288] ss:$16 sps:$4 sm:$0xff]  }
0x105b   : > { %v11792_v13 = vadd.f32 0.2548296, %v11788_v3  ;;  %v11789_v46 = vmul.f32 %v17394_v53, %v11785_v18  ;;  %v17196_v3 = vld [vmem:[%s19585_s4 + $0x28c] ss:$16 sps:$4 sm:$0xff]  }
0x105c   : > { %12616 = vmatpush2.bf16.msra.mxu0 %v17152_v30  ;;  %v12679_v30 = vrot.slane %v6446_v22, 4  ;;  %v17201_v18 = vld [vmem:[%s19585_s4 + $0x26c] ss:$16 sps:$4 sm:$0xff]  }
0x105d   : > { %v11796_v45 = vmul.f32 %v17392_v51, %v11792_v13  ;;  %12617 = vmatprep.subr.bf16.mxu0 %v17160_v27  ;;  %v11793_v32 = vadd.f32 0.2548296, %v11789_v46  ;;  %v17197_v27 = vld [vmem:[%s19587_s1 + $0x60] sm:$0xff]   ;;  %v17199_v46 = vld [vmem:[%s19585_s4 + $0x268] ss:$16 sps:$4 sm:$0xff]  }
0x105e   : > { %v12680_v13 = vadd.f32 %v12679_v30, %v6446_v22 }
0x105f   : > { %v11816_v31 = vmul.f32 %v17396_v47, %v11796_v45  ;;  %v11797_v29 = vmul.f32 %v17394_v53, %v11793_v32  ;;  %v17203_v45 = vld [vmem:[%s19587_s1 + $0x18] sm:$0xff]  }
0x1060   : > { %12618 = vmatpush2.bf16.msra.mxu0 %v17158_v15  ;;  %v17206_v15 = vld [vmem:[%s19585_s4 + $0x24c] ss:$16 sps:$4 sm:$0xff]   ;;  %v12681_v47 = vrot.slane %v12680_v13, 2  ;;  %v17204_v32 = vld [vmem:[%s19585_s4 + $0x248] ss:$16 sps:$4 sm:$0xff]  }
0x1061   : > { %v11820_v48 = vsub.f32 1.0, %v11816_v31  ;;  %12619 = vmatprep.subr.bf16.mxu0 %v17166_v57  ;;  %v11817_v11 = vmul.f32 %v17398_v36, %v11797_v29  ;;  %v17207_v57 = vld [vmem:[%s19587_s1 + $0x50] sm:$0xff]   ;;  %v17212_v36 = vld [vmem:[%s19587_s1 + $0x48] sm:$0xff]  }
0x1062   : > { %v17208_v31 = vld [vmem:[%s19587_s1 + $0x10] sm:$0xff]   ;;  %v12682_v29 = vadd.f32 %v12681_v47, %v12680_v13 }
0x1063   : > { %v11828_v1 = vsub.f32 0.0, %v11820_v48  ;;  %v11821_v42 = vsub.f32 1.0, %v11817_v11 }
0x1064   : > { %12620 = vmatpush2.bf16.msra.mxu0 %v17164_v52  ;;  %v17213_v52 = vld [vmem:[%s19587_s1 + $0x8] sm:$0xff]   ;;  %v12683_v11 = vrot.slane %v12682_v29, 1 }
0x1065   : > { %v11832_v51 = vsel %vm11824_vm13, %v11820_v48, %v11828_v1  ;;  %12621 = vmatprep.subr.bf16.mxu0 %v17172_v54  ;;  %v11829_v7 = vsub.f32 0.0, %v11821_v42  ;;  %v17209_v48 = vld [vmem:[%s19585_s4 + $0x228] ss:$16 sps:$4 sm:$0xff]   ;;  %v17216_v54 = vld [vmem:[%s19585_s4 + $0x20c] ss:$16 sps:$4 sm:$0xff]   ;;  %v17217_v1 = vld [vmem:[%s19587_s1 + $0x40] sm:$0xff]  }
0x1066   : > { %v11840_v63 = vadd.f32 1.0, %v11832_v51  ;;  %v17221_v51 = vld [vmem:[%s19585_s4 + $0x3ec] ss:$16 sps:$4 sm:$0xff]  }
0x1067   : > { %v11833_v53 = vsel %vm11825_vm14, %v11821_v42, %v11829_v7  ;;  %v17214_v42 = vld [vmem:[%s19585_s4 + $0x208] ss:$16 sps:$4 sm:$0xff]  }
0x1068   : > { %12622 = vmatpush2.bf16.msra.mxu0 %v17170_v2  ;;  %v11841_v10 = vadd.f32 1.0, %v11833_v53  ;;  %v11844_v14 = vmul.f32 %v11840_v63, %v11836_v44  ;;  %v12684_v2 = vadd.f32 %v12683_v11, %v12682_v29  ;;  %v17219_v63 = vld [vmem:[%s19585_s4 + $0x3e8] ss:$16 sps:$4 sm:$0xff]   ;;  %v17227_v53 = vld [vmem:[%s19585_s4 + $0x3ac] ss:$16 sps:$4 sm:$0xff]  }
0x1069   : > { %12623 = vmatprep.subr.bf16.mxu0 %v17178_v5  ;;  %v17224_v5 = vld [vmem:[%s19585_s4 + $0x3cc] ss:$16 sps:$4 sm:$0xff]   ;;  %v17222_v44 = vld [vmem:[%s19585_s4 + $0x3c8] ss:$16 sps:$4 sm:$0xff]  }
0x106a   : > { %v11845_v61 = vmul.f32 %v11841_v10, %v11837_v33  ;;  %v19301_v12 = vpack.c.bf16 %v11844_v14, %v11844_v14  ;;  %v12719_v7 = vpack.c.bf16 %v12684_v2, %v12684_v2  ;;  %v17230_v33 = vld [vmem:[%s19585_s4 + $0x38c] ss:$16 sps:$4 sm:$0xff]   ;;  %v17231_v14 = vld [vmem:[%s19585_s4 + $0x368] ss:$16 sps:$4 sm:$0xff]  }
0x106b   : > { %v17233_v10 = vld [vmem:[%s19585_s4 + $0x36c] ss:$16 sps:$4 sm:$0xff]  }
0x106c   : > { %12624 = vmatpush2.bf16.msra.mxu0 %v17176_v35  ;;  %v11849_v25 = vpack.c.bf16 %v11845_v61, %v11845_v61  ;;  %v17228_v35 = vld [vmem:[%s19585_s4 + $0x388] ss:$16 sps:$4 sm:$0xff]  }
0x106d   : > { %15686 = vmatprep.subr.bf16.mxu0 %v17182_v55  ;;  %v17236_v55 = vld [vmem:[%s19585_s4 + $0x34c] ss:$16 sps:$4 sm:$0xff]   ;;  %v17234_v61 = vld [vmem:[%s19585_s4 + $0x348] ss:$16 sps:$4 sm:$0xff]  }
0x106e   : > { %12584 = vmatprep.mubr.bf16.mxu1 %v11849_v25 }
0x106f   : > { %12585 = vmatmul.mubr.bf16.vlgmr.msra.gmra.mxu1 %v19301_v12  ;;  %12626 = vmatmul.mubr.bf16.vlgmr.msra.gmra.mxu0 %v19244_v9  ;;  %v17192_v9 = vld [vmem:[%s19587_s1 + $0x68] sm:$0xff]   ;;  %s19588_s1 = sld [smem:[#allocation28_spill]] }
0x1070   : > { %12635 = vmatpush1.bf16.msra.mxu1 %v17179_v24  ;;  %12666 = vmatprep.mubr.bf16.mxu1 %v11849_v25  ;;  %v17237_v25 = vld [vmem:[%s19585_s4 + $0x328] ss:$16 sps:$4 sm:$0xff]   ;;  %v17242_v24 = vld [vmem:[%s19585_s4 + $0x30c] ss:$16 sps:$4 sm:$0xff]  }
0x1071   : > { %15687 = vmatpush3.bf16.msra.mxu0 %v17183_v40  ;;  %12850 = vmatprep.mubr.bf16.mxu0 %v12720_v20  ;;  %v17240_v40 = vld [vmem:[%s19585_s4 + $0x308] ss:$16 sps:$4 sm:$0xff]   ;;  %s19592_s4 = sld [smem:[#allocation32_spill]] }
0x1072   : > { %12636 = vmatprep.subr.bf16.mxu1 %v17186_v17  ;;  %15688 = vmatprep.subr.bf16.mxu0 %v17187_v19 }
0x1074   : > { %12637 = vmatpush1.bf16.msra.mxu1 %v17184_v62 }
0x1075   : > { %15689 = vmatpush3.bf16.msra.mxu0 %v17188_v21  ;;  %12638 = vmatprep.subr.bf16.mxu1 %v17191_v38  ;;  %v17243_v17 = vld [vmem:[%s19588_s1 + $0x78] sm:$0xff]   ;;  %v17245_v20 = vld [vmem:[%s19588_s1 + $0x70] sm:$0xff]   ;;  %v17247_v21 = vld [vmem:[%s19588_s1 + $0x68] sm:$0xff]  }
0x1076   : > { %15690 = vmatprep.subr.bf16.mxu0 %v17192_v9  ;;  %v17244_v19 = vld [vmem:[%s19588_s1 + $0x38] sm:$0xff]   ;;  %v17246_v62 = vld [vmem:[%s19588_s1 + $0x30] sm:$0xff]   ;;  %v17248_v38 = vld [vmem:[%s19588_s1 + $0x28] sm:$0xff]  }
0x1077   : > { %v17249_v22 = vld [vmem:[%s19588_s1 + $0x60] sm:$0xff]   ;;  %v17255_v30 = vld [vmem:[%s19588_s1 + $0x48] sm:$0xff]   ;;  %v17260_v13 = vld [vmem:[%s19588_s1 + $0xb8] sm:$0xff]  }
0x1078   : > { %12639 = vmatpush1.bf16.msra.mxu1 %v17189_v23  ;;  %v17250_v9 = vld [vmem:[%s19588_s1 + $0x20] sm:$0xff]   ;;  %v17251_v23 = vld [vmem:[%s19588_s1 + $0x58] sm:$0xff]   ;;  %v17271_v11 = vld [vmem:[%s19588_s1 + $0xc8] sm:$0xff]  }
0x1079   : > { %15691 = vmatpush3.bf16.msra.mxu0 %v17193_v26  ;;  %12640 = vmatprep.subr.bf16.mxu1 %v17196_v3  ;;  %v17253_v26 = vld [vmem:[%s19588_s1 + $0x50] sm:$0xff]   ;;  %v17267_v29 = vld [vmem:[%s19588_s1 + $0xd8] sm:$0xff]  }
0x107a   : > { %15692 = vmatprep.subr.bf16.mxu0 %v17197_v27  ;;  %v17254_v3 = vld [vmem:[%s19588_s1 + $0x10] sm:$0xff]   ;;  %v17256_v27 = vld [vmem:[%s19588_s1 + $0x8] sm:$0xff]  }
0x107c   : > { %12641 = vmatpush1.bf16.msra.mxu1 %v17194_v16  ;;  %v17257_v16 = vld [vmem:[%s19588_s1 + $0x40] sm:$0xff]  }
0x107d   : > { %15693 = vmatpush3.bf16.msra.mxu0 %v17198_v60  ;;  %12642 = vmatprep.subr.bf16.mxu1 %v17201_v18  ;;  %v17258_v60 = vld [vmem:[%s19588_s1] sm:$0xff]   ;;  %v17259_v18 = vld [vmem:[%s19588_s1 + $0xf8] sm:$0xff]  }
0x107e   : > { %15694 = vmatprep.subr.bf16.mxu0 %v17202_v28  ;;  %v17261_v28 = vld [vmem:[%s19588_s1 + $0xf0] sm:$0xff]  }
0x1080   : > { %12643 = vmatpush1.bf16.msra.mxu1 %v17199_v46  ;;  %v17262_v46 = vld [vmem:[%s19588_s1 + $0xb0] sm:$0xff]  }
0x1081   : > { %15695 = vmatpush3.bf16.msra.mxu0 %v17203_v45  ;;  %12644 = vmatprep.subr.bf16.mxu1 %v17206_v15  ;;  %v17263_v45 = vld [vmem:[%s19588_s1 + $0xe8] sm:$0xff]  }
0x1082   : > { %15696 = vmatprep.subr.bf16.mxu0 %v17207_v57  ;;  %v17264_v15 = vld [vmem:[%s19588_s1 + $0xa8] sm:$0xff]   ;;  %v17265_v57 = vld [vmem:[%s19588_s1 + $0xe0] sm:$0xff]  }
0x1084   : > { %12645 = vmatpush1.bf16.msra.mxu1 %v17204_v32 }
0x1085   : > { %15697 = vmatpush3.bf16.msra.mxu0 %v17208_v31  ;;  %12646 = vmatprep.subr.bf16.mxu1 %v17211_v4  ;;  %v17266_v31 = vld [vmem:[%s19588_s1 + $0xa0] sm:$0xff]  }
0x1086   : > { %15698 = vmatprep.subr.bf16.mxu0 %v17212_v36 }
0x1088   : > { %12647 = vmatpush1.bf16.msra.mxu1 %v17209_v48  ;;  %v17268_v48 = vld [vmem:[%s19588_s1 + $0x98] sm:$0xff]  }
0x1089   : > { %15699 = vmatpush3.bf16.msra.mxu0 %v17213_v52  ;;  %12648 = vmatprep.subr.bf16.mxu1 %v17216_v54  ;;  %v17269_v52 = vld [vmem:[%s19588_s1 + $0xd0] sm:$0xff]  }
0x108a   : > { %15700 = vmatprep.subr.bf16.mxu0 %v17217_v1  ;;  %v17270_v54 = vld [vmem:[%s19588_s1 + $0x90] sm:$0xff]   ;;  %v17272_v1 = vld [vmem:[%s19588_s1 + $0x88] sm:$0xff]  }
0x108c   : > { %12649 = vmatpush1.bf16.msra.mxu1 %v17214_v42  ;;  %v17273_v42 = vld [vmem:[%s19588_s1 + $0xc0] sm:$0xff]  }
0x108d   : > { %15701 = vmatpush3.bf16.msra.mxu0 %v17218_v59  ;;  %12650 = vmatprep.subr.bf16.mxu1 %v17221_v51  ;;  %v17274_v59 = vld [vmem:[%s19588_s1 + $0x80] sm:$0xff]  }
0x108e   : > { %15730 = vmatprep.subr.bf16.mxu0 %v17259_v18  ;;  %v2882_v51 = vld [vmem:[%s19589_s3] sm:$0xf]  ;;  %s19590_s3 = sld [smem:[#allocation27_spill]] }
0x108f   : > { %v11854_v2 = vrot.slane %v2882_v51, %v17839_v49 }
0x1090   : > { %12651 = vmatpush2.bf16.msra.mxu1 %v17219_v63  ;;  %12851 = vmatmul.mubr.bf16.vlgmr.msra.gmra.mxu0 %v12719_v7  ;;  %v11858_v63 = vrot.slane %v2882_v51, %v17842_v50 }
0x1091   : > { %12652 = vmatprep.subr.bf16.mxu1 %v17224_v5  ;;  %15731 = vmatpush3.bf16.msra.mxu0 %v17260_v13 }
0x1092   : > { %15732 = vmatprep.subr.bf16.mxu0 %v17261_v28  ;;  %v11862_v28 = vrot.slane %v2882_v51, %v18324_v39 }
0x1094   : > { %12653 = vmatpush2.bf16.msra.mxu1 %v17222_v44 }
0x1095   : > { %12654 = vmatprep.subr.bf16.mxu1 %v17227_v53  ;;  %15733 = vmatpush3.bf16.msra.mxu0 %v17262_v46  ;;  %v11866_v46 = vrot.slane %v2882_v51, %v18329_v43 }
0x1096   : > { %15734 = vmatprep.subr.bf16.mxu0 %v17263_v45 }
0x1098   : > { %12655 = vmatpush2.bf16.msra.mxu1 %v17225_v37 }
0x1099   : > { %12656 = vmatprep.subr.bf16.mxu1 %v17230_v33  ;;  %15735 = vmatpush3.bf16.msra.mxu0 %v17264_v15 }
0x109a   : > { %15736 = vmatprep.subr.bf16.mxu0 %v17265_v57 }
0x109c   : > { %12657 = vmatpush2.bf16.msra.mxu1 %v17228_v35 }
0x109d   : > { %12658 = vmatprep.subr.bf16.mxu1 %v17233_v10  ;;  %15737 = vmatpush3.bf16.msra.mxu0 %v17266_v31 }
0x109e   : > { %15738 = vmatprep.subr.bf16.mxu0 %v17267_v29 }
0x10a0   : > { %12659 = vmatpush2.bf16.msra.mxu1 %v17231_v14 }
0x10a1   : > { %12660 = vmatprep.subr.bf16.mxu1 %v17236_v55  ;;  %15739 = vmatpush3.bf16.msra.mxu0 %v17268_v48 }
0x10a2   : > { %15740 = vmatprep.subr.bf16.mxu0 %v17269_v52 }
0x10a4   : > { %12661 = vmatpush2.bf16.msra.mxu1 %v17234_v61 }
0x10a5   : > { %12662 = vmatprep.subr.bf16.mxu1 %v17239_v8  ;;  %15741 = vmatpush3.bf16.msra.mxu0 %v17270_v54 }
0x10a6   : > { %15742 = vmatprep.subr.bf16.mxu0 %v17271_v11 }
0x10a8   : > { %12663 = vmatpush2.bf16.msra.mxu1 %v17237_v25 }
0x10a9   : > { %12664 = vmatprep.subr.bf16.mxu1 %v17242_v24  ;;  %15743 = vmatpush3.bf16.msra.mxu0 %v17272_v1 }
0x10aa   : > { %15744 = vmatprep.subr.bf16.mxu0 %v17273_v42 }
0x10ac   : > { %12665 = vmatpush2.bf16.msra.mxu1 %v17240_v40 }
0x10ad   : > { %15708 = vmatprep.subr.bf16.mxu1 %v17243_v17  ;;  %15745 = vmatpush3.bf16.msra.mxu0 %v17274_v59 }
0x10af   : > { %12667 = vmatmul.mubr.bf16.vlgmr.msra.gmra.mxu1 %v19301_v12  ;;  %v17252_v12 = vld [vmem:[%s19588_s1 + $0x18] sm:$0xff]   ;;  %s19591_s1 = sld [smem:[#allocation29_spill]] }
0x10b0   : > { %15709 = vmatpush3.bf16.msra.mxu1 %v17244_v19 }
0x10b1   : > { %15710 = vmatprep.subr.bf16.mxu1 %v17245_v20 }
0x10b4   : > { %15711 = vmatpush3.bf16.msra.mxu1 %v17246_v62 }
0x10b5   : > { %15712 = vmatprep.subr.bf16.mxu1 %v17247_v21 }
0x10b8   : > { %15713 = vmatpush3.bf16.msra.mxu1 %v17248_v38 }
0x10b9   : > { %15714 = vmatprep.subr.bf16.mxu1 %v17249_v22 }
0x10bc   : > { %15715 = vmatpush3.bf16.msra.mxu1 %v17250_v9 }
0x10bd   : > { %15716 = vmatprep.subr.bf16.mxu1 %v17251_v23 }
0x10c0   : > { %15717 = vmatpush3.bf16.msra.mxu1 %v17252_v12 }
0x10c1   : > { %15718 = vmatprep.subr.bf16.mxu1 %v17253_v26 }
0x10c4   : > { %15719 = vmatpush3.bf16.msra.mxu1 %v17254_v3 }
0x10c5   : > { %15720 = vmatprep.subr.bf16.mxu1 %v17255_v30 }
0x10c8   : > { %15721 = vmatpush3.bf16.msra.mxu1 %v17256_v27 }
0x10c9   : > { %15722 = vmatprep.subr.bf16.mxu1 %v17257_v16 }
0x10cc   : > { %15723 = vmatpush3.bf16.msra.mxu1 %v17258_v60 }
0x10ef   : > { %v12545_v47 = vpop.f32.mrf.mxu0 }
0x10f0   : > { %v12546_v5 = vadd.f32 %v12545_v47, %v11854_v2 }
0x10f1   : > { %v12547_v32 = vpop.f32.mrf.mxu0 }
0x10f2   : > { %v12548_v53 = vadd.f32 %v12547_v32, %v11858_v63 }
0x10f3   : > { %v12549_v4 = vpop.f32.mrf.mxu0 }
0x10f5   : > { %v12550_v36 = vpop.f32.mrf.mxu0 }
0x112f   : > { %v12586_v7 = vpop.f32.mrf.mxu1  ;;  %v12627_v44 = vpop.f32.mrf.mxu0 }
0x1130   : > { %v12587_v37 = vadd.f32 %v12586_v7, %v12546_v5  ;;  %v12628_v45 = vadd.f32 %v12627_v44, %v11862_v28  ;;  %v17289_v28 = vld [vmem:[%s19592_s4 + $0x34] ss:$8 sps:$4 sm:$0xff]  }
0x1131   : > { %v12588_v33 = vpop.f32.mrf.mxu1  ;;  %v12629_v35 = vpop.f32.mrf.mxu0 }
0x1132   : > { %v12675_v10 = vadd.f32 %v12587_v37, %v18977_v58  ;;  %v12589_v14 = vadd.f32 %v12588_v33, %v12548_v53  ;;  %v12630_v47 = vadd.f32 %v12629_v35, %v11866_v46  ;;  %v17287_v46 = vld [vmem:[%s19592_s4 + $0x30] ss:$8 sps:$4 sm:$0xff]  }
0x1133   : > { %v12590_v55 = vpop.f32.mrf.mxu1  ;;  %v12631_v61 = vpop.f32.mrf.mxu0 }
0x1134   : > { %v12691_v8 = vsel %vm4991_vm2, %v12675_v10, 0.0  ;;  %v12676_v25 = vadd.f32 %v12589_v14, %v18983_v56  ;;  %v2915_v10 = vld [vmem:[%s19590_s3] sm:$0x1]  ;;  %s19594_s3 = sld [smem:[#allocation30_spill]] }
0x1135   : > { %v12692_v24 = vrot.slane %v12691_v8, 4  ;;  %v12591_v40 = vpop.f32.mrf.mxu1  ;;  %v12632_v17 = vpop.f32.mrf.mxu0  ;;  %v12721_v55 = vmul.f32 8.0, %v2915_v10 }
0x1136   : > { %v12698_v19 = vsel %vm4991_vm2, %v12676_v25, 0.0 }
0x1137   : > { %v12693_v20 = vadd.f32 %v12692_v24, %v12691_v8  ;;  %v12699_v62 = vrot.slane %v12698_v19, 4  ;;  %v2980_v8 = vld [vmem:[%s19591_s1] sm:$0x1]  ;;  %s19593_s1 = sld [smem:[#allocation34_spill]] }
0x1139   : > { %v12694_v21 = vrot.slane %v12693_v20, 2  ;;  %v12700_v38 = vadd.f32 %v12699_v62, %v12698_v19  ;;  %v13135_v19 = vmul.f32 4.0, %v2980_v8  ;;  %v17318_v8 = vld [vmem:[%s19596_s5 + $0x20] sm:$0xff]  }
0x113b   : > { %v12695_v22 = vadd.f32 %v12694_v21, %v12693_v20  ;;  %v12701_v9 = vrot.slane %v12700_v38, 2 }
0x113d   : > { %v12696_v23 = vrot.slane %v12695_v22, 1  ;;  %v12702_v58 = vadd.f32 %v12701_v9, %v12700_v38  ;;  %v17275_v9 = vld [vmem:[%s19592_s4 + $0x70] ss:$8 sps:$4 sm:$0xff]   ;;  %v17314_v10 = vld [vmem:[%s19593_s1] sm:$0xff]  }
0x113f   : > { %v12703_v12 = vrot.slane %v12702_v58, 1  ;;  %v12697_v26 = vadd.f32 %v12696_v23, %v12695_v22  ;;  %v17277_v23 = vld [vmem:[%s19592_s4 + $0x74] ss:$8 sps:$4 sm:$0xff]  }
0x1140   : > { %13247 = vmatprep.subr.bf16.mxu1 %v17277_v23 }
0x1141   : > { %v12704_v3 = vadd.f32 %v12703_v12, %v12702_v58  ;;  %v12858_v27 = vpack.c.bf16 %v12697_v26, %v12697_v26  ;;  %v17280_v58 = vld [vmem:[%s19592_s4 + $0x64] ss:$8 sps:$4 sm:$0xff]   ;;  %v17278_v12 = vld [vmem:[%s19592_s4 + $0x60] ss:$8 sps:$4 sm:$0xff]  }
0x1143   : > { %v12859_v30 = vpack.c.bf16 %v12704_v3, %v12704_v3 }
0x1145   : > { %13086 = vmatprep.mubr.bf16.mxu1 %v12859_v30 }
0x1146   : > { %13087 = vmatmul.mubr.bf16.vlgmr.msra.gmra.mxu1 %v12858_v27 }
0x1147   : > { %13279 = vmatprep.mubr.bf16.mxu1 %v17511_v6  ;;  %13248 = vmatpush1.bf16.msra.mxu1 %v17275_v9 }
0x1148   : > { %13249 = vmatprep.subr.bf16.mxu1 %v17280_v58 }
0x114b   : > { %13250 = vmatpush1.bf16.msra.mxu1 %v17278_v12 }
0x1150   : > { %v15702_v56 = vpop.f32.mrf.mxu0 }
0x1152   : > { %v15703_v16 = vpop.f32.mrf.mxu0 }
0x1153   : > { %v15704_v60 = vadd.f32 %v15703_v16, %v15702_v56  ;;  %v17283_v16 = vld [vmem:[%s19592_s4 + $0x54] ss:$8 sps:$4 sm:$0xff]  }
0x1154   : > { %v15705_v18 = vpop.f32.mrf.mxu0  ;;  %13251 = vmatprep.subr.bf16.mxu1 %v17283_v16 }
0x1155   : > { %v12853_v40 = vadd.f32 %v15704_v60, %v12721_v55  ;;  %v17281_v60 = vld [vmem:[%s19592_s4 + $0x50] ss:$8 sps:$4 sm:$0xff]   ;;  %v17286_v18 = vld [vmem:[%s19592_s4 + $0x44] ss:$8 sps:$4 sm:$0xff]  }
0x1156   : > { %v15706_v13 = vpop.f32.mrf.mxu0  ;;  %13252 = vmatpush1.bf16.msra.mxu1 %v17281_v60  ;;  %v17316_v55 = vld [vmem:[%s19596_s5 + $0x30] sm:$0xff]  }
0x1157   : > { %v17284_v13 = vld [vmem:[%s19592_s4 + $0x40] ss:$8 sps:$4 sm:$0xff]   ;;  %13253 = vmatprep.subr.bf16.mxu1 %v17286_v18 }
0x115a   : > { %13254 = vmatpush1.bf16.msra.mxu1 %v17284_v13 }
0x115b   : > { %13255 = vmatprep.subr.bf16.mxu1 %v17289_v28 }
0x115e   : > { %13256 = vmatpush1.bf16.msra.mxu1 %v17287_v46 }
0x116f   : > { %v12668_v15 = vpop.f32.mrf.mxu1 }
0x1170   : > { %v12669_v57 = vadd.f32 %v12668_v15, %v12628_v45  ;;  %v17292_v45 = vld [vmem:[%s19592_s4 + $0x24] ss:$8 sps:$4 sm:$0xff]   ;;  %v17290_v15 = vld [vmem:[%s19592_s4 + $0x20] ss:$8 sps:$4 sm:$0xff]  }
0x1171   : > { %v12670_v32 = vpop.f32.mrf.mxu1  ;;  %13257 = vmatprep.subr.bf16.mxu1 %v17292_v45 }
0x1172   : > { %v12677_v31 = vadd.f32 %v12669_v57, %v18980_v34  ;;  %v12671_v4 = vadd.f32 %v12670_v32, %v12630_v47  ;;  %13258 = vmatpush1.bf16.msra.mxu1 %v17290_v15  ;;  %v17295_v47 = vld [vmem:[%s19592_s4 + $0x14] ss:$8 sps:$4 sm:$0xff]   ;;  %v17293_v57 = vld [vmem:[%s19592_s4 + $0x10] ss:$8 sps:$4 sm:$0xff]   ;;  %v17298_v32 = vld [vmem:[%s19592_s4 + $0x4] ss:$8 sps:$4 sm:$0xff]  }
0x1173   : > { %v12672_v29 = vpop.f32.mrf.mxu1  ;;  %13259 = vmatprep.subr.bf16.mxu1 %v17295_v47 }
0x1174   : > { %v12705_v6 = vsel %vm4991_vm2, %v12677_v31, 0.0  ;;  %v12678_v36 = vadd.f32 %v12671_v4, %v18986_v0  ;;  %v17296_v31 = vld [vmem:[%s19592_s4] ss:$8 sps:$4 sm:$0xff]   ;;  %v17299_v4 = vld [vmem:[%s19593_s1 + $0x78] sm:$0xff]   ;;  %s19595_s4 = sld [smem:[#allocation31_spill]] }
0x1175   : > { %v12706_v48 = vrot.slane %v12705_v6, 4  ;;  %v12673_v52 = vpop.f32.mrf.mxu1  ;;  %v17300_v29 = vld [vmem:[%s19593_s1 + $0x38] sm:$0xff]   ;;  %15752 = vmatprep.subr.bf16.mxu0 %v17299_v4  ;;  %v3049_v4 = vld [vmem:[%s17717_s20] sm:$0x1] }
0x1176   : > { %v12712_v54 = vsel %vm4991_vm2, %v12678_v36, 0.0  ;;  %13260 = vmatpush1.bf16.msra.mxu1 %v17293_v57  ;;  %v17302_v36 = vld [vmem:[%s19593_s1 + $0x30] sm:$0xff]   ;;  %v17304_v52 = vld [vmem:[%s19593_s1 + $0x28] sm:$0xff]  }
0x1177   : > { %v12707_v39 = vadd.f32 %v12706_v48, %v12705_v6  ;;  %v12713_v11 = vrot.slane %v12712_v54, 4  ;;  %13261 = vmatprep.subr.bf16.mxu1 %v17298_v32  ;;  %v17301_v6 = vld [vmem:[%s19593_s1 + $0x70] sm:$0xff]   ;;  %v17303_v48 = vld [vmem:[%s19593_s1 + $0x68] sm:$0xff]  }
0x1178   : > { %v17325_v32 = vld [vmem:[%s17722_s27 + $0x8] sm:$0xff]  }
0x1179   : > { %v12708_v43 = vrot.slane %v12707_v39, 2  ;;  %v12714_v1 = vadd.f32 %v12713_v11, %v12712_v54  ;;  %v17305_v54 = vld [vmem:[%s19593_s1 + $0x60] sm:$0xff]   ;;  %v17307_v11 = vld [vmem:[%s19593_s1 + $0x58] sm:$0xff]  }
0x117a   : > { %13262 = vmatpush1.bf16.msra.mxu1 %v17296_v31  ;;  %v17326_v31 = vld [vmem:[%s17722_s27] sm:$0xff]  }
0x117b   : > { %v12709_v42 = vadd.f32 %v12708_v43, %v12707_v39  ;;  %v12715_v59 = vrot.slane %v12714_v1, 2  ;;  %15884 = vmatprep.subr.bf16.mxu1 %v17509_v41  ;;  %v17306_v39 = vld [vmem:[%s19593_s1 + $0x20] sm:$0xff]   ;;  %v17308_v43 = vld [vmem:[%s19593_s1 + $0x18] sm:$0xff]  }
0x117d   : > { %v12710_v51 = vrot.slane %v12709_v42, 1  ;;  %v12716_v2 = vadd.f32 %v12715_v59, %v12714_v1  ;;  %v17309_v1 = vld [vmem:[%s19593_s1 + $0x50] sm:$0xff]  }
0x117f   : > { %v12717_v34 = vrot.slane %v12716_v2, 1  ;;  %v12711_v63 = vadd.f32 %v12710_v51, %v12709_v42 }
0x1181   : > { %v12718_v5 = vadd.f32 %v12717_v34, %v12716_v2  ;;  %v12860_v44 = vpack.c.bf16 %v12711_v63, %v12711_v63  ;;  %v2981_v34 = vld [vmem:[%s19594_s3] sm:$0x1]  ;;  %s19598_s3 = sld [smem:[#allocation35_spill]] }
0x1183   : > { %v12861_v7 = vpack.c.bf16 %v12718_v5, %v12718_v5  ;;  %v2982_v5 = vld [vmem:[%s19595_s4] sm:$0x1]  ;;  %s19597_s4 = sld [smem:[#allocation33_spill]] }
0x1185   : > { %13126 = vmatprep.mubr.bf16.mxu0 %v12861_v7 }
0x1186   : > { %13127 = vmatmul.mubr.bf16.vlgmr.msra.gmra.mxu0 %v12860_v44 }
0x1187   : > { %15753 = vmatpush3.bf16.msra.mxu0 %v17300_v29  ;;  %v3032_v60 = vld [vmem:[%s19598_s3] sm:$0x1]  ;;  %s14857_s3 = sshll.u32 %s17755_s0, 4  ;;  %s17513_s0 = smov [#allocation2]  }
0x1188   : > { %15754 = vmatprep.subr.bf16.mxu0 %v17301_v6  ;;  %s19474_s6 = scalar_lea.hbm %s17732_s12, %s14857_s3  ;;  %s17409_s11 = sshll.u32 %s17513_s0, 4  ;;  %s17410_s11 = int_to_ptr.vmem [resolvable:$false] %s17409_s11 }
0x1189   : > { %s17411_s13 = scalar_lea.vmem %s17410_s11, 32 }
0x118b   : > { %15755 = vmatpush3.bf16.msra.mxu0 %v17302_v36 }
0x118c   : > { %15756 = vmatprep.subr.bf16.mxu0 %v17303_v48 }
0x118f   : > { %15757 = vmatpush3.bf16.msra.mxu0 %v17304_v52 }
0x1190   : > { %15758 = vmatprep.subr.bf16.mxu0 %v17305_v54 }
0x1193   : > { %15759 = vmatpush3.bf16.msra.mxu0 %v17306_v39 }
0x1194   : > { %15760 = vmatprep.subr.bf16.mxu0 %v17307_v11 }
0x1197   : > { %15761 = vmatpush3.bf16.msra.mxu0 %v17308_v43 }
0x1198   : > { %15762 = vmatprep.subr.bf16.mxu0 %v17309_v1 }
0x1206   : > { %v15724_v0 = vpop.f32.mrf.mxu1 }
0x1208   : > { %v15725_v53 = vpop.f32.mrf.mxu1 }
0x1209   : > { %v15726_v37 = vadd.f32 %v15725_v53, %v15724_v0  ;;  %v17310_v53 = vld [vmem:[%s19593_s1 + $0x10] sm:$0xff]  }
0x120a   : > { %v15727_v33 = vpop.f32.mrf.mxu1  ;;  %15763 = vmatpush3.bf16.msra.mxu0 %v17310_v53 }
0x120b   : > { %v17312_v33 = vld [vmem:[%s19593_s1 + $0x8] sm:$0xff]  }
0x120c   : > { %v15728_v35 = vpop.f32.mrf.mxu1 }
0x120d   : > { %v17313_v35 = vld [vmem:[%s19593_s1 + $0x40] sm:$0xff]  }
0x1246   : > { %v15746_v14 = vpop.f32.mrf.mxu0 }
0x1248   : > { %v15747_v61 = vpop.f32.mrf.mxu0 }
0x1249   : > { %v15748_v25 = vadd.f32 %v15747_v61, %v15746_v14  ;;  %v17315_v14 = vld [vmem:[%s19596_s5 + $0x38] sm:$0xff]   ;;  %v17317_v61 = vld [vmem:[%s19596_s5 + $0x28] sm:$0xff]  }
0x124a   : > { %v15749_v24 = vpop.f32.mrf.mxu0 }
0x124b   : > { %v13129_v17 = vadd.f32 %v15748_v25, %v15726_v37  ;;  %v17311_v37 = vld [vmem:[%s19593_s1 + $0x48] sm:$0xff]   ;;  %v17319_v25 = vld [vmem:[%s19596_s5 + $0x18] sm:$0xff]   ;;  %v2999_v24 = vld [vmem:[%s19597_s4] sm:$0x3]  ;;  %s1272_s4 = sand.u32 1, %s17457_s16  }
0x124c   : > { %v15750_v20 = vpop.f32.mrf.mxu0  ;;  %15764 = vmatprep.subr.bf16.mxu0 %v17311_v37  ;;  %s1273_s1 = scalar_lea.vmem [#allocation2], %s1272_s4  ;;  %s13599_s8 = scalar_lea.sflag [#allocation3], %s1272_s4 }
0x124d   : > { %v13134_v62 = vadd.f32 %v13129_v17, %v12853_v40  ;;  %15765 = vmatpush3.bf16.msra.mxu0 %v17312_v33  ;;  %v13240_v40 = vrot.slane %v2999_v24, %v17839_v49  ;;  %v13244_v17 = vrot.slane %v2999_v24, %v17842_v50  ;;  %v17320_v50 = vld [vmem:[%s19596_s5 + $0x10] sm:$0xff]  }
0x124e   : > { %15766 = vmatprep.subr.bf16.mxu0 %v17313_v35 }
0x124f   : > { %v13136_v21 = vadd.f32 %v13135_v19, %v13134_v62 }
0x1251   : > { %v13137_v38 = vmul.f32 0.083333336, %v13136_v21  ;;  %15767 = vmatpush3.bf16.msra.mxu0 %v17314_v10 }
0x1252   : > { %15904 = vmatprep.subr.bf16.mxu0 %v17509_v41 }
0x1253   : > { %v13139_v22 = vsel %vm13138_vm15, %v13137_v38, 0.0 }
0x1254   : > { %13140 = vadd.xlane.f32.xlu0 %v13139_v22 }
0x12dd   : > { %v13141_v26 = vpop.xlane.xlu0 %13140 }
0x12de   : > { %v13143_v3 = vmul.f32 0.0078125, %v13141_v26 }
0x12e0   : > { %v13144_v30 = vsub.f32 %v13137_v38, %v13143_v3  ;;  %v17321_v3 = vld [vmem:[%s19596_s5 + $0x8] sm:$0xff]  }
0x12e2   : > { %v13145_v27 = vmul.f32 %v13144_v30, %v13144_v30 }
0x12e4   : > { %v13146_v56 = vsel %vm13138_vm15, %v13145_v27, 0.0  ;;  %v17323_v27 = vld [vmem:[%s17722_s27 + $0x18] sm:$0xff]  }
0x12e5   : > { %13147 = vadd.xlane.f32.xlu1 %v13146_v56  ;;  %v17324_v56 = vld [vmem:[%s17722_s27 + $0x10] sm:$0xff]  }
0x136e   : > { %v13148_v42 = vpop.xlane.xlu1 %13147 }
0x136f   : > { %v13149_v59 = vmul.f32 0.0078125, %v13148_v42 }
0x1371   : > { %v13150_v51 = vadd.f32 1e-05, %v13149_v59 }
0x1373   : > { %17399 = vrsqrt.f32 %v13150_v51 }
0x1380   : > { %v17400_v2 = vpop.eup %17399 }
0x1381   : > { %v13152_v63 = vmul.f32 %v17400_v2, %v13144_v30  ;;  %v17322_v30 = vld [vmem:[%s19596_s5] sm:$0xff]   ;;  %s13611_s5 = sshll.u32 %s1273_s1, 4  ;;  %s19476_s5 = int_to_ptr.vmem [resolvable:$true] %s13611_s5 }
0x1382   : > { %s17405_s9 = scalar_lea.vmem %s19476_s5, 16  ;;  %p17412_p0 = scmp.lt.s32.totalorder %s19476_s5, %s17410_s11 }
0x1383   : > { %v13153_v7 = vmul.f32 %v13152_v63, %v2981_v34  ;;  %p17406_p11 = scmp.ne.s32.totalorder %s19476_s5, %s17405_s9  ;;  %p17413_p1 = scmp.lt.s32.totalorder %s17411_s13, %s17405_s9 }
0x1385   : > { %v13154_v44 = vadd.f32 %v13153_v7, %v2982_v5  ;;  %p17407_p12 = pnand %p17406_p11, %p17772_p5  ;;  %p17414_p2 = por %p17413_p1, %p17412_p0 }
0x1387   : > { %v13155_v0 = vpack.c.bf16 %v13154_v44, %v13154_v44  ;;  %p17408_p13 = pneg %p17407_p12 }
0x1389   : > { %13280 = vmatmul.mubr.bf16.vlgmr.msra.gmra.mxu1 %v13155_v0  ;;  %p17415_p3 = pnand %p17414_p2, %p17408_p13 }
0x138a   : > { %15900 = vmatprep.mubr.msk.bf16.mxu1 %vm17510_vm0, %v17509_v41  ;;  %15885 = vmatpush3.bf16.msra.mxu1 %v17315_v14 }
0x138b   : > { %15886 = vmatprep.subr.bf16.mxu1 %v17509_v41 }
0x138e   : > { %15887 = vmatpush3.bf16.msra.mxu1 %v17316_v55 }
0x138f   : > { %15888 = vmatprep.subr.bf16.mxu1 %v17509_v41 }
0x1392   : > { %15889 = vmatpush3.bf16.msra.mxu1 %v17317_v61 }
0x1393   : > { %15890 = vmatprep.subr.bf16.mxu1 %v17509_v41 }
0x1396   : > { %15891 = vmatpush3.bf16.msra.mxu1 %v17318_v8 }
0x1397   : > { %15892 = vmatprep.subr.bf16.mxu1 %v17509_v41 }
0x139a   : > { %15893 = vmatpush3.bf16.msra.mxu1 %v17319_v25 }
0x139b   : > { %15894 = vmatprep.subr.bf16.mxu1 %v17509_v41 }
0x139e   : > { %15895 = vmatpush3.bf16.msra.mxu1 %v17320_v50 }
0x139f   : > { %15896 = vmatprep.subr.bf16.mxu1 %v17509_v41 }
0x13a2   : > { %15897 = vmatpush3.bf16.msra.mxu1 %v17321_v3 }
0x13a3   : > { %15898 = vmatprep.subr.bf16.mxu1 %v17509_v41 }
0x13a6   : > { %15899 = vmatpush3.bf16.msra.mxu1 %v17322_v30 }
0x1449   : > { %v13281_v19 = vpop.f32.mrf.mxu1 }
0x144a   : > { %v13282_v20 = vadd.f32 %v13281_v19, %v13240_v40 }
0x144b   : > { %v13283_v62 = vpop.f32.mrf.mxu1 }
0x144c   : > { %vm13288_vm1 = vcmp.ge.f32.partialorder %v13282_v20, 0.0  ;;  %v13290_v21 = vmul.f32 0.01, %v13282_v20  ;;  %v13284_v38 = vadd.f32 %v13283_v62, %v13244_v17 }
0x144d   : > { %v13285_v22 = vpop.f32.mrf.mxu1 }
0x144e   : > { %vm13289_vm2 = vcmp.ge.f32.partialorder %v13284_v38, 0.0  ;;  %v13291_v9 = vmul.f32 0.01, %v13284_v38  ;;  %v13292_v23 = vsel %vm13288_vm1, %v13282_v20, %v13290_v21 }
0x144f   : > { %v13286_v58 = vpop.f32.mrf.mxu1  ;;  %v13294_v26 = vpack.c.bf16 %v13292_v23, %v13292_v23 }
0x1450   : > { %v13293_v12 = vsel %vm13289_vm2, %v13284_v38, %v13291_v9 }
0x1451   : > { %v13295_v49 = vpack.c.bf16 %v13293_v12, %v13293_v12 }
0x1453   : > { %13424 = vmatprep.mubr.bf16.mxu0 %v13295_v49 }
0x1454   : > { %13425 = vmatmul.mubr.bf16.vlgmr.msra.gmra.mxu0 %v13294_v26 }
0x1455   : > { %15912 = vmatprep.mubr.msk.bf16.mxu0 %vm17510_vm0, %v17509_v41  ;;  %15905 = vmatpush3.bf16.msra.mxu0 %v17323_v27 }
0x1456   : > { %15906 = vmatprep.subr.bf16.mxu0 %v17509_v41 }
0x1459   : > { %15907 = vmatpush3.bf16.msra.mxu0 %v17324_v56 }
0x145a   : > { %15908 = vmatprep.subr.bf16.mxu0 %v17509_v41 }
0x145d   : > { %15909 = vmatpush3.bf16.msra.mxu0 %v17325_v32 }
0x145e   : > { %15910 = vmatprep.subr.bf16.mxu0 %v17509_v41  ;;  %v3058_v41 = vld [vmem:[%s17727_s30] sm:$0x1] }
0x1461   : > { %15911 = vmatpush3.bf16.msra.mxu0 %v17326_v31 }
0x1514   : > { %v15768_v16 = vpop.f32.mrf.mxu0 }
0x1516   : > { %v15769_v18 = vpop.f32.mrf.mxu0 }
0x1517   : > { %v15770_v13 = vadd.f32 %v15769_v18, %v15768_v16 }
0x1518   : > { %v15771_v28 = vpop.f32.mrf.mxu0 }
0x1519   : > { %v13427_v46 = vadd.f32 %v15770_v13, %v3032_v60 }
0x151a   : > { %v15772_v45 = vpop.f32.mrf.mxu0 }
0x151b   : > { %vm13432_vm0 = vcmp.ge.f32.partialorder %v13427_v46, 0.0  ;;  %v13433_v15 = vmul.f32 0.01, %v13427_v46 }
0x151d   : > { %v13434_v47 = vsel %vm13432_vm0, %v13427_v46, %v13433_v15 }
0x151e   : > { %v13435_v57 = vpack.c.bf16 %v13434_v47, %v13434_v47 }
0x1520   : > { %15901 = vmatmul.mubr.bf16.vlgmr.msra.gmra.mxu1 %v13435_v57 }
0x15e0   : > { %v13518_v29 = vpop.f32.mrf.mxu1 }
0x15e1   : > { %v13519_v6 = vadd.f32 %v13518_v29, %v3049_v4 }
0x15e2   : > { %v15902_v36 = vpop.f32.mrf.mxu1 }
0x15e3   : > { %vm13524_vm3 = vcmp.ge.f32.partialorder %v13519_v6, 0.0  ;;  %v13525_v48 = vmul.f32 0.01, %v13519_v6 }
0x15e4   : > { %v13521_v52 = vpop.f32.mrf.mxu1 }
0x15e5   : > { %v13526_v54 = vsel %vm13524_vm3, %v13519_v6, %v13525_v48 }
0x15e6   : > { %v13527_v39 = vpack.c.bf16 %v13526_v54, %v13526_v54  ;;  %v15903_v11 = vpop.f32.mrf.mxu1 }
0x15e8   : > { %15913 = vmatmul.mubr.msk.bf16.vlgmr.msra.gmra.mxu0 %vm13552_vm4, %v13527_v39 }
0x16a8   : > { %v13590_v43 = vpop.f32.mrf.mxu0 }
0x16a9   : > { %v13591_v1 = vadd.f32 %v13590_v43, %v3058_v41 }
0x16aa   : > { %v15914_v42 = vpop.f32.mrf.mxu0 }
0x16ab   : > { %13597 = vst.msk [vmem:[%s1273_s1] sm:$0x1] %vm13596_vm5, %v13591_v1 }
0x16ac   : > { %v13593_v59 = vpop.f32.mrf.mxu0 }
0x16ad   : > { %17418 = shalt.err (!%p17415_p3)
}
0x16ae   : > { %s17419_s1 = scalar_lea.hbm %s19474_s6, 16  ;;  %s17423_s4 = scalar_lea.hbm %s17732_s12, 32 }
0x16af   : > { %p17420_p4 = scmp.ne.s32.totalorder %s19474_s6, %s17419_s1  ;;  %p17424_p9 = scmp.lt.s32.totalorder %s19474_s6, %s17732_s12 }
0x16b0   : > { %p17425_p10 = scmp.lt.s32.totalorder %s17423_s4, %s17419_s1 }
0x16b1   : > { %p17421_p7 = pnand %p17420_p4, %p17772_p5 }
0x16b2   : > { %p17426_p11 = por %p17425_p10, %p17424_p9 }
0x16b3   : > { %p17422_p8 = pneg %p17421_p7 }
0x16b5   : > { %p17427_p12 = pnand %p17426_p11, %p17422_p8 }
0x16b7   : > { %17430 = shalt.err (!%p17427_p12)
}
0x16b8   : > { %15916 = dma.vmem_to_hbm [thread:$0]  (%p17772_p5), %s19476_s5, 16, %s19474_s6, %s13599_s8   ;;  %v15915_v51 = vpop.f32.mrf.mxu0 }
0x16b9 PF: > { %p15922_p13 = scmp.ge.s32.totalorder %s17465_s22, 2  ;;  %s13623_s9 = sand.u32 1, %s17453_s15  }
0x16ba   : > { %s13624_s13 = scalar_lea.sflag [#allocation3], %s13623_s9 }
0x16bb   : > { %p15919_p0 = pnand %p15922_p13, %p17776_p6 }
0x16bd   : > { %p15920_p1 = pneg %p15919_p0 }
0x16bf   : > { %17448 = dma.done.wait (%p15920_p1), %s13624_s13, 16  }
0x16c0   : > { %17450 = vsyncadd (%p15920_p1), %s13624_s13, 4294967280  ;;  %p95_p2 = scmp.ge.s32.totalorder %s17759_s26, 4   ;;  %s19599_s15 = smov %s17457_s16 }
0x16c1   : > { %s19600_s16 = smov %s17461_s18  ;;  %s19601_s18 = smov %s17770_s2 }
0x16c2   : > { %s19602_s22 = smov %s17759_s26  ;;  %97 = sbr.rel (!%p95_p2) target bundleno = 84 (0x54), region = 268 }
0x16c7   :  { %13628 = vsyncpa [#allocation3], 1 }
0x16c8   :  { %13630 = vsyncpa [#allocation3 + $0x1], 1 }

</bundles_post_ra>
